<compile_context>
chip_gen: v5e
topology: v5e:2x2
jax: 0.10.0
libtpu: 0.0.40
codegen_flags: <defaults>
</compile_context>

<pallas_src>
import functools

import jax
import jax.numpy as jnp
from jax.experimental import pallas as pl
from jax.experimental.pallas import tpu as pltpu

EPS = 1e-5
_VMEM_LIMIT = 48 * 1024 * 1024     # safe on v7x (64 MiB/TC); v5e/v6e have 128 MiB


def _round_up(x, m):
    return (x + m - 1) // m * m


# ---------------------------------------------------------------------------
# Pass 1: conv1 (K*K shifted-slice matmuls) + per-channel sum / sum-of-squares
#         accumulated across the grid ("arbitrary" axis, resident accumulators)
# ---------------------------------------------------------------------------
def _conv_stats_kernel(x0_ref, xh_ref, w_ref, mo_ref,
                       y_ref, sum_ref, ssq_ref, *, taps, tm):
    i = pl.program_id(0)

    @pl.when(i == 0)
    def _init():
        sum_ref[...] = jnp.zeros_like(sum_ref)
        ssq_ref[...] = jnp.zeros_like(ssq_ref)

    # Main block + small forward halo; upcast once to f32 for the tap slicing.
    x = jnp.concatenate([x0_ref[...].astype(jnp.float32),
                         xh_ref[...].astype(jnp.float32)], axis=0)  # (tm+hs, Cin_p)

    cout_p = w_ref.shape[2]
    acc = jnp.zeros((tm, cout_p), jnp.float32)
    for t, ro in enumerate(taps):                              # static unroll
        lhs = x[ro:ro + tm, :].astype(jnp.bfloat16)            # bf16 MXU feed
        acc = acc + jnp.dot(lhs, w_ref[t], preferred_element_type=jnp.float32)
    y_ref[...] = acc.astype(y_ref.dtype)                       # bf16 HBM store

    # BN statistics over valid pixels only (mask kills border/tail rows).
    msk = mo_ref[...]                                          # (tm, 1) f32 {0,1}
    am = acc * msk
    sum_ref[...] += jnp.sum(am, axis=0, keepdims=True)
    ssq_ref[...] += jnp.sum(am * acc, axis=0, keepdims=True)


def _conv_stats(x_ext, w_kkio, mask_out, *, taps, tm, hs, grid):
    kk, cin_p, cout_p = w_kkio.shape
    nh = tm // hs
    kernel = functools.partial(_conv_stats_kernel, taps=taps, tm=tm)
    cost = pl.CostEstimate(
        flops=2 * grid * tm * kk * cin_p * cout_p,
        transcendentals=0,
        bytes_accessed=(grid * (tm + hs) * cin_p * 2      # bf16 activation read
                        + kk * cin_p * cout_p * 2         # bf16 resident weight
                        + grid * tm * 4                   # stats mask
                        + grid * tm * cout_p * 2          # bf16 conv output
                        + 2 * cout_p * 4))                # stats
    return pl.pallas_call(
        kernel,
        out_shape=(jax.ShapeDtypeStruct((grid * tm, cout_p), jnp.bfloat16),
                   jax.ShapeDtypeStruct((1, cout_p), jnp.float32),
                   jax.ShapeDtypeStruct((1, cout_p), jnp.float32)),
        grid_spec=pltpu.PrefetchScalarGridSpec(
            num_scalar_prefetch=0,
            grid=(grid,),
            in_specs=[
                pl.BlockSpec((tm, cin_p), lambda i: (i, 0)),             # main block
                pl.BlockSpec((hs, cin_p), lambda i: ((i + 1) * nh, 0)),  # fwd halo
                pl.BlockSpec((kk, cin_p, cout_p), lambda i: (0, 0, 0)),  # weights
                pl.BlockSpec((tm, 1), lambda i: (i, 0)),                 # stats mask
            ],
            out_specs=[
                pl.BlockSpec((tm, cout_p), lambda i: (i, 0)),   # raw conv (bf16)
                pl.BlockSpec((1, cout_p), lambda i: (0, 0)),    # sum   accumulator
                pl.BlockSpec((1, cout_p), lambda i: (0, 0)),    # sumsq accumulator
            ]),
        compiler_params=pltpu.CompilerParams(
            dimension_semantics=("arbitrary",),
            vmem_limit_bytes=_VMEM_LIMIT),
        cost_estimate=cost,
    )(x_ext, x_ext, w_kkio, mask_out)


# ---------------------------------------------------------------------------
# Pass 2: fused stage-1 BN+ReLU prologue -> conv2 + per-channel stats
#         (no z1 HBM round trip; the mask also implements conv2's zero pad)
# ---------------------------------------------------------------------------
def _fused_conv_stats_kernel(y0_ref, yh_ref, m0_ref, mh_ref, sc_ref, sh_ref,
                             w_ref, mo_ref, y_ref, sum_ref, ssq_ref,
                             *, taps, tm):
    i = pl.program_id(0)

    @pl.when(i == 0)
    def _init():
        sum_ref[...] = jnp.zeros_like(sum_ref)
        ssq_ref[...] = jnp.zeros_like(ssq_ref)

    # Stage-1 BN + ReLU applied to the loaded rows (main + halo).  mask1==0 on
    # border / tail rows => they contribute exact zeros (conv2 zero padding).
    sc = sc_ref[...]
    sh = sh_ref[...]
    z0 = jnp.maximum(y0_ref[...].astype(jnp.float32) * sc + sh, 0.0) * m0_ref[...]
    zh = jnp.maximum(yh_ref[...].astype(jnp.float32) * sc + sh, 0.0) * mh_ref[...]
    z = jnp.concatenate([z0, zh], axis=0)                      # (tm+hs, Cmid_p) f32

    cout_p = w_ref.shape[2]
    acc = jnp.zeros((tm, cout_p), jnp.float32)
    for t, ro in enumerate(taps):                              # static unroll
        lhs = z[ro:ro + tm, :].astype(jnp.bfloat16)
        acc = acc + jnp.dot(lhs, w_ref[t], preferred_element_type=jnp.float32)
    y_ref[...] = acc.astype(y_ref.dtype)

    msk = mo_ref[...]
    am = acc * msk
    sum_ref[...] += jnp.sum(am, axis=0, keepdims=True)
    ssq_ref[...] += jnp.sum(am * acc, axis=0, keepdims=True)


def _fused_conv_stats(y_prev, mask_in, scale, shift, w_kkio, mask_out,
                      *, taps, tm, hs, grid):
    kk, cin_p, cout_p = w_kkio.shape
    nh = tm // hs
    kernel = functools.partial(_fused_conv_stats_kernel, taps=taps, tm=tm)
    cost = pl.CostEstimate(
        flops=2 * grid * tm * kk * cin_p * cout_p,
        transcendentals=0,
        bytes_accessed=(grid * (tm + hs) * cin_p * 2      # bf16 y1 read (+halo)
                        + grid * (tm + hs) * 4            # prologue mask
                        + kk * cin_p * cout_p * 2         # bf16 resident weight
                        + grid * tm * 4                   # stats mask
                        + grid * tm * cout_p * 2          # bf16 conv output
                        + 2 * cin_p * 4 + 2 * cout_p * 4))
    return pl.pallas_call(
        kernel,
        out_shape=(jax.ShapeDtypeStruct((grid * tm, cout_p), jnp.bfloat16),
                   jax.ShapeDtypeStruct((1, cout_p), jnp.float32),
                   jax.ShapeDtypeStruct((1, cout_p), jnp.float32)),
        grid_spec=pltpu.PrefetchScalarGridSpec(
            num_scalar_prefetch=0,
            grid=(grid,),
            in_specs=[
                pl.BlockSpec((tm, cin_p), lambda i: (i, 0)),             # y1 main
                pl.BlockSpec((hs, cin_p), lambda i: ((i + 1) * nh, 0)),  # y1 halo
                pl.BlockSpec((tm, 1), lambda i: (i, 0)),                 # mask main
                pl.BlockSpec((hs, 1), lambda i: ((i + 1) * nh, 0)),      # mask halo
                pl.BlockSpec((1, cin_p), lambda i: (0, 0)),              # scale1
                pl.BlockSpec((1, cin_p), lambda i: (0, 0)),              # shift1
                pl.BlockSpec((kk, cin_p, cout_p), lambda i: (0, 0, 0)),  # weights
                pl.BlockSpec((tm, 1), lambda i: (i, 0)),                 # stats mask
            ],
            out_specs=[
                pl.BlockSpec((tm, cout_p), lambda i: (i, 0)),
                pl.BlockSpec((1, cout_p), lambda i: (0, 0)),
                pl.BlockSpec((1, cout_p), lambda i: (0, 0)),
            ]),
        compiler_params=pltpu.CompilerParams(
            dimension_semantics=("arbitrary",),
            vmem_limit_bytes=_VMEM_LIMIT),
        cost_estimate=cost,
    )(y_prev, y_prev, mask_in, mask_in, scale, shift, w_kkio, mask_out)


# ---------------------------------------------------------------------------
# Pass 3: y2 -> relu(y2 * scale + shift)   (lane-dense, "parallel" axis)
#         (border/tail rows are sliced away by the wrapper, no mask needed)
# ---------------------------------------------------------------------------
def _bn_relu_kernel(y_ref, sc_ref, sh_ref, o_ref):
    z = y_ref[...].astype(jnp.float32) * sc_ref[...] + sh_ref[...]
    o_ref[...] = jnp.maximum(z, 0.0)


def _bn_relu(y_raw, scale, shift, *, tm, grid):
    c = y_raw.shape[1]
    return pl.pallas_call(
        _bn_relu_kernel,
        out_shape=jax.ShapeDtypeStruct((grid * tm, c), jnp.float32),
        grid_spec=pltpu.PrefetchScalarGridSpec(
            num_scalar_prefetch=0,
            grid=(grid,),
            in_specs=[
                pl.BlockSpec((tm, c), lambda i: (i, 0)),
                pl.BlockSpec((1, c), lambda i: (0, 0)),
                pl.BlockSpec((1, c), lambda i: (0, 0)),
            ],
            out_specs=pl.BlockSpec((tm, c), lambda i: (i, 0))),
        compiler_params=pltpu.CompilerParams(
            dimension_semantics=("parallel",),
            vmem_limit_bytes=_VMEM_LIMIT),
    )(y_raw, scale, shift)


def _bn_affine(s, q, gamma_p, beta_p, count):
    """Accumulated sum / sumsq -> per-channel scale/shift (tiny, plain JAX)."""
    mean = s / count
    var = jnp.maximum(q / count - mean * mean, 0.0)   # biased variance (training BN)
    inv = jax.lax.rsqrt(var + EPS)
    scale = gamma_p * inv
    shift = beta_p - mean * scale
    return scale, shift


def _prep_weight(w_oihw, cin_p, cout_p):
    """PyTorch [Cout, Cin, KH, KW] -> bf16 [KH*KW, Cin_p, Cout_p] (zero padded)."""
    co, ci, kh, kw = w_oihw.shape
    w = jnp.transpose(w_oihw, (2, 3, 1, 0))                       # (kh, kw, ci, co)
    w = jnp.pad(w, ((0, 0), (0, 0), (0, cin_p - ci), (0, cout_p - co)))
    return w.reshape(kh * kw, cin_p, cout_p).astype(jnp.bfloat16)


@functools.partial(jax.jit, static_argnames=("kernel_size", "dilation", "tm"))
def standard_block_forward(x_nchw, params, kernel_size=3, dilation=1, tm=None):
    """StandardBlock forward. x: [N, Cin, H, W] f32 -> [N, Cout, H, W] f32.

    tm=None picks a channel-aware default (1024 for <=256 padded channels, 512
    above).  v5e/v6e (128 MiB VMEM) can pass tm=2048+ for mem-bound layers;
    keep tm <= ~512-1024 at large channel counts on v7x (64 MiB VMEM / TC).
    """
    n, cin, h, w = x_nchw.shape
    ksz, d = kernel_size, dilation
    p = (ksz // 2) * d
    hp, wp = h + 2 * p, w + 2 * p
    m1 = n * hp * wp                          # pixels on the padded grid
    off = p * (wp + 1)                        # flat-row half-halo of the stencil

    cin_p = _round_up(cin, 128)
    cmid = params["w1"].shape[0]
    cout = params["w2"].shape[0]
    cmid_p = _round_up(cmid, 128)
    cout_p = _round_up(cout, 128)

    # Halo block (multiple of 16 = bf16 sublane tile); tm is a multiple of hs
    # so the halo is addressable as whole (hs, C) blocks of the same array.
    hs = max(16, _round_up(2 * off, 16))
    if tm is None:
        tm = 512 if max(cin_p, cmid_p, cout_p) >= 512 else 1024
    tm = _round_up(max(tm, hs), hs)

    g = -(-m1 // tm)                          # ceil: stage-2 / output grid
    g1 = g + 1                                # stage-1 grid also covers the +off shift

    # Static tap row-offsets into the flattened padded grid (kh outer, kw inner).
    taps = tuple(kh * d * wp + kw * d for kh in range(ksz) for kw in range(ksz))

    # Validity masks.  Row k of an array with `shift` holds pixel (k - shift);
    # a pixel is valid iff it is an interior pixel of the padded grid.
    def make_mask(rows, shift):
        r = jnp.arange(rows, dtype=jnp.int32) - shift
        q = r % (hp * wp)
        hh, ww = q // wp, q % wp
        valid = ((r >= 0) & (r < m1) &
                 (hh >= p) & (hh < hp - p) & (ww >= p) & (ww < wp - p))
        return valid.astype(jnp.float32)[:, None]

    mask1 = make_mask(g1 * tm, off)           # coords of y1 (pixel j at row j+off)
    mask2 = make_mask(g * tm, 0)              # coords of y2 (pixel j at row j)
    count = float(n * h * w)

    # ---- Stage 1: conv1 + stats ---------------------------------------------
    # x_ext row k holds pixel (k - 2*off) so every output block only needs a
    # *forward* halo of hs rows.  Stored bf16.
    x = jnp.transpose(x_nchw, (0, 2, 3, 1))                       # NHWC
    xpad = jnp.pad(x, ((0, 0), (p, p), (p, p), (0, cin_p - cin)))
    xflat = xpad.reshape(m1, cin_p).astype(jnp.bfloat16)
    rows_x = g1 * tm + hs
    x_ext = jnp.pad(xflat, ((2 * off, rows_x - 2 * off - m1), (0, 0)))

    w1 = _prep_weight(params["w1"], cin_p, cmid_p)
    ga1 = jnp.pad(params["gamma1"], (0, cmid_p - cmid)).reshape(1, cmid_p)
    be1 = jnp.pad(params["beta1"], (0, cmid_p - cmid)).reshape(1, cmid_p)

    y1, s1, q1 = _conv_stats(x_ext, w1, mask1, taps=taps, tm=tm, hs=hs, grid=g1)
    sc1, sh1 = _bn_affine(s1, q1, ga1, be1, count)

    # ---- Stage 2: fused BN1+ReLU1 -> conv2 + stats (no z1 round trip) --------
    w2 = _prep_weight(params["w2"], cmid_p, cout_p)
    ga2 = jnp.pad(params["gamma2"], (0, cout_p - cout)).reshape(1, cout_p)
    be2 = jnp.pad(params["beta2"], (0, cout_p - cout)).reshape(1, cout_p)

    y2, s2, q2 = _fused_conv_stats(y1, mask1, sc1, sh1, w2, mask2,
                                   taps=taps, tm=tm, hs=hs, grid=g)
    sc2, sh2 = _bn_affine(s2, q2, ga2, be2, count)

    # ---- Stage 3: BN2 affine + ReLU2 -----------------------------------------
    z2 = _bn_relu(y2, sc2, sh2, tm=tm, grid=g)

    out = z2[:m1].reshape(n, hp, wp, cout_p)[:, p:p + h, p:p + w, :cout]
    return jnp.transpose(out, (0, 3, 1, 2))                       # NCHW, f32


def init_params(key, in_channels, out_channels, mid_channels=None, kernel_size=3):
    if not mid_channels:
        mid_channels = out_channels
    k1, k2, k3, k4 = jax.random.split(key, 4)
    return {
        "w1": 0.1 * jax.random.normal(
            k1, (mid_channels, in_channels, kernel_size, kernel_size), jnp.float32),
        "gamma1": 1.0 + 0.1 * jax.random.normal(k2, (mid_channels,), jnp.float32),
        "beta1": 0.1 * jax.random.normal(k3, (mid_channels,), jnp.float32),
        "w2": 0.1 * jax.random.normal(
            k4, (out_channels, mid_channels, kernel_size, kernel_size), jnp.float32),
        "gamma2": jnp.ones((out_channels,), jnp.float32),
        "beta2": jnp.zeros((out_channels,), jnp.float32),
    }


def _reference_forward(x_nchw, params, kernel_size=3, dilation=1):
    """Pure-JAX f32 reference (lax conv + batch-stat BN + relu) for validation."""
    pad = (kernel_size // 2) * dilation

    def stage(x, w, g, b):
        y = jax.lax.conv_general_dilated(
            x, w, window_strides=(1, 1),
            padding=[(pad, pad), (pad, pad)],
            rhs_dilation=(dilation, dilation),
            dimension_numbers=("NCHW", "OIHW", "NCHW"))
        mean = jnp.mean(y, axis=(0, 2, 3), keepdims=True)
        var = jnp.mean((y - mean) ** 2, axis=(0, 2, 3), keepdims=True)
        y = (y - mean) * jax.lax.rsqrt(var + EPS)
        y = y * g.reshape(1, -1, 1, 1) + b.reshape(1, -1, 1, 1)
        return jnp.maximum(y, 0.0)

    y = stage(x_nchw, params["w1"], params["gamma1"], params["beta1"])
    return stage(y, params["w2"], params["gamma2"], params["beta2"])


if __name__ == "__main__":
    key = jax.random.PRNGKey(0)
    kx, kp = jax.random.split(key)

    N, C_IN, H, W = 2, 4, 16, 16
    C_OUT = 8

    x = jax.random.normal(kx, (N, C_IN, H, W), jnp.float32)
    params = init_params(kp, C_IN, C_OUT)

    out = standard_block_forward(x, params, tm=256)   # small tm -> multi-step grid
    out = jax.block_until_ready(out)
    assert out.shape == (N, C_OUT, H, W), out.shape

    ref = _reference_forward(x, params)
    max_err = float(jnp.max(jnp.abs(out - ref)))
    # bf16 activations + bf16-fed MXU vs f32 reference: matching tolerance.
    assert jnp.allclose(out, ref, rtol=5e-2, atol=5e-2), f"max_abs_err={max_err}"

    print("KERNEL_OK")
</pallas_src>

<mosaic_0001>
module attributes {stable_mosaic.version = 11 : i64} {
  func.func @_conv_stats_kernel(%arg0: i32, %arg1: memref<288x128xbf16, #tpu.memory_space<vmem>>, %arg2: memref<48x128xbf16, #tpu.memory_space<vmem>>, %arg3: memref<9x128x128xbf16, #tpu.memory_space<vmem>>, %arg4: memref<288x1xf32, #tpu.memory_space<vmem>>, %arg5: memref<288x128xbf16, #tpu.memory_space<vmem>>, %arg6: memref<1x128xf32, #tpu.memory_space<vmem>>, %arg7: memref<1x128xf32, #tpu.memory_space<vmem>>) attributes {dimension_semantics = [#tpu.dimension_semantics<arbitrary>], iteration_bounds = array<i64: 4>, scalar_prefetch = 0 : i64, scratch_operands = 0 : i64, tpu.core_type = #tpu.core_type<tc>, window_params = [{transform_indices = @transform_0, window_bounds = array<i64: 288, 128>}, {transform_indices = @transform_1, window_bounds = array<i64: 48, 128>}, {pipeline_mode = #tpu.pipeline_mode<synchronous>, transform_indices = @transform_2, window_bounds = array<i64: 9, 128, 128>}, {transform_indices = @transform_3, window_bounds = array<i64: 288, 1>}, {transform_indices = @transform_4, window_bounds = array<i64: 288, 128>}, {pipeline_mode = #tpu.pipeline_mode<synchronous>, transform_indices = @transform_5, window_bounds = array<i64: 1, 128>}, {pipeline_mode = #tpu.pipeline_mode<synchronous>, transform_indices = @transform_6, window_bounds = array<i64: 1, 128>}]} {
    %c0_i32 = arith.constant 0 : i32
    %0 = arith.cmpi eq, %arg0, %c0_i32 : i32
    %1 = arith.extui %0 : i1 to i32
    %c0_i32_0 = arith.constant 0 : i32
    %2 = arith.cmpi ne, %1, %c0_i32_0 : i32
    scf.if %2 {
      %cst_46 = arith.constant 0.000000e+00 : f32
      %79 = vector.broadcast %cst_46 : f32 to vector<1x128xf32>
      %c0_47 = arith.constant 0 : index
      %c0_48 = arith.constant 0 : index
      %80 = vector.load %arg6[%c0_47, %c0_48] : memref<1x128xf32, #tpu.memory_space<vmem>>, vector<1x128xf32>
      tpu.vector_store %arg6[%c0_47, %c0_48], %79 {strides = array<i32>} : memref<1x128xf32, #tpu.memory_space<vmem>>, vector<1x128xf32>,
      %cst_49 = arith.constant 0.000000e+00 : f32
      %81 = vector.broadcast %cst_49 : f32 to vector<1x128xf32>
      %c0_50 = arith.constant 0 : index
      %c0_51 = arith.constant 0 : index
      %82 = vector.load %arg7[%c0_50, %c0_51] : memref<1x128xf32, #tpu.memory_space<vmem>>, vector<1x128xf32>
      tpu.vector_store %arg7[%c0_50, %c0_51], %81 {strides = array<i32>} : memref<1x128xf32, #tpu.memory_space<vmem>>, vector<1x128xf32>,
    } else {
    }
    %c0 = arith.constant 0 : index
    %c0_1 = arith.constant 0 : index
    %3 = vector.load %arg1[%c0, %c0_1] : memref<288x128xbf16, #tpu.memory_space<vmem>>, vector<288x128xbf16>
    %4 = arith.extf %3 : vector<288x128xbf16> to vector<288x128xf32>
    %c0_2 = arith.constant 0 : index
    %c0_3 = arith.constant 0 : index
    %5 = vector.load %arg2[%c0_2, %c0_3] : memref<48x128xbf16, #tpu.memory_space<vmem>>, vector<48x128xbf16>
    %6 = arith.extf %5 : vector<48x128xbf16> to vector<48x128xf32>
    %7 = tpu.concatenate %4, %6 in 0 : vector<288x128xf32>, vector<48x128xf32> -> vector<336x128xf32>
    %cst = arith.constant 0.000000e+00 : f32
    %8 = vector.broadcast %cst : f32 to vector<288x128xf32>
    %9 = vector.extract_strided_slice %7 {offsets = [0, 0], sizes = [288, 128], strides = [1, 1]} : vector<336x128xf32> to vector<288x128xf32>
    %10 = arith.truncf %9 : vector<288x128xf32> to vector<288x128xbf16>
    %c0_4 = arith.constant 0 : index
    %c0_5 = arith.constant 0 : index
    %c0_6 = arith.constant 0 : index
    %11 = vector.load %arg3[%c0_4, %c0_5, %c0_6] : memref<9x128x128xbf16, #tpu.memory_space<vmem>>, vector<1x128x128xbf16>
    %12 = vector.shape_cast %11 : vector<1x128x128xbf16> to vector<128x128xbf16>
    %cst_7 = arith.constant dense<0.000000e+00> : vector<288x128xf32>
    %13 = tpu.matmul %10, %12, %cst_7 {dimension_numbers = #tpu.dot_dimension_numbers<[1], [0], [0], [1], [0, 0, 1, 1], [], []>} : vector<288x128xbf16>, vector<128x128xbf16>, vector<288x128xf32> -> vector<288x128xf32>
    %14 = arith.addf %8, %13 : vector<288x128xf32>
    %15 = vector.extract_strided_slice %7 {offsets = [1, 0], sizes = [288, 128], strides = [1, 1]} : vector<336x128xf32> to vector<288x128xf32>
    %16 = arith.truncf %15 : vector<288x128xf32> to vector<288x128xbf16>
    %c1 = arith.constant 1 : index
    %c0_8 = arith.constant 0 : index
    %c0_9 = arith.constant 0 : index
    %17 = vector.load %arg3[%c1, %c0_8, %c0_9] : memref<9x128x128xbf16, #tpu.memory_space<vmem>>, vector<1x128x128xbf16>
    %18 = vector.shape_cast %17 : vector<1x128x128xbf16> to vector<128x128xbf16>
    %cst_10 = arith.constant dense<0.000000e+00> : vector<288x128xf32>
    %19 = tpu.matmul %16, %18, %cst_10 {dimension_numbers = #tpu.dot_dimension_numbers<[1], [0], [0], [1], [0, 0, 1, 1], [], []>} : vector<288x128xbf16>, vector<128x128xbf16>, vector<288x128xf32> -> vector<288x128xf32>
    %20 = arith.addf %14, %19 : vector<288x128xf32>
    %21 = vector.extract_strided_slice %7 {offsets = [2, 0], sizes = [288, 128], strides = [1, 1]} : vector<336x128xf32> to vector<288x128xf32>
    %22 = arith.truncf %21 : vector<288x128xf32> to vector<288x128xbf16>
    %c2 = arith.constant 2 : index
    %c0_11 = arith.constant 0 : index
    %c0_12 = arith.constant 0 : index
    %23 = vector.load %arg3[%c2, %c0_11, %c0_12] : memref<9x128x128xbf16, #tpu.memory_space<vmem>>, vector<1x128x128xbf16>
    %24 = vector.shape_cast %23 : vector<1x128x128xbf16> to vector<128x128xbf16>
    %cst_13 = arith.constant dense<0.000000e+00> : vector<288x128xf32>
    %25 = tpu.matmul %22, %24, %cst_13 {dimension_numbers = #tpu.dot_dimension_numbers<[1], [0], [0], [1], [0, 0, 1, 1], [], []>} : vector<288x128xbf16>, vector<128x128xbf16>, vector<288x128xf32> -> vector<288x128xf32>
    %26 = arith.addf %20, %25 : vector<288x128xf32>
    %27 = vector.extract_strided_slice %7 {offsets = [18, 0], sizes = [288, 128], strides = [1, 1]} : vector<336x128xf32> to vector<288x128xf32>
    %28 = arith.truncf %27 : vector<288x128xf32> to vector<288x128xbf16>
    %c3 = arith.constant 3 : index
    %c0_14 = arith.constant 0 : index
    %c0_15 = arith.constant 0 : index
    %29 = vector.load %arg3[%c3, %c0_14, %c0_15] : memref<9x128x128xbf16, #tpu.memory_space<vmem>>, vector<1x128x128xbf16>
    %30 = vector.shape_cast %29 : vector<1x128x128xbf16> to vector<128x128xbf16>
    %cst_16 = arith.constant dense<0.000000e+00> : vector<288x128xf32>
    %31 = tpu.matmul %28, %30, %cst_16 {dimension_numbers = #tpu.dot_dimension_numbers<[1], [0], [0], [1], [0, 0, 1, 1], [], []>} : vector<288x128xbf16>, vector<128x128xbf16>, vector<288x128xf32> -> vector<288x128xf32>
    %32 = arith.addf %26, %31 : vector<288x128xf32>
    %33 = vector.extract_strided_slice %7 {offsets = [19, 0], sizes = [288, 128], strides = [1, 1]} : vector<336x128xf32> to vector<288x128xf32>
    %34 = arith.truncf %33 : vector<288x128xf32> to vector<288x128xbf16>
    %c4 = arith.constant 4 : index
    %c0_17 = arith.constant 0 : index
    %c0_18 = arith.constant 0 : index
    %35 = vector.load %arg3[%c4, %c0_17, %c0_18] : memref<9x128x128xbf16, #tpu.memory_space<vmem>>, vector<1x128x128xbf16>
    %36 = vector.shape_cast %35 : vector<1x128x128xbf16> to vector<128x128xbf16>
    %cst_19 = arith.constant dense<0.000000e+00> : vector<288x128xf32>
    %37 = tpu.matmul %34, %36, %cst_19 {dimension_numbers = #tpu.dot_dimension_numbers<[1], [0], [0], [1], [0, 0, 1, 1], [], []>} : vector<288x128xbf16>, vector<128x128xbf16>, vector<288x128xf32> -> vector<288x128xf32>
    %38 = arith.addf %32, %37 : vector<288x128xf32>
    %39 = vector.extract_strided_slice %7 {offsets = [20, 0], sizes = [288, 128], strides = [1, 1]} : vector<336x128xf32> to vector<288x128xf32>
    %40 = arith.truncf %39 : vector<288x128xf32> to vector<288x128xbf16>
    %c5 = arith.constant 5 : index
    %c0_20 = arith.constant 0 : index
    %c0_21 = arith.constant 0 : index
    %41 = vector.load %arg3[%c5, %c0_20, %c0_21] : memref<9x128x128xbf16, #tpu.memory_space<vmem>>, vector<1x128x128xbf16>
    %42 = vector.shape_cast %41 : vector<1x128x128xbf16> to vector<128x128xbf16>
    %cst_22 = arith.constant dense<0.000000e+00> : vector<288x128xf32>
    %43 = tpu.matmul %40, %42, %cst_22 {dimension_numbers = #tpu.dot_dimension_numbers<[1], [0], [0], [1], [0, 0, 1, 1], [], []>} : vector<288x128xbf16>, vector<128x128xbf16>, vector<288x128xf32> -> vector<288x128xf32>
    %44 = arith.addf %38, %43 : vector<288x128xf32>
    %45 = vector.extract_strided_slice %7 {offsets = [36, 0], sizes = [288, 128], strides = [1, 1]} : vector<336x128xf32> to vector<288x128xf32>
    %46 = arith.truncf %45 : vector<288x128xf32> to vector<288x128xbf16>
    %c6 = arith.constant 6 : index
    %c0_23 = arith.constant 0 : index
    %c0_24 = arith.constant 0 : index
    %47 = vector.load %arg3[%c6, %c0_23, %c0_24] : memref<9x128x128xbf16, #tpu.memory_space<vmem>>, vector<1x128x128xbf16>
    %48 = vector.shape_cast %47 : vector<1x128x128xbf16> to vector<128x128xbf16>
    %cst_25 = arith.constant dense<0.000000e+00> : vector<288x128xf32>
    %49 = tpu.matmul %46, %48, %cst_25 {dimension_numbers = #tpu.dot_dimension_numbers<[1], [0], [0], [1], [0, 0, 1, 1], [], []>} : vector<288x128xbf16>, vector<128x128xbf16>, vector<288x128xf32> -> vector<288x128xf32>
    %50 = arith.addf %44, %49 : vector<288x128xf32>
    %51 = vector.extract_strided_slice %7 {offsets = [37, 0], sizes = [288, 128], strides = [1, 1]} : vector<336x128xf32> to vector<288x128xf32>
    %52 = arith.truncf %51 : vector<288x128xf32> to vector<288x128xbf16>
    %c7 = arith.constant 7 : index
    %c0_26 = arith.constant 0 : index
    %c0_27 = arith.constant 0 : index
    %53 = vector.load %arg3[%c7, %c0_26, %c0_27] : memref<9x128x128xbf16, #tpu.memory_space<vmem>>, vector<1x128x128xbf16>
    %54 = vector.shape_cast %53 : vector<1x128x128xbf16> to vector<128x128xbf16>
    %cst_28 = arith.constant dense<0.000000e+00> : vector<288x128xf32>
    %55 = tpu.matmul %52, %54, %cst_28 {dimension_numbers = #tpu.dot_dimension_numbers<[1], [0], [0], [1], [0, 0, 1, 1], [], []>} : vector<288x128xbf16>, vector<128x128xbf16>, vector<288x128xf32> -> vector<288x128xf32>
    %56 = arith.addf %50, %55 : vector<288x128xf32>
    %57 = vector.extract_strided_slice %7 {offsets = [38, 0], sizes = [288, 128], strides = [1, 1]} : vector<336x128xf32> to vector<288x128xf32>
    %58 = arith.truncf %57 : vector<288x128xf32> to vector<288x128xbf16>
    %c8 = arith.constant 8 : index
    %c0_29 = arith.constant 0 : index
    %c0_30 = arith.constant 0 : index
    %59 = vector.load %arg3[%c8, %c0_29, %c0_30] : memref<9x128x128xbf16, #tpu.memory_space<vmem>>, vector<1x128x128xbf16>
    %60 = vector.shape_cast %59 : vector<1x128x128xbf16> to vector<128x128xbf16>
    %cst_31 = arith.constant dense<0.000000e+00> : vector<288x128xf32>
    %61 = tpu.matmul %58, %60, %cst_31 {dimension_numbers = #tpu.dot_dimension_numbers<[1], [0], [0], [1], [0, 0, 1, 1], [], []>} : vector<288x128xbf16>, vector<128x128xbf16>, vector<288x128xf32> -> vector<288x128xf32>
    %62 = arith.addf %56, %61 : vector<288x128xf32>
    %63 = arith.truncf %62 : vector<288x128xf32> to vector<288x128xbf16>
    %c0_32 = arith.constant 0 : index
    %c0_33 = arith.constant 0 : index
    %64 = vector.load %arg5[%c0_32, %c0_33] : memref<288x128xbf16, #tpu.memory_space<vmem>>, vector<288x128xbf16>
    tpu.vector_store %arg5[%c0_32, %c0_33], %63 {strides = array<i32>} : memref<288x128xbf16, #tpu.memory_space<vmem>>, vector<288x128xbf16>,
    %c0_34 = arith.constant 0 : index
    %c0_35 = arith.constant 0 : index
    %65 = vector.load %arg4[%c0_34, %c0_35] : memref<288x1xf32, #tpu.memory_space<vmem>>, vector<288x1xf32>
    %66 = vector.broadcast %65 : vector<288x1xf32> to vector<288x128xf32>
    %67 = arith.mulf %62, %66 : vector<288x128xf32>
    %c0_36 = arith.constant 0 : index
    %c0_37 = arith.constant 0 : index
    %68 = vector.load %arg6[%c0_36, %c0_37] : memref<1x128xf32, #tpu.memory_space<vmem>>, vector<1x128xf32>
    %cst_38 = arith.constant dense<0.000000e+00> : vector<128xf32>
    %69 = vector.multi_reduction <add>, %67, %cst_38 [0] : vector<288x128xf32> to vector<128xf32>
    %70 = vector.shape_cast %69 : vector<128xf32> to vector<1x128xf32>
    %71 = arith.addf %68, %70 : vector<1x128xf32>
    %c0_39 = arith.constant 0 : index
    %c0_40 = arith.constant 0 : index
    %72 = vector.load %arg6[%c0_39, %c0_40] : memref<1x128xf32, #tpu.memory_space<vmem>>, vector<1x128xf32>
    tpu.vector_store %arg6[%c0_39, %c0_40], %71 {strides = array<i32>} : memref<1x128xf32, #tpu.memory_space<vmem>>, vector<1x128xf32>,
    %c0_41 = arith.constant 0 : index
    %c0_42 = arith.constant 0 : index
    %73 = vector.load %arg7[%c0_41, %c0_42] : memref<1x128xf32, #tpu.memory_space<vmem>>, vector<1x128xf32>
    %74 = arith.mulf %67, %62 : vector<288x128xf32>
    %cst_43 = arith.constant dense<0.000000e+00> : vector<128xf32>
    %75 = vector.multi_reduction <add>, %74, %cst_43 [0] : vector<288x128xf32> to vector<128xf32>
    %76 = vector.shape_cast %75 : vector<128xf32> to vector<1x128xf32>
    %77 = arith.addf %73, %76 : vector<1x128xf32>
    %c0_44 = arith.constant 0 : index
    %c0_45 = arith.constant 0 : index
    %78 = vector.load %arg7[%c0_44, %c0_45] : memref<1x128xf32, #tpu.memory_space<vmem>>, vector<1x128xf32>
    tpu.vector_store %arg7[%c0_44, %c0_45], %77 {strides = array<i32>} : memref<1x128xf32, #tpu.memory_space<vmem>>, vector<1x128xf32>,
    return
  }
  func.func @transform_0(%arg0: i32) -> (i32, i32) {
    %c0_i32 = arith.constant 0 : i32
    %c0_i32_0 = arith.constant 0 : i32
    return %arg0, %c0_i32 : i32, i32
  }
  func.func @transform_1(%arg0: i32) -> (i32, i32) {
    %c1_i32 = arith.constant 1 : i32
    %0 = arith.addi %arg0, %c1_i32 : i32
    %c6_i32 = arith.constant 6 : i32
    %1 = arith.muli %0, %c6_i32 : i32
    %c0_i32 = arith.constant 0 : i32
    %c0_i32_0 = arith.constant 0 : i32
    return %1, %c0_i32 : i32, i32
  }
  func.func @transform_2(%arg0: i32) -> (i32, i32, i32) {
    %c0_i32 = arith.constant 0 : i32
    %c0_i32_0 = arith.constant 0 : i32
    %c0_i32_1 = arith.constant 0 : i32
    %c0_i32_2 = arith.constant 0 : i32
    return %c0_i32, %c0_i32_0, %c0_i32_1 : i32, i32, i32
  }
  func.func @transform_3(%arg0: i32) -> (i32, i32) {
    %c0_i32 = arith.constant 0 : i32
    %c0_i32_0 = arith.constant 0 : i32
    return %arg0, %c0_i32 : i32, i32
  }
  func.func @transform_4(%arg0: i32) -> (i32, i32) {
    %c0_i32 = arith.constant 0 : i32
    %c0_i32_0 = arith.constant 0 : i32
    return %arg0, %c0_i32 : i32, i32
  }
  func.func @transform_5(%arg0: i32) -> (i32, i32) {
    %c0_i32 = arith.constant 0 : i32
    %c0_i32_0 = arith.constant 0 : i32
    %c0_i32_1 = arith.constant 0 : i32
    return %c0_i32, %c0_i32_0 : i32, i32
  }
  func.func @transform_6(%arg0: i32) -> (i32, i32) {
    %c0_i32 = arith.constant 0 : i32
    %c0_i32_0 = arith.constant 0 : i32
    %c0_i32_1 = arith.constant 0 : i32
    return %c0_i32, %c0_i32_0 : i32, i32
  }
}

module attributes {stable_mosaic.version = 11 : i64} {
  func.func @_fused_conv_stats_kernel(%arg0: i32, %arg1: memref<288x128xbf16, #tpu.memory_space<vmem>>, %arg2: memref<48x128xbf16, #tpu.memory_space<vmem>>, %arg3: memref<288x1xf32, #tpu.memory_space<vmem>>, %arg4: memref<48x1xf32, #tpu.memory_space<vmem>>, %arg5: memref<1x128xf32, #tpu.memory_space<vmem>>, %arg6: memref<1x128xf32, #tpu.memory_space<vmem>>, %arg7: memref<9x128x128xbf16, #tpu.memory_space<vmem>>, %arg8: memref<288x1xf32, #tpu.memory_space<vmem>>, %arg9: memref<288x128xbf16, #tpu.memory_space<vmem>>, %arg10: memref<1x128xf32, #tpu.memory_space<vmem>>, %arg11: memref<1x128xf32, #tpu.memory_space<vmem>>) attributes {dimension_semantics = [#tpu.dimension_semantics<arbitrary>], iteration_bounds = array<i64: 3>, scalar_prefetch = 0 : i64, scratch_operands = 0 : i64, tpu.core_type = #tpu.core_type<tc>, window_params = [{transform_indices = @transform_0, window_bounds = array<i64: 288, 128>}, {transform_indices = @transform_1, window_bounds = array<i64: 48, 128>}, {transform_indices = @transform_2, window_bounds = array<i64: 288, 1>}, {transform_indices = @transform_3, window_bounds = array<i64: 48, 1>}, {pipeline_mode = #tpu.pipeline_mode<synchronous>, transform_indices = @transform_4, window_bounds = array<i64: 1, 128>}, {pipeline_mode = #tpu.pipeline_mode<synchronous>, transform_indices = @transform_5, window_bounds = array<i64: 1, 128>}, {pipeline_mode = #tpu.pipeline_mode<synchronous>, transform_indices = @transform_6, window_bounds = array<i64: 9, 128, 128>}, {transform_indices = @transform_7, window_bounds = array<i64: 288, 1>}, {transform_indices = @transform_8, window_bounds = array<i64: 288, 128>}, {pipeline_mode = #tpu.pipeline_mode<synchronous>, transform_indices = @transform_9, window_bounds = array<i64: 1, 128>}, {pipeline_mode = #tpu.pipeline_mode<synchronous>, transform_indices = @transform_10, window_bounds = array<i64: 1, 128>}]} {
    %c0_i32 = arith.constant 0 : i32
    %0 = arith.cmpi eq, %arg0, %c0_i32 : i32
    %1 = arith.extui %0 : i1 to i32
    %c0_i32_0 = arith.constant 0 : i32
    %2 = arith.cmpi ne, %1, %c0_i32_0 : i32
    scf.if %2 {
      %cst_56 = arith.constant 0.000000e+00 : f32
      %99 = vector.broadcast %cst_56 : f32 to vector<1x128xf32>
      %c0_57 = arith.constant 0 : index
      %c0_58 = arith.constant 0 : index
      %100 = vector.load %arg10[%c0_57, %c0_58] : memref<1x128xf32, #tpu.memory_space<vmem>>, vector<1x128xf32>
      tpu.vector_store %arg10[%c0_57, %c0_58], %99 {strides = array<i32>} : memref<1x128xf32, #tpu.memory_space<vmem>>, vector<1x128xf32>,
      %cst_59 = arith.constant 0.000000e+00 : f32
      %101 = vector.broadcast %cst_59 : f32 to vector<1x128xf32>
      %c0_60 = arith.constant 0 : index
      %c0_61 = arith.constant 0 : index
      %102 = vector.load %arg11[%c0_60, %c0_61] : memref<1x128xf32, #tpu.memory_space<vmem>>, vector<1x128xf32>
      tpu.vector_store %arg11[%c0_60, %c0_61], %101 {strides = array<i32>} : memref<1x128xf32, #tpu.memory_space<vmem>>, vector<1x128xf32>,
    } else {
    }
    %c0 = arith.constant 0 : index
    %c0_1 = arith.constant 0 : index
    %3 = vector.load %arg5[%c0, %c0_1] : memref<1x128xf32, #tpu.memory_space<vmem>>, vector<1x128xf32>
    %c0_2 = arith.constant 0 : index
    %c0_3 = arith.constant 0 : index
    %4 = vector.load %arg6[%c0_2, %c0_3] : memref<1x128xf32, #tpu.memory_space<vmem>>, vector<1x128xf32>
    %c0_4 = arith.constant 0 : index
    %c0_5 = arith.constant 0 : index
    %5 = vector.load %arg1[%c0_4, %c0_5] : memref<288x128xbf16, #tpu.memory_space<vmem>>, vector<288x128xbf16>
    %6 = arith.extf %5 : vector<288x128xbf16> to vector<288x128xf32>
    %7 = vector.broadcast %3 : vector<1x128xf32> to vector<288x128xf32>
    %8 = arith.mulf %6, %7 : vector<288x128xf32>
    %9 = vector.broadcast %4 : vector<1x128xf32> to vector<288x128xf32>
    %10 = arith.addf %8, %9 : vector<288x128xf32>
    %cst = arith.constant 0.000000e+00 : f32
    %11 = vector.broadcast %cst : f32 to vector<288x128xf32>
    %12 = arith.maximumf %10, %11 : vector<288x128xf32>
    %c0_6 = arith.constant 0 : index
    %c0_7 = arith.constant 0 : index
    %13 = vector.load %arg3[%c0_6, %c0_7] : memref<288x1xf32, #tpu.memory_space<vmem>>, vector<288x1xf32>
    %14 = vector.broadcast %13 : vector<288x1xf32> to vector<288x128xf32>
    %15 = arith.mulf %12, %14 : vector<288x128xf32>
    %c0_8 = arith.constant 0 : index
    %c0_9 = arith.constant 0 : index
    %16 = vector.load %arg2[%c0_8, %c0_9] : memref<48x128xbf16, #tpu.memory_space<vmem>>, vector<48x128xbf16>
    %17 = arith.extf %16 : vector<48x128xbf16> to vector<48x128xf32>
    %18 = vector.broadcast %3 : vector<1x128xf32> to vector<48x128xf32>
    %19 = arith.mulf %17, %18 : vector<48x128xf32>
    %20 = vector.broadcast %4 : vector<1x128xf32> to vector<48x128xf32>
    %21 = arith.addf %19, %20 : vector<48x128xf32>
    %cst_10 = arith.constant 0.000000e+00 : f32
    %22 = vector.broadcast %cst_10 : f32 to vector<48x128xf32>
    %23 = arith.maximumf %21, %22 : vector<48x128xf32>
    %c0_11 = arith.constant 0 : index
    %c0_12 = arith.constant 0 : index
    %24 = vector.load %arg4[%c0_11, %c0_12] : memref<48x1xf32, #tpu.memory_space<vmem>>, vector<48x1xf32>
    %25 = vector.broadcast %24 : vector<48x1xf32> to vector<48x128xf32>
    %26 = arith.mulf %23, %25 : vector<48x128xf32>
    %27 = tpu.concatenate %15, %26 in 0 : vector<288x128xf32>, vector<48x128xf32> -> vector<336x128xf32>
    %cst_13 = arith.constant 0.000000e+00 : f32
    %28 = vector.broadcast %cst_13 : f32 to vector<288x128xf32>
    %29 = vector.extract_strided_slice %27 {offsets = [0, 0], sizes = [288, 128], strides = [1, 1]} : vector<336x128xf32> to vector<288x128xf32>
    %30 = arith.truncf %29 : vector<288x128xf32> to vector<288x128xbf16>
    %c0_14 = arith.constant 0 : index
    %c0_15 = arith.constant 0 : index
    %c0_16 = arith.constant 0 : index
    %31 = vector.load %arg7[%c0_14, %c0_15, %c0_16] : memref<9x128x128xbf16, #tpu.memory_space<vmem>>, vector<1x128x128xbf16>
    %32 = vector.shape_cast %31 : vector<1x128x128xbf16> to vector<128x128xbf16>
    %cst_17 = arith.constant dense<0.000000e+00> : vector<288x128xf32>
    %33 = tpu.matmul %30, %32, %cst_17 {dimension_numbers = #tpu.dot_dimension_numbers<[1], [0], [0], [1], [0, 0, 1, 1], [], []>} : vector<288x128xbf16>, vector<128x128xbf16>, vector<288x128xf32> -> vector<288x128xf32>
    %34 = arith.addf %28, %33 : vector<288x128xf32>
    %35 = vector.extract_strided_slice %27 {offsets = [1, 0], sizes = [288, 128], strides = [1, 1]} : vector<336x128xf32> to vector<288x128xf32>
    %36 = arith.truncf %35 : vector<288x128xf32> to vector<288x128xbf16>
    %c1 = arith.constant 1 : index
    %c0_18 = arith.constant 0 : index
    %c0_19 = arith.constant 0 : index
    %37 = vector.load %arg7[%c1, %c0_18, %c0_19] : memref<9x128x128xbf16, #tpu.memory_space<vmem>>, vector<1x128x128xbf16>
    %38 = vector.shape_cast %37 : vector<1x128x128xbf16> to vector<128x128xbf16>
    %cst_20 = arith.constant dense<0.000000e+00> : vector<288x128xf32>
    %39 = tpu.matmul %36, %38, %cst_20 {dimension_numbers = #tpu.dot_dimension_numbers<[1], [0], [0], [1], [0, 0, 1, 1], [], []>} : vector<288x128xbf16>, vector<128x128xbf16>, vector<288x128xf32> -> vector<288x128xf32>
    %40 = arith.addf %34, %39 : vector<288x128xf32>
    %41 = vector.extract_strided_slice %27 {offsets = [2, 0], sizes = [288, 128], strides = [1, 1]} : vector<336x128xf32> to vector<288x128xf32>
    %42 = arith.truncf %41 : vector<288x128xf32> to vector<288x128xbf16>
    %c2 = arith.constant 2 : index
    %c0_21 = arith.constant 0 : index
    %c0_22 = arith.constant 0 : index
    %43 = vector.load %arg7[%c2, %c0_21, %c0_22] : memref<9x128x128xbf16, #tpu.memory_space<vmem>>, vector<1x128x128xbf16>
    %44 = vector.shape_cast %43 : vector<1x128x128xbf16> to vector<128x128xbf16>
    %cst_23 = arith.constant dense<0.000000e+00> : vector<288x128xf32>
    %45 = tpu.matmul %42, %44, %cst_23 {dimension_numbers = #tpu.dot_dimension_numbers<[1], [0], [0], [1], [0, 0, 1, 1], [], []>} : vector<288x128xbf16>, vector<128x128xbf16>, vector<288x128xf32> -> vector<288x128xf32>
    %46 = arith.addf %40, %45 : vector<288x128xf32>
    %47 = vector.extract_strided_slice %27 {offsets = [18, 0], sizes = [288, 128], strides = [1, 1]} : vector<336x128xf32> to vector<288x128xf32>
    %48 = arith.truncf %47 : vector<288x128xf32> to vector<288x128xbf16>
    %c3 = arith.constant 3 : index
    %c0_24 = arith.constant 0 : index
    %c0_25 = arith.constant 0 : index
    %49 = vector.load %arg7[%c3, %c0_24, %c0_25] : memref<9x128x128xbf16, #tpu.memory_space<vmem>>, vector<1x128x128xbf16>
    %50 = vector.shape_cast %49 : vector<1x128x128xbf16> to vector<128x128xbf16>
    %cst_26 = arith.constant dense<0.000000e+00> : vector<288x128xf32>
    %51 = tpu.matmul %48, %50, %cst_26 {dimension_numbers = #tpu.dot_dimension_numbers<[1], [0], [0], [1], [0, 0, 1, 1], [], []>} : vector<288x128xbf16>, vector<128x128xbf16>, vector<288x128xf32> -> vector<288x128xf32>
    %52 = arith.addf %46, %51 : vector<288x128xf32>
    %53 = vector.extract_strided_slice %27 {offsets = [19, 0], sizes = [288, 128], strides = [1, 1]} : vector<336x128xf32> to vector<288x128xf32>
    %54 = arith.truncf %53 : vector<288x128xf32> to vector<288x128xbf16>
    %c4 = arith.constant 4 : index
    %c0_27 = arith.constant 0 : index
    %c0_28 = arith.constant 0 : index
    %55 = vector.load %arg7[%c4, %c0_27, %c0_28] : memref<9x128x128xbf16, #tpu.memory_space<vmem>>, vector<1x128x128xbf16>
    %56 = vector.shape_cast %55 : vector<1x128x128xbf16> to vector<128x128xbf16>
    %cst_29 = arith.constant dense<0.000000e+00> : vector<288x128xf32>
    %57 = tpu.matmul %54, %56, %cst_29 {dimension_numbers = #tpu.dot_dimension_numbers<[1], [0], [0], [1], [0, 0, 1, 1], [], []>} : vector<288x128xbf16>, vector<128x128xbf16>, vector<288x128xf32> -> vector<288x128xf32>
    %58 = arith.addf %52, %57 : vector<288x128xf32>
    %59 = vector.extract_strided_slice %27 {offsets = [20, 0], sizes = [288, 128], strides = [1, 1]} : vector<336x128xf32> to vector<288x128xf32>
    %60 = arith.truncf %59 : vector<288x128xf32> to vector<288x128xbf16>
    %c5 = arith.constant 5 : index
    %c0_30 = arith.constant 0 : index
    %c0_31 = arith.constant 0 : index
    %61 = vector.load %arg7[%c5, %c0_30, %c0_31] : memref<9x128x128xbf16, #tpu.memory_space<vmem>>, vector<1x128x128xbf16>
    %62 = vector.shape_cast %61 : vector<1x128x128xbf16> to vector<128x128xbf16>
    %cst_32 = arith.constant dense<0.000000e+00> : vector<288x128xf32>
    %63 = tpu.matmul %60, %62, %cst_32 {dimension_numbers = #tpu.dot_dimension_numbers<[1], [0], [0], [1], [0, 0, 1, 1], [], []>} : vector<288x128xbf16>, vector<128x128xbf16>, vector<288x128xf32> -> vector<288x128xf32>
    %64 = arith.addf %58, %63 : vector<288x128xf32>
    %65 = vector.extract_strided_slice %27 {offsets = [36, 0], sizes = [288, 128], strides = [1, 1]} : vector<336x128xf32> to vector<288x128xf32>
    %66 = arith.truncf %65 : vector<288x128xf32> to vector<288x128xbf16>
    %c6 = arith.constant 6 : index
    %c0_33 = arith.constant 0 : index
    %c0_34 = arith.constant 0 : index
    %67 = vector.load %arg7[%c6, %c0_33, %c0_34] : memref<9x128x128xbf16, #tpu.memory_space<vmem>>, vector<1x128x128xbf16>
    %68 = vector.shape_cast %67 : vector<1x128x128xbf16> to vector<128x128xbf16>
    %cst_35 = arith.constant dense<0.000000e+00> : vector<288x128xf32>
    %69 = tpu.matmul %66, %68, %cst_35 {dimension_numbers = #tpu.dot_dimension_numbers<[1], [0], [0], [1], [0, 0, 1, 1], [], []>} : vector<288x128xbf16>, vector<128x128xbf16>, vector<288x128xf32> -> vector<288x128xf32>
    %70 = arith.addf %64, %69 : vector<288x128xf32>
    %71 = vector.extract_strided_slice %27 {offsets = [37, 0], sizes = [288, 128], strides = [1, 1]} : vector<336x128xf32> to vector<288x128xf32>
    %72 = arith.truncf %71 : vector<288x128xf32> to vector<288x128xbf16>
    %c7 = arith.constant 7 : index
    %c0_36 = arith.constant 0 : index
    %c0_37 = arith.constant 0 : index
    %73 = vector.load %arg7[%c7, %c0_36, %c0_37] : memref<9x128x128xbf16, #tpu.memory_space<vmem>>, vector<1x128x128xbf16>
    %74 = vector.shape_cast %73 : vector<1x128x128xbf16> to vector<128x128xbf16>
    %cst_38 = arith.constant dense<0.000000e+00> : vector<288x128xf32>
    %75 = tpu.matmul %72, %74, %cst_38 {dimension_numbers = #tpu.dot_dimension_numbers<[1], [0], [0], [1], [0, 0, 1, 1], [], []>} : vector<288x128xbf16>, vector<128x128xbf16>, vector<288x128xf32> -> vector<288x128xf32>
    %76 = arith.addf %70, %75 : vector<288x128xf32>
    %77 = vector.extract_strided_slice %27 {offsets = [38, 0], sizes = [288, 128], strides = [1, 1]} : vector<336x128xf32> to vector<288x128xf32>
    %78 = arith.truncf %77 : vector<288x128xf32> to vector<288x128xbf16>
    %c8 = arith.constant 8 : index
    %c0_39 = arith.constant 0 : index
    %c0_40 = arith.constant 0 : index
    %79 = vector.load %arg7[%c8, %c0_39, %c0_40] : memref<9x128x128xbf16, #tpu.memory_space<vmem>>, vector<1x128x128xbf16>
    %80 = vector.shape_cast %79 : vector<1x128x128xbf16> to vector<128x128xbf16>
    %cst_41 = arith.constant dense<0.000000e+00> : vector<288x128xf32>
    %81 = tpu.matmul %78, %80, %cst_41 {dimension_numbers = #tpu.dot_dimension_numbers<[1], [0], [0], [1], [0, 0, 1, 1], [], []>} : vector<288x128xbf16>, vector<128x128xbf16>, vector<288x128xf32> -> vector<288x128xf32>
    %82 = arith.addf %76, %81 : vector<288x128xf32>
    %83 = arith.truncf %82 : vector<288x128xf32> to vector<288x128xbf16>
    %c0_42 = arith.constant 0 : index
    %c0_43 = arith.constant 0 : index
    %84 = vector.load %arg9[%c0_42, %c0_43] : memref<288x128xbf16, #tpu.memory_space<vmem>>, vector<288x128xbf16>
    tpu.vector_store %arg9[%c0_42, %c0_43], %83 {strides = array<i32>} : memref<288x128xbf16, #tpu.memory_space<vmem>>, vector<288x128xbf16>,
    %c0_44 = arith.constant 0 : index
    %c0_45 = arith.constant 0 : index
    %85 = vector.load %arg8[%c0_44, %c0_45] : memref<288x1xf32, #tpu.memory_space<vmem>>, vector<288x1xf32>
    %86 = vector.broadcast %85 : vector<288x1xf32> to vector<288x128xf32>
    %87 = arith.mulf %82, %86 : vector<288x128xf32>
    %c0_46 = arith.constant 0 : index
    %c0_47 = arith.constant 0 : index
    %88 = vector.load %arg10[%c0_46, %c0_47] : memref<1x128xf32, #tpu.memory_space<vmem>>, vector<1x128xf32>
    %cst_48 = arith.constant dense<0.000000e+00> : vector<128xf32>
    %89 = vector.multi_reduction <add>, %87, %cst_48 [0] : vector<288x128xf32> to vector<128xf32>
    %90 = vector.shape_cast %89 : vector<128xf32> to vector<1x128xf32>
    %91 = arith.addf %88, %90 : vector<1x128xf32>
    %c0_49 = arith.constant 0 : index
    %c0_50 = arith.constant 0 : index
    %92 = vector.load %arg10[%c0_49, %c0_50] : memref<1x128xf32, #tpu.memory_space<vmem>>, vector<1x128xf32>
    tpu.vector_store %arg10[%c0_49, %c0_50], %91 {strides = array<i32>} : memref<1x128xf32, #tpu.memory_space<vmem>>, vector<1x128xf32>,
    %c0_51 = arith.constant 0 : index
    %c0_52 = arith.constant 0 : index
    %93 = vector.load %arg11[%c0_51, %c0_52] : memref<1x128xf32, #tpu.memory_space<vmem>>, vector<1x128xf32>
    %94 = arith.mulf %87, %82 : vector<288x128xf32>
    %cst_53 = arith.constant dense<0.000000e+00> : vector<128xf32>
    %95 = vector.multi_reduction <add>, %94, %cst_53 [0] : vector<288x128xf32> to vector<128xf32>
    %96 = vector.shape_cast %95 : vector<128xf32> to vector<1x128xf32>
    %97 = arith.addf %93, %96 : vector<1x128xf32>
    %c0_54 = arith.constant 0 : index
    %c0_55 = arith.constant 0 : index
    %98 = vector.load %arg11[%c0_54, %c0_55] : memref<1x128xf32, #tpu.memory_space<vmem>>, vector<1x128xf32>
    tpu.vector_store %arg11[%c0_54, %c0_55], %97 {strides = array<i32>} : memref<1x128xf32, #tpu.memory_space<vmem>>, vector<1x128xf32>,
    return
  }
  func.func @transform_0(%arg0: i32) -> (i32, i32) {
    %c0_i32 = arith.constant 0 : i32
    %c0_i32_0 = arith.constant 0 : i32
    return %arg0, %c0_i32 : i32, i32
  }
  func.func @transform_1(%arg0: i32) -> (i32, i32) {
    %c1_i32 = arith.constant 1 : i32
    %0 = arith.addi %arg0, %c1_i32 : i32
    %c6_i32 = arith.constant 6 : i32
    %1 = arith.muli %0, %c6_i32 : i32
    %c0_i32 = arith.constant 0 : i32
    %c0_i32_0 = arith.constant 0 : i32
    return %1, %c0_i32 : i32, i32
  }
  func.func @transform_2(%arg0: i32) -> (i32, i32) {
    %c0_i32 = arith.constant 0 : i32
    %c0_i32_0 = arith.constant 0 : i32
    return %arg0, %c0_i32 : i32, i32
  }
  func.func @transform_3(%arg0: i32) -> (i32, i32) {
    %c1_i32 = arith.constant 1 : i32
    %0 = arith.addi %arg0, %c1_i32 : i32
    %c6_i32 = arith.constant 6 : i32
    %1 = arith.muli %0, %c6_i32 : i32
    %c0_i32 = arith.constant 0 : i32
    %c0_i32_0 = arith.constant 0 : i32
    return %1, %c0_i32 : i32, i32
  }
  func.func @transform_4(%arg0: i32) -> (i32, i32) {
    %c0_i32 = arith.constant 0 : i32
    %c0_i32_0 = arith.constant 0 : i32
    %c0_i32_1 = arith.constant 0 : i32
    return %c0_i32, %c0_i32_0 : i32, i32
  }
  func.func @transform_5(%arg0: i32) -> (i32, i32) {
    %c0_i32 = arith.constant 0 : i32
    %c0_i32_0 = arith.constant 0 : i32
    %c0_i32_1 = arith.constant 0 : i32
    return %c0_i32, %c0_i32_0 : i32, i32
  }
  func.func @transform_6(%arg0: i32) -> (i32, i32, i32) {
    %c0_i32 = arith.constant 0 : i32
    %c0_i32_0 = arith.constant 0 : i32
    %c0_i32_1 = arith.constant 0 : i32
    %c0_i32_2 = arith.constant 0 : i32
    return %c0_i32, %c0_i32_0, %c0_i32_1 : i32, i32, i32
  }
  func.func @transform_7(%arg0: i32) -> (i32, i32) {
    %c0_i32 = arith.constant 0 : i32
    %c0_i32_0 = arith.constant 0 : i32
    return %arg0, %c0_i32 : i32, i32
  }
  func.func @transform_8(%arg0: i32) -> (i32, i32) {
    %c0_i32 = arith.constant 0 : i32
    %c0_i32_0 = arith.constant 0 : i32
    return %arg0, %c0_i32 : i32, i32
  }
  func.func @transform_9(%arg0: i32) -> (i32, i32) {
    %c0_i32 = arith.constant 0 : i32
    %c0_i32_0 = arith.constant 0 : i32
    %c0_i32_1 = arith.constant 0 : i32
    return %c0_i32, %c0_i32_0 : i32, i32
  }
  func.func @transform_10(%arg0: i32) -> (i32, i32) {
    %c0_i32 = arith.constant 0 : i32
    %c0_i32_0 = arith.constant 0 : i32
    %c0_i32_1 = arith.constant 0 : i32
    return %c0_i32, %c0_i32_0 : i32, i32
  }
}

module attributes {stable_mosaic.version = 11 : i64} {
  func.func @_bn_relu_kernel(%arg0: i32, %arg1: memref<288x128xbf16, #tpu.memory_space<vmem>>, %arg2: memref<1x128xf32, #tpu.memory_space<vmem>>, %arg3: memref<1x128xf32, #tpu.memory_space<vmem>>, %arg4: memref<288x128xf32, #tpu.memory_space<vmem>>) attributes {dimension_semantics = [#tpu.dimension_semantics<parallel>], iteration_bounds = array<i64: 3>, scalar_prefetch = 0 : i64, scratch_operands = 0 : i64, tpu.core_type = #tpu.core_type<tc>, window_params = [{transform_indices = @transform_0, window_bounds = array<i64: 288, 128>}, {pipeline_mode = #tpu.pipeline_mode<synchronous>, transform_indices = @transform_1, window_bounds = array<i64: 1, 128>}, {pipeline_mode = #tpu.pipeline_mode<synchronous>, transform_indices = @transform_2, window_bounds = array<i64: 1, 128>}, {transform_indices = @transform_3, window_bounds = array<i64: 288, 128>}]} {
    %c0 = arith.constant 0 : index
    %c0_0 = arith.constant 0 : index
    %0 = vector.load %arg1[%c0, %c0_0] : memref<288x128xbf16, #tpu.memory_space<vmem>>, vector<288x128xbf16>
    %1 = arith.extf %0 : vector<288x128xbf16> to vector<288x128xf32>
    %c0_1 = arith.constant 0 : index
    %c0_2 = arith.constant 0 : index
    %2 = vector.load %arg2[%c0_1, %c0_2] : memref<1x128xf32, #tpu.memory_space<vmem>>, vector<1x128xf32>
    %3 = vector.broadcast %2 : vector<1x128xf32> to vector<288x128xf32>
    %4 = arith.mulf %1, %3 : vector<288x128xf32>
    %c0_3 = arith.constant 0 : index
    %c0_4 = arith.constant 0 : index
    %5 = vector.load %arg3[%c0_3, %c0_4] : memref<1x128xf32, #tpu.memory_space<vmem>>, vector<1x128xf32>
    %6 = vector.broadcast %5 : vector<1x128xf32> to vector<288x128xf32>
    %7 = arith.addf %4, %6 : vector<288x128xf32>
    %cst = arith.constant 0.000000e+00 : f32
    %8 = vector.broadcast %cst : f32 to vector<288x128xf32>
    %9 = arith.maximumf %7, %8 : vector<288x128xf32>
    %c0_5 = arith.constant 0 : index
    %c0_6 = arith.constant 0 : index
    %10 = vector.load %arg4[%c0_5, %c0_6] : memref<288x128xf32, #tpu.memory_space<vmem>>, vector<288x128xf32>
    tpu.vector_store %arg4[%c0_5, %c0_6], %9 {strides = array<i32>} : memref<288x128xf32, #tpu.memory_space<vmem>>, vector<288x128xf32>,
    return
  }
  func.func @transform_0(%arg0: i32) -> (i32, i32) {
    %c0_i32 = arith.constant 0 : i32
    %c0_i32_0 = arith.constant 0 : i32
    return %arg0, %c0_i32 : i32, i32
  }
  func.func @transform_1(%arg0: i32) -> (i32, i32) {
    %c0_i32 = arith.constant 0 : i32
    %c0_i32_0 = arith.constant 0 : i32
    %c0_i32_1 = arith.constant 0 : i32
    return %c0_i32, %c0_i32_0 : i32, i32
  }
  func.func @transform_2(%arg0: i32) -> (i32, i32) {
    %c0_i32 = arith.constant 0 : i32
    %c0_i32_0 = arith.constant 0 : i32
    %c0_i32_1 = arith.constant 0 : i32
    return %c0_i32, %c0_i32_0 : i32, i32
  }
  func.func @transform_3(%arg0: i32) -> (i32, i32) {
    %c0_i32 = arith.constant 0 : i32
    %c0_i32_0 = arith.constant 0 : i32
    return %arg0, %c0_i32 : i32, i32
  }
}

</mosaic_0001>

<bundles_post_ra>
// kernel: standard_block_forward.3
= control target key start
LH: loop header
LB: loop body
LE: loop exit
PB: predicated region body
PF: predicated region fallthrough
CT: control target
= control target key end

     0   :  { %s4095_s21 = smov 0   ;;  %s5315_s0 = inlined_call_operand.vmem [shape: bf16[1200,128], index: 0, kind: input, shape index: {}, may-alias: {0,1}]   ;;  %s5316_s1 = inlined_call_operand.vmem [shape: bf16[1200,128], index: 1, kind: input, shape index: {}, may-alias: {0,1}]   ;;  %s5317_s2 = inlined_call_operand.vmem [shape: bf16[9,128,128], index: 2, kind: input, shape index: {}]   ;;  %s5318_s3 = inlined_call_operand.vmem [shape: f32[1152,1], index: 3, kind: input, shape index: {}]   ;;  %s5319_s4 = inlined_call_operand.vmem [shape: bf16[1152,128], index: 4, kind: output, shape index: {0}]   ;;  %s5320_s5 = inlined_call_operand.vmem [shape: f32[1,128], index: 5, kind: output, shape index: {1}]   ;;  %s5321_s6 = inlined_call_operand.vmem [shape: f32[1,128], index: 6, kind: output, shape index: {2}]  }
   0x1 LB: > { %s3284_s22 = sadd.s32 4294967295, %s4056_s21   ;;  %p3288_p0 = scmp.ge.s32.totalorder %s4056_s21, 1  ;;  %s4056_s21 = sphi %s4095_s21, %s17_s21  }
   0x2   : > { %p246_p1 = scmp.lt.s32.totalorder %s4056_s21, 5 }
   0x4   : > { %p247_p2 = pnand %p3288_p0, %p246_p1 }
   0x6   : > { %250 = sbr.rel (%p247_p2) target bundleno = 868 (0x364), region = 36 }
   0xb   : > { %s292_s23 = smul.u32 36, %s3284_s22  ;;  %s306_s24 = sadd.s32 1, %s3284_s22 }
   0xc   : > { %s3290_s25 = smul.u32 36, %s306_s24  ;;  %p3294_p6 = scmp.ne.s32.totalorder %s3284_s22, 0 }
   0xd   : > { %p297_p3 = scmp.lt.s32.totalorder %s292_s23, 149  ;;  %p317_p5 = scmp.lt.s32.totalorder %s292_s23, 143 }
   0xe   : > { %p309_p4 = scmp.lt.s32.totalorder %s3290_s25, 149 }
   0xf   : > { %s298_s26 = scalar_select %p297_p3, %s292_s23, 149 }
  0x10   : > { %s5463_s25 = smov (!%p309_p4, %s3290_s25), 149  ;;  %s5465_s23 = smov (!%p317_p5, %s292_s23), 143 }
  0x11   : > { %s3289_s27 = sshll.u32 %s298_s26, 2  ;;  %s3291_s7 = sshll.u32 %s5463_s25, 2 }
  0x12   : > { %s4106_s30 = scalar_lea.vmem %s5315_s0, %s3289_s27  ;;  %s4111_s10 = scalar_lea.vmem %s5316_s1, %s3291_s7 }
  0x13   : > { %s3292_s11 = sshll.u32 %s5465_s23, 3  ;;  %s3293_s12 = sshll.u32 %s5465_s23, 2 }
  0x14   : > { %s4116_s15 = scalar_lea.vmem %s5318_s3, %s3292_s11  ;;  %s4121_s18 = scalar_lea.vmem %s5319_s4, %s3293_s12 }
  0x15   : > { %331 = sbr.rel (%p3294_p6) target bundleno = 29 (0x1d), region = 40 }
  0x1a   : > { %v4058_v0 = vmov 0.0  }
  0x1b   : > { %332 = vst [vmem:[%s5320_s5] sm:$0x1] %v4058_v0 }
  0x1c   : > { %333 = vst [vmem:[%s5321_s6] sm:$0x1] %v4058_v0 }
  0x1d PF: > { %v3818_v1 = vld [vmem:[%s5317_s2 + $0x78] sm:$0xff]  ;;  %v3817_v2 = vld [vmem:[%s5317_s2 + $0x70] sm:$0xff]  ;;  %v3816_v3 = vld [vmem:[%s5317_s2 + $0x68] sm:$0xff]  ;;  %vm468_vm0 = vsmask.f32 7424  ;;  %vm965_vm1 = vcmask 1046528  }
  0x1e   : > { %3991 = vmatpush.bf16.msra.mxu1 %v3818_v1  ;;  %3992 = vmatpush.bf16.msra.mxu2 %v3818_v1  ;;  %v3815_v4 = vld [vmem:[%s5317_s2 + $0x60] sm:$0xff]  ;;  %v4142_v5 = vld [vmem:[%s4106_s30 + $0x28] sm:$0xff]  ;;  %v3814_v6 = vld [vmem:[%s5317_s2 + $0x58] sm:$0xff]  ;;  %vm1431_vm2 = vsmask.f32 6400  ;;  %vm1735_vm4 = vcmask 1045504  }
  0x1f   : > { %683 = vmatpush.bf16.msra.mxu0 %v3818_v1  ;;  %3993 = vmatpush.bf16.msra.mxu3 %v3818_v1  ;;  %v4148_v7 = vld [vmem:[%s4106_s30 + $0x50] sm:$0xff]  ;;  %v4151_v8 = vld [vmem:[%s4106_s30] sm:$0xff]  ;;  %v4157_v10 = vshll.u32 %v4142_v5, 16  ;;  %v4160_v11 = vld [vmem:[%s4106_s30 + $0x58] sm:$0xff]  ;;  %v4177_v18 = vshrl.u32 %v4142_v5, 16  ;;  %vm2505_vm5 = vcmask 1044480  }
  0x20   : > { %v4154_v9 = vld [vmem:[%s4106_s30 + $0x30] sm:$0xff]  ;;  %v4166_v13 = vshll.u32 %v4148_v7, 16  ;;  %v4169_v14 = vld [vmem:[%s4106_s30 + $0x8] sm:$0xff]  ;;  %v472_v15 = vshll.u32 %v4151_v8, 16  ;;  %v4173_v16 = vld [vmem:[%s4106_s30 + $0x78] sm:$0xff]  ;;  %v4183_v20 = vshll.u32 %v4160_v11, 16 }
  0x21   : > { %5353 = vst [vmem:[#allocation2_spill] sm:$0xff] %v4157_v10  ;;  %v3813_v12 = vld [vmem:[%s5317_s2 + $0x50] sm:$0xff]  ;;  %v5326_v17 = vrot.slane %v4157_v10, 1  ;;  %v4180_v19 = vshll.u32 %v4154_v9, 16  ;;  %v3812_v21 = vld [vmem:[%s5317_s2 + $0x48] sm:$0xff]  ;;  %v4190_v23 = vshrl.u32 %v4148_v7, 16 }
  0x22   : > { %3994 = vmatpush.bf16.msra.mxu1 %v3817_v2  ;;  %3995 = vmatpush.bf16.msra.mxu2 %v3817_v2  ;;  %5354 = vst [vmem:[#allocation3_spill] sm:$0xff] %v4166_v13  ;;  %v551_v22 = vrot.slane %v4166_v13, 1  ;;  %v4193_v24 = vld [vmem:[%s4106_s30 + $0x80] sm:$0xff]  ;;  %v4196_v25 = vshll.u32 %v4173_v16, 16  ;;  %v470_v26 = vshrl.u32 %v4151_v8, 16  ;;  %v474_v27 = vrot.slane %v472_v15, 1 }
  0x23   : > { %684 = vmatpush.bf16.msra.mxu0 %v3817_v2  ;;  %3996 = vmatpush.bf16.msra.mxu3 %v3817_v2  ;;  %5355 = vst [vmem:[#allocation4_spill] sm:$0xff] %v4177_v18  ;;  %v5322_v28 = vshll.u32 %v4169_v14, 16  ;;  %v515_v29 = vor.u32 %v4177_v18, %v5326_v17  ;;  %v519_v30 = vrot.slane %v4180_v19, 1  ;;  %v559_v31 = vrot.slane %v4183_v20, 1  ;;  %v3811_v32 = vld [vmem:[%s5317_s2 + $0x40] sm:$0xff]  ;;  %v3826_v37 = vld [vmem:[%s5317_s2 + $0xb8] sm:$0xff] }
  0x24   : > { %5356 = vst [vmem:[#allocation5_spill] sm:$0xff] %v4180_v19  ;;  %v555_v33 = vor.u32 %v4190_v23, %v551_v22  ;;  %v5324_v34 = vrot.slane %v4196_v25, 1  ;;  %v4213_v35 = vshrl.u32 %v4173_v16, 16  ;;  %v4216_v36 = vshll.u32 %v4193_v24, 16  ;;  %v3810_v40 = vld [vmem:[%s5317_s2 + $0x38] sm:$0xff]  ;;  %v3825_v47 = vld [vmem:[%s5317_s2 + $0xb0] sm:$0xff] }
  0x25   : > { %5357 = vst [vmem:[#allocation6_spill] sm:$0xff] %v4183_v20  ;;  %v475_v38 = vor.u32 %v474_v27, %v470_v26  ;;  %v479_v39 = vrot.slane %v5322_v28, 1  ;;  %v3842_v41 = vld [vmem:[%s5317_s2 + $0x138] sm:$0xff]  ;;  %v520_v42 = vsel %vm468_vm0, %v515_v29, %v519_v30  ;;  %v3809_v48 = vld [vmem:[%s5317_s2 + $0x30] sm:$0xff]  ;;  %v4251_v51 = vld [vmem:[%s4106_s30 + $0x60] sm:$0xff]  ;;  %v4270_v58 = vshrl.u32 %v4154_v9, 16 }
  0x26   : > { %3997 = vmatpush.bf16.msra.mxu1 %v3816_v3  ;;  %3998 = vmatpush.bf16.msra.mxu2 %v3816_v3  ;;  %5358 = vst [vmem:[#allocation7_spill] sm:$0xff] %v4190_v23  ;;  %v560_v43 = vsel %vm468_vm0, %v555_v33, %v559_v31  ;;  %v595_v44 = vor.u32 %v4213_v35, %v5324_v34  ;;  %v599_v45 = vrot.slane %v4216_v36, 1  ;;  %v3841_v49 = vld [vmem:[%s5317_s2 + $0x130] sm:$0xff]  ;;  %v4248_v50 = vld [vmem:[%s4106_s30 + $0x38] sm:$0xff]  ;;  %v3824_v55 = vld [vmem:[%s5317_s2 + $0xa8] sm:$0xff]  ;;  %v4276_v60 = vshrl.u32 %v4160_v11, 16 }
  0x27   : > { %685 = vmatpush.bf16.msra.mxu0 %v3816_v3  ;;  %3999 = vmatpush.bf16.msra.mxu3 %v3816_v3  ;;  %5359 = vst [vmem:[#allocation8_spill] sm:$0xff] %v4216_v36  ;;  %v480_v46 = vsel %vm468_vm0, %v475_v38, %v479_v39  ;;  %v3834_v53 = vld [vmem:[%s5317_s2 + $0xf8] sm:$0xff]  ;;  %v4258_v54 = vld [vmem:[%s4106_s30 + $0x10] sm:$0xff]  ;;  %v3808_v56 = vld [vmem:[%s5317_s2 + $0x28] sm:$0xff]  ;;  %v4273_v59 = vshll.u32 %v4248_v50, 16  ;;  %v4279_v61 = vshll.u32 %v4251_v51, 16 }
  0x28   : > { %v600_v52 = vsel %vm468_vm0, %v595_v44, %v599_v45  ;;  %v3840_v57 = vld [vmem:[%s5317_s2 + $0x128] sm:$0xff]  ;;  %5360 = vst [vmem:[#allocation9_spill] sm:$0xff] %v4270_v58  ;;  %v3833_v62 = vld [vmem:[%s5317_s2 + $0xf0] sm:$0xff]  ;;  %v5323_v0 = vshrl.u32 %v4169_v14, 16  ;;  %v4289_v1 = vshll.u32 %v4258_v54, 16  ;;  %v3823_v2 = vld [vmem:[%s5317_s2 + $0xa0] sm:$0xff]  ;;  %v563_v15 = vor.u32 %v4276_v60, %v559_v31 }
  0x29   : > { %5361 = vst [vmem:[#allocation10_spill] sm:$0xff] %v4273_v59  ;;  %v4285_v63 = vld [vmem:[%s4106_s30 + $0x88] sm:$0xff]  ;;  %v3807_v3 = vld [vmem:[%s5317_s2 + $0x20] sm:$0xff]  ;;  %v4307_v26 = vshrl.u32 %v4193_v24, 16  ;;  %v3822_v33 = vld [vmem:[%s5317_s2 + $0x98] sm:$0xff] }
  0x2a   : > { %4000 = vmatpush.bf16.msra.mxu1 %v3815_v4  ;;  %4001 = vmatpush.bf16.msra.mxu2 %v3815_v4  ;;  %v4310_v27 = vshll.u32 %v4285_v63, 16  ;;  %v3832_v29 = vld [vmem:[%s5317_s2 + $0xe8] sm:$0xff]  ;;  %v487_v31 = vrot.slane %v4289_v1, 1  ;;  %v4336_v44 = vld [vmem:[%s4106_s30 + $0x40] sm:$0xff]  ;;  %vm2201_vm3 = vsmask.f32 5376 }
  0x2b   : > { %686 = vmatpush.bf16.msra.mxu0 %v3815_v4  ;;  %4002 = vmatpush.bf16.msra.mxu3 %v3815_v4  ;;  %v3839_v4 = vld [vmem:[%s5317_s2 + $0x120] sm:$0xff] }
  0x2c   : > { %5362 = vst [vmem:[#allocation11_spill] sm:$0xff] %v4310_v27 }
  0x2e   : > { %4003 = vmatpush.bf16.msra.mxu1 %v3814_v6  ;;  %4004 = vmatpush.bf16.msra.mxu2 %v3814_v6 }
  0x2f   : > { %687 = vmatpush.bf16.msra.mxu0 %v3814_v6  ;;  %4005 = vmatpush.bf16.msra.mxu3 %v3814_v6  ;;  %v523_v6 = vor.u32 %v4270_v58, %v519_v30  ;;  %v4316_v30 = vld [vmem:[%s4106_s30 + $0x48] sm:$0xff] }
  0x32   : > { %4006 = vmatpush.bf16.msra.mxu1 %v3813_v12  ;;  %4007 = vmatpush.bf16.msra.mxu2 %v3813_v12 }
  0x33   : > { %688 = vmatpush.bf16.msra.mxu0 %v3813_v12  ;;  %4008 = vmatpush.bf16.msra.mxu3 %v3813_v12  ;;  %v527_v12 = vrot.slane %v4273_v59, 1 }
  0x35   : > { %v528_v38 = vsel %vm468_vm0, %v523_v6, %v527_v12  ;;  %v4375_v6 = vshrl.u32 %v4248_v50, 16 }
  0x36   : > { %4009 = vmatpush.bf16.msra.mxu1 %v3812_v21  ;;  %4010 = vmatpush.bf16.msra.mxu2 %v3812_v21 }
  0x37   : > { %689 = vmatpush.bf16.msra.mxu0 %v3812_v21  ;;  %4011 = vmatpush.bf16.msra.mxu3 %v3812_v21  ;;  %v567_v21 = vrot.slane %v4279_v61, 1  ;;  %5366 = vst [vmem:[#allocation15_spill] sm:$0xff] %v4375_v6 }
  0x3a   : > { %4012 = vmatpush.bf16.msra.mxu1 %v3811_v32  ;;  %4013 = vmatpush.bf16.msra.mxu2 %v3811_v32 }
  0x3b   : > { %690 = vmatpush.bf16.msra.mxu0 %v3811_v32  ;;  %4014 = vmatpush.bf16.msra.mxu3 %v3811_v32  ;;  %v483_v32 = vor.u32 %v5323_v0, %v479_v39  ;;  %v568_v39 = vsel %vm468_vm0, %v563_v15, %v567_v21  ;;  %v4378_v15 = vshll.u32 %v4336_v44, 16 }
  0x3d   : > { %716 = vmatmul.bf16.vlgmr.msra.gmra.mxu1 %v520_v42  ;;  %741 = vmatmul.bf16.vlgmr.msra.gmra.mxu2 %v560_v43  ;;  %v4332_v42 = vshll.u32 %v4316_v30, 16  ;;  %v488_v43 = vsel %vm468_vm0, %v483_v32, %v487_v31  ;;  %5367 = vst [vmem:[#allocation16_spill] sm:$0xff] %v4378_v15 }
  0x3e   : > { %1069 = vmatpush.bf16.msrb.mxu2 %v3826_v37  ;;  %830 = vmatpush.bf16.msrb.mxu1 %v3810_v40  ;;  %v3806_v37 = vld [vmem:[%s5317_s2 + $0x18] sm:$0xff]  ;;  %v603_v40 = vor.u32 %v4307_v26, %v599_v45 }
  0x3f   : > { %1583 = vmatpush.bf16.msrb.mxu0 %v3842_v41  ;;  %766 = vmatmul.bf16.vlgmr.msra.gmra.mxu3 %v600_v52  ;;  %v607_v41 = vrot.slane %v4310_v27, 1  ;;  %5363 = vst [vmem:[#allocation12_spill] sm:$0xff] %v4332_v42  ;;  %v3838_v52 = vld [vmem:[%s5317_s2 + $0x118] sm:$0xff] }
  0x40   : > { %691 = vmatmul.bf16.vlgmr.msra.gmra.mxu0 %v480_v46  ;;  %1279 = vmatpush.bf16.msrb.mxu3 %v3834_v53  ;;  %v4339_v46 = vld [vmem:[%s4106_s30 + $0x68] sm:$0xff]  ;;  %v3831_v53 = vld [vmem:[%s5317_s2 + $0xe0] sm:$0xff] }
  0x41   : > { %v608_v45 = vsel %vm468_vm0, %v603_v40, %v607_v41  ;;  %v4384_v32 = vshll.u32 %v4339_v46, 16  ;;  %v4400_v40 = vshrl.u32 %v4258_v54, 16 }
  0x42   : > { %1070 = vmatpush.bf16.msrb.mxu2 %v3825_v47  ;;  %831 = vmatpush.bf16.msrb.mxu1 %v3809_v48  ;;  %v4342_v47 = vld [vmem:[%s4111_s10] sm:$0xff]   ;;  %v5325_v48 = vrot.slane %v4332_v42, 1 }
  0x43   : > { %1584 = vmatpush.bf16.msrb.mxu0 %v3841_v49  ;;  %5364 = vst [vmem:[#allocation13_spill] sm:$0xff] %v4342_v47  ;;  %v3821_v49 = vld [vmem:[%s5317_s2 + $0x90] sm:$0xff] }
  0x44   : > { %1280 = vmatpush.bf16.msrb.mxu3 %v3833_v62  ;;  %v3805_v62 = vld [vmem:[%s5317_s2 + $0x10] sm:$0xff] }
  0x46   : > { %1071 = vmatpush.bf16.msrb.mxu2 %v3824_v55  ;;  %832 = vmatpush.bf16.msrb.mxu1 %v3808_v56  ;;  %v3877_v55 = vunpack.c.l.bf16 %v4342_v47  ;;  %v4357_v56 = vshrl.u32 %v4316_v30, 16  ;;  %v967_v47 = vrot.slane %v4169_v14, 1 }
  0x47   : > { %1585 = vmatpush.bf16.msrb.mxu0 %v3840_v57  ;;  %v4360_v57 = vld [vmem:[%s4106_s30 + $0x18] sm:$0xff] }
  0x48   : > { %1281 = vmatpush.bf16.msrb.mxu3 %v3832_v29  ;;  %5365 = vst [vmem:[#allocation14_spill] sm:$0xff] %v4357_v56  ;;  %v4381_v29 = vshrl.u32 %v4251_v51, 16 }
  0x4a   : > { %1072 = vmatpush.bf16.msrb.mxu2 %v3823_v2  ;;  %833 = vmatpush.bf16.msrb.mxu1 %v3807_v3  ;;  %v3820_v2 = vld [vmem:[%s5317_s2 + $0x88] sm:$0xff]  ;;  %v3837_v3 = vld [vmem:[%s5317_s2 + $0x110] sm:$0xff] }
  0x4b   : > { %1586 = vmatpush.bf16.msrb.mxu0 %v3839_v4  ;;  %v547_v4 = vor.u32 %v4357_v56, %v5325_v48 }
  0x4c   : > { %1282 = vmatpush.bf16.msrb.mxu3 %v3831_v53  ;;  %v575_v53 = vrot.slane %v4384_v32, 1 }
  0x4d   : > { %721 = vmatmul.bf16.gmra.mxu1 %v528_v38  ;;  %746 = vmatmul.bf16.gmra.mxu2 %v568_v39  ;;  %v3830_v38 = vld [vmem:[%s5317_s2 + $0xd8] sm:$0xff]  ;;  %v4397_v39 = vsel %vm468_vm0, %v547_v4, %v551_v22  ;;  %v4413_v22 = vshrl.u32 %v4285_v63, 16 }
  0x4e   : > { %1073 = vmatpush.bf16.msrb.mxu2 %v3822_v33  ;;  %834 = vmatpush.bf16.msrb.mxu1 %v3806_v37  ;;  %v4387_v33 = vld [vmem:[%s4106_s30 + $0x20] sm:$0xff]  ;;  %v4389_v37 = vpack.c.bf16 %v3877_v55, %v3877_v55 }
  0x4f   : > { %1587 = vmatpush.bf16.msrb.mxu0 %v3838_v52  ;;  %771 = vmatmul.bf16.gmra.mxu3 %v608_v45  ;;  %v531_v45 = vor.u32 %v4375_v6, %v527_v12  ;;  %v571_v52 = vor.u32 %v4381_v29, %v567_v21  ;;  %v4410_v55 = vshll.u32 %v4387_v33, 16  ;;  %5370 = vst [vmem:[#allocation19_spill] sm:$0xff] %v4413_v22  ;;  %v3829_v12 = vld [vmem:[%s5317_s2 + $0xd0] sm:$0xff] }
  0x50   : > { %696 = vmatmul.bf16.gmra.mxu0 %v488_v43  ;;  %5368 = vst [vmem:[#allocation17_spill] sm:$0xff] %v4389_v37  ;;  %v4403_v43 = vshll.u32 %v4360_v57, 16  ;;  %1283 = vmatpush.bf16.msrb.mxu3 %v3830_v38  ;;  %v611_v0 = vor.u32 %v4413_v22, %v607_v41  ;;  %v4426_v38 = vshrl.u32 %v4387_v33, 16 }
  0x51   : > { %5369 = vst [vmem:[#allocation18_spill] sm:$0xff] %v4410_v55  ;;  %v576_v4 = vsel %vm468_vm0, %v571_v52, %v575_v53  ;;  %v503_v28 = vrot.slane %v4410_v55, 1  ;;  %v5372_v52 = vrot.slane %v4157_v10, 1 }
  0x52   : > { %1074 = vmatpush.bf16.msrb.mxu2 %v3821_v49  ;;  %835 = vmatpush.bf16.msrb.mxu1 %v3805_v62  ;;  %v535_v49 = vrot.slane %v4378_v15, 1  ;;  %v613_v62 = vshll.u32 %v4389_v37, 16  ;;  %v495_v21 = vrot.slane %v4403_v43, 1  ;;  %5371 = vst [vmem:[#allocation20_spill] sm:$0xff] %v4426_v38  ;;  %v5374_v37 = vrot.slane %v4332_v42, 1 }
  0x53   : > { %1588 = vmatpush.bf16.msrb.mxu0 %v3837_v3  ;;  %v507_v17 = vor.u32 %v4426_v38, %v503_v28 }
  0x54   : > { %v536_v3 = vsel %vm468_vm0, %v531_v45, %v535_v49  ;;  %v615_v34 = vrot.slane %v613_v62, 1  ;;  %1284 = vmatpush.bf16.msrb.mxu3 %v3829_v12  ;;  %v3804_v45 = vld [vmem:[%s5317_s2 + $0x8] sm:$0xff] }
  0x55   : > { %v512_v62 = vsel %vm468_vm0, %v507_v17, %v5372_v52  ;;  %v3828_v12 = vld [vmem:[%s5317_s2 + $0xc8] sm:$0xff]  ;;  %v3827_v17 = vld [vmem:[%s5317_s2 + $0xc0] sm:$0xff]  ;;  %v4468_v52 = vshrl.u32 %v4360_v57, 16 }
  0x56   : > { %1075 = vmatpush.bf16.msrb.mxu2 %v3820_v2  ;;  %v491_v2 = vor.u32 %v4400_v40, %v487_v31  ;;  %v4431_v31 = vld [vmem:[%s4106_s30 + $0x70] sm:$0xff]  ;;  %v616_v41 = vsel %vm468_vm0, %v611_v0, %v615_v34  ;;  %836 = vmatpush.bf16.msrb.mxu1 %v3804_v45  ;;  %v3803_v34 = vld [vmem:[%s5317_s2] sm:$0xff] }
  0x57   : > { %v3835_v0 = vld [vmem:[%s5317_s2 + $0x100] sm:$0xff]  ;;  %v4465_v45 = vshll.u32 %v4431_v31, 16 }
  0x58   : > { %v496_v48 = vsel %vm468_vm0, %v491_v2, %v495_v21  ;;  %v3819_v2 = vld [vmem:[%s5317_s2 + $0x80] sm:$0xff]  ;;  %1285 = vmatpush.bf16.msrb.mxu3 %v3828_v12 }
  0x5a   : > { %1076 = vmatpush.bf16.msrb.mxu2 %v3819_v2  ;;  %837 = vmatpush.bf16.msrb.mxu1 %v3803_v34  ;;  %v583_v2 = vrot.slane %v4465_v45, 1  ;;  %v969_v34 = vrot.slane %v4258_v54, 1 }
  0x5c   : > { %1286 = vmatpush.bf16.msrb.mxu3 %v3827_v17 }
  0x5d   : > { %726 = vmatmul.bf16.gmra.mxu1 %v536_v3  ;;  %751 = vmatmul.bf16.gmra.mxu2 %v576_v4  ;;  %v3836_v3 = vld [vmem:[%s5317_s2 + $0x108] sm:$0xff]  ;;  %v4462_v4 = vshrl.u32 %v4339_v46, 16 }
  0x5e   : > { %1589 = vmatpush.bf16.msrb.mxu0 %v3836_v3  ;;  %v499_v3 = vor.u32 %v4468_v52, %v495_v21  ;;  %v3850_v21 = vld [vmem:[%s5317_s2 + $0x178] sm:$0xff] }
  0x5f   : > { %776 = vmatmul.bf16.gmra.mxu3 %v616_v41  ;;  %v579_v12 = vor.u32 %v4462_v4, %v575_v53  ;;  %v970_v53 = vsel %vm965_vm1, %v967_v47, %v969_v34  ;;  %1839 = vmatpush.bf16.msra.mxu1 %v3850_v21 }
  0x60   : > { %701 = vmatmul.bf16.gmra.mxu0 %v496_v48  ;;  %v4459_v48 = vshrl.u32 %v4336_v44, 16  ;;  %v504_v17 = vsel %vm468_vm0, %v499_v3, %v503_v28  ;;  %v3874_v28 = vld [vmem:[%s5317_s2 + $0x238] sm:$0xff] }
  0x61   : > { %v584_v22 = vsel %vm468_vm0, %v579_v12, %v583_v2  ;;  %v971_v12 = vrot.slane %v4360_v57, 1 }
  0x62   : > { %5373 = vst [vmem:[#allocation21_spill] sm:$0xff] %v4459_v48  ;;  %1590 = vmatpush.bf16.msrb.mxu0 %v3835_v0  ;;  %v539_v41 = vor.u32 %v4459_v48, %v535_v49  ;;  %v3858_v49 = vld [vmem:[%s5317_s2 + $0x1b8] sm:$0xff]  ;;  %v5375_v0 = vrot.slane %v4196_v25, 1 }
  0x63   : > { %2049 = vmatpush.bf16.msra.mxu2 %v3858_v49  ;;  %v972_v3 = vsel %vm965_vm1, %v969_v34, %v971_v12 }
  0x64   : > { %v544_v27 = vsel %vm468_vm0, %v539_v41, %v5374_v37  ;;  %v3866_v37 = vld [vmem:[%s5317_s2 + $0x1f8] sm:$0xff] }
  0x65   : > { %2353 = vmatpush.bf16.msra.mxu3 %v3866_v37  ;;  %v5377_v37 = vshll.u32 %v4169_v14, 16 }
  0x66   : > { %2609 = vmatpush.bf16.msra.mxu0 %v3874_v28  ;;  %v1436_v28 = vrot.slane %v4289_v1, 2 }
  0x67   : > { %v1433_v21 = vrot.slane %v5377_v37, 2 }
  0x6d   : > { %731 = vmatmul.bf16.gmra.mxu1 %v544_v27  ;;  %756 = vmatmul.bf16.gmra.mxu2 %v584_v22  ;;  %v4495_v27 = vshrl.u32 %v4431_v31, 16 }
  0x6f   : > { %1287 = vmatmul.bf16.vlgmr.msrb.gmra.mxu3 %v970_v53  ;;  %v587_v22 = vor.u32 %v4495_v27, %v583_v2  ;;  %v1435_v2 = vrot.slane %v4400_v40, 1 }
  0x70   : > { %706 = vmatmul.bf16.gmra.mxu0 %v504_v17  ;;  %v5376_v17 = vshrl.u32 %v4169_v14, 16 }
  0x71   : > { %v592_v41 = vsel %vm468_vm0, %v587_v22, %v5375_v0  ;;  %v966_v22 = vrot.slane %v4151_v8, 1  ;;  %v1437_v36 = vor.u32 %v1436_v28, %v1435_v2  ;;  %v3873_v2 = vld [vmem:[%s5317_s2 + $0x230] sm:$0xff] }
  0x72   : > { %v1432_v49 = vrot.slane %v5376_v17, 1  ;;  %v3857_v17 = vld [vmem:[%s5317_s2 + $0x1b0] sm:$0xff]  ;;  %2610 = vmatpush.bf16.msra.mxu0 %v3873_v2 }
  0x73   : > { %2050 = vmatpush.bf16.msra.mxu2 %v3857_v17  ;;  %v977_v17 = vrot.slane %v4154_v9, 1 }
  0x74   : > { %v1434_v0 = vor.u32 %v1433_v21, %v1432_v49  ;;  %v3865_v49 = vld [vmem:[%s5317_s2 + $0x1f0] sm:$0xff]  ;;  %v975_v21 = vrot.slane %v4142_v5, 1 }
  0x75   : > { %2354 = vmatpush.bf16.msra.mxu3 %v3865_v49 }
  0x76   : > { %v1438_v34 = vsel %vm1431_vm2, %v1434_v0, %v1437_v36  ;;  %v1443_v0 = vrot.slane %v4426_v38, 1  ;;  %v1471_v38 = vrot.slane %v4276_v60, 1 }
  0x7d   : > { %736 = vmatmul.bf16.gmra.mxu1 %v4397_v39  ;;  %761 = vmatmul.bf16.gmra.mxu2 %v592_v41  ;;  %v968_v39 = vsel %vm965_vm1, %v966_v22, %v967_v47  ;;  %v3849_v47 = vld [vmem:[%s5317_s2 + $0x170] sm:$0xff] }
  0x7e   : > { %1840 = vmatpush.bf16.msra.mxu1 %v3849_v47  ;;  %v3864_v47 = vld [vmem:[%s5317_s2 + $0x1e8] sm:$0xff] }
  0x7f   : > { %1292 = vmatmul.bf16.gmra.mxu3 %v972_v3 }
  0x80   : > { %711 = vmatmul.bf16.gmra.mxu0 %v512_v62  ;;  %v973_v62 = vrot.slane %v4387_v33, 1  ;;  %2355 = vmatpush.bf16.msra.mxu3 %v3864_v47 }
  0x82   : > { %v974_v41 = vsel %vm965_vm1, %v971_v12, %v973_v62  ;;  %v1440_v12 = vrot.slane %v4403_v43, 2  ;;  %v976_v22 = vsel %vm965_vm1, %v973_v62, %v975_v21  ;;  %v3856_v62 = vld [vmem:[%s5317_s2 + $0x1a8] sm:$0xff] }
  0x83   : > { %2051 = vmatpush.bf16.msra.mxu2 %v3856_v62  ;;  %v981_v62 = vrot.slane %v4336_v44, 1 }
  0x8d   : > { %838 = vmatmul.bf16.vlgmr.msrb.gmra.mxu1 %v4151_v8  ;;  %1077 = vmatmul.bf16.vlgmr.msrb.gmra.mxu2 %v968_v39  ;;  %v1439_v8 = vrot.slane %v4468_v52, 1  ;;  %v1444_v39 = vrot.slane %v4410_v55, 2 }
  0x8f   : > { %1297 = vmatmul.bf16.gmra.mxu3 %v974_v41  ;;  %v1441_v37 = vor.u32 %v1440_v12, %v1439_v8  ;;  %v979_v12 = vrot.slane %v4248_v50, 1 }
  0x90   : > { %1591 = vmatmul.bf16.vlgmr.msrb.gmra.mxu0 %v1438_v34  ;;  %v1445_v34 = vor.u32 %v1444_v39, %v1443_v0 }
  0x91   : > { %v1442_v28 = vsel %vm1431_vm2, %v1437_v36, %v1441_v37  ;;  %v1447_v36 = vrot.slane %v4177_v18, 1  ;;  %v980_v2 = vsel %vm965_vm1, %v977_v17, %v979_v12  ;;  %v989_v18 = vrot.slane %v4251_v51, 1 }
  0x92   : > { %v1446_v49 = vsel %vm1431_vm2, %v1441_v37, %v1445_v34 }
  0x9d   : > { %843 = vmatmul.bf16.gmra.mxu1 %v4169_v14  ;;  %1082 = vmatmul.bf16.gmra.mxu2 %v970_v53  ;;  %v978_v14 = vsel %vm965_vm1, %v975_v21, %v977_v17  ;;  %v1448_v53 = vrot.slane %v4157_v10, 2 }
  0x9f   : > { %1302 = vmatmul.bf16.gmra.mxu3 %v976_v22 }
  0xa0   : > { %1596 = vmatmul.bf16.gmra.mxu0 %v1442_v28  ;;  %v3872_v28 = vld [vmem:[%s5317_s2 + $0x228] sm:$0xff] }
  0xa1   : > { %2611 = vmatpush.bf16.msra.mxu0 %v3872_v28  ;;  %v982_v28 = vsel %vm965_vm1, %v979_v12, %v981_v62  ;;  %v983_v12 = vrot.slane %v4316_v30, 1 }
  0xad   : > { %848 = vmatmul.bf16.gmra.mxu1 %v4258_v54  ;;  %1087 = vmatmul.bf16.gmra.mxu2 %v972_v3  ;;  %v1449_v54 = vor.u32 %v1448_v53, %v1447_v36  ;;  %v3848_v3 = vld [vmem:[%s5317_s2 + $0x168] sm:$0xff] }
  0xae   : > { %1841 = vmatpush.bf16.msra.mxu1 %v3848_v3 }
  0xaf   : > { %1307 = vmatmul.bf16.gmra.mxu3 %v978_v14  ;;  %v1450_v21 = vsel %vm1431_vm2, %v1445_v34, %v1449_v54  ;;  %v1451_v34 = vrot.slane %v4270_v58, 1 }
  0xb0   : > { %1601 = vmatmul.bf16.gmra.mxu0 %v1446_v49 }
  0xba   : > { %v4551_v8 = vpop.f32.mrf.mxu1 }
  0xbd   : > { %v4554_v37 = vpop.f32.mrf.mxu0  ;;  %853 = vmatmul.bf16.gmra.mxu1 %v4360_v57  ;;  %1092 = vmatmul.bf16.gmra.mxu2 %v974_v41  ;;  %v1452_v57 = vrot.slane %v4180_v19, 2  ;;  %v1456_v19 = vrot.slane %v4273_v59, 2 }
  0xbf   : > { %1312 = vmatmul.bf16.gmra.mxu3 %v980_v2  ;;  %v1453_v36 = vor.u32 %v1452_v57, %v1451_v34 }
  0xc0   : > { %1606 = vmatmul.bf16.gmra.mxu0 %v1450_v21  ;;  %v4562_v0 = vpop.f32.mrf.mxu2 }
  0xc1   : > { %5378 = vst [vmem:[#allocation22_spill] sm:$0xff] %v4562_v0  ;;  %v1454_v3 = vsel %vm1431_vm2, %v1449_v54, %v1453_v36 }
  0xc2   : > { %v4564_v39 = vpop.f32.mrf.mxu1  ;;  %v4570_v41 = vpop.f32.mrf.mxu3 }
  0xc3   : > { %5379 = vst [vmem:[#allocation23_spill] sm:$0xff] %v4570_v41 }
  0xc5   : > { %v4566_v49 = vpop.f32.mrf.mxu0 }
  0xc8   : > { %v4572_v17 = vpop.f32.mrf.mxu2 }
  0xc9   : > { %5380 = vst [vmem:[#allocation24_spill] sm:$0xff] %v4572_v17  ;;  %v1455_v17 = vrot.slane %v4375_v6, 1 }
  0xca   : > { %v4574_v53 = vpop.f32.mrf.mxu1  ;;  %v4580_v21 = vpop.f32.mrf.mxu3 }
  0xcb   : > { %5381 = vst [vmem:[#allocation25_spill] sm:$0xff] %v4580_v21  ;;  %v1457_v21 = vor.u32 %v1456_v19, %v1455_v17  ;;  %v3847_v17 = vld [vmem:[%s5317_s2 + $0x160] sm:$0xff] }
  0xcc   : > { %1842 = vmatpush.bf16.msra.mxu1 %v3847_v17 }
  0xcd   : > { %v4577_v47 = vpop.f32.mrf.mxu0  ;;  %858 = vmatmul.bf16.gmra.mxu1 %v4387_v33  ;;  %1097 = vmatmul.bf16.gmra.mxu2 %v976_v22  ;;  %v3855_v33 = vld [vmem:[%s5317_s2 + $0x1a0] sm:$0xff] }
  0xce   : > { %2052 = vmatpush.bf16.msra.mxu2 %v3855_v33  ;;  %v984_v33 = vsel %vm965_vm1, %v981_v62, %v983_v12 }
  0xcf   : > { %1317 = vmatmul.bf16.gmra.mxu3 %v982_v28 }
  0xd0   : > { %1611 = vmatmul.bf16.gmra.mxu0 %v1454_v3  ;;  %v4584_v41 = vpop.f32.mrf.mxu2  ;;  %v3863_v3 = vld [vmem:[%s5317_s2 + $0x1e0] sm:$0xff] }
  0xd1   : > { %5382 = vst [vmem:[#allocation26_spill] sm:$0xff] %v4584_v41  ;;  %2356 = vmatpush.bf16.msra.mxu3 %v3863_v3 }
  0xd2   : > { %v4586_v34 = vpop.f32.mrf.mxu1  ;;  %v4592_v54 = vpop.f32.mrf.mxu3 }
  0xd3   : > { %5383 = vst [vmem:[#allocation27_spill] sm:$0xff] %v4592_v54  ;;  %v1458_v54 = vsel %vm1431_vm2, %v1453_v36, %v1457_v21  ;;  %v3871_v36 = vld [vmem:[%s5317_s2 + $0x220] sm:$0xff] }
  0xd4   : > { %2612 = vmatpush.bf16.msra.mxu0 %v3871_v36 }
  0xd5   : > { %v4588_v57 = vpop.f32.mrf.mxu0 }
  0xd8   : > { %v4594_v58 = vpop.f32.mrf.mxu2 }
  0xd9   : > { %5384 = vst [vmem:[#allocation28_spill] sm:$0xff] %v4594_v58 }
  0xda   : > { %v4599_v22 = vpop.f32.mrf.mxu1  ;;  %v4608_v19 = vpop.f32.mrf.mxu3 }
  0xdb   : > { %5385 = vst [vmem:[#allocation29_spill] sm:$0xff] %v4608_v19 }
  0xdd   : > { %v4605_v6 = vpop.f32.mrf.mxu0  ;;  %863 = vmatmul.bf16.gmra.mxu1 %v4142_v5  ;;  %1102 = vmatmul.bf16.gmra.mxu2 %v978_v14  ;;  %v1459_v5 = vrot.slane %v4459_v48, 1  ;;  %v1460_v14 = vrot.slane %v4378_v15, 2 }
  0xdf   : > { %1322 = vmatmul.bf16.gmra.mxu3 %v984_v33  ;;  %v1461_v62 = vor.u32 %v1460_v14, %v1459_v5 }
  0xe0   : > { %1616 = vmatmul.bf16.gmra.mxu0 %v1458_v54  ;;  %v4615_v58 = vpop.f32.mrf.mxu2 }
  0xe1   : > { %5386 = vst [vmem:[#allocation30_spill] sm:$0xff] %v4615_v58  ;;  %v985_v58 = vrot.slane %v4148_v7, 1  ;;  %v1462_v0 = vsel %vm1431_vm2, %v1457_v21, %v1461_v62  ;;  %v1464_v21 = vrot.slane %v4332_v42, 2  ;;  %v3854_v42 = vld [vmem:[%s5317_s2 + $0x198] sm:$0xff] }
  0xe2   : > { %v4617_v59 = vpop.f32.mrf.mxu1  ;;  %v4626_v19 = vpop.f32.mrf.mxu3  ;;  %2053 = vmatpush.bf16.msra.mxu2 %v3854_v42  ;;  %v3870_v42 = vld [vmem:[%s5317_s2 + $0x218] sm:$0xff] }
  0xe3   : > { %5387 = vst [vmem:[#allocation31_spill] sm:$0xff] %v4617_v59  ;;  %2613 = vmatpush.bf16.msra.mxu0 %v3870_v42 }
  0xe4   : > { %5388 = vst [vmem:[#allocation32_spill] sm:$0xff] %v4626_v19  ;;  %v4640_v19 = vsel %vm965_vm1, %v983_v12, %v985_v58 }
  0xe5   : > { %v4622_v3 = vpop.f32.mrf.mxu0 }
  0xe8   : > { %v4628_v54 = vpop.f32.mrf.mxu2 }
  0xe9   : > { %5389 = vst [vmem:[#allocation33_spill] sm:$0xff] %v4628_v54  ;;  %v1463_v54 = vrot.slane %v4357_v56, 1 }
  0xea   : > { %v4630_v17 = vpop.f32.mrf.mxu1  ;;  %v4636_v10 = vpop.f32.mrf.mxu3 }
  0xeb   : > { %5390 = vst [vmem:[#allocation34_spill] sm:$0xff] %v4630_v17  ;;  %v1465_v15 = vor.u32 %v1464_v21, %v1463_v54  ;;  %v3862_v21 = vld [vmem:[%s5317_s2 + $0x1d8] sm:$0xff] }
  0xec   : > { %5391 = vst [vmem:[#allocation35_spill] sm:$0xff] %v4636_v10  ;;  %2357 = vmatpush.bf16.msra.mxu3 %v3862_v21 }
  0xed   : > { %v4633_v41 = vpop.f32.mrf.mxu0  ;;  %868 = vmatmul.bf16.gmra.mxu1 %v4154_v9  ;;  %1107 = vmatmul.bf16.gmra.mxu2 %v980_v2 }
  0xef   : > { %1327 = vmatmul.bf16.gmra.mxu3 %v4640_v19 }
  0xf0   : > { %1621 = vmatmul.bf16.gmra.mxu0 %v1462_v0  ;;  %v4642_v36 = vpop.f32.mrf.mxu2  ;;  %v987_v0 = vrot.slane %v4160_v11, 1 }
  0xf1   : > { %5392 = vst [vmem:[#allocation36_spill] sm:$0xff] %v4642_v36  ;;  %v1466_v36 = vsel %vm1431_vm2, %v1461_v62, %v1465_v15  ;;  %v1467_v62 = vrot.slane %v4190_v23, 1 }
  0xf2   : > { %v4645_v5 = vpop.f32.mrf.mxu1  ;;  %v1288_v10 = vpop.f32.mrf.mxu3  ;;  %v4664_v54 = vsel %vm965_vm1, %v985_v58, %v987_v0  ;;  %v3846_v58 = vld [vmem:[%s5317_s2 + $0x158] sm:$0xff] }
  0xf3   : > { %5393 = vst [vmem:[#allocation37_spill] sm:$0xff] %v4645_v5  ;;  %1843 = vmatpush.bf16.msra.mxu1 %v3846_v58  ;;  %v4690_v5 = vsel %vm965_vm1, %v987_v0, %v989_v18 }
  0xf5   : > { %v4647_v14 = vpop.f32.mrf.mxu0 }
  0xf8   : > { %v4651_v9 = vpop.f32.mrf.mxu2 }
  0xf9   : > { %5394 = vst [vmem:[#allocation38_spill] sm:$0xff] %v4651_v9 }
  0xfa   : > { %v4653_v2 = vpop.f32.mrf.mxu1  ;;  %v1290_v48 = vpop.f32.mrf.mxu3 }
  0xfb   : > { %5395 = vst [vmem:[#allocation39_spill] sm:$0xff] %v4653_v2 }
  0xfd   : > { %v4656_v12 = vpop.f32.mrf.mxu0  ;;  %873 = vmatmul.bf16.gmra.mxu1 %v4248_v50  ;;  %1112 = vmatmul.bf16.gmra.mxu2 %v982_v28 }
  0xff   : > { %1332 = vmatmul.bf16.gmra.mxu3 %v4664_v54 }
 0x100   : > { %1626 = vmatmul.bf16.gmra.mxu0 %v1466_v36  ;;  %v4669_v9 = vpop.f32.mrf.mxu2  ;;  %v1468_v36 = vrot.slane %v4166_v13, 2 }
 0x101   : > { %5396 = vst [vmem:[#allocation40_spill] sm:$0xff] %v4669_v9 }
 0x102   : > { %v4672_v50 = vpop.f32.mrf.mxu1  ;;  %v1293_v9 = vpop.f32.mrf.mxu3  ;;  %v1469_v21 = vor.u32 %v1468_v36, %v1467_v62 }
 0x103   : > { %5397 = vst [vmem:[#allocation41_spill] sm:$0xff] %v4672_v50 }
 0x104   : > { %v1470_v13 = vsel %vm1431_vm2, %v1465_v15, %v1469_v21  ;;  %v1472_v15 = vrot.slane %v4183_v20, 2 }
 0x105   : > { %v4674_v28 = vpop.f32.mrf.mxu0 }
 0x108   : > { %v4684_v56 = vpop.f32.mrf.mxu2 }
 0x109   : > { %5398 = vst [vmem:[#allocation42_spill] sm:$0xff] %v4684_v56 }
 0x10a   : > { %v839_v50 = vpop.f32.mrf.mxu1  ;;  %v1295_v2 = vpop.f32.mrf.mxu3 }
 0x10b   : > { %v840_v58 = vadd.f32 %v839_v50, %v4554_v37  ;;  %v991_v50 = vrot.slane %v4339_v46, 1 }
 0x10d   : > { %v1592_v23 = vpop.f32.mrf.mxu0  ;;  %878 = vmatmul.bf16.gmra.mxu1 %v4336_v44  ;;  %1117 = vmatmul.bf16.gmra.mxu2 %v984_v33  ;;  %v1473_v33 = vor.u32 %v1472_v15, %v1471_v38 }
 0x10f   : > { %1337 = vmatmul.bf16.gmra.mxu3 %v4690_v5 }
 0x110   : > { %1631 = vmatmul.bf16.gmra.mxu0 %v1470_v13  ;;  %v1078_v42 = vpop.f32.mrf.mxu2 }
 0x111   : > { %v1168_v62 = vadd.f32 %v1078_v42, %v840_v58 }
 0x112   : > { %v841_v36 = vpop.f32.mrf.mxu1  ;;  %v1298_v17 = vpop.f32.mrf.mxu3 }
 0x113   : > { %v1378_v56 = vadd.f32 %v1288_v10, %v1168_v62  ;;  %v842_v13 = vadd.f32 %v841_v36, %v4566_v49  ;;  %v1474_v10 = vsel %vm1431_vm2, %v1469_v21, %v1473_v33  ;;  %v1475_v36 = vrot.slane %v4381_v29, 1 }
 0x115   : > { %v1594_v55 = vpop.f32.mrf.mxu0  ;;  %v4696_v44 = vadd.f32 %v1592_v23, %v1378_v56  ;;  %v4706_v23 = vsel %vm965_vm1, %v989_v18, %v991_v50  ;;  %v3861_v18 = vld [vmem:[%s5317_s2 + $0x1d0] sm:$0xff] }
 0x116   : > { %2358 = vmatpush.bf16.msra.mxu3 %v3861_v18 }
 0x118   : > { %v1080_v0 = vpop.f32.mrf.mxu2 }
 0x119   : > { %v1169_v59 = vadd.f32 %v1080_v0, %v842_v13 }
 0x11a   : > { %v844_v37 = vpop.f32.mrf.mxu1  ;;  %v1300_v62 = vpop.f32.mrf.mxu3 }
 0x11b   : > { %v1379_v58 = vadd.f32 %v1290_v48, %v1169_v59  ;;  %v845_v56 = vadd.f32 %v844_v37, %v4577_v47  ;;  %v3845_v47 = vld [vmem:[%s5317_s2 + $0x150] sm:$0xff] }
 0x11c   : > { %1844 = vmatpush.bf16.msra.mxu1 %v3845_v47 }
 0x11d   : > { %v1597_v42 = vpop.f32.mrf.mxu0  ;;  %883 = vmatmul.bf16.gmra.mxu1 %v4316_v30  ;;  %1122 = vmatmul.bf16.gmra.mxu2 %v4640_v19  ;;  %v4703_v20 = vadd.f32 %v1594_v55, %v1379_v58  ;;  %v1476_v30 = vrot.slane %v4279_v61, 2  ;;  %v3853_v55 = vld [vmem:[%s5317_s2 + $0x190] sm:$0xff] }
 0x11e   : > { %2054 = vmatpush.bf16.msra.mxu2 %v3853_v55  ;;  %v3869_v55 = vld [vmem:[%s5317_s2 + $0x210] sm:$0xff] }
 0x11f   : > { %1342 = vmatmul.bf16.gmra.mxu3 %v4706_v23  ;;  %v1477_v13 = vor.u32 %v1476_v30, %v1475_v36  ;;  %2614 = vmatpush.bf16.msra.mxu0 %v3869_v55 }
 0x120   : > { %1636 = vmatmul.bf16.gmra.mxu0 %v1474_v10  ;;  %v1083_v38 = vpop.f32.mrf.mxu2  ;;  %v993_v10 = vrot.slane %v4431_v31, 1 }
 0x121   : > { %v1170_v49 = vadd.f32 %v1083_v38, %v845_v56 }
 0x122   : > { %v846_v59 = vpop.f32.mrf.mxu1  ;;  %v1303_v19 = vpop.f32.mrf.mxu3 }
 0x123   : > { %v1380_v48 = vadd.f32 %v1293_v9, %v1170_v49  ;;  %v847_v15 = vadd.f32 %v846_v59, %v4588_v57  ;;  %v1478_v49 = vsel %vm1431_vm2, %v1473_v33, %v1477_v13 }
 0x125   : > { %v1599_v21 = vpop.f32.mrf.mxu0  ;;  %v4721_v9 = vadd.f32 %v1597_v42, %v1380_v48  ;;  %v4734_v42 = vsel %vm965_vm1, %v991_v50, %v993_v10 }
 0x128   : > { %v1085_v0 = vpop.f32.mrf.mxu2 }
 0x129   : > { %v1171_v37 = vadd.f32 %v1085_v0, %v847_v15 }
 0x12a   : > { %v849_v58 = vpop.f32.mrf.mxu1  ;;  %v1305_v18 = vpop.f32.mrf.mxu3 }
 0x12b   : > { %v1381_v56 = vadd.f32 %v1295_v2, %v1171_v37  ;;  %v850_v2 = vadd.f32 %v849_v58, %v4605_v6  ;;  %v995_v58 = vrot.slane %v4173_v16, 1 }
 0x12d   : > { %v1602_v38 = vpop.f32.mrf.mxu0  ;;  %888 = vmatmul.bf16.gmra.mxu1 %v4148_v7  ;;  %1127 = vmatmul.bf16.gmra.mxu2 %v4664_v54  ;;  %v4731_v57 = vadd.f32 %v1599_v21, %v1381_v56  ;;  %v1479_v7 = vrot.slane %v4462_v4, 1  ;;  %v1480_v54 = vrot.slane %v4384_v32, 2 }
 0x12f   : > { %1347 = vmatmul.bf16.gmra.mxu3 %v4734_v42  ;;  %v1481_v15 = vor.u32 %v1480_v54, %v1479_v7 }
 0x130   : > { %1641 = vmatmul.bf16.gmra.mxu0 %v1478_v49  ;;  %v1088_v59 = vpop.f32.mrf.mxu2 }
 0x131   : > { %v1172_v33 = vadd.f32 %v1088_v59, %v850_v2 }
 0x132   : > { %v851_v48 = vpop.f32.mrf.mxu1  ;;  %v1308_v21 = vpop.f32.mrf.mxu3 }
 0x133   : > { %v1382_v36 = vadd.f32 %v1298_v17, %v1172_v33  ;;  %v852_v50 = vadd.f32 %v851_v48, %v4622_v3  ;;  %v1482_v17 = vsel %vm1431_vm2, %v1477_v13, %v1481_v15  ;;  %v4750_v3 = vsel %vm965_vm1, %v993_v10, %v995_v58  ;;  %v3860_v10 = vld [vmem:[%s5317_s2 + $0x1c8] sm:$0xff] }
 0x134   : > { %v1483_v48 = vrot.slane %v4495_v27, 1  ;;  %2359 = vmatpush.bf16.msra.mxu3 %v3860_v10 }
 0x135   : > { %v1604_v30 = vpop.f32.mrf.mxu0  ;;  %v4740_v47 = vadd.f32 %v1602_v38, %v1382_v36 }
 0x138   : > { %v1090_v0 = vpop.f32.mrf.mxu2 }
 0x139   : > { %v1173_v6 = vadd.f32 %v1090_v0, %v852_v50  ;;  %v997_v0 = vrot.slane %v4193_v24, 1  ;;  %v3868_v24 = vld [vmem:[%s5317_s2 + $0x208] sm:$0xff] }
 0x13a   : > { %v854_v37 = vpop.f32.mrf.mxu1  ;;  %v1310_v55 = vpop.f32.mrf.mxu3  ;;  %2615 = vmatpush.bf16.msra.mxu0 %v3868_v24  ;;  %v5399_v24 = vld [vmem:[#allocation8_spill] sm:$0xff] }
 0x13b   : > { %v1383_v56 = vadd.f32 %v1300_v62, %v1173_v6  ;;  %v855_v38 = vadd.f32 %v854_v37, %v4633_v41 }
 0x13d   : > { %v1607_v49 = vpop.f32.mrf.mxu0  ;;  %893 = vmatmul.bf16.gmra.mxu1 %v4160_v11  ;;  %1132 = vmatmul.bf16.gmra.mxu2 %v4690_v5  ;;  %v4747_v2 = vadd.f32 %v1604_v30, %v1383_v56  ;;  %v1484_v11 = vrot.slane %v4465_v45, 2  ;;  %v3852_v5 = vld [vmem:[%s5317_s2 + $0x188] sm:$0xff] }
 0x13e   : > { %2055 = vmatpush.bf16.msra.mxu2 %v3852_v5 }
 0x13f   : > { %1352 = vmatmul.bf16.gmra.mxu3 %v4750_v3  ;;  %v1485_v30 = vor.u32 %v1484_v11, %v1483_v48 }
 0x140   : > { %1646 = vmatmul.bf16.gmra.mxu0 %v1482_v17  ;;  %v1093_v59 = vpop.f32.mrf.mxu2  ;;  %v3844_v17 = vld [vmem:[%s5317_s2 + $0x148] sm:$0xff] }
 0x141   : > { %v1174_v33 = vadd.f32 %v1093_v59, %v855_v38  ;;  %v1486_v56 = vsel %vm1431_vm2, %v1481_v15, %v1485_v30  ;;  %1845 = vmatpush.bf16.msra.mxu1 %v3844_v17 }
 0x142   : > { %v856_v16 = vpop.f32.mrf.mxu1  ;;  %v1313_v41 = vpop.f32.mrf.mxu3 }
 0x143   : > { %v1384_v62 = vadd.f32 %v1303_v19, %v1174_v33  ;;  %v857_v19 = vadd.f32 %v856_v16, %v4647_v14  ;;  %v1487_v16 = vrot.slane %v4213_v35, 1 }
 0x145   : > { %v1609_v13 = vpop.f32.mrf.mxu0  ;;  %v4762_v36 = vadd.f32 %v1607_v49, %v1384_v62  ;;  %v4775_v49 = vsel %vm965_vm1, %v995_v58, %v997_v0  ;;  %v1488_v58 = vrot.slane %v4196_v25, 2 }
 0x147   : > { %v1489_v11 = vor.u32 %v1488_v58, %v1487_v16 }
 0x148   : > { %v1095_v7 = vpop.f32.mrf.mxu2 }
 0x149   : > { %v1175_v54 = vadd.f32 %v1095_v7, %v857_v19  ;;  %v4788_v19 = vrot.slane %v4285_v63, 1 }
 0x14a   : > { %v859_v50 = vpop.f32.mrf.mxu1  ;;  %v1315_v38 = vpop.f32.mrf.mxu3 }
 0x14b   : > { %v1385_v6 = vadd.f32 %v1305_v18, %v1175_v54  ;;  %v860_v18 = vadd.f32 %v859_v50, %v4656_v12 }
 0x14d   : > { %v1612_v37 = vpop.f32.mrf.mxu0  ;;  %898 = vmatmul.bf16.gmra.mxu1 %v4251_v51  ;;  %1137 = vmatmul.bf16.gmra.mxu2 %v4706_v23  ;;  %v4772_v14 = vadd.f32 %v1609_v13, %v1385_v6 }
 0x14f   : > { %1357 = vmatmul.bf16.gmra.mxu3 %v4775_v49 }
 0x150   : > { %1651 = vmatmul.bf16.gmra.mxu0 %v1486_v56  ;;  %v1098_v15 = vpop.f32.mrf.mxu2 }
 0x151   : > { %v1176_v59 = vadd.f32 %v1098_v15, %v860_v18 }
 0x152   : > { %v861_v51 = vpop.f32.mrf.mxu1  ;;  %v1318_v62 = vpop.f32.mrf.mxu3 }
 0x153   : > { %v1386_v23 = vadd.f32 %v1308_v21, %v1176_v59  ;;  %v862_v48 = vadd.f32 %v861_v51, %v4674_v28  ;;  %v1490_v21 = vsel %vm1431_vm2, %v1485_v30, %v1489_v11  ;;  %v4797_v28 = vsel %vm965_vm1, %v997_v0, %v4788_v19 }
 0x155   : > { %v1614_v33 = vpop.f32.mrf.mxu0  ;;  %v4784_v13 = vadd.f32 %v1612_v37, %v1386_v23 }
 0x158   : > { %v1100_v5 = vpop.f32.mrf.mxu2 }
 0x159   : > { %v1177_v12 = vadd.f32 %v1100_v5, %v862_v48  ;;  %v3851_v5 = vld [vmem:[%s5317_s2 + $0x180] sm:$0xff] }
 0x15a   : > { %v864_v10 = vpop.f32.mrf.mxu1  ;;  %v1320_v50 = vpop.f32.mrf.mxu3  ;;  %2056 = vmatpush.bf16.msra.mxu2 %v3851_v5 }
 0x15b   : > { %v1387_v7 = vadd.f32 %v1310_v55, %v1177_v12  ;;  %v865_v37 = vadd.f32 %v864_v10, %v4551_v8  ;;  %v3859_v12 = vld [vmem:[%s5317_s2 + $0x1c0] sm:$0xff] }
 0x15c   : > { %2360 = vmatpush.bf16.msra.mxu3 %v3859_v12 }
 0x15d   : > { %v1617_v54 = vpop.f32.mrf.mxu0  ;;  %903 = vmatmul.bf16.gmra.mxu1 %v4339_v46  ;;  %1142 = vmatmul.bf16.gmra.mxu2 %v4734_v42  ;;  %v4793_v6 = vadd.f32 %v1614_v33, %v1387_v7  ;;  %v1491_v46 = vrot.slane %v4307_v26, 1  ;;  %v1492_v42 = vrot.slane %v5399_v24, 2  ;;  %v5400_v33 = vld [vmem:[#allocation13_spill] sm:$0xff] }
 0x15e   : > { %v1225_v16 = vrot.slane %v5400_v33, 1 }
 0x15f   : > { %1362 = vmatmul.bf16.gmra.mxu3 %v4797_v28  ;;  %v1493_v0 = vor.u32 %v1492_v42, %v1491_v46  ;;  %v3867_v42 = vld [vmem:[%s5317_s2 + $0x200] sm:$0xff] }
 0x160   : > { %1656 = vmatmul.bf16.gmra.mxu0 %v1490_v21  ;;  %v1103_v63 = vpop.f32.mrf.mxu2 }
 0x161   : > { %v1178_v56 = vadd.f32 %v1103_v63, %v865_v37  ;;  %2616 = vmatpush.bf16.msra.mxu0 %v3867_v42  ;;  %v2203_v42 = vrot.slane %v4289_v1, 3  ;;  %v4029_v1 = vld [vmem:[%s4106_s30 + $0x80] sm:$0xff] }
 0x162   : > { %v866_v55 = vpop.f32.mrf.mxu1  ;;  %v1323_v18 = vpop.f32.mrf.mxu3 }
 0x163   : > { %v1388_v30 = vadd.f32 %v1313_v41, %v1178_v56  ;;  %v867_v59 = vadd.f32 %v866_v55, %v4564_v39  ;;  %v1494_v41 = vsel %vm1431_vm2, %v1489_v11, %v1493_v0  ;;  %v1226_v11 = vsel %vm965_vm1, %v4788_v19, %v1225_v16  ;;  %v5401_v55 = vld [vmem:[#allocation19_spill] sm:$0xff] }
 0x165   : > { %v1619_v17 = vpop.f32.mrf.mxu0  ;;  %v4803_v15 = vadd.f32 %v1617_v54, %v1388_v30  ;;  %v3973_v54 = vld [vmem:[%s4111_s10 + $0x8] sm:$0xff]   ;;  %v1495_v30 = vrot.slane %v5401_v55, 1 }
 0x166   : > { %v3881_v37 = vunpack.c.l.bf16 %v3973_v54  ;;  %v4028_v54 = vld [vmem:[%s4106_s30 + $0x78] sm:$0xff] }
 0x168   : > { %v1105_v51 = vpop.f32.mrf.mxu2 }
 0x169   : > { %v1179_v23 = vadd.f32 %v1105_v51, %v867_v59  ;;  %v4834_v51 = vpack.c.bf16 %v3881_v37, %v3881_v37 }
 0x16a   : > { %v869_v8 = vpop.f32.mrf.mxu1  ;;  %v4814_v39 = vpop.f32.mrf.mxu3 }
 0x16b   : > { %v1389_v58 = vadd.f32 %v1315_v38, %v1179_v23  ;;  %v3843_v38 = vld [vmem:[%s5317_s2 + $0x140] sm:$0xff]  ;;  %v870_v7 = vadd.f32 %v869_v8, %v4574_v53  ;;  %v1227_v5 = vrot.slane %v4834_v51, 1 }
 0x16c   : > { %1846 = vmatpush.bf16.msra.mxu1 %v3843_v38 }
 0x16d   : > { %v1622_v48 = vpop.f32.mrf.mxu0  ;;  %908 = vmatmul.bf16.gmra.mxu1 %v4431_v31  ;;  %1147 = vmatmul.bf16.gmra.mxu2 %v4750_v3  ;;  %v4821_v10 = vadd.f32 %v1619_v17, %v1389_v58  ;;  %v5402_v17 = vld [vmem:[#allocation11_spill] sm:$0xff] }
 0x16e   : > { %v1496_v46 = vrot.slane %v5402_v17, 2 }
 0x16f   : > { %1367 = vmatmul.bf16.gmra.mxu3 %v1226_v11 }
 0x170   : > { %1661 = vmatmul.bf16.gmra.mxu0 %v1494_v41  ;;  %v1108_v21 = vpop.f32.mrf.mxu2  ;;  %v1497_v8 = vor.u32 %v1496_v46, %v1495_v30 }
 0x171   : > { %v1180_v31 = vadd.f32 %v1108_v21, %v870_v7 }
 0x172   : > { %v871_v3 = vpop.f32.mrf.mxu1  ;;  %v1328_v53 = vpop.f32.mrf.mxu3  ;;  %v1498_v11 = vsel %vm1431_vm2, %v1493_v0, %v1497_v8 }
 0x173   : > { %v1390_v63 = vadd.f32 %v1318_v62, %v1180_v31  ;;  %v872_v23 = vadd.f32 %v871_v3, %v4586_v34  ;;  %v1228_v34 = vsel %vm965_vm1, %v1225_v16, %v1227_v5  ;;  %v5352_v31 = vshrl.u32 %v5400_v33, 16 }
 0x175   : > { %v1624_v56 = vpop.f32.mrf.mxu0  ;;  %v4832_v59 = vadd.f32 %v1622_v48, %v1390_v63 }
 0x178   : > { %v1110_v62 = vpop.f32.mrf.mxu2 }
 0x179   : > { %v1181_v58 = vadd.f32 %v1110_v62, %v872_v23  ;;  %v2205_v23 = vrot.slane %v4468_v52, 2  ;;  %v2206_v62 = vrot.slane %v4403_v43, 3 }
 0x17a   : > { %v874_v41 = vpop.f32.mrf.mxu1  ;;  %v4839_v7 = vpop.f32.mrf.mxu3 }
 0x17b   : > { %v1391_v12 = vadd.f32 %v1320_v50, %v1181_v58  ;;  %v875_v21 = vadd.f32 %v874_v41, %v4599_v22  ;;  %v5351_v50 = vshll.u32 %v5400_v33, 16  ;;  %v2202_v22 = vrot.slane %v4400_v40, 2 }
 0x17d   : > { %v1627_v38 = vpop.f32.mrf.mxu0  ;;  %913 = vmatmul.bf16.gmra.mxu1 %v4028_v54  ;;  %1152 = vmatmul.bf16.gmra.mxu2 %v4775_v49  ;;  %v4843_v48 = vadd.f32 %v1624_v56, %v1391_v12  ;;  %v1502_v49 = vrot.slane %v5352_v31, 1  ;;  %v1505_v56 = vrot.slane %v5351_v50, 2  ;;  %v2204_v54 = vor.u32 %v2203_v42, %v2202_v22 }
 0x17f   : > { %1372 = vmatmul.bf16.gmra.mxu3 %v1228_v34  ;;  %v1506_v41 = vor.u32 %v1505_v56, %v1502_v49  ;;  %v2207_v34 = vor.u32 %v2206_v62, %v2205_v23 }
 0x180   : > { %1666 = vmatmul.bf16.gmra.mxu0 %v1498_v11  ;;  %v1113_v3 = vpop.f32.mrf.mxu2 }
 0x181   : > { %v1182_v37 = vadd.f32 %v1113_v3, %v875_v21  ;;  %v1507_v40 = vsel %vm1431_vm2, %v1497_v8, %v1506_v41  ;;  %v2208_v52 = vsel %vm2201_vm3, %v2204_v54, %v2207_v34 }
 0x182   : > { %v876_v0 = vpop.f32.mrf.mxu1  ;;  %v1333_v46 = vpop.f32.mrf.mxu3 }
 0x183   : > { %v1392_v63 = vadd.f32 %v1323_v18, %v1182_v37  ;;  %v5403_v18 = vld [vmem:[#allocation31_spill] sm:$0xff]  ;;  %v5404_v37 = vld [vmem:[#allocation34_spill] sm:$0xff] }
 0x184   : > { %v877_v58 = vadd.f32 %v876_v0, %v5403_v18  ;;  %v5405_v18 = vld [vmem:[#allocation17_spill] sm:$0xff] }
 0x185   : > { %v1629_v30 = vpop.f32.mrf.mxu0  ;;  %v4853_v16 = vadd.f32 %v1627_v38, %v1392_v63  ;;  %v1509_v63 = vshrl.u32 %v4834_v51, 16 }
 0x187   : > { %v1511_v23 = vrot.slane %v1509_v63, 1 }
 0x188   : > { %v1115_v5 = vpop.f32.mrf.mxu2 }
 0x189   : > { %v1183_v12 = vadd.f32 %v1115_v5, %v877_v58  ;;  %v1001_v58 = vrot.slane %v5405_v18, 1  ;;  %v5406_v5 = vld [vmem:[#allocation20_spill] sm:$0xff] }
 0x18a   : > { %v879_v11 = vpop.f32.mrf.mxu1  ;;  %v4862_v3 = vpop.f32.mrf.mxu3 }
 0x18b   : > { %v1393_v38 = vadd.f32 %v4814_v39, %v1183_v12  ;;  %v880_v0 = vadd.f32 %v879_v11, %v5404_v37  ;;  %v1512_v39 = vshll.u32 %v4834_v51, 16  ;;  %v2209_v12 = vrot.slane %v5406_v5, 2  ;;  %v5407_v11 = vld [vmem:[#allocation18_spill] sm:$0xff] }
 0x18c   : > { %v2210_v54 = vrot.slane %v5407_v11, 3  ;;  %v2816_v11 = vld [vmem:[%s4116_s15] sm:$0xff] }
 0x18d   : > { %v1632_v21 = vpop.f32.mrf.mxu0  ;;  %918 = vmatmul.bf16.gmra.mxu1 %v4029_v1  ;;  %1157 = vmatmul.bf16.gmra.mxu2 %v4797_v28  ;;  %v4866_v43 = vadd.f32 %v1629_v30, %v1393_v38  ;;  %v1514_v62 = vrot.slane %v1512_v39, 2  ;;  %v5408_v38 = vld [vmem:[#allocation37_spill] sm:$0xff] }
 0x18e   : > { %v2211_v63 = vor.u32 %v2210_v54, %v2209_v12  ;;  %v4059_v12 = vmov 0   ;;  %v4031_v54 = vld [vmem:[%s4106_s30 + $0x8] sm:$0xff] }
 0x18f   : > { %2361 = vmatmul.bf16.vlgmr.msra.gmra.mxu3 %v2208_v52  ;;  %v1515_v1 = vor.u32 %v1514_v62, %v1511_v23  ;;  %v5409_v62 = vld [vmem:[#allocation39_spill] sm:$0xff]  ;;  %4025 = vset.pattern.permute.xlu0 %v4059_v12 }
 0x190   : > { %1671 = vmatmul.bf16.gmra.mxu0 %v1507_v40  ;;  %v1118_v49 = vpop.f32.mrf.mxu2  ;;  %v2212_v23 = vsel %vm2201_vm3, %v2207_v34, %v2211_v63  ;;  %4026 = vset.pattern.permute.xlu1 %v4059_v12  ;;  %v1736_v34 = vrot.slane %v4031_v54, 2 }
 0x191   : > { %v1184_v8 = vadd.f32 %v1118_v49, %v880_v0  ;;  %v1002_v0 = vsel %vm965_vm1, %v4788_v19, %v1001_v58  ;;  %v1516_v49 = vsel %vm1431_vm2, %v1506_v41, %v1515_v1  ;;  %2854 = vperm.xlu0 %4025, %v2816_v11   ;;  %4027 = vset.pattern.permute.xlu2 %v4059_v12 }
 0x192   : > { %v881_v56 = vpop.f32.mrf.mxu1  ;;  %v4872_v28 = vpop.f32.mrf.mxu3 }
 0x193   : > { %v1394_v22 = vadd.f32 %v1328_v53, %v1184_v8  ;;  %v882_v40 = vadd.f32 %v881_v56, %v5408_v38 }
 0x195   : > { %v1634_v42 = vpop.f32.mrf.mxu0  ;;  %v4874_v30 = vadd.f32 %v1632_v21, %v1394_v22  ;;  %v4030_v22 = vld [vmem:[%s4106_s30 + $0x88] sm:$0xff] }
 0x198   : > { %v1120_v52 = vpop.f32.mrf.mxu2 }
 0x199   : > { %v1185_v37 = vadd.f32 %v1120_v52, %v882_v40  ;;  %v4032_v40 = vld [vmem:[%s4106_s30 + $0x10] sm:$0xff]  ;;  %v4033_v52 = vld [vmem:[%s4106_s30 + $0x18] sm:$0xff] }
 0x19a   : > { %v884_v53 = vpop.f32.mrf.mxu1  ;;  %v4884_v8 = vpop.f32.mrf.mxu3  ;;  %v1737_v1 = vrot.slane %v4032_v40, 2 }
 0x19b   : > { %v1395_v39 = vadd.f32 %v4839_v7, %v1185_v37  ;;  %v885_v19 = vadd.f32 %v884_v53, %v5409_v62  ;;  %v1739_v37 = vrot.slane %v4033_v52, 2  ;;  %v5410_v53 = vld [vmem:[#allocation4_spill] sm:$0xff]  ;;  %v2507_v62 = vrot.slane %v4033_v52, 3  ;;  %v5414_v52 = vld [vmem:[#allocation22_spill] sm:$0xff] }
 0x19d   : > { %v1637_v21 = vpop.f32.mrf.mxu0  ;;  %923 = vmatmul.bf16.gmra.mxu1 %v4030_v22  ;;  %1162 = vmatmul.bf16.gmra.mxu2 %v1002_v0  ;;  %v4887_v56 = vadd.f32 %v1634_v42, %v1395_v39  ;;  %v2213_v0 = vrot.slane %v5410_v53, 2 }
 0x19f   : > { %2366 = vmatmul.bf16.gmra.mxu3 %v2212_v23  ;;  %v2506_v23 = vrot.slane %v4032_v40, 3 }
 0x1a0   : > { %1676 = vmatmul.bf16.gmra.mxu0 %v1516_v49  ;;  %v1123_v18 = vpop.f32.mrf.mxu2  ;;  %v5412_v49 = vld [vmem:[#allocation41_spill] sm:$0xff] }
 0x1a1   : > { %v1186_v7 = vadd.f32 %v1123_v18, %v885_v19  ;;  %v2508_v53 = vsel %vm2505_vm5, %v2506_v23, %v2507_v62  ;;  %v2818_v23 = vld [vmem:[%s4116_s15 + $0x10] sm:$0xff] }
 0x1a2   : > { %v886_v41 = vpop.f32.mrf.mxu1  ;;  %v4892_v42 = vpop.f32.mrf.mxu3  ;;  %2864 = vperm.xlu1 %4026, %v2818_v23  }
 0x1a3   : > { %v1396_v58 = vadd.f32 %v1333_v46, %v1186_v7  ;;  %v5411_v46 = vld [vmem:[#allocation2_spill] sm:$0xff]  ;;  %v887_v22 = vadd.f32 %v886_v41, %v5412_v49 }
 0x1a4   : > { %v2214_v39 = vrot.slane %v5411_v46, 3  ;;  %v2817_v46 = vld [vmem:[%s4116_s15 + $0x8] sm:$0xff] }
 0x1a5   : > { %v1639_v5 = vpop.f32.mrf.mxu0  ;;  %v4895_v38 = vadd.f32 %v1637_v21, %v1396_v58  ;;  %v1738_v21 = vsel %vm1735_vm4, %v1736_v34, %v1737_v1  ;;  %v1740_v58 = vsel %vm1735_vm4, %v1737_v1, %v1739_v37  ;;  %2859 = vperm.xlu0 %4025, %v2817_v46  }
 0x1a6   : > { %v2215_v12 = vor.u32 %v2214_v39, %v2213_v0 }
 0x1a8   : > { %v1125_v19 = vpop.f32.mrf.mxu2  ;;  %v2216_v34 = vsel %vm2201_vm3, %v2211_v63, %v2215_v12  ;;  %v5417_v63 = vld [vmem:[#allocation5_spill] sm:$0xff] }
 0x1a9   : > { %v1187_v18 = vadd.f32 %v1125_v19, %v887_v22  ;;  %v2218_v46 = vrot.slane %v5417_v63, 3 }
 0x1aa   : > { %v889_v7 = vpop.f32.mrf.mxu1  ;;  %v1345_v41 = vpop.f32.mrf.mxu3 }
 0x1ab   : > { %v1397_v11 = vadd.f32 %v4862_v3, %v1187_v18  ;;  %v890_v1 = vadd.f32 %v889_v7, %v5414_v52  ;;  %v5418_v7 = vld [vmem:[#allocation24_spill] sm:$0xff] }
 0x1ad   : > { %v1642_v54 = vpop.f32.mrf.mxu0  ;;  %1847 = vmatmul.bf16.vlgmr.msra.gmra.mxu1 %v1738_v21  ;;  %2057 = vmatmul.bf16.vlgmr.msra.gmra.mxu2 %v1740_v58  ;;  %v4907_v40 = vadd.f32 %v1639_v5, %v1397_v11  ;;  %v4034_v5 = vld [vmem:[%s4106_s30 + $0x20] sm:$0xff]  ;;  %v5416_v11 = vld [vmem:[#allocation9_spill] sm:$0xff] }
 0x1ae   : > { %v1741_v21 = vrot.slane %v4034_v5, 2 }
 0x1af   : > { %5413 = vst [vmem:[#allocation8_spill] sm:$0xff] %v4907_v40  ;;  %2371 = vmatmul.bf16.gmra.mxu3 %v2216_v34 }
 0x1b0   : > { %2617 = vmatmul.bf16.vlgmr.msra.gmra.mxu0 %v2508_v53  ;;  %v1128_v0 = vpop.f32.mrf.mxu2  ;;  %v2217_v53 = vrot.slane %v5416_v11, 2 }
 0x1b1   : > { %v1188_v39 = vadd.f32 %v1128_v0, %v890_v1  ;;  %v2509_v1 = vrot.slane %v4034_v5, 3  ;;  %v5420_v5 = vld [vmem:[#allocation26_spill] sm:$0xff] }
 0x1b2   : > { %v891_v3 = vpop.f32.mrf.mxu1  ;;  %v1348_v19 = vpop.f32.mrf.mxu3 }
 0x1b3   : > { %v1398_v49 = vadd.f32 %v4872_v28, %v1188_v39  ;;  %v892_v52 = vadd.f32 %v891_v3, %v5418_v7  ;;  %v1742_v28 = vsel %vm1735_vm4, %v1739_v37, %v1741_v21  ;;  %v2219_v39 = vor.u32 %v2218_v46, %v2217_v53 }
 0x1b5   : > { %v1644_v22 = vpop.f32.mrf.mxu0  ;;  %v4913_v18 = vadd.f32 %v1642_v54, %v1398_v49  ;;  %v2510_v54 = vsel %vm2505_vm5, %v2507_v62, %v2509_v1  ;;  %v2819_v49 = vld [vmem:[%s4116_s15 + $0x18] sm:$0xff]  ;;  %v2220_v3 = vsel %vm2201_vm3, %v2215_v12, %v2219_v39 }
 0x1b6   : > { %2869 = vperm.xlu1 %4026, %v2819_v49   ;;  %v5424_v49 = vld [vmem:[#allocation28_spill] sm:$0xff] }
 0x1b7   : > { %5415 = vst [vmem:[#allocation13_spill] sm:$0xff] %v4913_v18 }
 0x1b8   : > { %v1130_v34 = vpop.f32.mrf.mxu2 }
 0x1b9   : > { %v1189_v0 = vadd.f32 %v1130_v34, %v892_v52  ;;  %v4035_v34 = vld [vmem:[%s4106_s30 + $0x28] sm:$0xff] }
 0x1ba   : > { %v894_v50 = vpop.f32.mrf.mxu1  ;;  %v1350_v18 = vpop.f32.mrf.mxu3 }
 0x1bb   : > { %v1399_v23 = vadd.f32 %v4884_v8, %v1189_v0  ;;  %v895_v63 = vadd.f32 %v894_v50, %v5420_v5  ;;  %v5422_v0 = vld [vmem:[#allocation15_spill] sm:$0xff] }
 0x1bd   : > { %v1647_v31 = vpop.f32.mrf.mxu0  ;;  %1852 = vmatmul.bf16.gmra.mxu1 %v1740_v58  ;;  %2062 = vmatmul.bf16.gmra.mxu2 %v1742_v28  ;;  %v4923_v11 = vadd.f32 %v1644_v22, %v1399_v23  ;;  %v1743_v58 = vrot.slane %v4035_v34, 2  ;;  %v2221_v22 = vrot.slane %v5422_v0, 2  ;;  %v5423_v23 = vld [vmem:[#allocation10_spill] sm:$0xff] }
 0x1bf   : > { %5419 = vst [vmem:[#allocation19_spill] sm:$0xff] %v4923_v11  ;;  %2376 = vmatmul.bf16.gmra.mxu3 %v2220_v3  ;;  %v2511_v11 = vrot.slane %v4035_v34, 3  ;;  %v1744_v3 = vsel %vm1735_vm4, %v1741_v21, %v1743_v58  ;;  %v5426_v34 = vld [vmem:[#allocation30_spill] sm:$0xff] }
 0x1c0   : > { %2622 = vmatmul.bf16.gmra.mxu0 %v2510_v54  ;;  %v1133_v37 = vpop.f32.mrf.mxu2  ;;  %v2222_v54 = vrot.slane %v5423_v23, 3 }
 0x1c1   : > { %v1190_v53 = vadd.f32 %v1133_v37, %v895_v63 }
 0x1c2   : > { %v896_v8 = vpop.f32.mrf.mxu1  ;;  %v1353_v7 = vpop.f32.mrf.mxu3  ;;  %v2223_v37 = vor.u32 %v2222_v54, %v2221_v22 }
 0x1c3   : > { %v1400_v46 = vadd.f32 %v4892_v42, %v1190_v53  ;;  %v897_v12 = vadd.f32 %v896_v8, %v5424_v49 }
 0x1c4   : > { %v2224_v8 = vsel %vm2201_vm3, %v2219_v39, %v2223_v37 }
 0x1c5   : > { %v1649_v62 = vpop.f32.mrf.mxu0  ;;  %v4928_v52 = vadd.f32 %v1647_v31, %v1400_v46  ;;  %v2512_v31 = vsel %vm2505_vm5, %v2509_v1, %v2511_v11 }
 0x1c7   : > { %5421 = vst [vmem:[#allocation11_spill] sm:$0xff] %v4928_v52 }
 0x1c8   : > { %v1135_v50 = vpop.f32.mrf.mxu2 }
 0x1c9   : > { %v1191_v5 = vadd.f32 %v1135_v50, %v897_v12  ;;  %v2822_v12 = vld [vmem:[%s4116_s15 + $0x30] sm:$0xff] }
 0x1ca   : > { %v899_v63 = vpop.f32.mrf.mxu1  ;;  %v4936_v46 = vpop.f32.mrf.mxu3  ;;  %2884 = vperm.xlu0 %4025, %v2822_v12  }
 0x1cb   : > { %v1401_v42 = vadd.f32 %v1345_v41, %v1191_v5  ;;  %v900_v23 = vadd.f32 %v899_v63, %v5426_v34  ;;  %v5428_v5 = vld [vmem:[#allocation21_spill] sm:$0xff] }
 0x1cc   : > { %v2225_v39 = vrot.slane %v5428_v5, 2 }
 0x1cd   : > { %v1652_v53 = vpop.f32.mrf.mxu0  ;;  %1857 = vmatmul.bf16.gmra.mxu1 %v1742_v28  ;;  %2067 = vmatmul.bf16.gmra.mxu2 %v1744_v3  ;;  %v4938_v0 = vadd.f32 %v1649_v62, %v1401_v42  ;;  %v4036_v62 = vld [vmem:[%s4106_s30 + $0x30] sm:$0xff] }
 0x1ce   : > { %v1745_v50 = vrot.slane %v4036_v62, 2  ;;  %v5429_v42 = vld [vmem:[#allocation16_spill] sm:$0xff] }
 0x1cf   : > { %5425 = vst [vmem:[#allocation31_spill] sm:$0xff] %v4938_v0  ;;  %2381 = vmatmul.bf16.gmra.mxu3 %v2224_v8  ;;  %v2226_v63 = vrot.slane %v5429_v42, 3  ;;  %v2513_v8 = vrot.slane %v4036_v62, 3  ;;  %v5431_v62 = vld [vmem:[#allocation36_spill] sm:$0xff] }
 0x1d0   : > { %2627 = vmatmul.bf16.gmra.mxu0 %v2512_v31  ;;  %v1138_v49 = vpop.f32.mrf.mxu2  ;;  %v5430_v31 = vld [vmem:[#allocation33_spill] sm:$0xff] }
 0x1d1   : > { %v1192_v21 = vadd.f32 %v1138_v49, %v900_v23  ;;  %v2227_v0 = vor.u32 %v2226_v63, %v2225_v39 }
 0x1d2   : > { %v901_v41 = vpop.f32.mrf.mxu1  ;;  %v4943_v1 = vpop.f32.mrf.mxu3 }
 0x1d3   : > { %v1402_v22 = vadd.f32 %v1348_v19, %v1192_v21  ;;  %v902_v34 = vadd.f32 %v901_v41, %v5430_v31  ;;  %v1746_v21 = vsel %vm1735_vm4, %v1743_v58, %v1745_v50  ;;  %v2228_v58 = vsel %vm2201_vm3, %v2223_v37, %v2227_v0  ;;  %v2821_v31 = vld [vmem:[%s4116_s15 + $0x28] sm:$0xff]  ;;  %v5434_v37 = vld [vmem:[#allocation12_spill] sm:$0xff] }
 0x1d5   : > { %v1654_v54 = vpop.f32.mrf.mxu0  ;;  %v4945_v28 = vadd.f32 %v1652_v53, %v1402_v22  ;;  %v2514_v53 = vsel %vm2505_vm5, %v2511_v11, %v2513_v8  ;;  %v2820_v22 = vld [vmem:[%s4116_s15 + $0x20] sm:$0xff] }
 0x1d6   : > { %2874 = vperm.xlu2 %4027, %v2820_v22  }
 0x1d7   : > { %5427 = vst [vmem:[#allocation34_spill] sm:$0xff] %v4945_v28  ;;  %v2823_v28 = vld [vmem:[%s4116_s15 + $0x38] sm:$0xff] }
 0x1d8   : > { %v1140_v23 = vpop.f32.mrf.mxu2  ;;  %2889 = vperm.xlu1 %4026, %v2823_v28  }
 0x1d9   : > { %v1193_v19 = vadd.f32 %v1140_v23, %v902_v34  ;;  %v5433_v23 = vld [vmem:[#allocation14_spill] sm:$0xff] }
 0x1da   : > { %v904_v49 = vpop.f32.mrf.mxu1  ;;  %v4955_v40 = vpop.f32.mrf.mxu3 }
 0x1db   : > { %v1403_v12 = vadd.f32 %v1350_v18, %v1193_v19  ;;  %v905_v18 = vadd.f32 %v904_v49, %v5431_v62  ;;  %v2229_v19 = vrot.slane %v5433_v23, 2  ;;  %v5435_v49 = vld [vmem:[#allocation38_spill] sm:$0xff]  ;;  %v5437_v23 = vld [vmem:[#allocation40_spill] sm:$0xff] }
 0x1dd   : > { %v1657_v52 = vpop.f32.mrf.mxu0  ;;  %1862 = vmatmul.bf16.gmra.mxu1 %v1744_v3  ;;  %2072 = vmatmul.bf16.gmra.mxu2 %v1746_v21  ;;  %v4957_v41 = vadd.f32 %v1654_v54, %v1403_v12  ;;  %v4037_v54 = vld [vmem:[%s4106_s30 + $0x38] sm:$0xff]  ;;  %v2230_v12 = vrot.slane %v5434_v37, 3 }
 0x1de   : > { %2879 = vperm.xlu2 %4027, %v2821_v31   ;;  %v1747_v28 = vrot.slane %v4037_v54, 2  ;;  %v2515_v22 = vrot.slane %v4037_v54, 3 }
 0x1df   : > { %2386 = vmatmul.bf16.gmra.mxu3 %v2228_v58 }
 0x1e0   : > { %2632 = vmatmul.bf16.gmra.mxu0 %v2514_v53  ;;  %v1143_v5 = vpop.f32.mrf.mxu2 }
 0x1e1   : > { %v1194_v39 = vadd.f32 %v1143_v5, %v905_v18  ;;  %v1748_v18 = vsel %vm1735_vm4, %v1745_v50, %v1747_v28  ;;  %v2231_v5 = vor.u32 %v2230_v12, %v2229_v19 }
 0x1e2   : > { %v906_v11 = vpop.f32.mrf.mxu1  ;;  %v4962_v34 = vpop.f32.mrf.mxu3 }
 0x1e3   : > { %v1404_v42 = vadd.f32 %v1353_v7, %v1194_v39  ;;  %v907_v53 = vadd.f32 %v906_v11, %v5435_v49  ;;  %v2232_v54 = vsel %vm2201_vm3, %v2227_v0, %v2231_v5  ;;  %v2826_v49 = vld [vmem:[%s4116_s15 + $0x50] sm:$0xff] }
 0x1e4   : > { %2904 = vperm.xlu1 %4026, %v2826_v49  }
 0x1e5   : > { %v1659_v63 = vpop.f32.mrf.mxu0  ;;  %v4964_v3 = vadd.f32 %v1657_v52, %v1404_v42  ;;  %v2516_v52 = vsel %vm2505_vm5, %v2513_v8, %v2515_v22  ;;  %v2825_v42 = vld [vmem:[%s4116_s15 + $0x48] sm:$0xff] }
 0x1e6   : > { %2899 = vperm.xlu0 %4025, %v2825_v42  }
 0x1e7   : > { %5432 = vst [vmem:[#allocation17_spill] sm:$0xff] %v4964_v3 }
 0x1e8   : > { %v1145_v58 = vpop.f32.mrf.mxu2 }
 0x1e9   : > { %v1195_v62 = vadd.f32 %v1145_v58, %v907_v53 }
 0x1ea   : > { %v909_v7 = vpop.f32.mrf.mxu1  ;;  %v1365_v3 = vpop.f32.mrf.mxu3 }
 0x1eb   : > { %v1405_v39 = vadd.f32 %v4936_v46, %v1195_v62  ;;  %v910_v50 = vadd.f32 %v909_v7, %v5437_v23  ;;  %v5439_v62 = vld [vmem:[#allocation7_spill] sm:$0xff] }
 0x1ec   : > { %v2233_v0 = vrot.slane %v5439_v62, 2  ;;  %v5442_v62 = vld [vmem:[#allocation23_spill] sm:$0xff] }
 0x1ed   : > { %v1662_v31 = vpop.f32.mrf.mxu0  ;;  %1867 = vmatmul.bf16.gmra.mxu1 %v1746_v21  ;;  %2077 = vmatmul.bf16.gmra.mxu2 %v1748_v18  ;;  %v4974_v11 = vadd.f32 %v1659_v63, %v1405_v39  ;;  %v4038_v63 = vld [vmem:[%s4106_s30 + $0x40] sm:$0xff]  ;;  %v5440_v39 = vld [vmem:[#allocation3_spill] sm:$0xff] }
 0x1ee   : > { %v1749_v58 = vrot.slane %v4038_v63, 2  ;;  %v2234_v7 = vrot.slane %v5440_v39, 3 }
 0x1ef   : > { %5436 = vst [vmem:[#allocation20_spill] sm:$0xff] %v4974_v11  ;;  %2391 = vmatmul.bf16.gmra.mxu3 %v2232_v54  ;;  %v2517_v54 = vrot.slane %v4038_v63, 3 }
 0x1f0   : > { %2637 = vmatmul.bf16.gmra.mxu0 %v2516_v52  ;;  %v1148_v19 = vpop.f32.mrf.mxu2  ;;  %v5441_v52 = vld [vmem:[#allocation42_spill] sm:$0xff] }
 0x1f1   : > { %v1196_v37 = vadd.f32 %v1148_v19, %v910_v50  ;;  %v1750_v19 = vsel %vm1735_vm4, %v1747_v28, %v1749_v58 }
 0x1f2   : > { %v911_v46 = vpop.f32.mrf.mxu1  ;;  %v4980_v53 = vpop.f32.mrf.mxu3 }
 0x1f3   : > { %v1406_v8 = vadd.f32 %v4943_v1, %v1196_v37  ;;  %v912_v42 = vadd.f32 %v911_v46, %v5441_v52  ;;  %v2235_v37 = vor.u32 %v2234_v7, %v2233_v0  ;;  %v2828_v52 = vld [vmem:[%s4116_s15 + $0x60] sm:$0xff] }
 0x1f4   : > { %2914 = vperm.xlu0 %4025, %v2828_v52  }
 0x1f5   : > { %v1664_v12 = vpop.f32.mrf.mxu0  ;;  %v4982_v21 = vadd.f32 %v1662_v31, %v1406_v8  ;;  %v2518_v31 = vsel %vm2505_vm5, %v2515_v22, %v2517_v54  ;;  %v2824_v8 = vld [vmem:[%s4116_s15 + $0x40] sm:$0xff]  ;;  %v2236_v63 = vsel %vm2201_vm3, %v2231_v5, %v2235_v37  ;;  %v2237_v5 = vrot.slane %v4276_v60, 2 }
 0x1f6   : > { %2894 = vperm.xlu2 %4027, %v2824_v8  }
 0x1f7   : > { %5438 = vst [vmem:[#allocation18_spill] sm:$0xff] %v4982_v21 }
 0x1f8   : > { %v1150_v23 = vpop.f32.mrf.mxu2 }
 0x1f9   : > { %v1197_v50 = vadd.f32 %v1150_v23, %v912_v42 }
 0x1fa   : > { %v914_v1 = vpop.f32.mrf.mxu1  ;;  %v1370_v21 = vpop.f32.mrf.mxu3 }
 0x1fb   : > { %v1407_v49 = vadd.f32 %v4955_v40, %v1197_v50  ;;  %v915_v28 = vadd.f32 %v914_v1, %v5442_v62  ;;  %v5444_v50 = vld [vmem:[#allocation6_spill] sm:$0xff] }
 0x1fc   : > { %v2238_v1 = vrot.slane %v5444_v50, 3 }
 0x1fd   : > { %v1667_v11 = vpop.f32.mrf.mxu0  ;;  %1872 = vmatmul.bf16.gmra.mxu1 %v1748_v18  ;;  %2082 = vmatmul.bf16.gmra.mxu2 %v1750_v19  ;;  %v4992_v46 = vadd.f32 %v1664_v12, %v1407_v49  ;;  %v4039_v12 = vld [vmem:[%s4106_s30 + $0x48] sm:$0xff]  ;;  %v5445_v49 = vld [vmem:[#allocation25_spill] sm:$0xff] }
 0x1fe   : > { %v1751_v23 = vrot.slane %v4039_v12, 2  ;;  %v2519_v8 = vrot.slane %v4039_v12, 3  ;;  %v5446_v12 = vld [vmem:[#allocation27_spill] sm:$0xff] }
 0x1ff   : > { %2396 = vmatmul.bf16.gmra.mxu3 %v2236_v63 }
 0x200   : > { %2642 = vmatmul.bf16.gmra.mxu0 %v2518_v31  ;;  %v1153_v0 = vpop.f32.mrf.mxu2 }
 0x201   : > { %v1198_v39 = vadd.f32 %v1153_v0, %v915_v28  ;;  %v1752_v28 = vsel %vm1735_vm4, %v1749_v58, %v1751_v23  ;;  %v2239_v0 = vor.u32 %v2238_v1, %v2237_v5 }
 0x202   : > { %v916_v40 = vpop.f32.mrf.mxu1  ;;  %v4998_v42 = vpop.f32.mrf.mxu3 }
 0x203   : > { %v1408_v22 = vadd.f32 %v4962_v34, %v1198_v39  ;;  %v917_v31 = vadd.f32 %v916_v40, %v5445_v49  ;;  %v2240_v40 = vsel %vm2201_vm3, %v2235_v37, %v2239_v0  ;;  %v2827_v49 = vld [vmem:[%s4116_s15 + $0x58] sm:$0xff]  ;;  %v2241_v37 = vrot.slane %v4381_v29, 2 }
 0x204   : > { %2909 = vperm.xlu2 %4027, %v2827_v49  }
 0x205   : > { %v1669_v7 = vpop.f32.mrf.mxu0  ;;  %v5000_v18 = vadd.f32 %v1667_v11, %v1408_v22  ;;  %v2520_v11 = vsel %vm2505_vm5, %v2517_v54, %v2519_v8  ;;  %v2829_v22 = vld [vmem:[%s4116_s15 + $0x68] sm:$0xff] }
 0x206   : > { %2919 = vperm.xlu1 %4026, %v2829_v22  }
 0x207   : > { %5443 = vst [vmem:[#allocation37_spill] sm:$0xff] %v5000_v18 }
 0x208   : > { %v1155_v63 = vpop.f32.mrf.mxu2 }
 0x209   : > { %v1199_v62 = vadd.f32 %v1155_v63, %v917_v31 }
 0x20a   : > { %v919_v34 = vpop.f32.mrf.mxu1  ;;  %v1375_v18 = vpop.f32.mrf.mxu3 }
 0x20b   : > { %v1409_v39 = vadd.f32 %v1365_v3, %v1199_v62  ;;  %v920_v50 = vadd.f32 %v919_v34, %v5446_v12  ;;  %v2242_v62 = vrot.slane %v4279_v61, 3  ;;  %v5447_v34 = vld [vmem:[#allocation29_spill] sm:$0xff] }
 0x20d   : > { %v1672_v52 = vpop.f32.mrf.mxu0  ;;  %1877 = vmatmul.bf16.gmra.mxu1 %v1750_v19  ;;  %2087 = vmatmul.bf16.gmra.mxu2 %v1752_v28  ;;  %v5009_v60 = vadd.f32 %v1669_v7, %v1409_v39  ;;  %v4040_v7 = vld [vmem:[%s4106_s30 + $0x50] sm:$0xff] }
 0x20e   : > { %v1753_v63 = vrot.slane %v4040_v7, 2 }
 0x20f   : > { %2401 = vmatmul.bf16.gmra.mxu3 %v2240_v40 }
 0x210   : > { %2647 = vmatmul.bf16.gmra.mxu0 %v2520_v11  ;;  %v1158_v58 = vpop.f32.mrf.mxu2  ;;  %v2521_v11 = vrot.slane %v4040_v7, 3  ;;  %v1754_v12 = vsel %vm1735_vm4, %v1751_v23, %v1753_v63 }
 0x211   : > { %v1200_v5 = vadd.f32 %v1158_v58, %v920_v50  ;;  %v2243_v50 = vor.u32 %v2242_v62, %v2241_v37 }
 0x212   : > { %v921_v3 = vpop.f32.mrf.mxu1  ;;  %v5015_v31 = vpop.f32.mrf.mxu3 }
 0x213   : > { %v1410_v54 = vadd.f32 %v4980_v53, %v1200_v5  ;;  %v922_v39 = vadd.f32 %v921_v3, %v5447_v34  ;;  %v2244_v29 = vsel %vm2201_vm3, %v2239_v0, %v2243_v50  ;;  %v5448_v3 = vld [vmem:[#allocation32_spill] sm:$0xff]  ;;  %v2832_v34 = vld [vmem:[%s4116_s15 + $0x80] sm:$0xff]  ;;  %v2245_v0 = vrot.slane %v4462_v4, 2 }
 0x214   : > { %2934 = vperm.xlu1 %4026, %v2832_v34  }
 0x215   : > { %v1674_v1 = vpop.f32.mrf.mxu0  ;;  %v5017_v19 = vadd.f32 %v1672_v52, %v1410_v54  ;;  %v2522_v52 = vsel %vm2505_vm5, %v2519_v8, %v2521_v11  ;;  %v2831_v54 = vld [vmem:[%s4116_s15 + $0x78] sm:$0xff] }
 0x216   : > { %2929 = vperm.xlu0 %4025, %v2831_v54  }
 0x218   : > { %v1160_v22 = vpop.f32.mrf.mxu2 }
 0x219   : > { %v1201_v40 = vadd.f32 %v1160_v22, %v922_v39 }
 0x21a   : > { %v924_v53 = vpop.f32.mrf.mxu1  ;;  %v5026_v49 = vpop.f32.mrf.mxu3 }
 0x21b   : > { %v1411_v58 = vadd.f32 %v1370_v21, %v1201_v40  ;;  %v925_v23 = vadd.f32 %v924_v53, %v5448_v3  ;;  %v2246_v40 = vrot.slane %v4384_v32, 3  ;;  %v5449_v53 = vld [vmem:[#allocation35_spill] sm:$0xff] }
 0x21d   : > { %v1677_v5 = vpop.f32.mrf.mxu0  ;;  %1882 = vmatmul.bf16.gmra.mxu1 %v1752_v28  ;;  %2092 = vmatmul.bf16.gmra.mxu2 %v1754_v12  ;;  %v5028_v61 = vadd.f32 %v1674_v1, %v1411_v58  ;;  %v4041_v1 = vld [vmem:[%s4106_s30 + $0x58] sm:$0xff] }
 0x21e   : > { %v1755_v22 = vrot.slane %v4041_v1, 2 }
 0x21f   : > { %2406 = vmatmul.bf16.gmra.mxu3 %v2244_v29 }
 0x220   : > { %2652 = vmatmul.bf16.gmra.mxu0 %v2522_v52  ;;  %v1163_v7 = vpop.f32.mrf.mxu2  ;;  %v2523_v52 = vrot.slane %v4041_v1, 3  ;;  %v1756_v3 = vsel %vm1735_vm4, %v1753_v63, %v1755_v22 }
 0x221   : > { %v1202_v21 = vadd.f32 %v1163_v7, %v925_v23  ;;  %v2247_v23 = vor.u32 %v2246_v40, %v2245_v0  ;;  %v2834_v40 = vld [vmem:[%s4116_s15 + $0x90] sm:$0xff] }
 0x222   : > { %v926_v37 = vpop.f32.mrf.mxu1  ;;  %v5034_v39 = vpop.f32.mrf.mxu3  ;;  %2944 = vperm.xlu0 %4025, %v2834_v40  }
 0x223   : > { %v1412_v8 = vadd.f32 %v4998_v42, %v1202_v21  ;;  %v927_v58 = vadd.f32 %v926_v37, %v5449_v53  ;;  %v2248_v4 = vsel %vm2201_vm3, %v2243_v50, %v2247_v23  ;;  %v2249_v50 = vrot.slane %v4495_v27, 2 }
 0x225   : > { %v1679_v62 = vpop.f32.mrf.mxu0  ;;  %v5036_v28 = vadd.f32 %v1677_v5, %v1412_v8  ;;  %v2524_v5 = vsel %vm2505_vm5, %v2521_v11, %v2523_v52  ;;  %v2830_v8 = vld [vmem:[%s4116_s15 + $0x70] sm:$0xff]  ;;  %v2855_v11 = vpop.permute.xlu0 %2854 }
 0x226   : > { %2924 = vperm.xlu2 %4027, %v2830_v8   ;;  %v2835_v8 = vld [vmem:[%s4116_s15 + $0x98] sm:$0xff] }
 0x227   : > { %2949 = vperm.xlu1 %4026, %v2835_v8  }
 0x228   : > { %v1165_v54 = vpop.f32.mrf.mxu2 }
 0x229   : > { %v1203_v29 = vadd.f32 %v1165_v54, %v927_v58 }
 0x22a   : > { %v1848_v42 = vpop.f32.mrf.mxu1  ;;  %v5045_v34 = vpop.f32.mrf.mxu3 }
 0x22b   : > { %v1413_v7 = vadd.f32 %v1375_v18, %v1203_v29  ;;  %v1938_v63 = vadd.f32 %v1848_v42, %v4696_v44  ;;  %v2250_v44 = vrot.slane %v4465_v45, 3 }
 0x22d   : > { %v2618_v21 = vpop.f32.mrf.mxu0  ;;  %1887 = vmatmul.bf16.gmra.mxu1 %v1754_v12  ;;  %2097 = vmatmul.bf16.gmra.mxu2 %v1756_v3  ;;  %v5047_v32 = vadd.f32 %v1679_v62, %v1413_v7  ;;  %v5056_v62 = vld [vmem:[%s4106_s30 + $0x60] sm:$0xff] }
 0x22e   : > { %v1757_v58 = vrot.slane %v5056_v62, 2  ;;  %v2525_v29 = vrot.slane %v5056_v62, 3  ;;  %v2843_v62 = vld [vmem:[%s4116_s15 + $0xd8] sm:$0xff] }
 0x22f   : > { %2411 = vmatmul.bf16.gmra.mxu3 %v2248_v4 }
 0x230   : > { %2657 = vmatmul.bf16.gmra.mxu0 %v2524_v5  ;;  %v2058_v37 = vpop.f32.mrf.mxu2  ;;  %v1758_v4 = vsel %vm1735_vm4, %v1755_v22, %v1757_v58 }
 0x231   : > { %v2148_v18 = vadd.f32 %v2058_v37, %v1938_v63  ;;  %v5067_v63 = vor.u32 %v2250_v44, %v2249_v50  ;;  %v2860_v37 = vpop.permute.xlu0 %2859  ;;  %v2837_v50 = vld [vmem:[%s4116_s15 + $0xa8] sm:$0xff] }
 0x232   : > { %v1850_v1 = vpop.f32.mrf.mxu1  ;;  %v5053_v12 = vpop.f32.mrf.mxu3  ;;  %2959 = vperm.xlu0 %4025, %v2837_v50  }
 0x233   : > { %v2452_v53 = vadd.f32 %v5015_v31, %v2148_v18  ;;  %v1939_v54 = vadd.f32 %v1850_v1, %v4703_v20  ;;  %v2526_v20 = vsel %vm2505_vm5, %v2523_v52, %v2525_v29  ;;  %v2252_v1 = vsel %vm2201_vm3, %v2247_v23, %v5067_v63 }
 0x235   : > { %v2620_v0 = vpop.f32.mrf.mxu0  ;;  %v2708_v42 = vadd.f32 %v2618_v21, %v2452_v53 }
 0x237   : > { %v3032_v21 = vmul.f32 %v2855_v11, %v2708_v42 }
 0x238   : > { %v2060_v7 = vpop.f32.mrf.mxu2 }
 0x239   : > { %v2149_v5 = vadd.f32 %v2060_v7, %v1939_v54  ;;  %v3113_v52 = vmul.f32 %v3032_v21, %v2708_v42 }
 0x23a   : > { %v1853_v31 = vpop.f32.mrf.mxu1  ;;  %v5073_v18 = vpop.f32.mrf.mxu3 }
 0x23b   : > { %v2453_v27 = vadd.f32 %v5026_v49, %v2149_v5  ;;  %v1940_v49 = vadd.f32 %v1853_v31, %v4721_v9  ;;  %v2865_v5 = vpop.permute.xlu1 %2864  ;;  %v2833_v31 = vld [vmem:[%s4116_s15 + $0x88] sm:$0xff] }
 0x23c   : > { %2939 = vperm.xlu2 %4027, %v2833_v31  }
 0x23d   : > { %v2623_v45 = vpop.f32.mrf.mxu0  ;;  %1892 = vmatmul.bf16.gmra.mxu1 %v1756_v3  ;;  %2102 = vmatmul.bf16.gmra.mxu2 %v1758_v4  ;;  %v2709_v22 = vadd.f32 %v2620_v0, %v2453_v27  ;;  %v2838_v0 = vld [vmem:[%s4116_s15 + $0xb0] sm:$0xff] }
 0x23e   : > { %2964 = vperm.xlu1 %4026, %v2838_v0  }
 0x23f   : > { %v3886_v40 = vpack.c.bf16 %v2709_v22, %v2708_v42  ;;  %v3033_v53 = vmul.f32 %v2860_v37, %v2709_v22  ;;  %2416 = vmatmul.bf16.gmra.mxu3 %v2252_v1  ;;  %v2253_v37 = vrot.slane %v4213_v35, 2 }
 0x240   : > { %2662 = vmatmul.bf16.gmra.mxu0 %v2526_v20  ;;  %v2063_v44 = vpop.f32.mrf.mxu2  ;;  %v5086_v20 = vld [vmem:[%s4106_s30 + $0x68] sm:$0xff] }
 0x241   : > { %3887 = vst [vmem:[%s4121_s18] sm:$0xff] %v3886_v40   ;;  %v3069_v11 = vadd.f32 %v3033_v53, %v3032_v21  ;;  %v3114_v3 = vmul.f32 %v3033_v53, %v2709_v22  ;;  %v2150_v54 = vadd.f32 %v2063_v44, %v1940_v49  ;;  %v1759_v21 = vrot.slane %v5086_v20, 2  ;;  %v2840_v40 = vld [vmem:[%s4116_s15 + $0xc0] sm:$0xff] }
 0x242   : > { %v1855_v7 = vpop.f32.mrf.mxu1  ;;  %v5083_v27 = vpop.f32.mrf.mxu3  ;;  %v2254_v22 = vrot.slane %v4196_v25, 3  ;;  %2974 = vperm.xlu0 %4025, %v2840_v40   ;;  %v2836_v40 = vld [vmem:[%s4116_s15 + $0xa0] sm:$0xff] }
 0x243   : > { %v3149_v23 = vadd.f32 %v3114_v3, %v3113_v52  ;;  %v2454_v9 = vadd.f32 %v5034_v39, %v2150_v54  ;;  %v1941_v1 = vadd.f32 %v1855_v7, %v4731_v57  ;;  %v2527_v39 = vrot.slane %v5086_v20, 3  ;;  %v2870_v7 = vpop.permute.xlu1 %2869 }
 0x244   : > { %v1760_v35 = vsel %vm1735_vm4, %v1757_v58, %v1759_v21  ;;  %v5100_v25 = vor.u32 %v2254_v22, %v2253_v37  ;;  %2954 = vperm.xlu2 %4027, %v2836_v40  }
 0x245   : > { %v2625_v8 = vpop.f32.mrf.mxu0  ;;  %v2710_v42 = vadd.f32 %v2623_v45, %v2454_v9  ;;  %v2841_v45 = vld [vmem:[%s4116_s15 + $0xc8] sm:$0xff] }
 0x246   : > { %2979 = vperm.xlu1 %4026, %v2841_v45   ;;  %v2257_v45 = vrot.slane %v4307_v26, 2 }
 0x247   : > { %v3034_v49 = vmul.f32 %v2865_v5, %v2710_v42 }
 0x248   : > { %v2065_v53 = vpop.f32.mrf.mxu2 }
 0x249   : > { %v3070_v50 = vadd.f32 %v3069_v11, %v3034_v49  ;;  %v3115_v52 = vmul.f32 %v3034_v49, %v2710_v42  ;;  %v2151_v44 = vadd.f32 %v2065_v53, %v1941_v1  ;;  %v2528_v11 = vsel %vm2505_vm5, %v2525_v29, %v2527_v39  ;;  %v2875_v49 = vpop.permute.xlu2 %2874 }
 0x24a   : > { %v1858_v3 = vpop.f32.mrf.mxu1  ;;  %v5108_v5 = vpop.f32.mrf.mxu3  ;;  %2989 = vperm.xlu0 %4025, %v2843_v62  }
 0x24b   : > { %v3150_v57 = vadd.f32 %v3149_v23, %v3115_v52  ;;  %v2455_v54 = vadd.f32 %v5045_v34, %v2151_v44  ;;  %v2256_v34 = vsel %vm2201_vm3, %v5067_v63, %v5100_v25  ;;  %v1942_v23 = vadd.f32 %v1858_v3, %v4740_v47  ;;  %v5122_v44 = vld [vmem:[%s4106_s30 + $0x70] sm:$0xff] }
 0x24c   : > { %v2258_v3 = vrot.slane %v5399_v24, 3 }
 0x24d   : > { %v2628_v0 = vpop.f32.mrf.mxu0  ;;  %1897 = vmatmul.bf16.gmra.mxu1 %v1758_v4  ;;  %2107 = vmatmul.bf16.gmra.mxu2 %v1760_v35  ;;  %v2711_v58 = vadd.f32 %v2625_v8, %v2455_v54  ;;  %v2844_v8 = vld [vmem:[%s4116_s15 + $0xe0] sm:$0xff] }
 0x24e   : > { %2994 = vperm.xlu1 %4026, %v2844_v8   ;;  %v5136_v24 = vor.u32 %v2258_v3, %v2257_v45 }
 0x24f   : > { %v3891_v9 = vpack.c.bf16 %v2711_v58, %v2710_v42  ;;  %v3035_v31 = vmul.f32 %v2870_v7, %v2711_v58  ;;  %2421 = vmatmul.bf16.gmra.mxu3 %v2256_v34 }
 0x250   : > { %2667 = vmatmul.bf16.gmra.mxu0 %v2528_v11  ;;  %v2068_v37 = vpop.f32.mrf.mxu2  ;;  %v2846_v11 = vld [vmem:[%s4116_s15 + $0xf0] sm:$0xff] }
 0x251   : > { %3974 = vst [vmem:[%s4121_s18 + $0x8] sm:$0xff] %v3891_v9   ;;  %v3071_v29 = vadd.f32 %v3070_v50, %v3035_v31  ;;  %v3116_v4 = vmul.f32 %v3035_v31, %v2711_v58  ;;  %v2152_v22 = vadd.f32 %v2068_v37, %v1942_v23  ;;  %v1761_v50 = vrot.slane %v5122_v44, 2  ;;  %v2847_v23 = vld [vmem:[%s4116_s15 + $0xf8] sm:$0xff] }
 0x252   : > { %v1860_v1 = vpop.f32.mrf.mxu1  ;;  %v5119_v53 = vpop.f32.mrf.mxu3  ;;  %3004 = vperm.xlu0 %4025, %v2846_v11   ;;  %v5159_v11 = vld [vmem:[%s4106_s30 + $0x78] sm:$0xff] }
 0x253   : > { %v3151_v63 = vadd.f32 %v3150_v57, %v3116_v4  ;;  %v2456_v47 = vadd.f32 %v5053_v12, %v2152_v22  ;;  %v1943_v54 = vadd.f32 %v1860_v1, %v4747_v2  ;;  %v2529_v12 = vrot.slane %v5122_v44, 3  ;;  %v2880_v4 = vpop.permute.xlu2 %2879  ;;  %v2849_v1 = vld [vmem:[%s4116_s15 + $0x108] sm:$0xff] }
 0x254   : > { %v1762_v26 = vsel %vm1735_vm4, %v1759_v21, %v1761_v50 }
 0x255   : > { %v2630_v42 = vpop.f32.mrf.mxu0  ;;  %v2712_v52 = vadd.f32 %v2628_v0, %v2456_v47  ;;  %v2530_v37 = vsel %vm2505_vm5, %v2527_v39, %v2529_v12 }
 0x256   : > { %3009 = vperm.xlu1 %4026, %v2847_v23  }
 0x257   : > { %v3036_v57 = vmul.f32 %v2875_v49, %v2712_v52 }
 0x258   : > { %v2070_v7 = vpop.f32.mrf.mxu2 }
 0x259   : > { %v3072_v58 = vadd.f32 %v3071_v29, %v3036_v57  ;;  %v3117_v34 = vmul.f32 %v3036_v57, %v2712_v52  ;;  %v2153_v0 = vadd.f32 %v2070_v7, %v1943_v54  ;;  %v2839_v29 = vld [vmem:[%s4116_s15 + $0xb8] sm:$0xff]  ;;  %v1763_v7 = vrot.slane %v5159_v11, 2 }
 0x25a   : > { %v1863_v9 = vpop.f32.mrf.mxu1  ;;  %v5145_v22 = vpop.f32.mrf.mxu3  ;;  %2969 = vperm.xlu2 %4027, %v2839_v29   ;;  %3019 = vperm.xlu0 %4025, %v2849_v1  }
 0x25b   : > { %v3152_v2 = vadd.f32 %v3151_v63, %v3117_v34  ;;  %v2457_v31 = vadd.f32 %v5073_v18, %v2153_v0  ;;  %v2260_v18 = vsel %vm2201_vm3, %v5100_v25, %v5136_v24  ;;  %v1944_v8 = vadd.f32 %v1863_v9, %v4762_v36  ;;  %v2842_v36 = vld [vmem:[%s4116_s15 + $0xd0] sm:$0xff] }
 0x25c   : > { %v2262_v34 = vrot.slane %v5402_v17, 3 }
 0x25d   : > { %v2633_v62 = vpop.f32.mrf.mxu0  ;;  %1902 = vmatmul.bf16.gmra.mxu1 %v1760_v35  ;;  %2112 = vmatmul.bf16.gmra.mxu2 %v1762_v26  ;;  %v2713_v21 = vadd.f32 %v2630_v42, %v2457_v31  ;;  %v2850_v42 = vld [vmem:[%s4116_s15 + $0x110] sm:$0xff] }
 0x25e   : > { %3024 = vperm.xlu1 %4026, %v2850_v42  }
 0x25f   : > { %v3896_v20 = vpack.c.bf16 %v2713_v21, %v2712_v52  ;;  %v3037_v39 = vmul.f32 %v2880_v4, %v2713_v21  ;;  %2426 = vmatmul.bf16.gmra.mxu3 %v2260_v18  ;;  %v2885_v52 = vpop.permute.xlu0 %2884  ;;  %v2845_v18 = vld [vmem:[%s4116_s15 + $0xe8] sm:$0xff] }
 0x260   : > { %2672 = vmatmul.bf16.gmra.mxu0 %v2530_v37  ;;  %v2073_v49 = vpop.f32.mrf.mxu2 }
 0x261   : > { %3975 = vst [vmem:[%s4121_s18 + $0x10] sm:$0xff] %v3896_v20   ;;  %v3073_v63 = vadd.f32 %v3072_v58, %v3037_v39  ;;  %v3118_v35 = vmul.f32 %v3037_v39, %v2713_v21  ;;  %v2154_v47 = vadd.f32 %v2073_v49, %v1944_v8  ;;  %v2261_v58 = vrot.slane %v5401_v55, 2  ;;  %v2890_v8 = vpop.permute.xlu1 %2889 }
 0x262   : > { %v1865_v40 = vpop.f32.mrf.mxu1  ;;  %v5156_v54 = vpop.f32.mrf.mxu3  ;;  %2984 = vperm.xlu2 %4027, %v2842_v36  }
 0x263   : > { %v3153_v45 = vadd.f32 %v3152_v2, %v3118_v35  ;;  %v2458_v25 = vadd.f32 %v5083_v27, %v2154_v47  ;;  %v1945_v0 = vadd.f32 %v1865_v40, %v4772_v14  ;;  %v2531_v27 = vrot.slane %v5159_v11, 3 }
 0x264   : > { %v2263_v4 = vor.u32 %v2262_v34, %v2261_v58  ;;  %v5451_v11 = vshll.u32 %v5400_v33, 16 }
 0x265   : > { %v2635_v3 = vpop.f32.mrf.mxu0  ;;  %v2714_v57 = vadd.f32 %v2633_v62, %v2458_v25  ;;  %v1764_v62 = vsel %vm1735_vm4, %v1761_v50, %v1763_v7  ;;  %v2532_v14 = vsel %vm2505_vm5, %v2529_v12, %v2531_v27  ;;  %v2895_v25 = vpop.permute.xlu2 %2894 }
 0x266   : > { %v2264_v50 = vsel %vm2201_vm3, %v5136_v24, %v2263_v4  ;;  %v5185_v24 = vld [vmem:[%s4106_s30 + $0x80] sm:$0xff]  ;;  %v2266_v58 = vrot.slane %v5451_v11, 3 }
 0x267   : > { %v3038_v23 = vmul.f32 %v2885_v52, %v2714_v57  ;;  %v1765_v36 = vrot.slane %v5185_v24, 2  ;;  %v5450_v52 = vshrl.u32 %v5400_v33, 16 }
 0x268   : > { %v2075_v9 = vpop.f32.mrf.mxu2 }
 0x269   : > { %v3074_v2 = vadd.f32 %v3073_v63, %v3038_v23  ;;  %v3119_v31 = vmul.f32 %v3038_v23, %v2714_v57  ;;  %v2155_v37 = vadd.f32 %v2075_v9, %v1945_v0  ;;  %v2533_v0 = vrot.slane %v5185_v24, 3 }
 0x26a   : > { %v1868_v29 = vpop.f32.mrf.mxu1  ;;  %v5174_v20 = vpop.f32.mrf.mxu3  ;;  %2999 = vperm.xlu2 %4027, %v2845_v18   ;;  %v2851_v18 = vld [vmem:[%s4116_s15 + $0x118] sm:$0xff] }
 0x26b   : > { %v3154_v21 = vadd.f32 %v3153_v45, %v3119_v31  ;;  %v2459_v55 = vadd.f32 %v5108_v5, %v2155_v37  ;;  %v1946_v5 = vadd.f32 %v1868_v29, %v4784_v13  ;;  %v2848_v45 = vld [vmem:[%s4116_s15 + $0x100] sm:$0xff]  ;;  %v1766_v29 = vsel %vm1735_vm4, %v1763_v7, %v1765_v36 }
 0x26d   : > { %v2638_v17 = vpop.f32.mrf.mxu0  ;;  %1907 = vmatmul.bf16.gmra.mxu1 %v1762_v26  ;;  %2117 = vmatmul.bf16.gmra.mxu2 %v1764_v62  ;;  %v2715_v39 = vadd.f32 %v2635_v3, %v2459_v55 }
 0x26f   : > { %v3901_v1 = vpack.c.bf16 %v2715_v39, %v2714_v57  ;;  %v3039_v49 = vmul.f32 %v2890_v8, %v2715_v39  ;;  %2431 = vmatmul.bf16.gmra.mxu3 %v2264_v50  ;;  %v2265_v57 = vrot.slane %v5450_v52, 2 }
 0x270   : > { %2677 = vmatmul.bf16.gmra.mxu0 %v2532_v14  ;;  %v2078_v44 = vpop.f32.mrf.mxu2  ;;  %v2534_v14 = vsel %vm2505_vm5, %v2531_v27, %v2533_v0 }
 0x271   : > { %3976 = vst [vmem:[%s4121_s18 + $0x18] sm:$0xff] %v3901_v1   ;;  %v3075_v12 = vadd.f32 %v3074_v2, %v3039_v49  ;;  %v3120_v63 = vmul.f32 %v3039_v49, %v2715_v39  ;;  %v2156_v35 = vadd.f32 %v2078_v44, %v1946_v5 }
 0x272   : > { %v1870_v47 = vpop.f32.mrf.mxu1  ;;  %v5182_v3 = vpop.f32.mrf.mxu3  ;;  %3014 = vperm.xlu2 %4027, %v2848_v45   ;;  %v5212_v45 = vld [vmem:[%s4106_s30 + $0x88] sm:$0xff] }
 0x273   : > { %v3155_v26 = vadd.f32 %v3154_v21, %v3120_v63  ;;  %v2460_v42 = vadd.f32 %v5119_v53, %v2156_v35  ;;  %v1947_v53 = vadd.f32 %v1870_v47, %v4793_v6  ;;  %v2267_v21 = vor.u32 %v2266_v58, %v2265_v57  ;;  %v2900_v6 = vpop.permute.xlu0 %2899  ;;  %v5204_v63 = vld [vmem:[%s4111_s10 + $0x8] sm:$0xff]  }
 0x274   : > { %v2273_v35 = vshll.u32 %v5204_v63, 16  ;;  %v2535_v11 = vrot.slane %v5212_v45, 3 }
 0x275   : > { %v2640_v40 = vpop.f32.mrf.mxu0  ;;  %v2716_v13 = vadd.f32 %v2638_v17, %v2460_v42  ;;  %v2268_v7 = vsel %vm2201_vm3, %v2263_v4, %v2267_v21 }
 0x276   : > { %v2275_v24 = vrot.slane %v2273_v35, 3 }
 0x277   : > { %v3040_v34 = vmul.f32 %v2895_v25, %v2716_v13  ;;  %v1767_v25 = vrot.slane %v5212_v45, 2 }
 0x278   : > { %v2080_v23 = vpop.f32.mrf.mxu2 }
 0x279   : > { %v3076_v9 = vadd.f32 %v3075_v12, %v3040_v34  ;;  %v3121_v2 = vmul.f32 %v3040_v34, %v2716_v13  ;;  %v2157_v31 = vadd.f32 %v2080_v23, %v1947_v53 }
 0x27a   : > { %v1873_v37 = vpop.f32.mrf.mxu1  ;;  %v5198_v8 = vpop.f32.mrf.mxu3  ;;  %3029 = vperm.xlu2 %4027, %v2851_v18  }
 0x27b   : > { %v3156_v55 = vadd.f32 %v3155_v26, %v3121_v2  ;;  %v2461_v17 = vadd.f32 %v5145_v22, %v2157_v31  ;;  %v1948_v50 = vadd.f32 %v1873_v37, %v4803_v15  ;;  %v2905_v26 = vpop.permute.xlu1 %2904 }
 0x27d   : > { %v2643_v33 = vpop.f32.mrf.mxu0  ;;  %1912 = vmatmul.bf16.gmra.mxu1 %v1764_v62  ;;  %2122 = vmatmul.bf16.gmra.mxu2 %v1766_v29  ;;  %v2717_v39 = vadd.f32 %v2640_v40, %v2461_v17  ;;  %v2270_v62 = vshrl.u32 %v5204_v63, 16  ;;  %v2536_v17 = vsel %vm2505_vm5, %v2533_v0, %v2535_v11 }
 0x27f   : > { %v3906_v5 = vpack.c.bf16 %v2717_v39, %v2716_v13  ;;  %v3041_v22 = vmul.f32 %v2900_v6, %v2717_v39  ;;  %2436 = vmatmul.bf16.gmra.mxu3 %v2268_v7  ;;  %v2272_v13 = vrot.slane %v2270_v62, 2  ;;  %v2915_v62 = vpop.permute.xlu0 %2914 }
 0x280   : > { %2682 = vmatmul.bf16.gmra.mxu0 %v2534_v14  ;;  %v2083_v1 = vpop.f32.mrf.mxu2 }
 0x281   : > { %3977 = vst [vmem:[%s4121_s18 + $0x20] sm:$0xff] %v3906_v5   ;;  %v3077_v27 = vadd.f32 %v3076_v9, %v3041_v22  ;;  %v3122_v49 = vmul.f32 %v3041_v22, %v2717_v39  ;;  %v2158_v44 = vadd.f32 %v2083_v1, %v1948_v50  ;;  %v1768_v9 = vsel %vm1735_vm4, %v1765_v36, %v1767_v25 }
 0x282   : > { %v1875_v12 = vpop.f32.mrf.mxu1  ;;  %v5209_v42 = vpop.f32.mrf.mxu3  ;;  %v2276_v2 = vor.u32 %v2275_v24, %v2272_v13 }
 0x283   : > { %v3157_v47 = vadd.f32 %v3156_v55, %v3122_v49  ;;  %v2462_v4 = vadd.f32 %v5156_v54, %v2158_v44  ;;  %v1949_v52 = vadd.f32 %v1875_v12, %v4821_v10  ;;  %v2910_v10 = vpop.permute.xlu2 %2909 }
 0x284   : > { %v2277_v39 = vsel %vm2201_vm3, %v2267_v21, %v2276_v2 }
 0x285   : > { %v2645_v15 = vpop.f32.mrf.mxu0  ;;  %v2718_v40 = vadd.f32 %v2643_v33, %v2462_v4  ;;  %v410_v33 = vld [vmem:[%s4111_s10 + $0x10] sm:$0xf] }
 0x286   : > { %v415_v18 = vunpack.c.l.bf16 %v410_v33 }
 0x287   : > { %v3042_v57 = vmul.f32 %v2905_v26, %v2718_v40 }
 0x288   : > { %v2085_v58 = vpop.f32.mrf.mxu2  ;;  %v5224_v36 = vpack.c.bf16 %v415_v18, %v415_v18 }
 0x289   : > { %v3078_v53 = vadd.f32 %v3077_v27, %v3042_v57  ;;  %v3123_v54 = vmul.f32 %v3042_v57, %v2718_v40  ;;  %v2159_v34 = vadd.f32 %v2085_v58, %v1949_v52 }
 0x28a   : > { %v1878_v23 = vpop.f32.mrf.mxu1  ;;  %v5221_v14 = vpop.f32.mrf.mxu3  ;;  %v2282_v49 = vshll.u32 %v5224_v36, 16 }
 0x28b   : > { %v3158_v31 = vadd.f32 %v3157_v47, %v3123_v54  ;;  %v2463_v37 = vadd.f32 %v5174_v20, %v2159_v34  ;;  %v1950_v7 = vadd.f32 %v1878_v23, %v4832_v59  ;;  %v4049_v47 = vld [vmem:[%s4111_s10] sm:$0xff]  }
 0x28c   : > { %v5234_v4 = vrot.slane %v4049_v47, 2  ;;  %v2284_v26 = vrot.slane %v2282_v49, 3  ;;  %v2537_v13 = vrot.slane %v4049_v47, 3 }
 0x28d   : > { %v2648_v55 = vpop.f32.mrf.mxu0  ;;  %1917 = vmatmul.bf16.gmra.mxu1 %v1766_v29  ;;  %2127 = vmatmul.bf16.gmra.mxu2 %v1768_v9  ;;  %v2719_v6 = vadd.f32 %v2645_v15, %v2463_v37  ;;  %v2279_v29 = vshrl.u32 %v5224_v36, 16 }
 0x28e   : > { %v2538_v37 = vsel %vm2505_vm5, %v2535_v11, %v2537_v13 }
 0x28f   : > { %v3911_v20 = vpack.c.bf16 %v2719_v6, %v2718_v40  ;;  %v3043_v50 = vmul.f32 %v2910_v10, %v2719_v6  ;;  %2441 = vmatmul.bf16.gmra.mxu3 %v2277_v39  ;;  %v2281_v15 = vrot.slane %v2279_v29, 2 }
 0x290   : > { %2687 = vmatmul.bf16.gmra.mxu0 %v2536_v17  ;;  %v2088_v5 = vpop.f32.mrf.mxu2 }
 0x291   : > { %3978 = vst [vmem:[%s4121_s18 + $0x28] sm:$0xff] %v3911_v20   ;;  %v3079_v0 = vadd.f32 %v3078_v53, %v3043_v50  ;;  %v3124_v22 = vmul.f32 %v3043_v50, %v2719_v6  ;;  %v2160_v1 = vadd.f32 %v2088_v5, %v1950_v7  ;;  %v2285_v54 = vor.u32 %v2284_v26, %v2281_v15  ;;  %v2930_v26 = vpop.permute.xlu0 %2929 }
 0x292   : > { %v1880_v27 = vpop.f32.mrf.mxu1  ;;  %v5231_v59 = vpop.f32.mrf.mxu3 }
 0x293   : > { %v3159_v44 = vadd.f32 %v3158_v31, %v3124_v22  ;;  %v2464_v21 = vadd.f32 %v5182_v3, %v2160_v1  ;;  %v1951_v40 = vadd.f32 %v1880_v27, %v4843_v48  ;;  %v1770_v3 = vsel %vm1735_vm4, %v1767_v25, %v5234_v4 }
 0x294   : > { %v2286_v33 = vsel %vm2201_vm3, %v2276_v2, %v2285_v54  ;;  %v1995_v2 = vrot.slane %v5204_v63, 2  ;;  %v2539_v27 = vrot.slane %v5204_v63, 3 }
 0x295   : > { %v2650_v12 = vpop.f32.mrf.mxu0  ;;  %v2720_v35 = vadd.f32 %v2648_v55, %v2464_v21  ;;  %v2920_v55 = vpop.permute.xlu1 %2919 }
 0x296   : > { %v2540_v15 = vsel %vm2505_vm5, %v2537_v13, %v2539_v27 }
 0x297   : > { %v3044_v45 = vmul.f32 %v2915_v62, %v2720_v35 }
 0x298   : > { %v2090_v24 = vpop.f32.mrf.mxu2 }
 0x299   : > { %v3080_v52 = vadd.f32 %v3079_v0, %v3044_v45  ;;  %v3125_v57 = vmul.f32 %v3044_v45, %v2720_v35  ;;  %v2161_v58 = vadd.f32 %v2090_v24, %v1951_v40 }
 0x29a   : > { %v1883_v53 = vpop.f32.mrf.mxu1  ;;  %v5241_v48 = vpop.f32.mrf.mxu3 }
 0x29b   : > { %v3160_v34 = vadd.f32 %v3159_v44, %v3125_v57  ;;  %v2465_v23 = vadd.f32 %v5198_v8, %v2161_v58  ;;  %v1952_v25 = vadd.f32 %v1883_v53, %v4853_v16 }
 0x29d   : > { %v2653_v31 = vpop.f32.mrf.mxu0  ;;  %v2721_v17 = vadd.f32 %v2650_v12, %v2465_v23  ;;  %1922 = vmatmul.bf16.gmra.mxu1 %v1768_v9  ;;  %2132 = vmatmul.bf16.gmra.mxu2 %v1770_v3  ;;  %v2925_v9 = vpop.permute.xlu2 %2924 }
 0x29e   : > { %v2935_v23 = vpop.permute.xlu1 %2934 }
 0x29f   : > { %v3916_v10 = vpack.c.bf16 %v2721_v17, %v2720_v35  ;;  %v3045_v18 = vmul.f32 %v2920_v55, %v2721_v17  ;;  %2446 = vmatmul.bf16.gmra.mxu3 %v2286_v33  ;;  %v1997_v55 = vrot.slane %v5224_v36, 2  ;;  %v2541_v33 = vrot.slane %v5224_v36, 3 }
 0x2a0   : > { %2692 = vmatmul.bf16.gmra.mxu0 %v2538_v37  ;;  %v2093_v6 = vpop.f32.mrf.mxu2 }
 0x2a1   : > { %3979 = vst [vmem:[%s4121_s18 + $0x30] sm:$0xff] %v3916_v10   ;;  %v3081_v39 = vadd.f32 %v3080_v52, %v3045_v18  ;;  %v3126_v8 = vmul.f32 %v3045_v18, %v2721_v17  ;;  %v2162_v7 = vadd.f32 %v2093_v6, %v1952_v25 }
 0x2a2   : > { %v1885_v11 = vpop.f32.mrf.mxu1  ;;  %v5247_v0 = vpop.f32.mrf.mxu3 }
 0x2a3   : > { %v3161_v20 = vadd.f32 %v3160_v34, %v3126_v8  ;;  %v2466_v50 = vadd.f32 %v5209_v42, %v2162_v7  ;;  %v1953_v16 = vadd.f32 %v1885_v11, %v4866_v43  ;;  %v1996_v42 = vsel %vm1735_vm4, %v5234_v4, %v1995_v2 }
 0x2a4   : > { %v1998_v8 = vsel %vm1735_vm4, %v1995_v2, %v1997_v55 }
 0x2a5   : > { %v2655_v5 = vpop.f32.mrf.mxu0  ;;  %v2722_v22 = vadd.f32 %v2653_v31, %v2466_v50 }
 0x2a7   : > { %v3046_v1 = vmul.f32 %v2925_v9, %v2722_v22 }
 0x2a8   : > { %v2095_v29 = vpop.f32.mrf.mxu2 }
 0x2a9   : > { %v3082_v49 = vadd.f32 %v3081_v39, %v3046_v1  ;;  %v3127_v44 = vmul.f32 %v3046_v1, %v2722_v22  ;;  %v2163_v21 = vadd.f32 %v2095_v29, %v1953_v16 }
 0x2aa   : > { %v1888_v12 = vpop.f32.mrf.mxu1  ;;  %v5256_v43 = vpop.f32.mrf.mxu3 }
 0x2ab   : > { %v3162_v62 = vadd.f32 %v3161_v20, %v3127_v44  ;;  %v2467_v35 = vadd.f32 %v5221_v14, %v2163_v21  ;;  %v1954_v45 = vadd.f32 %v1888_v12, %v4874_v30  ;;  %v2940_v20 = vpop.permute.xlu2 %2939  ;;  %v2945_v44 = vpop.permute.xlu0 %2944  ;;  %v5452_v12 = vld [vmem:[#allocation8_spill] sm:$0xff] }
 0x2ad   : > { %v2658_v47 = vpop.f32.mrf.mxu0  ;;  %v2723_v40 = vadd.f32 %v2655_v5, %v2467_v35  ;;  %1927 = vmatmul.bf16.gmra.mxu1 %v1770_v3  ;;  %2137 = vmatmul.bf16.gmra.mxu2 %v1996_v42  ;;  %v1771_v3 = vrot.slane %v4834_v51, 2 }
 0x2af   : > { %v3921_v63 = vpack.c.bf16 %v2723_v40, %v2722_v22  ;;  %v3047_v24 = vmul.f32 %v2930_v26, %v2723_v40 }
 0x2b0   : > { %2697 = vmatmul.bf16.gmra.mxu0 %v2540_v15  ;;  %v2098_v52 = vpop.f32.mrf.mxu2 }
 0x2b1   : > { %3980 = vst [vmem:[%s4121_s18 + $0x38] sm:$0xff] %v3921_v63   ;;  %v3083_v57 = vadd.f32 %v3082_v49, %v3047_v24  ;;  %v3128_v58 = vmul.f32 %v3047_v24, %v2723_v40  ;;  %v2164_v53 = vadd.f32 %v2098_v52, %v1954_v45 }
 0x2b2   : > { %v1890_v14 = vpop.f32.mrf.mxu1  ;;  %v2412_v31 = vpop.f32.mrf.mxu3 }
 0x2b3   : > { %v3163_v54 = vadd.f32 %v3162_v62, %v3128_v58  ;;  %v2468_v13 = vadd.f32 %v5231_v59, %v2164_v53  ;;  %v1955_v30 = vadd.f32 %v1890_v14, %v4887_v56  ;;  %v1772_v59 = vsel %vm1735_vm4, %v5234_v4, %v1771_v3  ;;  %v5453_v58 = vld [vmem:[#allocation13_spill] sm:$0xff] }
 0x2b4   : > { %v2542_v56 = vsel %vm2505_vm5, %v2539_v27, %v2541_v33 }
 0x2b5   : > { %v2660_v34 = vpop.f32.mrf.mxu0  ;;  %v2724_v37 = vadd.f32 %v2658_v47, %v2468_v13 }
 0x2b7   : > { %v3048_v17 = vmul.f32 %v2935_v23, %v2724_v37 }
 0x2b8   : > { %v2100_v10 = vpop.f32.mrf.mxu2 }
 0x2b9   : > { %v3084_v25 = vadd.f32 %v3083_v57, %v3048_v17  ;;  %v3129_v18 = vmul.f32 %v3048_v17, %v2724_v37  ;;  %v2165_v6 = vadd.f32 %v2100_v10, %v1955_v30  ;;  %v2950_v57 = vpop.permute.xlu1 %2949  ;;  %v2955_v10 = vpop.permute.xlu2 %2954 }
 0x2ba   : > { %v1893_v39 = vpop.f32.mrf.mxu1  ;;  %v2414_v36 = vpop.f32.mrf.mxu3 }
 0x2bb   : > { %v3164_v7 = vadd.f32 %v3163_v54, %v3129_v18  ;;  %v2469_v51 = vadd.f32 %v5241_v48, %v2165_v6  ;;  %v1956_v9 = vadd.f32 %v1893_v39, %v4895_v38 }
 0x2bd   : > { %v2663_v11 = vpop.f32.mrf.mxu0  ;;  %v2725_v50 = vadd.f32 %v2660_v34, %v2469_v51  ;;  %1932 = vmatmul.bf16.gmra.mxu1 %v1772_v59  ;;  %2142 = vmatmul.bf16.gmra.mxu2 %v1998_v8 }
 0x2bf   : > { %v3926_v5 = vpack.c.bf16 %v2725_v50, %v2724_v37  ;;  %v3049_v22 = vmul.f32 %v2940_v20, %v2725_v50 }
 0x2c0   : > { %2702 = vmatmul.bf16.gmra.mxu0 %v2542_v56  ;;  %v2103_v4 = vpop.f32.mrf.mxu2 }
 0x2c1   : > { %3981 = vst [vmem:[%s4121_s18 + $0x40] sm:$0xff] %v3926_v5   ;;  %v3085_v16 = vadd.f32 %v3084_v25, %v3049_v22  ;;  %v3130_v2 = vmul.f32 %v3049_v22, %v2725_v50  ;;  %v2166_v1 = vadd.f32 %v2103_v4, %v1956_v9  ;;  %v5454_v25 = vld [vmem:[#allocation19_spill] sm:$0xff]  ;;  %v2960_v5 = vpop.permute.xlu0 %2959 }
 0x2c2   : > { %v1895_v29 = vpop.f32.mrf.mxu1  ;;  %v2417_v47 = vpop.f32.mrf.mxu3  ;;  %v5455_v22 = vld [vmem:[#allocation11_spill] sm:$0xff] }
 0x2c3   : > { %v3165_v48 = vadd.f32 %v3164_v7, %v3130_v2  ;;  %v2470_v49 = vadd.f32 %v5247_v0, %v2166_v1  ;;  %v1957_v42 = vadd.f32 %v1895_v29, %v5452_v12  ;;  %v2965_v12 = vpop.permute.xlu1 %2964 }
 0x2c5   : > { %v2665_v27 = vpop.f32.mrf.mxu0  ;;  %v2726_v21 = vadd.f32 %v2663_v11, %v2470_v49 }
 0x2c7   : > { %v3050_v62 = vmul.f32 %v2945_v44, %v2726_v21 }
 0x2c8   : > { %v2105_v35 = vpop.f32.mrf.mxu2 }
 0x2c9   : > { %v3086_v38 = vadd.f32 %v3085_v16, %v3050_v62  ;;  %v3131_v15 = vmul.f32 %v3050_v62, %v2726_v21  ;;  %v2167_v26 = vadd.f32 %v2105_v35, %v1957_v42  ;;  %v5456_v62 = vld [vmem:[#allocation31_spill] sm:$0xff] }
 0x2ca   : > { %v1898_v40 = vpop.f32.mrf.mxu1  ;;  %v2419_v3 = vpop.f32.mrf.mxu3 }
 0x2cb   : > { %v3166_v63 = vadd.f32 %v3165_v48, %v3131_v15  ;;  %v2471_v45 = vadd.f32 %v5256_v43, %v2167_v26  ;;  %v1958_v53 = vadd.f32 %v1898_v40, %v5453_v58 }
 0x2cd   : > { %v2668_v24 = vpop.f32.mrf.mxu0  ;;  %v2727_v52 = vadd.f32 %v2665_v27, %v2471_v45 }
 0x2cf   : > { %v3931_v0 = vpack.c.bf16 %v2727_v52, %v2726_v21  ;;  %v3051_v14 = vmul.f32 %v2950_v57, %v2727_v52 }
 0x2d0   : > { %v2108_v54 = vpop.f32.mrf.mxu2 }
 0x2d1   : > { %3982 = vst [vmem:[%s4121_s18 + $0x48] sm:$0xff] %v3931_v0   ;;  %v3087_v13 = vadd.f32 %v3086_v38, %v3051_v14  ;;  %v3132_v34 = vmul.f32 %v3051_v14, %v2727_v52  ;;  %v2168_v23 = vadd.f32 %v2108_v54, %v1958_v53  ;;  %v2970_v0 = vpop.permute.xlu2 %2969  ;;  %v5457_v53 = vld [vmem:[#allocation34_spill] sm:$0xff] }
 0x2d2   : > { %v1900_v37 = vpop.f32.mrf.mxu1  ;;  %v2422_v20 = vpop.f32.mrf.mxu3 }
 0x2d3   : > { %v3167_v55 = vadd.f32 %v3166_v63, %v3132_v34  ;;  %v2472_v30 = vadd.f32 %v2412_v31, %v2168_v23  ;;  %v1959_v18 = vadd.f32 %v1900_v37, %v5454_v25 }
 0x2d5   : > { %v2670_v17 = vpop.f32.mrf.mxu0  ;;  %v2728_v33 = vadd.f32 %v2668_v24, %v2472_v30 }
 0x2d7   : > { %v3052_v43 = vmul.f32 %v2955_v10, %v2728_v33 }
 0x2d8   : > { %v2110_v6 = vpop.f32.mrf.mxu2 }
 0x2d9   : > { %v3088_v39 = vadd.f32 %v3087_v13, %v3052_v43  ;;  %v3133_v59 = vmul.f32 %v3052_v43, %v2728_v33  ;;  %v2169_v8 = vadd.f32 %v2110_v6, %v1959_v18  ;;  %v2975_v43 = vpop.permute.xlu0 %2974 }
 0x2da   : > { %v1903_v7 = vpop.f32.mrf.mxu1 }
 0x2db   : > { %v3168_v51 = vadd.f32 %v3167_v55, %v3133_v59  ;;  %v2473_v11 = vadd.f32 %v2414_v36, %v2169_v8  ;;  %v1960_v4 = vadd.f32 %v1903_v7, %v5455_v22  ;;  %v2424_v36 = vpop.f32.mrf.mxu3 }
 0x2dd   : > { %v2673_v56 = vpop.f32.mrf.mxu0  ;;  %v2729_v50 = vadd.f32 %v2670_v17, %v2473_v11 }
 0x2df   : > { %v3936_v9 = vpack.c.bf16 %v2729_v50, %v2728_v33  ;;  %v3053_v31 = vmul.f32 %v2960_v5, %v2729_v50  ;;  %v2980_v5 = vpop.permute.xlu1 %2979 }
 0x2e0   : > { %v2113_v16 = vpop.f32.mrf.mxu2 }
 0x2e1   : > { %3983 = vst [vmem:[%s4121_s18 + $0x50] sm:$0xff] %v3936_v9   ;;  %v3089_v2 = vadd.f32 %v3088_v39, %v3053_v31  ;;  %v3134_v1 = vmul.f32 %v3053_v31, %v2729_v50  ;;  %v2170_v29 = vadd.f32 %v2113_v16, %v1960_v4  ;;  %v5458_v31 = vld [vmem:[#allocation17_spill] sm:$0xff] }
 0x2e2   : > { %v1905_v48 = vpop.f32.mrf.mxu1 }
 0x2e3   : > { %v3169_v49 = vadd.f32 %v3168_v51, %v3134_v1  ;;  %v2474_v27 = vadd.f32 %v2417_v47, %v2170_v29  ;;  %v1961_v35 = vadd.f32 %v1905_v48, %v5456_v62  ;;  %v2427_v13 = vpop.f32.mrf.mxu3 }
 0x2e5   : > { %v2675_v44 = vpop.f32.mrf.mxu0  ;;  %v2730_v21 = vadd.f32 %v2673_v56, %v2474_v27 }
 0x2e7   : > { %v3054_v42 = vmul.f32 %v2965_v12, %v2730_v21 }
 0x2e8   : > { %v2115_v38 = vpop.f32.mrf.mxu2 }
 0x2e9   : > { %v3090_v15 = vadd.f32 %v3089_v2, %v3054_v42  ;;  %v3135_v26 = vmul.f32 %v3054_v42, %v2730_v21  ;;  %v2171_v40 = vadd.f32 %v2115_v38, %v1961_v35 }
 0x2ea   : > { %v1908_v63 = vpop.f32.mrf.mxu1 }
 0x2eb   : > { %v3170_v45 = vadd.f32 %v3169_v49, %v3135_v26  ;;  %v2475_v24 = vadd.f32 %v2419_v3, %v2171_v40  ;;  %v1962_v14 = vadd.f32 %v1908_v63, %v5457_v53  ;;  %v2429_v7 = vpop.f32.mrf.mxu3 }
 0x2ed   : > { %v2678_v52 = vpop.f32.mrf.mxu0  ;;  %v2731_v57 = vadd.f32 %v2675_v44, %v2475_v24 }
 0x2ef   : > { %v3941_v58 = vpack.c.bf16 %v2731_v57, %v2730_v21  ;;  %v3055_v47 = vmul.f32 %v2970_v0, %v2731_v57  ;;  %v2985_v21 = vpop.permute.xlu2 %2984 }
 0x2f0   : > { %v2118_v54 = vpop.f32.mrf.mxu2 }
 0x2f1   : > { %3984 = vst [vmem:[%s4121_s18 + $0x58] sm:$0xff] %v3941_v58   ;;  %v3091_v34 = vadd.f32 %v3090_v15, %v3055_v47  ;;  %v3136_v23 = vmul.f32 %v3055_v47, %v2731_v57  ;;  %v2172_v37 = vadd.f32 %v2118_v54, %v1962_v14  ;;  %v5460_v47 = vld [vmem:[#allocation18_spill] sm:$0xff] }
 0x2f2   : > { %v1910_v55 = vpop.f32.mrf.mxu1 }
 0x2f3   : > { %v3171_v30 = vadd.f32 %v3170_v45, %v3136_v23  ;;  %v2476_v17 = vadd.f32 %v2422_v20, %v2172_v37  ;;  %v1963_v25 = vadd.f32 %v1910_v55, %v4957_v41  ;;  %v2432_v27 = vpop.f32.mrf.mxu3 }
 0x2f5   : > { %v2680_v33 = vpop.f32.mrf.mxu0  ;;  %v2732_v10 = vadd.f32 %v2678_v52, %v2476_v17  ;;  %v2990_v52 = vpop.permute.xlu0 %2989 }
 0x2f7   : > { %v3056_v3 = vmul.f32 %v2975_v43, %v2732_v10 }
 0x2f8   : > { %v2120_v18 = vpop.f32.mrf.mxu2 }
 0x2f9   : > { %v3092_v6 = vadd.f32 %v3091_v34, %v3056_v3  ;;  %v3137_v39 = vmul.f32 %v3056_v3, %v2732_v10  ;;  %v2173_v59 = vadd.f32 %v2120_v18, %v1963_v25 }
 0x2fa   : > { %v1913_v8 = vpop.f32.mrf.mxu1 }
 0x2fb   : > { %v3172_v51 = vadd.f32 %v3171_v30, %v3137_v39  ;;  %v2477_v11 = vadd.f32 %v2424_v36, %v2173_v59  ;;  %v1964_v22 = vadd.f32 %v1913_v8, %v5458_v31  ;;  %v5459_v36 = vld [vmem:[#allocation20_spill] sm:$0xff]  ;;  %v2434_v57 = vpop.f32.mrf.mxu3 }
 0x2fd   : > { %v2683_v56 = vpop.f32.mrf.mxu0  ;;  %v2733_v50 = vadd.f32 %v2680_v33, %v2477_v11  ;;  %v2995_v33 = vpop.permute.xlu1 %2994 }
 0x2ff   : > { %v3946_v9 = vpack.c.bf16 %v2733_v50, %v2732_v10  ;;  %v3057_v20 = vmul.f32 %v2980_v5, %v2733_v50 }
 0x300   : > { %v2123_v4 = vpop.f32.mrf.mxu2 }
 0x301   : > { %3985 = vst [vmem:[%s4121_s18 + $0x60] sm:$0xff] %v3946_v9   ;;  %v3093_v16 = vadd.f32 %v3092_v6, %v3057_v20  ;;  %v3138_v41 = vmul.f32 %v3057_v20, %v2733_v50  ;;  %v2174_v2 = vadd.f32 %v2123_v4, %v1964_v22  ;;  %v5461_v9 = vld [vmem:[#allocation37_spill] sm:$0xff] }
 0x302   : > { %v1915_v1 = vpop.f32.mrf.mxu1 }
 0x303   : > { %v3173_v29 = vadd.f32 %v3172_v51, %v3138_v41  ;;  %v2478_v48 = vadd.f32 %v2427_v13, %v2174_v2  ;;  %v1965_v42 = vadd.f32 %v1915_v1, %v5459_v36  ;;  %v2437_v25 = vpop.f32.mrf.mxu3 }
 0x305   : > { %v2685_v49 = vpop.f32.mrf.mxu0  ;;  %v2734_v44 = vadd.f32 %v2683_v56, %v2478_v48  ;;  %v3000_v56 = vpop.permute.xlu2 %2999 }
 0x307   : > { %v3058_v12 = vmul.f32 %v2985_v21, %v2734_v44 }
 0x308   : > { %v2125_v62 = vpop.f32.mrf.mxu2 }
 0x309   : > { %v3094_v35 = vadd.f32 %v3093_v16, %v3058_v12  ;;  %v3139_v38 = vmul.f32 %v3058_v12, %v2734_v44  ;;  %v2175_v15 = vadd.f32 %v2125_v62, %v1965_v42 }
 0x30a   : > { %v1918_v26 = vpop.f32.mrf.mxu1 }
 0x30b   : > { %v3174_v40 = vadd.f32 %v3173_v29, %v3139_v38  ;;  %v2479_v63 = vadd.f32 %v2429_v7, %v2175_v15  ;;  %v1966_v53 = vadd.f32 %v1918_v26, %v5460_v47  ;;  %v2439_v41 = vpop.f32.mrf.mxu3 }
 0x30d   : > { %v2688_v45 = vpop.f32.mrf.mxu0  ;;  %v2735_v24 = vadd.f32 %v2685_v49, %v2479_v63  ;;  %v3005_v49 = vpop.permute.xlu0 %3004 }
 0x30f   : > { %v3951_v0 = vpack.c.bf16 %v2735_v24, %v2734_v44  ;;  %v3059_v58 = vmul.f32 %v2990_v52, %v2735_v24 }
 0x310   : > { %v2128_v14 = vpop.f32.mrf.mxu2 }
 0x311   : > { %3986 = vst [vmem:[%s4121_s18 + $0x68] sm:$0xff] %v3951_v0   ;;  %v3095_v54 = vadd.f32 %v3094_v35, %v3059_v58  ;;  %v3140_v13 = vmul.f32 %v3059_v58, %v2735_v24  ;;  %v2176_v34 = vadd.f32 %v2128_v14, %v1966_v53 }
 0x312   : > { %v1920_v23 = vpop.f32.mrf.mxu1 }
 0x313   : > { %v3175_v37 = vadd.f32 %v3174_v40, %v3140_v13  ;;  %v2480_v55 = vadd.f32 %v2432_v27, %v2176_v34  ;;  %v1967_v43 = vadd.f32 %v1920_v23, %v4992_v46  ;;  %v2442_v15 = vpop.f32.mrf.mxu3  ;;  %v3010_v40 = vpop.permute.xlu1 %3009 }
 0x314   : > { %v3015_v13 = vpop.permute.xlu2 %3014 }
 0x315   : > { %v2690_v30 = vpop.f32.mrf.mxu0  ;;  %v2736_v17 = vadd.f32 %v2688_v45, %v2480_v55 }
 0x317   : > { %v3060_v10 = vmul.f32 %v2995_v33, %v2736_v17 }
 0x318   : > { %v2130_v3 = vpop.f32.mrf.mxu2 }
 0x319   : > { %v3096_v18 = vadd.f32 %v3095_v54, %v3060_v10  ;;  %v3141_v6 = vmul.f32 %v3060_v10, %v2736_v17  ;;  %v2177_v39 = vadd.f32 %v2130_v3, %v1967_v43 }
 0x31a   : > { %v1923_v59 = vpop.f32.mrf.mxu1 }
 0x31b   : > { %v3176_v8 = vadd.f32 %v3175_v37, %v3141_v6  ;;  %v2481_v7 = vadd.f32 %v2434_v57, %v2177_v39  ;;  %v1968_v20 = vadd.f32 %v1923_v59, %v5461_v9  ;;  %v2444_v34 = vpop.f32.mrf.mxu3 }
 0x31d   : > { %v2693_v51 = vpop.f32.mrf.mxu0  ;;  %v2737_v11 = vadd.f32 %v2690_v30, %v2481_v7 }
 0x31f   : > { %v3956_v50 = vpack.c.bf16 %v2737_v11, %v2736_v17  ;;  %v3061_v5 = vmul.f32 %v3000_v56, %v2737_v11 }
 0x320   : > { %v2133_v31 = vpop.f32.mrf.mxu2 }
 0x321   : > { %3987 = vst [vmem:[%s4121_s18 + $0x70] sm:$0xff] %v3956_v50   ;;  %v3097_v22 = vadd.f32 %v3096_v18, %v3061_v5  ;;  %v3142_v46 = vmul.f32 %v3061_v5, %v2737_v11  ;;  %v2178_v4 = vadd.f32 %v2133_v31, %v1968_v20  ;;  %v3020_v18 = vpop.permute.xlu0 %3019  ;;  %v3025_v31 = vpop.permute.xlu1 %3024 }
 0x322   : > { %v1925_v16 = vpop.f32.mrf.mxu1 }
 0x323   : > { %v3177_v2 = vadd.f32 %v3176_v8, %v3142_v46  ;;  %v2482_v1 = vadd.f32 %v2437_v25, %v2178_v4  ;;  %v1969_v44 = vadd.f32 %v1925_v16, %v5009_v60  ;;  %v2447_v8 = vpop.f32.mrf.mxu3 }
 0x325   : > { %v2695_v29 = vpop.f32.mrf.mxu0  ;;  %v2738_v48 = vadd.f32 %v2693_v51, %v2482_v1 }
 0x327   : > { %v3062_v27 = vmul.f32 %v3005_v49, %v2738_v48 }
 0x328   : > { %v2135_v21 = vpop.f32.mrf.mxu2 }
 0x329   : > { %v3098_v12 = vadd.f32 %v3097_v22, %v3062_v27  ;;  %v3143_v36 = vmul.f32 %v3062_v27, %v2738_v48  ;;  %v2179_v42 = vadd.f32 %v2135_v21, %v1969_v44  ;;  %v3030_v27 = vpop.permute.xlu2 %3029 }
 0x32a   : > { %v1928_v62 = vpop.f32.mrf.mxu1 }
 0x32b   : > { %v3178_v35 = vadd.f32 %v3177_v2, %v3143_v36  ;;  %v2483_v38 = vadd.f32 %v2439_v41, %v2179_v42  ;;  %v1970_v52 = vadd.f32 %v1928_v62, %v5017_v19  ;;  %v2449_v2 = vpop.f32.mrf.mxu3 }
 0x32d   : > { %v2739_v26 = vadd.f32 %v2695_v29, %v2483_v38  ;;  %v2698_v63 = vpop.f32.mrf.mxu0 }
 0x32f   : > { %v3961_v45 = vpack.c.bf16 %v2739_v26, %v2738_v48  ;;  %v3063_v24 = vmul.f32 %v3010_v40, %v2739_v26 }
 0x330   : > { %v2138_v57 = vpop.f32.mrf.mxu2 }
 0x331   : > { %3988 = vst [vmem:[%s4121_s18 + $0x78] sm:$0xff] %v3961_v45   ;;  %v3099_v0 = vadd.f32 %v3098_v12, %v3063_v24  ;;  %v3144_v60 = vmul.f32 %v3063_v24, %v2739_v26  ;;  %v2180_v58 = vadd.f32 %v2138_v57, %v1970_v52  ;;  %v3068_v24 = vld [vmem:[%s5320_s5] sm:$0x1] }
 0x332   : > { %v1930_v47 = vpop.f32.mrf.mxu1 }
 0x333   : > { %v3179_v53 = vadd.f32 %v3178_v35, %v3144_v60  ;;  %v2484_v14 = vadd.f32 %v2442_v15, %v2180_v58  ;;  %v1971_v37 = vadd.f32 %v1930_v47, %v5028_v61 }
 0x335   : > { %v2740_v54 = vadd.f32 %v2698_v63, %v2484_v14  ;;  %v2700_v55 = vpop.f32.mrf.mxu0 }
 0x337   : > { %v3064_v23 = vmul.f32 %v3015_v13, %v2740_v54 }
 0x338   : > { %v2140_v30 = vpop.f32.mrf.mxu2 }
 0x339   : > { %v3100_v17 = vadd.f32 %v3099_v0, %v3064_v23  ;;  %v3145_v33 = vmul.f32 %v3064_v23, %v2740_v54  ;;  %v2181_v19 = vadd.f32 %v2140_v30, %v1971_v37  ;;  %v3112_v0 = vld [vmem:[%s5321_s6] sm:$0x1] }
 0x33a   : > { %v1933_v10 = vpop.f32.mrf.mxu1 }
 0x33b   : > { %v3180_v43 = vadd.f32 %v3179_v53, %v3145_v33  ;;  %v2485_v3 = vadd.f32 %v2444_v34, %v2181_v19  ;;  %v1972_v59 = vadd.f32 %v1933_v10, %v5036_v28 }
 0x33d   : > { %v2741_v25 = vadd.f32 %v2700_v55, %v2485_v3  ;;  %v2703_v56 = vpop.f32.mrf.mxu0 }
 0x33f   : > { %v3966_v6 = vpack.c.bf16 %v2741_v25, %v2740_v54  ;;  %v3065_v39 = vmul.f32 %v3020_v18, %v2741_v25 }
 0x340   : > { %v2143_v7 = vpop.f32.mrf.mxu2 }
 0x341   : > { %3989 = vst [vmem:[%s4121_s18 + $0x80] sm:$0xff] %v3966_v6   ;;  %v3101_v51 = vadd.f32 %v3100_v17, %v3065_v39  ;;  %v3146_v61 = vmul.f32 %v3065_v39, %v2741_v25  ;;  %v2182_v11 = vadd.f32 %v2143_v7, %v1972_v59 }
 0x342   : > { %v1935_v9 = vpop.f32.mrf.mxu1 }
 0x343   : > { %v3181_v50 = vadd.f32 %v3180_v43, %v3146_v61  ;;  %v2486_v5 = vadd.f32 %v2447_v8, %v2182_v11  ;;  %v1973_v46 = vadd.f32 %v1935_v9, %v5047_v32 }
 0x345   : > { %v2742_v20 = vadd.f32 %v2703_v56, %v2486_v5  ;;  %v2705_v48 = vpop.f32.mrf.mxu0 }
 0x347   : > { %v3066_v22 = vmul.f32 %v3025_v31, %v2742_v20 }
 0x348   : > { %v2145_v4 = vpop.f32.mrf.mxu2 }
 0x349   : > { %v3102_v16 = vadd.f32 %v3101_v51, %v3066_v22  ;;  %v3147_v41 = vmul.f32 %v3066_v22, %v2742_v20  ;;  %v2183_v28 = vadd.f32 %v2145_v4, %v1973_v46 }
 0x34b   : > { %v3182_v1 = vadd.f32 %v3181_v50, %v3147_v41  ;;  %v2487_v29 = vadd.f32 %v2449_v2, %v2183_v28 }
 0x34d   : > { %v2743_v49 = vadd.f32 %v2705_v48, %v2487_v29 }
 0x34f   : > { %v3971_v44 = vpack.c.bf16 %v2743_v49, %v2742_v20  ;;  %v3067_v21 = vmul.f32 %v3030_v27, %v2743_v49 }
 0x351   : > { %3990 = vst [vmem:[%s4121_s18 + $0x88] sm:$0xff] %v3971_v44   ;;  %v3103_v12 = vadd.f32 %v3102_v16, %v3067_v21  ;;  %v3148_v36 = vmul.f32 %v3067_v21, %v2743_v49 }
 0x353   : > { %v3104_v42 = vrot.slane %v3103_v12, 4  ;;  %v3183_v62 = vadd.f32 %v3182_v1, %v3148_v36 }
 0x355   : > { %v3105_v35 = vadd.f32 %v3104_v42, %v3103_v12  ;;  %v3184_v38 = vrot.slane %v3183_v62, 4 }
 0x357   : > { %v3106_v32 = vrot.slane %v3105_v35, 2  ;;  %v3185_v15 = vadd.f32 %v3184_v38, %v3183_v62 }
 0x359   : > { %v3107_v26 = vadd.f32 %v3106_v32, %v3105_v35  ;;  %v3186_v40 = vrot.slane %v3185_v15, 2 }
 0x35b   : > { %v3108_v63 = vrot.slane %v3107_v26, 1  ;;  %v3187_v45 = vadd.f32 %v3186_v40, %v3185_v15 }
 0x35d   : > { %v3109_v52 = vadd.f32 %v3108_v63, %v3107_v26  ;;  %v3188_v57 = vrot.slane %v3187_v45, 1 }
 0x35f   : > { %v3110_v60 = vadd.f32 %v3109_v52, %v3068_v24  ;;  %v3189_v58 = vadd.f32 %v3188_v57, %v3187_v45 }
 0x361   : > { %3111 = vst [vmem:[%s5320_s5] sm:$0x1] %v3110_v60  ;;  %v3190_v47 = vadd.f32 %v3189_v58, %v3112_v0 }
 0x363   : > { %3191 = vst [vmem:[%s5321_s6] sm:$0x1] %v3190_v47 }
 0x364 PF: > { %s17_s21 = sadd.s32 1, %s4056_s21  }
 0x365   : > { %p14_p7 = scmp.ge.s32.totalorder %s17_s21, 6  }
 0x367   :  { %16 = sbr.rel (!%p14_p7) target bundleno = 1 (0x1), region = 100 }

// kernel: standard_block_forward.4
= control target key start
LH: loop header
LB: loop body
LE: loop exit
PB: predicated region body
PF: predicated region fallthrough
CT: control target
= control target key end

     0   :  { %s4689_s13 = smov 0   ;;  %s6100_s0 = inlined_call_operand.vmem [shape: bf16[1152,128], index: 0, kind: input, shape index: {}, may-alias: {0,1}]   ;;  %s6101_s1 = inlined_call_operand.vmem [shape: bf16[1152,128], index: 1, kind: input, shape index: {}, may-alias: {0,1}]   ;;  %s6102_s2 = inlined_call_operand.vmem [shape: f32[1152,1], index: 2, kind: input, shape index: {}, may-alias: {2,3}]   ;;  %s6103_s3 = inlined_call_operand.vmem [shape: f32[1152,1], index: 3, kind: input, shape index: {}, may-alias: {2,3}]   ;;  %s6104_s4 = inlined_call_operand.vmem [shape: f32[1,128], index: 4, kind: input, shape index: {}]   ;;  %s6105_s5 = inlined_call_operand.vmem [shape: f32[1,128], index: 5, kind: input, shape index: {}]   ;;  %s6106_s6 = inlined_call_operand.vmem [shape: bf16[9,128,128], index: 6, kind: input, shape index: {}]   ;;  %s6107_s7 = inlined_call_operand.vmem [shape: f32[864,1], index: 7, kind: input, shape index: {}]   ;;  %s6108_s8 = inlined_call_operand.vmem [shape: bf16[864,128], index: 8, kind: output, shape index: {0}]   ;;  %s6109_s9 = inlined_call_operand.vmem [shape: f32[1,128], index: 9, kind: output, shape index: {1}]   ;;  %s6110_s10 = inlined_call_operand.vmem [shape: f32[1,128], index: 10, kind: output, shape index: {2}]  }
   0x1   :  { %6154 = sst [smem:[#allocation42_spill]] %s6100_s0 }
   0x2 LB: > { %s3872_s14 = sadd.s32 4294967295, %s4630_s13   ;;  %p3876_p0 = scmp.ge.s32.totalorder %s4630_s13, 1  ;;  %s4630_s13 = sphi %s4689_s13, %s21_s13  }
   0x3   : > { %p368_p1 = scmp.lt.s32.totalorder %s4630_s13, 4 }
   0x5   : > { %p369_p2 = pnand %p3876_p0, %p368_p1 }
   0x7   : > { %372 = sbr.rel (%p369_p2) target bundleno = 1002 (0x3ea), region = 52 }
   0xc   : > { %s430_s15 = smul.u32 36, %s3872_s14  ;;  %s436_s16 = sadd.s32 1, %s3872_s14 }
   0xd   : > { %s3878_s17 = smul.u32 36, %s436_s16  ;;  %s6155_s0 = sld [smem:[#allocation42_spill]] }
   0xe   : > { %p431_p3 = scmp.lt.s32.totalorder %s430_s15, 143  ;;  %p463_p5 = scmp.lt.s32.totalorder %s430_s15, 107 }
   0xf   : > { %p439_p4 = scmp.lt.s32.totalorder %s3878_s17, 143  ;;  %p3885_p6 = scmp.ne.s32.totalorder %s3872_s14, 0 }
  0x10   : > { %s432_s18 = scalar_select %p431_p3, %s430_s15, 143 }
  0x11   : > { %s6290_s17 = smov (!%p439_p4, %s3878_s17), 143  ;;  %s6292_s15 = smov (!%p463_p5, %s430_s15), 107 }
  0x12   : > { %s3877_s19 = sshll.u32 %s432_s18, 2  ;;  %s3880_s20 = sshll.u32 %s432_s18, 3 }
  0x13   : > { %s4700_s23 = scalar_lea.vmem %s6155_s0, %s3877_s19  ;;  %s3879_s24 = sshll.u32 %s6290_s17, 2 }
  0x14   : > { %s4705_s27 = scalar_lea.vmem %s6101_s1, %s3879_s24  ;;  %s4710_s30 = scalar_lea.vmem %s6102_s2, %s3880_s20 }
  0x15   : > { %s3882_s11 = sshll.u32 %s6290_s17, 3  ;;  %s3883_s19 = sshll.u32 %s6292_s15, 3 }
  0x16   : > { %s4715_s18 = scalar_lea.vmem %s6103_s3, %s3882_s11  ;;  %s3884_s21 = sshll.u32 %s6292_s15, 2 }
  0x17   : > { %s4720_s25 = scalar_lea.vmem %s6107_s7, %s3883_s19  ;;  %s4725_s28 = scalar_lea.vmem %s6108_s8, %s3884_s21 }
  0x18   : > { %477 = sbr.rel (%p3885_p6) target bundleno = 32 (0x20), region = 56 }
  0x1d   : > { %v4632_v0 = vmov 0.0  }
  0x1e   : > { %478 = vst [vmem:[%s6109_s9] sm:$0x1] %v4632_v0 }
  0x1f   : > { %479 = vst [vmem:[%s6110_s10] sm:$0x1] %v4632_v0 }
  0x20 PF: > { %v690_v1 = vld [vmem:[%s4710_s30 + $0xb0] sm:$0xff]  ;;  %v688_v2 = vld [vmem:[%s4710_s30 + $0xa0] sm:$0xff]  ;;  %v4633_v4 = vmov 0   ;;  %v691_v5 = vld [vmem:[%s4710_s30 + $0xb8] sm:$0xff]  ;;  %vm1032_vm0 = vsmask.f32 7424 }
  0x21   : > { %v678_v3 = vld [vmem:[%s4710_s30 + $0x50] sm:$0xff]  ;;  %4617 = vset.pattern.permute.xlu2 %v4633_v4  ;;  %4616 = vset.pattern.permute.xlu1 %v4633_v4  ;;  %v689_v6 = vld [vmem:[%s4710_s30 + $0xa8] sm:$0xff]  ;;  %v679_v7 = vld [vmem:[%s4710_s30 + $0x58] sm:$0xff]  ;;  %vm1995_vm1 = vsmask.f32 6400  ;;  %vm1529_vm3 = vcmask 1046528  }
  0x22   : > { %4615 = vset.pattern.permute.xlu0 %v4633_v4  ;;  %816 = vperm.xlu1 %4616, %v690_v1   ;;  %v681_v8 = vld [vmem:[%s4710_s30 + $0x68] sm:$0xff]  ;;  %v680_v9 = vld [vmem:[%s4710_s30 + $0x60] sm:$0xff]  ;;  %v670_v11 = vld [vmem:[%s4710_s30 + $0x10] sm:$0xff]  ;;  %vm2765_vm2 = vsmask.f32 5376  ;;  %vm2299_vm4 = vcmask 1045504  }
  0x23   : > { %806 = vperm.xlu0 %4615, %v688_v2   ;;  %756 = vperm.xlu2 %4617, %v678_v3   ;;  %v668_v10 = vld [vmem:[%s4710_s30] sm:$0xff]  ;;  %v669_v12 = vld [vmem:[%s4710_s30 + $0x8] sm:$0xff]  ;;  %v671_v13 = vld [vmem:[%s4710_s30 + $0x18] sm:$0xff]  ;;  %vm3069_vm5 = vcmask 1044480  }
  0x24   : > { %v693_v14 = vld [vmem:[%s4710_s30 + $0xc8] sm:$0xff]  ;;  %v692_v15 = vld [vmem:[%s4710_s30 + $0xc0] sm:$0xff]  ;;  %v682_v16 = vld [vmem:[%s4710_s30 + $0x70] sm:$0xff] }
  0x25   : > { %v672_v17 = vld [vmem:[%s4710_s30 + $0x20] sm:$0xff]  ;;  %v683_v18 = vld [vmem:[%s4710_s30 + $0x78] sm:$0xff]  ;;  %v673_v19 = vld [vmem:[%s4710_s30 + $0x28] sm:$0xff] }
  0x26   : > { %v695_v20 = vld [vmem:[%s4710_s30 + $0xd8] sm:$0xff]  ;;  %v694_v21 = vld [vmem:[%s4710_s30 + $0xd0] sm:$0xff]  ;;  %v700_v23 = vld [vmem:[%s4710_s30 + $0x100] sm:$0xff] }
  0x27   : > { %v698_v22 = vld [vmem:[%s4710_s30 + $0xf0] sm:$0xff]  ;;  %v699_v24 = vld [vmem:[%s4710_s30 + $0xf8] sm:$0xff]  ;;  %v701_v25 = vld [vmem:[%s4710_s30 + $0x108] sm:$0xff] }
  0x28   : > { %v685_v26 = vld [vmem:[%s4710_s30 + $0x88] sm:$0xff]  ;;  %v684_v27 = vld [vmem:[%s4710_s30 + $0x80] sm:$0xff]  ;;  %v674_v28 = vld [vmem:[%s4710_s30 + $0x30] sm:$0xff] }
  0x29   : > { %v696_v29 = vld [vmem:[%s4710_s30 + $0xe0] sm:$0xff]  ;;  %v675_v30 = vld [vmem:[%s4710_s30 + $0x38] sm:$0xff]  ;;  %v697_v31 = vld [vmem:[%s4710_s30 + $0xe8] sm:$0xff] }
  0x2a   : > { %821 = vperm.xlu1 %4616, %v691_v5   ;;  %v4319_v32 = vld [vmem:[%s6106_s6 + $0x78] sm:$0xff]  ;;  %v4318_v33 = vld [vmem:[%s6106_s6 + $0x70] sm:$0xff]  ;;  %v4317_v34 = vld [vmem:[%s6106_s6 + $0x68] sm:$0xff] }
  0x2b   : > { %811 = vperm.xlu0 %4615, %v689_v6   ;;  %761 = vperm.xlu2 %4617, %v679_v7   ;;  %v703_v35 = vld [vmem:[%s4710_s30 + $0x118] sm:$0xff]  ;;  %v702_v36 = vld [vmem:[%s4710_s30 + $0x110] sm:$0xff]  ;;  %v4550_v38 = vld [vmem:[%s4700_s23 + $0x28] sm:$0xff]  }
  0x2c   : > { %4582 = vmatpush.bf16.msra.mxu2 %v4319_v32  ;;  %4581 = vmatpush.bf16.msra.mxu1 %v4319_v32  ;;  %v686_v37 = vld [vmem:[%s4710_s30 + $0x90] sm:$0xff]  ;;  %v4398_v39 = vunpack.c.l.bf16 %v4550_v38  ;;  %v4316_v40 = vld [vmem:[%s6106_s6 + $0x60] sm:$0xff]  ;;  %v4399_v42 = vunpack.c.h.bf16 %v4550_v38  ;;  %v4315_v43 = vld [vmem:[%s6106_s6 + $0x58] sm:$0xff] }
  0x2d   : > { %1247 = vmatpush.bf16.msra.mxu0 %v4319_v32  ;;  %4583 = vmatpush.bf16.msra.mxu3 %v4319_v32  ;;  %v4782_v41 = vld [vmem:[%s6104_s4] ss:$0 sm:$0xff]  ;;  %v687_v45 = vld [vmem:[%s4710_s30 + $0x98] sm:$0xff]  ;;  %v677_v46 = vld [vmem:[%s4710_s30 + $0x48] sm:$0xff] }
  0x2e   : > { %v676_v44 = vld [vmem:[%s4710_s30 + $0x40] sm:$0xff]  ;;  %v567_v47 = vmul.f32 %v4782_v41, %v4398_v39  ;;  %v568_v49 = vmul.f32 %v4782_v41, %v4399_v42  ;;  %v4314_v51 = vld [vmem:[%s6106_s6 + $0x50] sm:$0xff]  ;;  %v946_v54 = vld [vmem:[%s4715_s18 + $0x8] sm:$0xff] }
  0x2f   : > { %v4794_v48 = vld [vmem:[%s6105_s5] ss:$0 sm:$0xff]  ;;  %v947_v57 = vld [vmem:[%s4715_s18 + $0x10] sm:$0xff]  ;;  %v4313_v58 = vld [vmem:[%s6106_s6 + $0x48] sm:$0xff] }
  0x30   : > { %4585 = vmatpush.bf16.msra.mxu2 %v4318_v33  ;;  %4584 = vmatpush.bf16.msra.mxu1 %v4318_v33  ;;  %v606_v50 = vadd.f32 %v4794_v48, %v567_v47  ;;  %v607_v53 = vadd.f32 %v4794_v48, %v568_v49  ;;  %v945_v56 = vld [vmem:[%s4715_s18] sm:$0xff]  ;;  %v948_v2 = vld [vmem:[%s4715_s18 + $0x18] sm:$0xff]  ;;  %v4555_v5 = vld [vmem:[%s4700_s23 + $0x50] sm:$0xff]  }
  0x31   : > { %1248 = vmatpush.bf16.msra.mxu0 %v4318_v33  ;;  %4586 = vmatpush.bf16.msra.mxu3 %v4318_v33  ;;  %v4312_v61 = vld [vmem:[%s6106_s6 + $0x40] sm:$0xff]  ;;  %v4556_v4 = vld [vmem:[%s4700_s23 + $0x58] sm:$0xff]   ;;  %v3386_v39 = vld [vmem:[%s4720_s25 + $0x30] sm:$0xff] }
  0x32   : > { %771 = vperm.xlu1 %4616, %v681_v8   ;;  %v642_v55 = vmax.f32 %v606_v50, 0.0  ;;  %v643_v59 = vmax.f32 %v607_v53, 0.0  ;;  %v949_v0 = vld [vmem:[%s4715_s18 + $0x20] sm:$0xff]  ;;  %v4422_v8 = vunpack.c.l.bf16 %v4556_v4 }
  0x33   : > { %766 = vperm.xlu0 %4615, %v680_v9   ;;  %706 = vperm.xlu2 %4617, %v668_v10   ;;  %v3380_v3 = vld [vmem:[%s4720_s25] sm:$0xff]  ;;  %v4423_v9 = vunpack.c.h.bf16 %v4556_v4  ;;  %v3389_v4 = vld [vmem:[%s4720_s25 + $0x48] sm:$0xff] }
  0x34   : > { %4588 = vmatpush.bf16.msra.mxu2 %v4317_v34  ;;  %4587 = vmatpush.bf16.msra.mxu1 %v4317_v34  ;;  %v3384_v38 = vld [vmem:[%s4720_s25 + $0x20] sm:$0xff] }
  0x35   : > { %1249 = vmatpush.bf16.msra.mxu0 %v4317_v34  ;;  %4589 = vmatpush.bf16.msra.mxu3 %v4317_v34 }
  0x38   : > { %4591 = vmatpush.bf16.msra.mxu2 %v4316_v40  ;;  %4590 = vmatpush.bf16.msra.mxu1 %v4316_v40 }
  0x39   : > { %1250 = vmatpush.bf16.msra.mxu0 %v4316_v40  ;;  %4592 = vmatpush.bf16.msra.mxu3 %v4316_v40 }
  0x3a   : > { %716 = vperm.xlu1 %4616, %v670_v11  }
  0x3b   : > { %711 = vperm.xlu0 %4615, %v669_v12   ;;  %721 = vperm.xlu2 %4617, %v671_v13   ;;  %v4418_v12 = vunpack.c.l.bf16 %v4555_v5  ;;  %v4419_v13 = vunpack.c.h.bf16 %v4555_v5  ;;  %v4327_v5 = vld [vmem:[%s6106_s6 + $0xb8] sm:$0xff] }
  0x3c   : > { %4594 = vmatpush.bf16.msra.mxu2 %v4315_v43  ;;  %4593 = vmatpush.bf16.msra.mxu1 %v4315_v43 }
  0x3d   : > { %1251 = vmatpush.bf16.msra.mxu0 %v4315_v43  ;;  %4595 = vmatpush.bf16.msra.mxu3 %v4315_v43 }
  0x40   : > { %4597 = vmatpush.bf16.msra.mxu2 %v4314_v51  ;;  %4596 = vmatpush.bf16.msra.mxu1 %v4314_v51 }
  0x41   : > { %1252 = vmatpush.bf16.msra.mxu0 %v4314_v51  ;;  %4598 = vmatpush.bf16.msra.mxu3 %v4314_v51 }
  0x42   : > { %831 = vperm.xlu1 %4616, %v693_v14  }
  0x43   : > { %826 = vperm.xlu0 %4615, %v692_v15   ;;  %776 = vperm.xlu2 %4617, %v682_v16   ;;  %v3382_v15 = vld [vmem:[%s4720_s25 + $0x10] sm:$0xff] }
  0x44   : > { %4600 = vmatpush.bf16.msra.mxu2 %v4313_v58  ;;  %4599 = vmatpush.bf16.msra.mxu1 %v4313_v58 }
  0x45   : > { %1253 = vmatpush.bf16.msra.mxu0 %v4313_v58  ;;  %4601 = vmatpush.bf16.msra.mxu3 %v4313_v58 }
  0x48   : > { %4603 = vmatpush.bf16.msra.mxu2 %v4312_v61  ;;  %4602 = vmatpush.bf16.msra.mxu1 %v4312_v61 }
  0x49   : > { %1254 = vmatpush.bf16.msra.mxu0 %v4312_v61  ;;  %4604 = vmatpush.bf16.msra.mxu3 %v4312_v61 }
  0x4a   : > { %726 = vperm.xlu1 %4616, %v672_v17   ;;  %v3381_v17 = vld [vmem:[%s4720_s25 + $0x8] sm:$0xff] }
  0x4b   : > { %781 = vperm.xlu0 %4615, %v683_v18   ;;  %731 = vperm.xlu2 %4617, %v673_v19   ;;  %v3383_v18 = vld [vmem:[%s4720_s25 + $0x18] sm:$0xff] }
  0x4c   : > { %1633 = vmatpush.bf16.msrb.mxu2 %v4327_v5 }
  0x52   : > { %841 = vperm.xlu1 %4616, %v695_v20   ;;  %v579_v20 = vmul.f32 %v4782_v41, %v4422_v8 }
  0x53   : > { %836 = vperm.xlu0 %4615, %v694_v21   ;;  %856 = vperm.xlu2 %4617, %v698_v22   ;;  %v580_v21 = vmul.f32 %v4782_v41, %v4423_v9  ;;  %v4551_v22 = vld [vmem:[%s4700_s23 + $0x30] sm:$0xff]  }
  0x54   : > { %v4402_v34 = vunpack.c.l.bf16 %v4551_v22 }
  0x56   : > { %v569_v47 = vmul.f32 %v4782_v41, %v4402_v34 }
  0x5a   : > { %866 = vperm.xlu1 %4616, %v700_v23  }
  0x5b   : > { %861 = vperm.xlu0 %4615, %v699_v24   ;;  %871 = vperm.xlu2 %4617, %v701_v25   ;;  %v577_v24 = vmul.f32 %v4782_v41, %v4418_v12  ;;  %v578_v25 = vmul.f32 %v4782_v41, %v4419_v13 }
  0x5d   : > { %v616_v32 = vadd.f32 %v4794_v48, %v577_v24  ;;  %v617_v33 = vadd.f32 %v4794_v48, %v578_v25 }
  0x62   : > { %791 = vperm.xlu1 %4616, %v685_v26  }
  0x63   : > { %786 = vperm.xlu0 %4615, %v684_v27   ;;  %736 = vperm.xlu2 %4617, %v674_v28   ;;  %v4403_v28 = vunpack.c.h.bf16 %v4551_v22 }
  0x65   : > { %v570_v40 = vmul.f32 %v4782_v41, %v4403_v28 }
  0x6a   : > { %846 = vperm.xlu1 %4616, %v696_v29   ;;  %v618_v29 = vadd.f32 %v4794_v48, %v579_v20 }
  0x6b   : > { %741 = vperm.xlu0 %4615, %v675_v30   ;;  %851 = vperm.xlu2 %4617, %v697_v31   ;;  %v619_v31 = vadd.f32 %v4794_v48, %v580_v21 }
  0x6c   : > { %v654_v42 = vmax.f32 %v618_v29, 0.0 }
  0x72   : > { %881 = vperm.xlu1 %4616, %v703_v35   ;;  %v4377_v35 = vld [vmem:[%s4700_s23] sm:$0xff]  }
  0x73   : > { %876 = vperm.xlu0 %4615, %v702_v36   ;;  %796 = vperm.xlu2 %4617, %v686_v37   ;;  %v3385_v36 = vld [vmem:[%s4720_s25 + $0x28] sm:$0xff]  ;;  %v4378_v49 = vunpack.c.l.bf16 %v4377_v35 }
  0x74   : > { %v4546_v37 = vld [vmem:[%s4700_s23 + $0x8] sm:$0xff]  }
  0x75   : > { %v4383_v50 = vunpack.c.h.bf16 %v4546_v37  ;;  %v557_v61 = vmul.f32 %v4782_v41, %v4378_v49  ;;  %v4311_v49 = vld [vmem:[%s6106_s6 + $0x38] sm:$0xff] }
  0x76   : > { %1394 = vmatpush.bf16.msrb.mxu1 %v4311_v49 }
  0x7a   : > { %746 = vperm.xlu1 %4616, %v676_v44   ;;  %v655_v44 = vmax.f32 %v619_v31, 0.0 }
  0x7b   : > { %801 = vperm.xlu0 %4615, %v687_v45   ;;  %751 = vperm.xlu2 %4617, %v677_v46   ;;  %v652_v45 = vmax.f32 %v616_v32, 0.0  ;;  %v653_v46 = vmax.f32 %v617_v33, 0.0 }
  0x7d   : > { %v757_v52 = vpop.permute.xlu2 %756 }
  0x7e   : > { %v894_v60 = vmul.f32 %v757_v52, %v642_v55  ;;  %v609_v52 = vadd.f32 %v4794_v48, %v570_v40 }
  0x80   : > { %v645_v8 = vmax.f32 %v609_v52, 0.0 }
  0x82   : > { %957 = vperm.xlu1 %4616, %v946_v54  }
  0x83   : > { %952 = vperm.xlu0 %4615, %v945_v56   ;;  %962 = vperm.xlu2 %4617, %v947_v57   ;;  %v4382_v56 = vunpack.c.l.bf16 %v4546_v37  ;;  %v4379_v57 = vunpack.c.h.bf16 %v4377_v35  ;;  %v4552_v35 = vld [vmem:[%s4700_s23 + $0x38] sm:$0xff]  }
  0x84   : > { %v3391_v37 = vld [vmem:[%s4720_s25 + $0x58] sm:$0xff] }
  0x85   : > { %v762_v62 = vpop.permute.xlu2 %761  ;;  %v559_v9 = vmul.f32 %v4782_v41, %v4382_v56  ;;  %v4406_v56 = vunpack.c.l.bf16 %v4552_v35 }
  0x86   : > { %v895_v63 = vmul.f32 %v762_v62, %v643_v59  ;;  %v560_v62 = vmul.f32 %v4782_v41, %v4383_v50 }
  0x87   : > { %v598_v28 = vadd.f32 %v4794_v48, %v559_v9 }
  0x88   : > { %v4812_v1 = vpack.c.bf16 %v895_v63, %v894_v60  ;;  %v608_v60 = vadd.f32 %v4794_v48, %v569_v47 }
  0x8a   : > { %972 = vperm.xlu1 %4616, %v949_v0   ;;  %v4819_v6 = vshll.u32 %v4812_v1, 16  ;;  %v4822_v7 = vshrl.u32 %v4812_v1, 16  ;;  %v3388_v0 = vld [vmem:[%s4720_s25 + $0x40] sm:$0xff]  ;;  %v644_v12 = vmax.f32 %v608_v60, 0.0  ;;  %v4343_v60 = vld [vmem:[%s6106_s6 + $0x138] sm:$0xff] }
  0x8b   : > { %967 = vperm.xlu0 %4615, %v948_v2   ;;  %3418 = vperm.xlu2 %4617, %v3380_v3   ;;  %v3387_v3 = vld [vmem:[%s4720_s25 + $0x38] sm:$0xff] }
  0x8c   : > { %v2011_v10 = vrot.slane %v4822_v7, 1  ;;  %v2012_v11 = vrot.slane %v4819_v6, 2  ;;  %v2777_v19 = vrot.slane %v4822_v7, 2  ;;  %v2778_v23 = vrot.slane %v4819_v6, 3  ;;  %2147 = vmatpush.bf16.msrb.mxu0 %v4343_v60 }
  0x8d   : > { %v4826_v14 = vpop.permute.xlu2 %706 }
  0x8e   : > { %v4829_v16 = vor.u32 %v2012_v11, %v2011_v10  ;;  %v4840_v26 = vor.u32 %v2778_v23, %v2777_v19  ;;  %v558_v10 = vmul.f32 %v4782_v41, %v4379_v57  ;;  %v4557_v11 = vld [vmem:[%s4700_s23 + $0x60] sm:$0xff]   ;;  %v599_v19 = vadd.f32 %v4794_v48, %v560_v62 }
  0x8f   : > { %v4427_v23 = vunpack.c.h.bf16 %v4557_v11  ;;  %v4426_v34 = vunpack.c.l.bf16 %v4557_v11 }
  0x90   : > { %v597_v29 = vadd.f32 %v4794_v48, %v558_v10  ;;  %v635_v40 = vmax.f32 %v599_v19, 0.0  ;;  %v4407_v10 = vunpack.c.h.bf16 %v4552_v35 }
  0x91   : > { %v582_v47 = vmul.f32 %v4782_v41, %v4427_v23 }
  0x92   : > { %3428 = vperm.xlu1 %4616, %v3382_v15   ;;  %v633_v52 = vmax.f32 %v597_v29, 0.0  ;;  %v3395_v29 = vld [vmem:[%s4720_s25 + $0x78] sm:$0xff] }
  0x93   : > { %3423 = vperm.xlu0 %4615, %v3381_v17   ;;  %3433 = vperm.xlu2 %4617, %v3383_v18   ;;  %v596_v18 = vadd.f32 %v4794_v48, %v557_v61 }
  0x94   : > { %v817_v27 = vpop.permute.xlu1 %816 }
  0x95   : > { %v807_v30 = vpop.permute.xlu0 %806  ;;  %v4852_v43 = vpop.permute.xlu2 %721  ;;  %v906_v53 = vmul.f32 %v817_v27, %v654_v42  ;;  %v632_v50 = vmax.f32 %v596_v18, 0.0 }
  0x96   : > { %v904_v58 = vmul.f32 %v807_v30, %v652_v45  ;;  %v3390_v45 = vld [vmem:[%s4720_s25 + $0x50] sm:$0xff]  ;;  %v887_v61 = vmul.f32 %v4852_v43, %v635_v40 }
  0x97   : > { %v884_v11 = vmul.f32 %v4826_v14, %v632_v50 }
  0x9a   : > { %3443 = vperm.xlu1 %4616, %v3385_v36   ;;  %v4547_v36 = vld [vmem:[%s4700_s23 + $0x10] sm:$0xff]  }
  0x9b   : > { %3438 = vperm.xlu0 %4615, %v3384_v38   ;;  %3448 = vperm.xlu2 %4617, %v3386_v39   ;;  %v6112_v38 = vrot.slane %v4819_v6, 1  ;;  %v4387_v57 = vunpack.c.h.bf16 %v4547_v36  ;;  %v4386_v9 = vunpack.c.l.bf16 %v4547_v36  ;;  %v572_v36 = vmul.f32 %v4782_v41, %v4407_v10  ;;  %v3397_v10 = vld [vmem:[%s4720_s25 + $0x88] sm:$0xff] }
  0x9c   : > { %v822_v51 = vpop.permute.xlu1 %821 }
  0x9d   : > { %v907_v54 = vmul.f32 %v822_v51, %v655_v44  ;;  %v812_v55 = vpop.permute.xlu0 %811  ;;  %v4883_v20 = vpop.permute.xlu2 %776  ;;  %v634_v51 = vmax.f32 %v598_v28, 0.0  ;;  %v561_v35 = vmul.f32 %v4782_v41, %v4386_v9  ;;  %v611_v60 = vadd.f32 %v4794_v48, %v572_v36  ;;  %v4561_v9 = vld [vmem:[%s4700_s23 + $0x80] sm:$0xff]  }
  0x9e   : > { %v905_v59 = vmul.f32 %v812_v55, %v653_v46  ;;  %v3392_v46 = vld [vmem:[%s4720_s25 + $0x60] sm:$0xff] }
  0x9f   : > { %v4859_v63 = vpack.c.bf16 %v907_v54, %v906_v53  ;;  %v581_v54 = vmul.f32 %v4782_v41, %v4426_v34 }
  0xa0   : > { %v4862_v2 = vpack.c.bf16 %v905_v59, %v904_v58  ;;  %v1079_v58 = vor.u32 %v4822_v7, %v6112_v38  ;;  %v4326_v59 = vld [vmem:[%s6106_s6 + $0xb0] sm:$0xff] }
  0xa1   : > { %v4879_v17 = vshll.u32 %v4859_v63, 16  ;;  %1634 = vmatpush.bf16.msrb.mxu2 %v4326_v59  ;;  %v620_v19 = vadd.f32 %v4794_v48, %v581_v54  ;;  %v600_v59 = vadd.f32 %v4794_v48, %v561_v35  ;;  %v5004_v35 = vshrl.u32 %v4859_v63, 16 }
  0xa2   : > { %3458 = vperm.xlu1 %4616, %v3388_v0   ;;  %v4873_v13 = vshll.u32 %v4862_v2, 16  ;;  %v4876_v15 = vshrl.u32 %v4862_v2, 16 }
  0xa3   : > { %6156 = vst [vmem:[#allocation2_spill] sm:$0xff] %v4879_v17  ;;  %3453 = vperm.xlu0 %4615, %v3387_v3   ;;  %3463 = vperm.xlu2 %4617, %v3389_v4   ;;  %v1123_v33 = vrot.slane %v4879_v17, 1  ;;  %v621_v3 = vadd.f32 %v4794_v48, %v582_v47  ;;  %v656_v40 = vmax.f32 %v620_v19, 0.0  ;;  %v4961_v47 = vld [vmem:[%s4700_s23 + $0x78] sm:$0xff]   ;;  %v3398_v19 = vld [vmem:[%s4720_s25 + $0x90] sm:$0xff] }
  0xa4   : > { %v772_v21 = vpop.permute.xlu1 %771  ;;  %v6111_v22 = vrot.slane %v4873_v13, 1  ;;  %v2031_v24 = vrot.slane %v4876_v15, 1  ;;  %v2032_v30 = vrot.slane %v4873_v13, 2  ;;  %6159 = vst [vmem:[#allocation5_spill] sm:$0xff] %v5004_v35 }
  0xa5   : > { %v897_v25 = vmul.f32 %v772_v21, %v645_v8  ;;  %v767_v27 = vpop.permute.xlu0 %766  ;;  %v4931_v5 = vpop.permute.xlu2 %731  ;;  %v571_v21 = vmul.f32 %v4782_v41, %v4406_v56  ;;  %v657_v14 = vmax.f32 %v621_v3, 0.0 }
  0xa6   : > { %v896_v31 = vmul.f32 %v767_v27, %v644_v12  ;;  %v1119_v32 = vor.u32 %v4876_v15, %v6111_v22  ;;  %v4898_v39 = vor.u32 %v2032_v30, %v2031_v24  ;;  %v3394_v24 = vld [vmem:[%s4720_s25 + $0x70] sm:$0xff]  ;;  %v562_v27 = vmul.f32 %v4782_v41, %v4387_v57  ;;  %v4558_v30 = vld [vmem:[%s4700_s23 + $0x68] sm:$0xff]  }
  0xa8   : > { %v4900_v42 = vpack.c.bf16 %v897_v25, %v896_v31  ;;  %v1124_v44 = vsel %vm1032_vm0, %v1119_v32, %v1123_v33  ;;  %v3393_v25 = vld [vmem:[%s4720_s25 + $0x68] sm:$0xff]  ;;  %v4310_v31 = vld [vmem:[%s6106_s6 + $0x30] sm:$0xff]  ;;  %v601_v56 = vadd.f32 %v4794_v48, %v562_v27 }
  0xa9   : > { %1305 = vmatmul.bf16.vlgmr.msra.gmra.mxu2 %v1124_v44  ;;  %1395 = vmatpush.bf16.msrb.mxu1 %v4310_v31  ;;  %v4309_v31 = vld [vmem:[%s6106_s6 + $0x28] sm:$0xff] }
  0xaa   : > { %6157 = vst [vmem:[#allocation3_spill] sm:$0xff] %v4900_v42  ;;  %3473 = vperm.xlu1 %4616, %v3391_v37   ;;  %v4912_v53 = vshll.u32 %v4900_v42, 16  ;;  %v4916_v55 = vshrl.u32 %v4900_v42, 16 }
  0xab   : > { %3468 = vperm.xlu0 %4615, %v3390_v45   ;;  %3478 = vperm.xlu2 %4617, %v3392_v46   ;;  %v610_v45 = vadd.f32 %v4794_v48, %v571_v21  ;;  %v4431_v46 = vunpack.c.h.bf16 %v4558_v30  ;;  %v4325_v21 = vld [vmem:[%s6106_s6 + $0xa8] sm:$0xff] }
  0xac   : > { %v717_v62 = vpop.permute.xlu1 %716  ;;  %v1083_v0 = vrot.slane %v4912_v53, 1  ;;  %v2015_v4 = vrot.slane %v4916_v55, 1  ;;  %v2016_v43 = vrot.slane %v4912_v53, 2  ;;  %1635 = vmatpush.bf16.msrb.mxu2 %v4325_v21  ;;  %v5034_v21 = vld [vmem:[%s4700_s23 + $0x40] sm:$0xff]  }
  0xad   : > { %v886_v7 = vmul.f32 %v717_v62, %v634_v51  ;;  %v712_v8 = vpop.permute.xlu0 %711  ;;  %1396 = vmatpush.bf16.msrb.mxu1 %v4309_v31 }
  0xae   : > { %v885_v12 = vmul.f32 %v712_v8, %v633_v52  ;;  %v1084_v18 = vsel %vm1032_vm0, %v1079_v58, %v1083_v0  ;;  %v4952_v32 = vor.u32 %v2016_v43, %v2015_v4  ;;  %v4430_v4 = vunpack.c.l.bf16 %v4558_v30  ;;  %v3396_v43 = vld [vmem:[%s4720_s25 + $0x80] sm:$0xff] }
  0xaf   : > { %v4940_v23 = vpack.c.bf16 %v887_v61, %v886_v7  ;;  %1280 = vmatmul.bf16.vlgmr.msra.gmra.mxu1 %v1084_v18  ;;  %v4975_v7 = vpop.permute.xlu2 %856  ;;  %v4438_v8 = vunpack.c.l.bf16 %v4961_v47  ;;  %v636_v30 = vmax.f32 %v600_v59, 0.0 }
  0xb0   : > { %v4945_v28 = vpack.c.bf16 %v885_v12, %v884_v11  ;;  %v584_v11 = vmul.f32 %v4782_v41, %v4431_v46  ;;  %v4998_v27 = vsel %vm1995_vm1, %v4829_v16, %v4952_v32 }
  0xb1   : > { %v1041_v34 = vshll.u32 %v4940_v23, 16  ;;  %v1045_v37 = vshrl.u32 %v4940_v23, 16 }
  0xb2   : > { %3488 = vperm.xlu1 %4616, %v3394_v24   ;;  %v1036_v44 = vshll.u32 %v4945_v28, 16  ;;  %v1034_v50 = vshrl.u32 %v4945_v28, 16  ;;  %v4342_v24 = vld [vmem:[%s6106_s6 + $0x130] sm:$0xff]  ;;  %v623_v46 = vadd.f32 %v4794_v48, %v584_v11 }
  0xb3   : > { %3483 = vperm.xlu0 %4615, %v3393_v25   ;;  %3493 = vperm.xlu2 %4617, %v3395_v29   ;;  %v4966_v52 = vrot.slane %v1045_v37, 1  ;;  %v4968_v54 = vrot.slane %v1041_v34, 2  ;;  %v4973_v3 = vrot.slane %v1041_v34, 1  ;;  %v646_v29 = vmax.f32 %v610_v45, 0.0 }
  0xb4   : > { %v832_v49 = vpop.permute.xlu1 %831  ;;  %v1038_v51 = vrot.slane %v1036_v44, 1  ;;  %v647_v34 = vmax.f32 %v611_v60, 0.0  ;;  %v587_v44 = vmul.f32 %v4782_v41, %v4438_v8  ;;  %v4443_v45 = vunpack.c.h.bf16 %v4561_v9  ;;  %2148 = vmatpush.bf16.msrb.mxu0 %v4342_v24  ;;  %v4341_v24 = vld [vmem:[%s6106_s6 + $0x128] sm:$0xff] }
  0xb5   : > { %v909_v57 = vmul.f32 %v832_v49, %v657_v14  ;;  %v827_v58 = vpop.permute.xlu0 %826  ;;  %v1998_v25 = vor.u32 %v4968_v54, %v4966_v52  ;;  %v637_v14 = vmax.f32 %v601_v56, 0.0  ;;  %v2781_v56 = vrot.slane %v4916_v55, 2 }
  0xb6   : > { %v908_v61 = vmul.f32 %v827_v58, %v656_v40  ;;  %v1039_v62 = vor.u32 %v1038_v51, %v1034_v50  ;;  %v583_v40 = vmul.f32 %v4782_v41, %v4430_v4  ;;  %v1127_v50 = vor.u32 %v5004_v35, %v1123_v33 }
  0xb7   : > { %v889_v58 = vmul.f32 %v4931_v5, %v637_v14  ;;  %v898_v33 = vmul.f32 %v4883_v20, %v646_v29  ;;  %v3400_v5 = vld [vmem:[%s4720_s25 + $0xa0] sm:$0xff]  ;;  %v5044_v14 = vpop.permute.xlu2 %871 }
  0xb8   : > { %v4982_v12 = vpack.c.bf16 %v909_v57, %v908_v61  ;;  %v1044_v18 = vsel %vm1032_vm0, %v1039_v62, %v4973_v3  ;;  %v2782_v57 = vrot.slane %v4912_v53, 3  ;;  %v4442_v61 = vunpack.c.l.bf16 %v4561_v9  ;;  %v4324_v20 = vld [vmem:[%s6106_s6 + $0xa0] sm:$0xff]  ;;  %2149 = vmatpush.bf16.msrb.mxu0 %v4341_v24  ;;  %v3403_v24 = vld [vmem:[%s4720_s25 + $0xb8] sm:$0xff] }
  0xb9   : > { %1255 = vmatmul.bf16.vlgmr.msra.gmra.mxu0 %v1044_v18  ;;  %v4439_v62 = vunpack.c.h.bf16 %v4961_v47  ;;  %v3399_v18 = vld [vmem:[%s4720_s25 + $0x98] sm:$0xff]  ;;  %v659_v47 = vmax.f32 %v623_v46, 0.0  ;;  %1636 = vmatpush.bf16.msrb.mxu2 %v4324_v20 }
  0xba   : > { %6158 = vst [vmem:[#allocation4_spill] sm:$0xff] %v4982_v12  ;;  %3503 = vperm.xlu1 %4616, %v3397_v10   ;;  %v5007_v36 = vshll.u32 %v4982_v12, 16  ;;  %v622_v10 = vadd.f32 %v4794_v48, %v583_v40  ;;  %v5042_v29 = vor.u32 %v2782_v57, %v2781_v56  ;;  %v589_v31 = vmul.f32 %v4782_v41, %v4442_v61 }
  0xbb   : > { %3498 = vperm.xlu0 %4615, %v3396_v43   ;;  %3508 = vperm.xlu2 %4617, %v3398_v19   ;;  %v590_v43 = vmul.f32 %v4782_v41, %v4443_v45  ;;  %v3401_v19 = vld [vmem:[%s4720_s25 + $0xa8] sm:$0xff]  ;;  %v5055_v45 = vadd.f32 %v4794_v48, %v587_v44  ;;  %v1087_v56 = vor.u32 %v4916_v55, %v1083_v0  ;;  %v4411_v57 = vunpack.c.h.bf16 %v5034_v21  ;;  %v4308_v44 = vld [vmem:[%s6106_s6 + $0x20] sm:$0xff] }
  0xbc   : > { %6160 = vst [vmem:[#allocation6_spill] sm:$0xff] %v5007_v36  ;;  %v727_v49 = vpop.permute.xlu1 %726  ;;  %v1131_v51 = vrot.slane %v5007_v36, 1  ;;  %v658_v46 = vmax.f32 %v622_v10, 0.0  ;;  %1397 = vmatpush.bf16.msrb.mxu1 %v4308_v44  ;;  %v5083_v10 = vld [vmem:[%s4700_s23 + $0x18] sm:$0xff]  }
  0xbd   : > { %v888_v59 = vmul.f32 %v727_v49, %v636_v30  ;;  %v782_v60 = vpop.permute.xlu0 %781  ;;  %v662_v20 = vmax.f32 %v5055_v45, 0.0 }
  0xbe   : > { %v899_v4 = vmul.f32 %v782_v60, %v647_v34  ;;  %v1132_v8 = vsel %vm1032_vm0, %v1127_v50, %v1131_v51  ;;  %v588_v34 = vmul.f32 %v4782_v41, %v4439_v62  ;;  %v5061_v50 = vadd.f32 %v4794_v48, %v590_v43 }
  0xbf   : > { %v5026_v11 = vpack.c.bf16 %v889_v58, %v888_v59  ;;  %1310 = vmatmul.bf16.gmra.mxu2 %v1132_v8  ;;  %v4335_v58 = vld [vmem:[%s6106_s6 + $0xf8] sm:$0xff] }
  0xc0   : > { %v5031_v9 = vpack.c.bf16 %v899_v4, %v898_v33  ;;  %v628_v4 = vadd.f32 %v4794_v48, %v589_v31  ;;  %v627_v8 = vadd.f32 %v4794_v48, %v588_v34  ;;  %1843 = vmatpush.bf16.msrb.mxu3 %v4335_v58  ;;  %v3402_v31 = vld [vmem:[%s4720_s25 + $0xb0] sm:$0xff]  ;;  %v3404_v34 = vld [vmem:[%s4720_s25 + $0xc0] sm:$0xff] }
  0xc1   : > { %v5047_v30 = vshll.u32 %v5026_v11, 16  ;;  %v5052_v40 = vshrl.u32 %v5026_v11, 16 }
  0xc2   : > { %6161 = vst [vmem:[#allocation7_spill] sm:$0xff] %v5031_v9  ;;  %3518 = vperm.xlu1 %4616, %v3400_v5   ;;  %v5058_v49 = vshll.u32 %v5031_v9, 16  ;;  %v5077_v55 = vshrl.u32 %v5031_v9, 16  ;;  %v5086_v5 = vld [vmem:[%s4700_s23 + $0x70] sm:$0xff]  }
  0xc3   : > { %3513 = vperm.xlu0 %4615, %v3399_v18   ;;  %3523 = vperm.xlu2 %4617, %v3401_v19   ;;  %v1999_v59 = vrot.slane %v5052_v40, 1  ;;  %v6113_v53 = vrot.slane %v5047_v30, 1  ;;  %v2000_v0 = vrot.slane %v5047_v30, 2  ;;  %v1047_v19 = vor.u32 %v1045_v37, %v4973_v3  ;;  %v4323_v37 = vld [vmem:[%s6106_s6 + $0x98] sm:$0xff]  ;;  %v4334_v3 = vld [vmem:[%s6106_s6 + $0xf0] sm:$0xff] }
  0xc4   : > { %v842_v60 = vpop.permute.xlu1 %841  ;;  %v1091_v61 = vrot.slane %v5058_v49, 1  ;;  %v2019_v45 = vrot.slane %v5077_v55, 1  ;;  %1637 = vmatpush.bf16.msrb.mxu2 %v4323_v37  ;;  %1844 = vmatpush.bf16.msrb.mxu3 %v4334_v3  ;;  %v4434_v37 = vunpack.c.l.bf16 %v5086_v5  ;;  %v4391_v3 = vunpack.c.h.bf16 %v5083_v10 }
  0xc5   : > { %v911_v62 = vmul.f32 %v842_v60, %v659_v47  ;;  %v837_v33 = vpop.permute.xlu0 %836  ;;  %v4410_v47 = vunpack.c.l.bf16 %v5034_v21  ;;  %v5100_v44 = vor.u32 %v2000_v0, %v1999_v59  ;;  %v4340_v21 = vld [vmem:[%s6106_s6 + $0x120] sm:$0xff]  ;;  %v665_v59 = vmax.f32 %v5061_v50, 0.0 }
  0xc6   : > { %v910_v43 = vmul.f32 %v837_v33, %v658_v46  ;;  %v1092_v18 = vsel %vm1032_vm0, %v1087_v56, %v1091_v61  ;;  %v574_v46 = vmul.f32 %v4782_v41, %v4411_v57  ;;  %v1052_v56 = vsel %vm1032_vm0, %v1047_v19, %v6113_v53  ;;  %2150 = vmatpush.bf16.msrb.mxu0 %v4340_v21 }
  0xc7   : > { %1285 = vmatmul.bf16.gmra.mxu1 %v1092_v18  ;;  %v2020_v57 = vrot.slane %v5058_v49, 2  ;;  %v664_v60 = vmax.f32 %v628_v4, 0.0  ;;  %v5120_v0 = vshrl.u32 %v4982_v12, 16  ;;  %v663_v33 = vmax.f32 %v627_v8, 0.0  ;;  %v5135_v4 = vpop.permute.xlu2 %736 }
  0xc8   : > { %v5102_v58 = vpack.c.bf16 %v911_v62, %v910_v43  ;;  %v5127_v62 = vsel %vm1995_vm1, %v1998_v25, %v5100_v44  ;;  %v573_v18 = vmul.f32 %v4782_v41, %v4410_v47  ;;  %v4390_v19 = vunpack.c.l.bf16 %v5083_v10  ;;  %v4333_v10 = vld [vmem:[%s6106_s6 + $0xe8] sm:$0xff] }
  0xc9   : > { %1260 = vmatmul.bf16.gmra.mxu0 %v1052_v56  ;;  %6162 = vst [vmem:[#allocation8_spill] sm:$0xff] %v5120_v0  ;;  %v5133_v50 = vor.u32 %v2020_v57, %v2019_v45  ;;  %v4435_v56 = vunpack.c.h.bf16 %v5086_v5  ;;  %v1135_v52 = vor.u32 %v5120_v0, %v1131_v51  ;;  %v613_v54 = vadd.f32 %v4794_v48, %v574_v46  ;;  %v3406_v57 = vld [vmem:[%s4720_s25 + $0xd0] sm:$0xff]  ;;  %v4562_v5 = vld [vmem:[%s4700_s23 + $0x88] sm:$0xff]  }
  0xca   : > { %3533 = vperm.xlu1 %4616, %v3403_v24   ;;  %v5130_v43 = vshll.u32 %v5102_v58, 16  ;;  %v2766_v24 = vrot.slane %v5052_v40, 2  ;;  %v917_v51 = vmul.f32 %v5044_v14, %v665_v59  ;;  %v914_v21 = vmul.f32 %v4975_v7, %v662_v20  ;;  %v3405_v14 = vld [vmem:[%s4720_s25 + $0xc8] sm:$0xff]  ;;  %v3407_v59 = vld [vmem:[%s4720_s25 + $0xd8] sm:$0xff]  ;;  %v4322_v20 = vld [vmem:[%s6106_s6 + $0x90] sm:$0xff]  ;;  %1845 = vmatpush.bf16.msrb.mxu3 %v4333_v10 }
  0xcb   : > { %3528 = vperm.xlu0 %4615, %v3402_v31   ;;  %3538 = vperm.xlu2 %4617, %v3404_v34   ;;  %v5147_v47 = vsel %vm1995_vm1, %v4952_v32, %v5133_v50  ;;  %v2767_v31 = vrot.slane %v5047_v30, 3  ;;  %v612_v22 = vadd.f32 %v4794_v48, %v573_v18  ;;  %v563_v38 = vmul.f32 %v4782_v41, %v4390_v19  ;;  %v4307_v7 = vld [vmem:[%s6106_s6 + $0x18] sm:$0xff] }
  0xcc   : > { %6163 = vst [vmem:[#allocation9_spill] sm:$0xff] %v5130_v43  ;;  %v867_v25 = vpop.permute.xlu1 %866  ;;  %v6114_v8 = vrot.slane %v5130_v43, 1  ;;  %v586_v18 = vmul.f32 %v4782_v41, %v4435_v56  ;;  %v649_v19 = vmax.f32 %v613_v54, 0.0  ;;  %1398 = vmatpush.bf16.msrb.mxu1 %v4307_v7  ;;  %v4447_v54 = vunpack.c.h.bf16 %v4562_v5  ;;  %1638 = vmatpush.bf16.msrb.mxu2 %v4322_v20 }
  0xcd   : > { %v916_v34 = vmul.f32 %v867_v25, %v664_v60  ;;  %v862_v46 = vpop.permute.xlu0 %861  ;;  %v564_v25 = vmul.f32 %v4782_v41, %v4391_v3  ;;  %v602_v56 = vadd.f32 %v4794_v48, %v563_v38  ;;  %v4446_v20 = vunpack.c.l.bf16 %v4562_v5 }
  0xce   : > { %v915_v45 = vmul.f32 %v862_v46, %v663_v33  ;;  %v1140_v32 = vsel %vm1032_vm0, %v1135_v52, %v6114_v8  ;;  %v5177_v33 = vor.u32 %v2767_v31, %v2766_v24  ;;  %v585_v52 = vmul.f32 %v4782_v41, %v4434_v37  ;;  %v4549_v8 = vld [vmem:[%s4700_s23 + $0x20] sm:$0xff]  }
  0xcf   : > { %v5161_v53 = vpack.c.bf16 %v917_v51, %v916_v34  ;;  %1315 = vmatmul.bf16.gmra.mxu2 %v1140_v32  ;;  %v4339_v51 = vld [vmem:[%s6106_s6 + $0x118] sm:$0xff]  ;;  %v648_v34 = vmax.f32 %v612_v22, 0.0  ;;  %v852_v22 = vpop.permute.xlu2 %851  ;;  %v625_v3 = vadd.f32 %v4794_v48, %v586_v18  ;;  %v638_v18 = vmax.f32 %v602_v56, 0.0 }
  0xd0   : > { %v5166_v60 = vpack.c.bf16 %v915_v45, %v914_v21  ;;  %v624_v38 = vadd.f32 %v4794_v48, %v585_v52  ;;  %2151 = vmatpush.bf16.msrb.mxu0 %v4339_v51  ;;  %v3408_v51 = vld [vmem:[%s4720_s25 + $0xe0] sm:$0xff]  ;;  %v4394_v36 = vunpack.c.l.bf16 %v4549_v8 }
  0xd1   : > { %6164 = vst [vmem:[#allocation10_spill] sm:$0xff] %v5161_v53  ;;  %v5189_v21 = vshll.u32 %v5161_v53, 16  ;;  %v661_v5 = vmax.f32 %v625_v3, 0.0  ;;  %v4306_v3 = vld [vmem:[%s6106_s6 + $0x10] sm:$0xff] }
  0xd2   : > { %6165 = vst [vmem:[#allocation11_spill] sm:$0xff] %v5166_v60  ;;  %3548 = vperm.xlu1 %4616, %v3406_v57   ;;  %v5186_v46 = vshll.u32 %v5166_v60, 16  ;;  %v5194_v37 = vshrl.u32 %v5166_v60, 16  ;;  %v603_v57 = vadd.f32 %v4794_v48, %v564_v25  ;;  %1399 = vmatpush.bf16.msrb.mxu1 %v4306_v3  ;;  %v3412_v3 = vld [vmem:[%s4720_s25 + $0x100] sm:$0xff] }
  0xd3   : > { %6166 = vst [vmem:[#allocation12_spill] sm:$0xff] %v5189_v21  ;;  %3543 = vperm.xlu0 %4615, %v3405_v14   ;;  %3553 = vperm.xlu2 %4617, %v3407_v59   ;;  %v5200_v14 = vld [vmem:[%s4700_s23 + $0x48] sm:$0xff]   ;;  %v6116_v10 = vrot.slane %v5189_v21, 1 }
  0xd4   : > { %v792_v24 = vpop.permute.xlu1 %791  ;;  %v6115_v31 = vrot.slane %v5186_v46, 1  ;;  %6167 = vst [vmem:[#allocation13_spill] sm:$0xff] %v5194_v37  ;;  %v4414_v56 = vunpack.c.l.bf16 %v5200_v14  ;;  %v4415_v12 = vunpack.c.h.bf16 %v5200_v14 }
  0xd5   : > { %v901_v45 = vmul.f32 %v792_v24, %v649_v19  ;;  %v787_v32 = vpop.permute.xlu0 %786  ;;  %v3409_v19 = vld [vmem:[%s4720_s25 + $0xe8] sm:$0xff]  ;;  %v592_v24 = vmul.f32 %v4782_v41, %v4447_v54  ;;  %v660_v54 = vmax.f32 %v624_v38, 0.0  ;;  %v890_v38 = vmul.f32 %v5135_v4, %v638_v18  ;;  %v4331_v4 = vld [vmem:[%s6106_s6 + $0xd8] sm:$0xff] }
  0xd6   : > { %v900_v59 = vmul.f32 %v787_v32, %v648_v34  ;;  %v1159_v7 = vor.u32 %v5194_v37, %v6115_v31  ;;  %v3410_v34 = vld [vmem:[%s4720_s25 + $0xf0] sm:$0xff]  ;;  %v5219_v32 = vsel %vm2765_vm2, %v4840_v26, %v5042_v29  ;;  %v591_v31 = vmul.f32 %v4782_v41, %v4446_v20 }
  0xd7   : > { %6169 = vst [vmem:[#allocation15_spill] sm:$0xff] %v5219_v32  ;;  %v2785_v20 = vrot.slane %v5077_v55, 2  ;;  %v1095_v32 = vor.u32 %v5077_v55, %v1091_v61  ;;  %v2786_v61 = vrot.slane %v5058_v49, 3  ;;  %v5254_v17 = vpop.permute.xlu2 %796  ;;  %v575_v35 = vmul.f32 %v4782_v41, %v4414_v56  ;;  %v3413_v49 = vld [vmem:[%s4720_s25 + $0x108] sm:$0xff]  ;;  %v4338_v56 = vld [vmem:[%s6106_s6 + $0x110] sm:$0xff] }
  0xd8   : > { %v5208_v52 = vpack.c.bf16 %v901_v45, %v900_v59  ;;  %v1164_v25 = vsel %vm1032_vm0, %v1159_v7, %v6116_v10  ;;  %v639_v45 = vmax.f32 %v603_v57, 0.0  ;;  %v4332_v10 = vld [vmem:[%s6106_s6 + $0xe0] sm:$0xff]  ;;  %v631_v57 = vadd.f32 %v4794_v48, %v592_v24  ;;  %2152 = vmatpush.bf16.msrb.mxu0 %v4338_v56 }
  0xd9   : > { %1330 = vmatmul.bf16.vlgmr.msra.gmra.mxu3 %v1164_v25  ;;  %v630_v0 = vadd.f32 %v4794_v48, %v591_v31 }
  0xda   : > { %6168 = vst [vmem:[#allocation14_spill] sm:$0xff] %v5208_v52  ;;  %3563 = vperm.xlu1 %4616, %v3409_v19   ;;  %v5223_v59 = vshll.u32 %v5208_v52, 16  ;;  %v5227_v7 = vshrl.u32 %v5208_v52, 16  ;;  %v4395_v19 = vunpack.c.h.bf16 %v4549_v8  ;;  %1846 = vmatpush.bf16.msrb.mxu3 %v4332_v10  ;;  %v3411_v8 = vld [vmem:[%s4720_s25 + $0xf8] sm:$0xff] }
  0xdb   : > { %3558 = vperm.xlu0 %4615, %v3408_v51   ;;  %3568 = vperm.xlu2 %4617, %v3410_v34   ;;  %v913_v51 = vmul.f32 %v852_v22, %v661_v5  ;;  %v5266_v5 = vor.u32 %v2786_v61, %v2785_v20  ;;  %v5281_v20 = vshrl.u32 %v5102_v58, 16  ;;  %v6170_v61 = vrot.slane %v5130_v43, 1 }
  0xdc   : > { %v847_v25 = vpop.permute.xlu1 %846  ;;  %v6131_v37 = vrot.slane %v5223_v59, 1  ;;  %v2023_v18 = vrot.slane %v5227_v7, 1  ;;  %v2024_v24 = vrot.slane %v5223_v59, 2  ;;  %v566_v31 = vmul.f32 %v4782_v41, %v4395_v19 }
  0xdd   : > { %v912_v34 = vmul.f32 %v847_v25, %v660_v54  ;;  %v742_v60 = vpop.permute.xlu0 %741  ;;  %v667_v54 = vmax.f32 %v631_v57, 0.0  ;;  %v4330_v25 = vld [vmem:[%s6106_s6 + $0xd0] sm:$0xff]  ;;  %v565_v19 = vmul.f32 %v4782_v41, %v4394_v36  ;;  %v4449_v57 = vld [vmem:[%s4705_s27] sm:$0xff]   ;;  %v5301_v36 = vadd.f32 %v4794_v48, %v575_v35 }
  0xde   : > { %v891_v55 = vmul.f32 %v742_v60, %v639_v45  ;;  %v1100_v10 = vsel %vm1032_vm0, %v1095_v32, %v6131_v37  ;;  %v4321_v60 = vld [vmem:[%s6106_s6 + $0x88] sm:$0xff]  ;;  %v5264_v32 = vor.u32 %v2024_v24, %v2023_v18  ;;  %1847 = vmatpush.bf16.msrb.mxu3 %v4331_v4  ;;  %v4320_v4 = vld [vmem:[%s6106_s6 + $0x80] sm:$0xff]  ;;  %v666_v24 = vmax.f32 %v630_v0, 0.0 }
  0xdf   : > { %v5257_v22 = vpack.c.bf16 %v913_v51, %v912_v34  ;;  %1290 = vmatmul.bf16.gmra.mxu1 %v1100_v10  ;;  %v4305_v45 = vld [vmem:[%s6106_s6 + $0x8] sm:$0xff]  ;;  %1639 = vmatpush.bf16.msrb.mxu2 %v4321_v60  ;;  %v576_v34 = vmul.f32 %v4782_v41, %v4415_v12  ;;  %v605_v10 = vadd.f32 %v4794_v48, %v566_v31  ;;  %v4451_v12 = vunpack.c.h.bf16 %v4449_v57 }
  0xe0   : > { %v5269_v14 = vpack.c.bf16 %v891_v55, %v890_v38  ;;  %v5294_v18 = vsel %vm1995_vm1, %v5133_v50, %v5264_v32  ;;  %v1143_v55 = vor.u32 %v5281_v20, %v6170_v61  ;;  %1400 = vmatpush.bf16.msrb.mxu1 %v4305_v45  ;;  %v604_v31 = vadd.f32 %v4794_v48, %v565_v19  ;;  %v4329_v61 = vld [vmem:[%s6106_s6 + $0xc8] sm:$0xff] }
  0xe1   : > { %v5284_v38 = vshll.u32 %v5257_v22, 16  ;;  %v4450_v45 = vunpack.c.l.bf16 %v4449_v57  ;;  %v4337_v19 = vld [vmem:[%s6106_s6 + $0x108] sm:$0xff] }
  0xe2   : > { %3578 = vperm.xlu1 %4616, %v3412_v3   ;;  %v5297_v51 = vshll.u32 %v5269_v14, 16  ;;  %v6171_v3 = vrot.slane %v5047_v30, 1  ;;  %1848 = vmatpush.bf16.msrb.mxu3 %v4330_v25  ;;  %v5317_v30 = vshrl.u32 %v5269_v14, 16  ;;  %v3415_v25 = vld [vmem:[%s4720_s25 + $0x118] sm:$0xff] }
  0xe3   : > { %3573 = vperm.xlu0 %4615, %v3411_v8   ;;  %3583 = vperm.xlu2 %4617, %v3413_v49   ;;  %v6133_v50 = vrot.slane %v5284_v38, 1 }
  0xe4   : > { %v882_v0 = vpop.permute.xlu1 %881  ;;  %v1055_v60 = vor.u32 %v5052_v40, %v6171_v3  ;;  %v6132_v41 = vrot.slane %v5297_v51, 1  ;;  %1640 = vmatpush.bf16.msrb.mxu2 %v4320_v4  ;;  %v641_v4 = vmax.f32 %v605_v10, 0.0  ;;  %v650_v3 = vmax.f32 %v5301_v36, 0.0  ;;  %2153 = vmatpush.bf16.msrb.mxu0 %v4337_v19  ;;  %v4328_v10 = vld [vmem:[%s6106_s6 + $0xc0] sm:$0xff] }
  0xe5   : > { %v919_v35 = vmul.f32 %v882_v0, %v667_v54  ;;  %v877_v8 = vpop.permute.xlu0 %876  ;;  %v1148_v49 = vsel %vm1032_vm0, %v1143_v55, %v6133_v50  ;;  %v615_v54 = vadd.f32 %v4794_v48, %v576_v34  ;;  %v3414_v0 = vld [vmem:[%s4720_s25 + $0x110] sm:$0xff]  ;;  %v4620_v48 = vld [vmem:[%s6104_s4] ss:$0 sm:$0xff] }
  0xe6   : > { %v918_v40 = vmul.f32 %v877_v8, %v666_v24  ;;  %v1060_v56 = vsel %vm1032_vm0, %v1055_v60, %v6132_v41  ;;  %1320 = vmatmul.bf16.gmra.mxu2 %v1148_v49  ;;  %v4563_v24 = vld [vmem:[%s4705_s27 + $0x8] sm:$0xff]   ;;  %v931_v57 = vmul.f32 %v4620_v48, %v4451_v12  ;;  %v4304_v34 = vld [vmem:[%s6106_s6] sm:$0xff]  ;;  %v752_v60 = vpop.permute.xlu2 %751  ;;  %v640_v8 = vmax.f32 %v604_v31, 0.0  ;;  %1849 = vmatpush.bf16.msrb.mxu3 %v4329_v61 }
  0xe7   : > { %1265 = vmatmul.bf16.gmra.mxu0 %v1060_v56  ;;  %v2770_v49 = vrot.slane %v5297_v51, 3  ;;  %v651_v12 = vmax.f32 %v615_v54, 0.0  ;;  %v930_v36 = vmul.f32 %v4620_v48, %v4450_v45  ;;  %1401 = vmatpush.bf16.msrb.mxu1 %v4304_v34  ;;  %v4454_v31 = vunpack.c.l.bf16 %v4563_v24 }
  0xe8   : > { %v5331_v55 = vpack.c.bf16 %v919_v35, %v918_v40  ;;  %v2769_v35 = vrot.slane %v5317_v30, 2  ;;  %v5347_v40 = vshrl.u32 %v5161_v53, 16  ;;  %v893_v19 = vmul.f32 %v752_v60, %v641_v4 }
  0xe9   : > { %v6173_v41 = vrot.slane %v5189_v21, 1  ;;  %v4455_v34 = vunpack.c.h.bf16 %v4563_v24 }
  0xea   : > { %3593 = vperm.xlu1 %4616, %v3415_v25   ;;  %6172 = vst [vmem:[#allocation16_spill] sm:$0xff] %v5347_v40  ;;  %v5350_v56 = vshll.u32 %v5331_v55, 16  ;;  %v5352_v61 = vor.u32 %v2770_v49, %v2769_v35  ;;  %v4621_v25 = vld [vmem:[%s6105_s5] ss:$0 sm:$0xff]  ;;  %1850 = vmatpush.bf16.msrb.mxu3 %v4328_v10 }
  0xeb   : > { %3588 = vperm.xlu0 %4615, %v3414_v0   ;;  %v1167_v50 = vor.u32 %v5347_v40, %v6173_v41  ;;  %v936_v53 = vadd.f32 %v4621_v25, %v931_v57  ;;  %v5369_v41 = vsel %vm2765_vm2, %v5042_v29, %v5266_v5  ;;  %v902_v0 = vmul.f32 %v5254_v17, %v650_v3  ;;  %v4359_v17 = vld [vmem:[%s6106_s6 + $0x1b8] sm:$0xff] }
  0xec   : > { %v747_v37 = vpop.permute.xlu1 %746  ;;  %v6138_v54 = vrot.slane %v5350_v56, 1  ;;  %v5364_v4 = vsel %vm2765_vm2, %v5177_v33, %v5352_v61  ;;  %6175 = vst [vmem:[#allocation18_spill] sm:$0xff] %v5369_v41  ;;  %v935_v57 = vadd.f32 %v4621_v25, %v930_v36  ;;  %v4336_v33 = vld [vmem:[%s6106_s6 + $0x100] sm:$0xff]  ;;  %v932_v29 = vmul.f32 %v4620_v48, %v4454_v31  ;;  %2613 = vmatpush.bf16.msra.mxu2 %v4359_v17 }
  0xed   : > { %v892_v43 = vmul.f32 %v747_v37, %v640_v8  ;;  %v802_v45 = vpop.permute.xlu0 %801  ;;  %6174 = vst [vmem:[#allocation17_spill] sm:$0xff] %v5364_v4  ;;  %v5378_v8 = vshrl.u32 %v5257_v22, 16  ;;  %v941_v10 = vmax.f32 %v936_v53, 0.0  ;;  %v933_v49 = vmul.f32 %v4620_v48, %v4455_v34  ;;  %2154 = vmatpush.bf16.msrb.mxu0 %v4336_v33 }
  0xee   : > { %v903_v60 = vmul.f32 %v802_v45, %v651_v12  ;;  %v1172_v37 = vsel %vm1032_vm0, %v1167_v50, %v6138_v54  ;;  %v940_v12 = vmax.f32 %v935_v57, 0.0  ;;  %v6177_v31 = vrot.slane %v5297_v51, 1 }
  0xef   : > { %v5375_v24 = vpack.c.bf16 %v893_v19, %v892_v43  ;;  %1335 = vmatmul.bf16.gmra.mxu3 %v1172_v37  ;;  %v6176_v43 = vrot.slane %v5284_v38, 1  ;;  %v6178_v34 = vrot.slane %v5223_v59, 1  ;;  %v938_v4 = vadd.f32 %v4621_v25, %v933_v49 }
  0xf0   : > { %v5386_v3 = vpack.c.bf16 %v903_v60, %v902_v0  ;;  %v1063_v53 = vor.u32 %v5317_v30, %v6177_v31  ;;  %v937_v60 = vadd.f32 %v4621_v25, %v932_v29  ;;  %v6179_v31 = vrot.slane %v5186_v46, 1  ;;  %v4367_v29 = vld [vmem:[%s6106_s6 + $0x1f8] sm:$0xff] }
  0xf1   : > { %v5389_v50 = vshll.u32 %v5375_v24, 16  ;;  %v1151_v35 = vor.u32 %v5378_v8, %v6176_v43  ;;  %v5405_v0 = vshrl.u32 %v5375_v24, 16  ;;  %v1103_v37 = vor.u32 %v5227_v7, %v6178_v34  ;;  %2917 = vmatpush.bf16.msra.mxu3 %v4367_v29 }
  0xf2   : > { %v5395_v36 = vshll.u32 %v5386_v3, 16  ;;  %v5398_v19 = vshrl.u32 %v5386_v3, 16  ;;  %v2790_v29 = vrot.slane %v5223_v59, 3  ;;  %v2797_v59 = vrot.slane %v4876_v15, 2 }
  0xf3   : > { %v1067_v45 = vrot.slane %v5389_v50, 1  ;;  %v1156_v41 = vsel %vm1032_vm0, %v1151_v35, %v6179_v31  ;;  %v2789_v31 = vrot.slane %v5227_v7, 2 }
  0xf4   : > { %v958_v48 = vpop.permute.xlu1 %957  ;;  %v1107_v57 = vrot.slane %v5395_v36, 1  ;;  %v2027_v33 = vrot.slane %v5398_v19, 1  ;;  %v2028_v40 = vrot.slane %v5395_v36, 2  ;;  %v2794_v15 = vrot.slane %v5395_v36, 3 }
  0xf5   : > { %v976_v17 = vmul.f32 %v958_v48, %v941_v10  ;;  %v953_v43 = vpop.permute.xlu0 %952  ;;  %v1068_v54 = vsel %vm1032_vm0, %v1063_v53, %v1067_v45  ;;  %v4351_v10 = vld [vmem:[%s6106_s6 + $0x178] sm:$0xff]  ;;  %v2773_v53 = vrot.slane %v5405_v0, 2  ;;  %v943_v48 = vmax.f32 %v938_v4, 0.0 }
  0xf6   : > { %v975_v21 = vmul.f32 %v953_v43, %v940_v12  ;;  %v1108_v34 = vsel %vm1032_vm0, %v1103_v37, %v1107_v57  ;;  %1325 = vmatmul.bf16.gmra.mxu2 %v1156_v41  ;;  %v2029_v49 = vor.u32 %v2028_v40, %v2027_v33  ;;  %v942_v12 = vmax.f32 %v937_v60, 0.0  ;;  %2403 = vmatpush.bf16.msra.mxu1 %v4351_v10 }
  0xf7   : > { %1270 = vmatmul.bf16.gmra.mxu0 %v1068_v54  ;;  %1295 = vmatmul.bf16.gmra.mxu1 %v1108_v34  ;;  %v2774_v41 = vrot.slane %v5389_v50, 3  ;;  %v5432_v37 = vshrl.u32 %v5331_v55, 16  ;;  %v6181_v4 = vrot.slane %v5350_v56, 1  ;;  %v1533_v36 = vrot.slane %v5026_v11, 1 }
  0xf8   : > { %v5425_v35 = vpack.c.bf16 %v975_v21, %v975_v21  ;;  %v5427_v25 = vpack.c.bf16 %v976_v17, %v975_v21  ;;  %v5436_v43 = vsel %vm1995_vm1, %v5264_v32, %v2029_v49  ;;  %v5440_v21 = vsel %vm1995_vm1, %v2029_v49, %v4898_v39  ;;  %v963_v17 = vpop.permute.xlu2 %962  ;;  %v4375_v32 = vld [vmem:[%s6106_s6 + $0x238] sm:$0xff] }
  0xf9   : > { %v2775_v40 = vor.u32 %v2774_v41, %v2773_v53  ;;  %v1175_v60 = vor.u32 %v5432_v37, %v6181_v4  ;;  %v5450_v10 = vmul.f32 %v963_v17, %v942_v12  ;;  %3173 = vmatpush.bf16.msra.mxu0 %v4375_v32  ;;  %v2798_v41 = vrot.slane %v4873_v13, 3 }
  0xfa   : > { %6180 = vst [vmem:[#allocation19_spill] sm:$0xff] %v5425_v35  ;;  %v1177_v54 = vshll.u32 %v5425_v35, 16  ;;  %v1531_v17 = vrot.slane %v4940_v23, 1  ;;  %v1111_v4 = vor.u32 %v5398_v19, %v1107_v57  ;;  %v1535_v32 = vrot.slane %v5269_v14, 1 }
  0xfb   : > { %v5455_v53 = vsel %vm2765_vm2, %v5352_v61, %v2775_v40  ;;  %v5459_v7 = vsel %vm2765_vm2, %v2775_v40, %v4840_v26  ;;  %v2793_v61 = vrot.slane %v5398_v19, 2  ;;  %v5476_v40 = vor.u32 %v2798_v41, %v2797_v59  ;;  %v4374_v59 = vld [vmem:[%s6106_s6 + $0x230] sm:$0xff] }
  0xfc   : > { %v1179_v33 = vrot.slane %v1177_v54, 1  ;;  %6182 = vst [vmem:[#allocation20_spill] sm:$0xff] %v5459_v7  ;;  %v1530_v54 = vrot.slane %v4945_v28, 1  ;;  %v1534_v57 = vsel %vm1529_vm3, %v1531_v17, %v1533_v36 }
  0xfd   : > { %v968_v34 = vpop.permute.xlu0 %967  ;;  %6185 = vst [vmem:[#allocation23_spill] sm:$0xff] %v5476_v40  ;;  %3174 = vmatpush.bf16.msra.mxu0 %v4374_v59 }
  0xfe   : > { %v978_v49 = vmul.f32 %v968_v34, %v943_v48  ;;  %v1180_v35 = vsel %vm1032_vm0, %v1175_v60, %v1179_v33  ;;  %v2791_v48 = vor.u32 %v2790_v29, %v2789_v31  ;;  %v2795_v60 = vor.u32 %v2794_v15, %v2793_v61  ;;  %v4350_v34 = vld [vmem:[%s6106_s6 + $0x170] sm:$0xff] }
  0xff   : > { %1340 = vmatmul.bf16.gmra.mxu3 %v1180_v35  ;;  %v1071_v35 = vor.u32 %v5405_v0, %v1067_v45  ;;  %v1532_v33 = vsel %vm1529_vm3, %v1530_v54, %v1531_v17  ;;  %v6186_v31 = vrot.slane %v4819_v6, 1  ;;  %v6187_v45 = vrot.slane %v4873_v13, 1  ;;  %v4358_v6 = vld [vmem:[%s6106_s6 + $0x1b0] sm:$0xff]  ;;  %2404 = vmatpush.bf16.msra.mxu1 %v4350_v34 }
 0x100   : > { %v5464_v12 = vpack.c.bf16 %v978_v49, %v5450_v10  ;;  %v5473_v26 = vsel %vm2765_vm2, %v5266_v5, %v2791_v48  ;;  %v5486_v5 = vsel %vm2765_vm2, %v2791_v48, %v2795_v60  ;;  %v4366_v13 = vld [vmem:[%s6106_s6 + $0x1f0] sm:$0xff]  ;;  %2614 = vmatpush.bf16.msra.mxu2 %v4358_v6  ;;  %v2004_v49 = vrot.slane %v5297_v51, 2 }
 0x101   : > { %6184 = vst [vmem:[#allocation22_spill] sm:$0xff] %v5473_v26  ;;  %v1076_v29 = vsel %vm1032_vm0, %v1071_v35, %v6186_v31  ;;  %v1116_v19 = vsel %vm1032_vm0, %v1111_v4, %v6187_v45  ;;  %2918 = vmatpush.bf16.msra.mxu3 %v4366_v13  ;;  %v1537_v54 = vrot.slane %v5375_v24, 1  ;;  %v2007_v51 = vrot.slane %v5405_v0, 1  ;;  %v4357_v0 = vld [vmem:[%s6106_s6 + $0x1a8] sm:$0xff] }
 0x102   : > { %6183 = vst [vmem:[#allocation21_spill] sm:$0xff] %v5464_v12  ;;  %v2008_v17 = vrot.slane %v5389_v50, 2  ;;  %v5519_v4 = vsel %vm2765_vm2, %v2795_v60, %v5476_v40  ;;  %v1539_v50 = vrot.slane %v4812_v1, 1  ;;  %v4365_v60 = vld [vmem:[%s6106_s6 + $0x1e8] sm:$0xff]  ;;  %v1541_v34 = vrot.slane %v4900_v42, 1 }
 0x103   : > { %6188 = vst [vmem:[#allocation24_spill] sm:$0xff] %v5486_v5  ;;  %v4349_v45 = vld [vmem:[%s6106_s6 + $0x168] sm:$0xff] }
 0x104   : > { %v2009_v35 = vor.u32 %v2008_v17, %v2007_v51  ;;  %6189 = vst [vmem:[#allocation25_spill] sm:$0xff] %v5519_v4  ;;  %2615 = vmatpush.bf16.msra.mxu2 %v4357_v0  ;;  %2405 = vmatpush.bf16.msra.mxu1 %v4349_v45  ;;  %v4364_v51 = vld [vmem:[%s6106_s6 + $0x1e0] sm:$0xff]  ;;  %v1545_v45 = vrot.slane %v5208_v52, 1 }
 0x105   : > { %2919 = vmatpush.bf16.msra.mxu3 %v4365_v60 }
 0x106   : > { %1641 = vmatmul.bf16.vlgmr.msrb.gmra.mxu2 %v1532_v33 }
 0x107   : > { %1275 = vmatmul.bf16.gmra.mxu0 %v1076_v29  ;;  %1300 = vmatmul.bf16.gmra.mxu1 %v1116_v19  ;;  %v1540_v29 = vsel %vm1529_vm3, %v1537_v54, %v1539_v50 }
 0x109   : > { %2920 = vmatpush.bf16.msra.mxu3 %v4364_v51 }
 0x10f   : > { %1851 = vmatmul.bf16.vlgmr.msrb.gmra.mxu3 %v1534_v57 }
 0x116   : > { %1646 = vmatmul.bf16.gmra.mxu2 %v1534_v57  ;;  %v2014_v57 = vsel %vm1995_vm1, %v2009_v35, %v4829_v16 }
 0x117   : > { %1402 = vmatmul.bf16.vlgmr.msrb.gmra.mxu1 %v4945_v28  ;;  %2155 = vmatmul.bf16.vlgmr.msrb.gmra.mxu0 %v5127_v62  ;;  %v1536_v28 = vsel %vm1529_vm3, %v1533_v36, %v1535_v32  ;;  %v2003_v62 = vrot.slane %v5317_v30, 1  ;;  %v1538_v30 = vsel %vm1529_vm3, %v1535_v32, %v1537_v54  ;;  %v4373_v36 = vld [vmem:[%s6106_s6 + $0x228] sm:$0xff] }
 0x118   : > { %3175 = vmatpush.bf16.msra.mxu0 %v4373_v36 }
 0x119   : > { %v2005_v41 = vor.u32 %v2004_v49, %v2003_v62 }
 0x11b   : > { %v2006_v48 = vsel %vm1995_vm1, %v5100_v44, %v2005_v41  ;;  %v2010_v44 = vsel %vm1995_vm1, %v2005_v41, %v2009_v35  ;;  %v1543_v41 = vrot.slane %v5031_v9, 1 }
 0x11d   : > { %v1544_v54 = vsel %vm1529_vm3, %v1541_v34, %v1543_v41 }
 0x11f   : > { %1856 = vmatmul.bf16.gmra.mxu3 %v1536_v28 }
 0x126   : > { %1651 = vmatmul.bf16.gmra.mxu2 %v1536_v28  ;;  %v1542_v28 = vsel %vm1529_vm3, %v1539_v50, %v1541_v34  ;;  %v4372_v50 = vld [vmem:[%s6106_s6 + $0x220] sm:$0xff]  ;;  %v1546_v34 = vsel %vm1529_vm3, %v1543_v41, %v1545_v45  ;;  %v1547_v41 = vrot.slane %v5386_v3, 1 }
 0x127   : > { %1407 = vmatmul.bf16.gmra.mxu1 %v4940_v23  ;;  %2160 = vmatmul.bf16.gmra.mxu0 %v2006_v48 }
 0x128   : > { %3176 = vmatpush.bf16.msra.mxu0 %v4372_v50  ;;  %v1548_v40 = vsel %vm1529_vm3, %v1545_v45, %v1547_v41 }
 0x12c   : > { %v5515_v61 = vpop.f32.mrf.mxu2  ;;  %v5532_v33 = vpop.f32.mrf.mxu1 }
 0x12f   : > { %1861 = vmatmul.bf16.gmra.mxu3 %v1538_v30 }
 0x134   : > { %v5526_v15 = vpop.f32.mrf.mxu2  ;;  %v5548_v6 = vpop.f32.mrf.mxu1 }
 0x136   : > { %1656 = vmatmul.bf16.gmra.mxu2 %v1538_v30  ;;  %v5534_v31 = vpop.f32.mrf.mxu0  ;;  %v4356_v30 = vld [vmem:[%s6106_s6 + $0x1a0] sm:$0xff] }
 0x137   : > { %1412 = vmatmul.bf16.gmra.mxu1 %v5026_v11  ;;  %2165 = vmatmul.bf16.gmra.mxu0 %v2010_v44  ;;  %v4348_v44 = vld [vmem:[%s6106_s6 + $0x160] sm:$0xff] }
 0x138   : > { %2616 = vmatpush.bf16.msra.mxu2 %v4356_v30  ;;  %2406 = vmatpush.bf16.msra.mxu1 %v4348_v44 }
 0x13e   : > { %v5550_v13 = vpop.f32.mrf.mxu0 }
 0x13f   : > { %1866 = vmatmul.bf16.gmra.mxu3 %v1540_v29 }
 0x142   : > { %v5540_v19 = vpop.f32.mrf.mxu2 }
 0x143   : > { %6190 = vst [vmem:[#allocation26_spill] sm:$0xff] %v5540_v19 }
 0x144   : > { %v5556_v62 = vpop.f32.mrf.mxu1 }
 0x146   : > { %1661 = vmatmul.bf16.gmra.mxu2 %v1540_v29  ;;  %v5558_v49 = vpop.f32.mrf.mxu0 }
 0x147   : > { %1417 = vmatmul.bf16.gmra.mxu1 %v5269_v14  ;;  %2170 = vmatmul.bf16.gmra.mxu0 %v2014_v57 }
 0x14a   : > { %v5553_v32 = vpop.f32.mrf.mxu2 }
 0x14b   : > { %6191 = vst [vmem:[#allocation27_spill] sm:$0xff] %v5553_v32 }
 0x14c   : > { %v5564_v59 = vpop.f32.mrf.mxu1 }
 0x14e   : > { %v5567_v48 = vpop.f32.mrf.mxu0 }
 0x14f   : > { %1871 = vmatmul.bf16.gmra.mxu3 %v1542_v28 }
 0x152   : > { %v5560_v16 = vpop.f32.mrf.mxu2 }
 0x153   : > { %6192 = vst [vmem:[#allocation28_spill] sm:$0xff] %v5560_v16 }
 0x156   : > { %1666 = vmatmul.bf16.gmra.mxu2 %v1542_v28 }
 0x157   : > { %1422 = vmatmul.bf16.gmra.mxu1 %v5375_v24  ;;  %2175 = vmatmul.bf16.gmra.mxu0 %v4998_v27 }
 0x15a   : > { %v5578_v27 = vpop.f32.mrf.mxu2 }
 0x15b   : > { %6194 = vst [vmem:[#allocation30_spill] sm:$0xff] %v5578_v27  ;;  %v1551_v27 = vrot.slane %v4859_v63, 1 }
 0x15c   : > { %v5576_v17 = vpop.f32.mrf.mxu3  ;;  %v5580_v35 = vpop.f32.mrf.mxu1 }
 0x15d   : > { %6193 = vst [vmem:[#allocation29_spill] sm:$0xff] %v5576_v17 }
 0x15f   : > { %1876 = vmatmul.bf16.gmra.mxu3 %v1544_v54 }
 0x164   : > { %v5585_v0 = vpop.f32.mrf.mxu0  ;;  %v5594_v29 = vpop.f32.mrf.mxu3 }
 0x165   : > { %6196 = vst [vmem:[#allocation32_spill] sm:$0xff] %v5594_v29  ;;  %v5597_v36 = vpop.f32.mrf.mxu1  ;;  %v4347_v29 = vld [vmem:[%s6106_s6 + $0x158] sm:$0xff] }
 0x166   : > { %1671 = vmatmul.bf16.gmra.mxu2 %v1544_v54  ;;  %2407 = vmatpush.bf16.msra.mxu1 %v4347_v29 }
 0x167   : > { %1427 = vmatmul.bf16.gmra.mxu1 %v4812_v1  ;;  %2180 = vmatmul.bf16.gmra.mxu0 %v5147_v47 }
 0x169   : > { %v5592_v60 = vpop.f32.mrf.mxu2 }
 0x16a   : > { %6195 = vst [vmem:[#allocation31_spill] sm:$0xff] %v5592_v60 }
 0x16c   : > { %v5599_v57 = vpop.f32.mrf.mxu0 }
 0x16f   : > { %1881 = vmatmul.bf16.gmra.mxu3 %v1546_v34 }
 0x171   : > { %v5602_v28 = vpop.f32.mrf.mxu2 }
 0x172   : > { %6197 = vst [vmem:[#allocation33_spill] sm:$0xff] %v5602_v28  ;;  %v5604_v47 = vpop.f32.mrf.mxu3 }
 0x173   : > { %6198 = vst [vmem:[#allocation34_spill] sm:$0xff] %v5604_v47 }
 0x174   : > { %v5606_v54 = vpop.f32.mrf.mxu0  ;;  %v5608_v30 = vpop.f32.mrf.mxu1 }
 0x176   : > { %1676 = vmatmul.bf16.gmra.mxu2 %v1546_v34 }
 0x177   : > { %1432 = vmatmul.bf16.gmra.mxu1 %v4900_v42  ;;  %2185 = vmatmul.bf16.gmra.mxu0 %v5294_v18  ;;  %v4355_v18 = vld [vmem:[%s6106_s6 + $0x198] sm:$0xff] }
 0x178   : > { %2617 = vmatpush.bf16.msra.mxu2 %v4355_v18 }
 0x179   : > { %v5612_v51 = vpop.f32.mrf.mxu2 }
 0x17a   : > { %6199 = vst [vmem:[#allocation35_spill] sm:$0xff] %v5612_v51  ;;  %v5614_v44 = vpop.f32.mrf.mxu3 }
 0x17b   : > { %6200 = vst [vmem:[#allocation36_spill] sm:$0xff] %v5614_v44 }
 0x17c   : > { %v5617_v50 = vpop.f32.mrf.mxu0  ;;  %v5619_v12 = vpop.f32.mrf.mxu1 }
 0x17f   : > { %1886 = vmatmul.bf16.gmra.mxu3 %v1548_v40 }
 0x181   : > { %v5622_v4 = vpop.f32.mrf.mxu2 }
 0x182   : > { %6201 = vst [vmem:[#allocation37_spill] sm:$0xff] %v5622_v4  ;;  %v5624_v34 = vpop.f32.mrf.mxu3  ;;  %v4371_v4 = vld [vmem:[%s6106_s6 + $0x218] sm:$0xff] }
 0x183   : > { %6202 = vst [vmem:[#allocation38_spill] sm:$0xff] %v5624_v34  ;;  %v4363_v34 = vld [vmem:[%s6106_s6 + $0x1d8] sm:$0xff]  ;;  %3177 = vmatpush.bf16.msra.mxu0 %v4371_v4 }
 0x184   : > { %v5629_v47 = vpop.f32.mrf.mxu0  ;;  %v5631_v44 = vpop.f32.mrf.mxu1  ;;  %2921 = vmatpush.bf16.msra.mxu3 %v4363_v34  ;;  %v6205_v4 = vld [vmem:[#allocation5_spill] sm:$0xff] }
 0x186   : > { %1681 = vmatmul.bf16.gmra.mxu2 %v1548_v40  ;;  %v1549_v40 = vrot.slane %v4862_v2, 1 }
 0x187   : > { %1437 = vmatmul.bf16.gmra.mxu1 %v5031_v9  ;;  %2190 = vmatmul.bf16.gmra.mxu0 %v5436_v43 }
 0x188   : > { %v1550_v43 = vsel %vm1529_vm3, %v1547_v41, %v1549_v40 }
 0x189   : > { %v1642_v45 = vpop.f32.mrf.mxu2 }
 0x18a   : > { %v5635_v5 = vpop.f32.mrf.mxu3 }
 0x18b   : > { %6203 = vst [vmem:[#allocation39_spill] sm:$0xff] %v5635_v5 }
 0x18c   : > { %v5643_v17 = vpop.f32.mrf.mxu0  ;;  %v5645_v26 = vpop.f32.mrf.mxu1 }
 0x18f   : > { %1891 = vmatmul.bf16.gmra.mxu3 %v1550_v43 }
 0x191   : > { %v1644_v18 = vpop.f32.mrf.mxu2 }
 0x192   : > { %v1852_v5 = vpop.f32.mrf.mxu3 }
 0x194   : > { %v1403_v51 = vpop.f32.mrf.mxu1  ;;  %v2156_v28 = vpop.f32.mrf.mxu0 }
 0x195   : > { %v1404_v60 = vadd.f32 %v1403_v51, %v5534_v31  ;;  %v1552_v31 = vsel %vm1529_vm3, %v1549_v40, %v1551_v27  ;;  %v2035_v51 = vrot.slane %v6205_v4, 1 }
 0x196   : > { %1686 = vmatmul.bf16.gmra.mxu2 %v1550_v43 }
 0x197   : > { %v1732_v9 = vadd.f32 %v1642_v45, %v1404_v60  ;;  %1442 = vmatmul.bf16.gmra.mxu1 %v5208_v52  ;;  %2195 = vmatmul.bf16.gmra.mxu0 %v5440_v21  ;;  %v6206_v60 = vld [vmem:[#allocation2_spill] sm:$0xff] }
 0x198   : > { %v2036_v45 = vrot.slane %v6206_v60, 2 }
 0x199   : > { %v1942_v29 = vadd.f32 %v1852_v5, %v1732_v9  ;;  %v1647_v41 = vpop.f32.mrf.mxu2 }
 0x19a   : > { %v1854_v34 = vpop.f32.mrf.mxu3  ;;  %v2037_v52 = vor.u32 %v2036_v45, %v2035_v51 }
 0x19b   : > { %v5656_v16 = vadd.f32 %v2156_v28, %v1942_v29 }
 0x19c   : > { %v1405_v42 = vpop.f32.mrf.mxu1  ;;  %v2158_v7 = vpop.f32.mrf.mxu0 }
 0x19d   : > { %6204 = vst [vmem:[#allocation40_spill] sm:$0xff] %v5656_v16  ;;  %v1406_v32 = vadd.f32 %v1405_v42, %v5550_v13  ;;  %v2038_v42 = vsel %vm1995_vm1, %v4898_v39, %v2037_v52  ;;  %v4346_v39 = vld [vmem:[%s6106_s6 + $0x150] sm:$0xff] }
 0x19e   : > { %2408 = vmatpush.bf16.msra.mxu1 %v4346_v39 }
 0x19f   : > { %v1733_v43 = vadd.f32 %v1644_v18, %v1406_v32  ;;  %1896 = vmatmul.bf16.gmra.mxu3 %v1552_v31 }
 0x1a1   : > { %v1943_v21 = vadd.f32 %v1854_v34, %v1733_v43  ;;  %v1649_v9 = vpop.f32.mrf.mxu2  ;;  %v6208_v34 = vld [vmem:[#allocation4_spill] sm:$0xff] }
 0x1a2   : > { %v1857_v5 = vpop.f32.mrf.mxu3  ;;  %v1553_v43 = vrot.slane %v6208_v34, 1 }
 0x1a3   : > { %v5662_v19 = vadd.f32 %v2158_v7, %v1943_v21  ;;  %v4354_v7 = vld [vmem:[%s6106_s6 + $0x190] sm:$0xff] }
 0x1a4   : > { %v1408_v28 = vpop.f32.mrf.mxu1  ;;  %v2161_v29 = vpop.f32.mrf.mxu0  ;;  %2618 = vmatpush.bf16.msra.mxu2 %v4354_v7  ;;  %v1554_v45 = vsel %vm1529_vm3, %v1551_v27, %v1553_v43  ;;  %v6210_v21 = vld [vmem:[#allocation8_spill] sm:$0xff] }
 0x1a5   : > { %6207 = vst [vmem:[#allocation5_spill] sm:$0xff] %v5662_v19  ;;  %v1409_v16 = vadd.f32 %v1408_v28, %v5558_v49  ;;  %v4362_v49 = vld [vmem:[%s6106_s6 + $0x1d0] sm:$0xff]  ;;  %v6211_v28 = vld [vmem:[#allocation6_spill] sm:$0xff] }
 0x1a6   : > { %1691 = vmatmul.bf16.gmra.mxu2 %v1552_v31  ;;  %2922 = vmatpush.bf16.msra.mxu3 %v4362_v49 }
 0x1a7   : > { %v1734_v13 = vadd.f32 %v1647_v41, %v1409_v16  ;;  %1447 = vmatmul.bf16.gmra.mxu1 %v5386_v3  ;;  %2200 = vmatmul.bf16.gmra.mxu0 %v2038_v42 }
 0x1a9   : > { %v1944_v32 = vadd.f32 %v1857_v5, %v1734_v13  ;;  %v1652_v40 = vpop.f32.mrf.mxu2  ;;  %v2039_v5 = vrot.slane %v6210_v21, 1 }
 0x1aa   : > { %v1859_v18 = vpop.f32.mrf.mxu3 }
 0x1ab   : > { %v5669_v51 = vadd.f32 %v2161_v29, %v1944_v32  ;;  %v2040_v29 = vrot.slane %v6211_v28, 2 }
 0x1ac   : > { %v1410_v16 = vpop.f32.mrf.mxu1  ;;  %v2163_v41 = vpop.f32.mrf.mxu0 }
 0x1ad   : > { %6209 = vst [vmem:[#allocation4_spill] sm:$0xff] %v5669_v51  ;;  %v1411_v31 = vadd.f32 %v1410_v16, %v5567_v48  ;;  %v2041_v19 = vor.u32 %v2040_v29, %v2039_v5  ;;  %v4370_v48 = vld [vmem:[%s6106_s6 + $0x210] sm:$0xff] }
 0x1ae   : > { %3178 = vmatpush.bf16.msra.mxu0 %v4370_v48 }
 0x1af   : > { %v1735_v42 = vadd.f32 %v1649_v9, %v1411_v31  ;;  %1901 = vmatmul.bf16.gmra.mxu3 %v1554_v45  ;;  %v2042_v39 = vsel %vm1995_vm1, %v2037_v52, %v2041_v19  ;;  %v1555_v31 = vrot.slane %v5102_v58, 1  ;;  %v6213_v52 = vld [vmem:[#allocation9_spill] sm:$0xff] }
 0x1b1   : > { %v1945_v13 = vadd.f32 %v1859_v18, %v1735_v42  ;;  %v1654_v32 = vpop.f32.mrf.mxu2 }
 0x1b2   : > { %v1862_v51 = vpop.f32.mrf.mxu3 }
 0x1b3   : > { %v5684_v60 = vadd.f32 %v2163_v41, %v1945_v13 }
 0x1b4   : > { %v1413_v7 = vpop.f32.mrf.mxu1  ;;  %v2166_v49 = vpop.f32.mrf.mxu0 }
 0x1b5   : > { %v1414_v27 = vadd.f32 %v1413_v7, %v5585_v0  ;;  %v1556_v0 = vsel %vm1529_vm3, %v1553_v43, %v1555_v31 }
 0x1b6   : > { %1696 = vmatmul.bf16.gmra.mxu2 %v1554_v45  ;;  %v2043_v45 = vrot.slane %v5281_v20, 1 }
 0x1b7   : > { %v1736_v9 = vadd.f32 %v1652_v40, %v1414_v27  ;;  %1452 = vmatmul.bf16.gmra.mxu1 %v4862_v2  ;;  %2205 = vmatmul.bf16.gmra.mxu0 %v2042_v39  ;;  %v2044_v40 = vrot.slane %v6213_v52, 2 }
 0x1b9   : > { %v1946_v18 = vadd.f32 %v1862_v51, %v1736_v9  ;;  %v1657_v16 = vpop.f32.mrf.mxu2  ;;  %v2045_v39 = vor.u32 %v2044_v40, %v2043_v45 }
 0x1ba   : > { %v1864_v41 = vpop.f32.mrf.mxu3 }
 0x1bb   : > { %v5693_v5 = vadd.f32 %v2166_v49, %v1946_v18 }
 0x1bc   : > { %v1415_v29 = vpop.f32.mrf.mxu1  ;;  %v2168_v42 = vpop.f32.mrf.mxu0 }
 0x1bd   : > { %6212 = vst [vmem:[#allocation8_spill] sm:$0xff] %v5693_v5  ;;  %v1416_v13 = vadd.f32 %v1415_v29, %v5599_v57  ;;  %v2046_v57 = vsel %vm1995_vm1, %v2041_v19, %v2045_v39 }
 0x1bf   : > { %v1737_v48 = vadd.f32 %v1654_v32, %v1416_v13  ;;  %1906 = vmatmul.bf16.gmra.mxu3 %v1556_v0 }
 0x1c1   : > { %v1947_v7 = vadd.f32 %v1864_v41, %v1737_v48  ;;  %v1659_v51 = vpop.f32.mrf.mxu2  ;;  %v1557_v41 = vrot.slane %v5257_v22, 1 }
 0x1c2   : > { %v1867_v27 = vpop.f32.mrf.mxu3 }
 0x1c3   : > { %v5699_v9 = vadd.f32 %v2168_v42, %v1947_v7  ;;  %v4353_v42 = vld [vmem:[%s6106_s6 + $0x188] sm:$0xff]  ;;  %v1558_v19 = vsel %vm1529_vm3, %v1555_v31, %v1557_v41 }
 0x1c4   : > { %v1418_v49 = vpop.f32.mrf.mxu1  ;;  %v2171_v18 = vpop.f32.mrf.mxu0  ;;  %2619 = vmatpush.bf16.msra.mxu2 %v4353_v42 }
 0x1c5   : > { %v1419_v5 = vadd.f32 %v1418_v49, %v5606_v54 }
 0x1c6   : > { %1701 = vmatmul.bf16.gmra.mxu2 %v1556_v0 }
 0x1c7   : > { %v1738_v43 = vadd.f32 %v1657_v16, %v1419_v5  ;;  %1457 = vmatmul.bf16.gmra.mxu1 %v4859_v63  ;;  %2210 = vmatmul.bf16.gmra.mxu0 %v2046_v57  ;;  %v2047_v16 = vrot.slane %v5378_v8, 1  ;;  %v2048_v5 = vrot.slane %v5284_v38, 2 }
 0x1c9   : > { %v1948_v29 = vadd.f32 %v1867_v27, %v1738_v43  ;;  %v1662_v32 = vpop.f32.mrf.mxu2  ;;  %v4361_v43 = vld [vmem:[%s6106_s6 + $0x1c8] sm:$0xff] }
 0x1ca   : > { %v1869_v13 = vpop.f32.mrf.mxu3  ;;  %2923 = vmatpush.bf16.msra.mxu3 %v4361_v43 }
 0x1cb   : > { %v5705_v48 = vadd.f32 %v2171_v18, %v1948_v29  ;;  %v2049_v18 = vor.u32 %v2048_v5, %v2047_v16  ;;  %v4369_v5 = vld [vmem:[%s6106_s6 + $0x208] sm:$0xff] }
 0x1cc   : > { %v1420_v45 = vpop.f32.mrf.mxu1  ;;  %v2173_v54 = vpop.f32.mrf.mxu0  ;;  %3179 = vmatpush.bf16.msra.mxu0 %v4369_v5 }
 0x1cd   : > { %6214 = vst [vmem:[#allocation6_spill] sm:$0xff] %v5705_v48  ;;  %v1421_v0 = vadd.f32 %v1420_v45, %v5617_v50  ;;  %v4345_v50 = vld [vmem:[%s6106_s6 + $0x148] sm:$0xff] }
 0x1ce   : > { %2409 = vmatpush.bf16.msra.mxu1 %v4345_v50 }
 0x1cf   : > { %v1739_v40 = vadd.f32 %v1659_v51, %v1421_v0  ;;  %1911 = vmatmul.bf16.gmra.mxu3 %v1558_v19  ;;  %v2050_v51 = vsel %vm1995_vm1, %v2045_v39, %v2049_v18 }
 0x1d1   : > { %v1949_v7 = vadd.f32 %v1869_v13, %v1739_v40  ;;  %v1664_v27 = vpop.f32.mrf.mxu2 }
 0x1d2   : > { %v1872_v49 = vpop.f32.mrf.mxu3 }
 0x1d3   : > { %v5714_v57 = vadd.f32 %v2173_v54, %v1949_v7  ;;  %v6217_v7 = vld [vmem:[#allocation11_spill] sm:$0xff] }
 0x1d4   : > { %v1423_v31 = vpop.f32.mrf.mxu1  ;;  %v2176_v29 = vpop.f32.mrf.mxu0  ;;  %v1559_v43 = vrot.slane %v6217_v7, 1 }
 0x1d5   : > { %6215 = vst [vmem:[#allocation9_spill] sm:$0xff] %v5714_v57  ;;  %v1424_v42 = vadd.f32 %v1423_v31, %v5629_v47  ;;  %v2052_v31 = vrot.slane %v5186_v46, 2 }
 0x1d6   : > { %1706 = vmatmul.bf16.gmra.mxu2 %v1558_v19  ;;  %v1560_v39 = vsel %vm1529_vm3, %v1557_v41, %v1559_v43 }
 0x1d7   : > { %v1740_v13 = vadd.f32 %v1662_v32, %v1424_v42  ;;  %1462 = vmatmul.bf16.gmra.mxu1 %v6208_v34  ;;  %2215 = vmatmul.bf16.gmra.mxu0 %v2050_v51 }
 0x1d9   : > { %v1950_v45 = vadd.f32 %v1872_v49, %v1740_v13  ;;  %v1667_v54 = vpop.f32.mrf.mxu2  ;;  %v6218_v49 = vld [vmem:[#allocation13_spill] sm:$0xff] }
 0x1da   : > { %v1874_v0 = vpop.f32.mrf.mxu3  ;;  %v2051_v50 = vrot.slane %v6218_v49, 1 }
 0x1db   : > { %v5725_v16 = vadd.f32 %v2176_v29, %v1950_v45 }
 0x1dc   : > { %v1425_v40 = vpop.f32.mrf.mxu1  ;;  %v2178_v47 = vpop.f32.mrf.mxu0  ;;  %v2053_v57 = vor.u32 %v2052_v31, %v2051_v50 }
 0x1dd   : > { %6216 = vst [vmem:[#allocation41_spill] sm:$0xff] %v5725_v16  ;;  %v1426_v19 = vadd.f32 %v1425_v40, %v5643_v17 }
 0x1de   : > { %v2054_v17 = vsel %vm1995_vm1, %v2049_v18, %v2053_v57  ;;  %v6222_v18 = vld [vmem:[#allocation12_spill] sm:$0xff] }
 0x1df   : > { %v1741_v32 = vadd.f32 %v1664_v27, %v1426_v19  ;;  %1916 = vmatmul.bf16.gmra.mxu3 %v1560_v39 }
 0x1e1   : > { %v1951_v29 = vadd.f32 %v1874_v0, %v1741_v32  ;;  %v1669_v42 = vpop.f32.mrf.mxu2  ;;  %v6220_v0 = vld [vmem:[#allocation10_spill] sm:$0xff] }
 0x1e2   : > { %v1877_v51 = vpop.f32.mrf.mxu3  ;;  %v1561_v19 = vrot.slane %v6220_v0, 1 }
 0x1e3   : > { %v5735_v13 = vadd.f32 %v2178_v47, %v1951_v29 }
 0x1e4   : > { %v1428_v45 = vpop.f32.mrf.mxu1  ;;  %v2181_v16 = vpop.f32.mrf.mxu0 }
 0x1e5   : > { %6219 = vst [vmem:[#allocation11_spill] sm:$0xff] %v5735_v13  ;;  %v1429_v48 = vadd.f32 %v1428_v45, %v5532_v33  ;;  %v1562_v33 = vsel %vm1529_vm3, %v1559_v43, %v1561_v19  ;;  %v4344_v43 = vld [vmem:[%s6106_s6 + $0x140] sm:$0xff] }
 0x1e6   : > { %1711 = vmatmul.bf16.gmra.mxu2 %v1560_v39  ;;  %v6221_v39 = vld [vmem:[#allocation16_spill] sm:$0xff]  ;;  %2410 = vmatpush.bf16.msra.mxu1 %v4344_v43 }
 0x1e7   : > { %v1742_v41 = vadd.f32 %v1667_v54, %v1429_v48  ;;  %1467 = vmatmul.bf16.gmra.mxu1 %v5102_v58  ;;  %2220 = vmatmul.bf16.gmra.mxu0 %v2054_v17  ;;  %v2055_v31 = vrot.slane %v6221_v39, 1  ;;  %v2056_v48 = vrot.slane %v6222_v18, 2 }
 0x1e9   : > { %v1952_v27 = vadd.f32 %v1877_v51, %v1742_v41  ;;  %v1672_v5 = vpop.f32.mrf.mxu2  ;;  %v2057_v41 = vor.u32 %v2056_v48, %v2055_v31 }
 0x1ea   : > { %v1879_v40 = vpop.f32.mrf.mxu3 }
 0x1eb   : > { %v5741_v32 = vadd.f32 %v2181_v16, %v1952_v27  ;;  %v4352_v16 = vld [vmem:[%s6106_s6 + $0x180] sm:$0xff] }
 0x1ec   : > { %v1430_v47 = vpop.f32.mrf.mxu1  ;;  %v2183_v29 = vpop.f32.mrf.mxu0  ;;  %2620 = vmatpush.bf16.msra.mxu2 %v4352_v16 }
 0x1ed   : > { %v1431_v50 = vadd.f32 %v1430_v47, %v5548_v6  ;;  %v4360_v6 = vld [vmem:[%s6106_s6 + $0x1c0] sm:$0xff]  ;;  %v2058_v47 = vsel %vm1995_vm1, %v2053_v57, %v2057_v41 }
 0x1ee   : > { %2924 = vmatpush.bf16.msra.mxu3 %v4360_v6  ;;  %v2059_v6 = vrot.slane %v5432_v37, 1 }
 0x1ef   : > { %v1743_v54 = vadd.f32 %v1669_v42, %v1431_v50  ;;  %1921 = vmatmul.bf16.gmra.mxu3 %v1562_v33 }
 0x1f1   : > { %v1953_v45 = vadd.f32 %v1879_v40, %v1743_v54  ;;  %v1674_v51 = vpop.f32.mrf.mxu2  ;;  %v1563_v54 = vrot.slane %v5331_v55, 1 }
 0x1f2   : > { %v1882_v17 = vpop.f32.mrf.mxu3 }
 0x1f3   : > { %v5747_v13 = vadd.f32 %v2183_v29, %v1953_v45 }
 0x1f4   : > { %v1433_v42 = vpop.f32.mrf.mxu1  ;;  %v2186_v27 = vpop.f32.mrf.mxu0 }
 0x1f5   : > { %6223 = vst [vmem:[#allocation13_spill] sm:$0xff] %v5747_v13  ;;  %v1434_v40 = vadd.f32 %v1433_v42, %v5556_v62  ;;  %v4368_v62 = vld [vmem:[%s6106_s6 + $0x200] sm:$0xff] }
 0x1f6   : > { %1716 = vmatmul.bf16.gmra.mxu2 %v1562_v33  ;;  %3180 = vmatpush.bf16.msra.mxu0 %v4368_v62 }
 0x1f7   : > { %v1744_v29 = vadd.f32 %v1672_v5, %v1434_v40  ;;  %1472 = vmatmul.bf16.gmra.mxu1 %v5257_v22  ;;  %2225 = vmatmul.bf16.gmra.mxu0 %v2058_v47  ;;  %v1564_v5 = vsel %vm1529_vm3, %v1561_v19, %v1563_v54 }
 0x1f9   : > { %v1954_v50 = vadd.f32 %v1882_v17, %v1744_v29  ;;  %v1677_v31 = vpop.f32.mrf.mxu2  ;;  %v2060_v17 = vrot.slane %v5350_v56, 2 }
 0x1fa   : > { %v1884_v48 = vpop.f32.mrf.mxu3 }
 0x1fb   : > { %v5762_v45 = vadd.f32 %v2186_v27, %v1954_v50  ;;  %v2061_v47 = vor.u32 %v2060_v17, %v2059_v6 }
 0x1fc   : > { %v1435_v16 = vpop.f32.mrf.mxu1  ;;  %v2188_v33 = vpop.f32.mrf.mxu0 }
 0x1fd   : > { %6224 = vst [vmem:[#allocation10_spill] sm:$0xff] %v5762_v45  ;;  %v1436_v57 = vadd.f32 %v1435_v16, %v5564_v59  ;;  %v2062_v59 = vsel %vm1995_vm1, %v2057_v41, %v2061_v47 }
 0x1ff   : > { %v1745_v43 = vadd.f32 %v1674_v51, %v1436_v57  ;;  %1926 = vmatmul.bf16.gmra.mxu3 %v1564_v5  ;;  %v6152_v57 = vshrl.u32 %v5427_v25, 16 }
 0x201   : > { %v1955_v42 = vadd.f32 %v1884_v48, %v1745_v43  ;;  %v1679_v27 = vpop.f32.mrf.mxu2  ;;  %v1789_v48 = vrot.slane %v5427_v25, 1  ;;  %v2066_v41 = vrot.slane %v6152_v57, 1 }
 0x202   : > { %v1887_v40 = vpop.f32.mrf.mxu3 }
 0x203   : > { %v5771_v29 = vadd.f32 %v2188_v33, %v1955_v42  ;;  %v6153_v33 = vshll.u32 %v5427_v25, 16  ;;  %v6227_v42 = vld [vmem:[#allocation19_spill] sm:$0xff] }
 0x204   : > { %v1438_v50 = vpop.f32.mrf.mxu1  ;;  %v2191_v45 = vpop.f32.mrf.mxu0 }
 0x205   : > { %6225 = vst [vmem:[#allocation16_spill] sm:$0xff] %v5771_v29  ;;  %v1439_v13 = vadd.f32 %v1438_v50, %v5580_v35 }
 0x206   : > { %1721 = vmatmul.bf16.gmra.mxu2 %v1564_v5 }
 0x207   : > { %v1746_v19 = vadd.f32 %v1677_v31, %v1439_v13  ;;  %1477 = vmatmul.bf16.gmra.mxu1 %v6217_v7  ;;  %2230 = vmatmul.bf16.gmra.mxu0 %v2062_v59  ;;  %v1790_v13 = vsel %vm1529_vm3, %v1563_v54, %v1789_v48  ;;  %v2069_v31 = vrot.slane %v6153_v33, 2 }
 0x209   : > { %v1956_v62 = vadd.f32 %v1887_v40, %v1746_v19  ;;  %v1682_v51 = vpop.f32.mrf.mxu2  ;;  %v1565_v40 = vrot.slane %v6227_v42, 1  ;;  %v2070_v19 = vor.u32 %v2069_v31, %v2066_v41  ;;  %v2303_v42 = vrot.slane %v5269_v14, 2 }
 0x20a   : > { %v1889_v16 = vpop.f32.mrf.mxu3 }
 0x20b   : > { %v5779_v6 = vadd.f32 %v2191_v45, %v1956_v62  ;;  %v1566_v29 = vsel %vm1529_vm3, %v1563_v54, %v1565_v40  ;;  %v2071_v57 = vsel %vm1995_vm1, %v2061_v47, %v2070_v19 }
 0x20c   : > { %v1440_v17 = vpop.f32.mrf.mxu1  ;;  %v2193_v35 = vpop.f32.mrf.mxu0 }
 0x20d   : > { %6226 = vst [vmem:[#allocation12_spill] sm:$0xff] %v5779_v6  ;;  %v1441_v5 = vadd.f32 %v1440_v17, %v5597_v36 }
 0x20f   : > { %v1747_v43 = vadd.f32 %v1679_v27, %v1441_v5  ;;  %1931 = vmatmul.bf16.gmra.mxu3 %v1790_v13  ;;  %v5796_v27 = vpack.c.bf16 %v5450_v10, %v5450_v10 }
 0x211   : > { %v1957_v50 = vadd.f32 %v1889_v16, %v1747_v43  ;;  %v1684_v59 = vpop.f32.mrf.mxu2  ;;  %v1791_v54 = vrot.slane %v5796_v27, 1  ;;  %v2076_v47 = vshll.u32 %v5796_v27, 16 }
 0x212   : > { %v1892_v45 = vpop.f32.mrf.mxu3 }
 0x213   : > { %v5788_v62 = vadd.f32 %v2193_v35, %v1957_v50 }
 0x214   : > { %v1443_v6 = vpop.f32.mrf.mxu1  ;;  %v2196_v36 = vpop.f32.mrf.mxu0 }
 0x215   : > { %v1444_v17 = vadd.f32 %v1443_v6, %v5608_v30 }
 0x216   : > { %1726 = vmatmul.bf16.gmra.mxu2 %v1566_v29  ;;  %v2073_v29 = vshrl.u32 %v5796_v27, 16 }
 0x217   : > { %v1748_v33 = vadd.f32 %v1682_v51, %v1444_v17  ;;  %1482 = vmatmul.bf16.gmra.mxu1 %v6220_v0  ;;  %2235 = vmatmul.bf16.gmra.mxu0 %v2071_v57  ;;  %v1792_v57 = vsel %vm1529_vm3, %v1789_v48, %v1791_v54 }
 0x218   : > { %v2075_v10 = vrot.slane %v2073_v29, 1 }
 0x219   : > { %v1958_v16 = vadd.f32 %v1892_v45, %v1748_v33  ;;  %v1687_v35 = vpop.f32.mrf.mxu2  ;;  %v2078_v33 = vrot.slane %v2076_v47, 2  ;;  %v2301_v45 = vrot.slane %v5026_v11, 2 }
 0x21a   : > { %v1894_v5 = vpop.f32.mrf.mxu3 }
 0x21b   : > { %v5798_v13 = vadd.f32 %v2196_v36, %v1958_v16  ;;  %v2079_v16 = vor.u32 %v2078_v33, %v2075_v10  ;;  %v2304_v48 = vsel %vm2299_vm4, %v2301_v45, %v2303_v42 }
 0x21c   : > { %v1445_v41 = vpop.f32.mrf.mxu1  ;;  %v2198_v30 = vpop.f32.mrf.mxu0 }
 0x21d   : > { %v1446_v51 = vadd.f32 %v1445_v41, %v5619_v12 }
 0x21f   : > { %v1749_v6 = vadd.f32 %v1684_v59, %v1446_v51  ;;  %1936 = vmatmul.bf16.gmra.mxu3 %v1792_v57  ;;  %v2080_v59 = vsel %vm1995_vm1, %v2070_v19, %v2079_v16  ;;  %v2305_v19 = vrot.slane %v5375_v24, 2 }
 0x221   : > { %v1959_v31 = vadd.f32 %v1894_v5, %v1749_v6  ;;  %v1689_v43 = vpop.f32.mrf.mxu2 }
 0x222   : > { %v1897_v40 = vpop.f32.mrf.mxu3 }
 0x223   : > { %v5806_v50 = vadd.f32 %v2198_v30, %v1959_v31  ;;  %v3071_v31 = vrot.slane %v5269_v14, 3 }
 0x224   : > { %v1448_v36 = vpop.f32.mrf.mxu1  ;;  %v2201_v17 = vpop.f32.mrf.mxu0 }
 0x225   : > { %v1449_v12 = vadd.f32 %v1448_v36, %v5631_v44  ;;  %v6228_v44 = vld [vmem:[#allocation17_spill] sm:$0xff] }
 0x226   : > { %2621 = vmatmul.bf16.vlgmr.msra.gmra.mxu2 %v2304_v48 }
 0x227   : > { %v1750_v5 = vadd.f32 %v1687_v35, %v1449_v12  ;;  %1487 = vmatmul.bf16.gmra.mxu1 %v5331_v55  ;;  %2240 = vmatmul.bf16.gmra.mxu0 %v2080_v59  ;;  %v3070_v12 = vrot.slane %v5026_v11, 3 }
 0x229   : > { %v1960_v41 = vadd.f32 %v1897_v40, %v1750_v5  ;;  %v1692_v30 = vpop.f32.mrf.mxu2  ;;  %v3072_v5 = vsel %vm3069_vm5, %v3070_v12, %v3071_v31 }
 0x22a   : > { %v1899_v54 = vpop.f32.mrf.mxu3 }
 0x22b   : > { %v5813_v29 = vadd.f32 %v2201_v17, %v1960_v41  ;;  %v2300_v17 = vrot.slane %v4940_v23, 2 }
 0x22c   : > { %v1450_v47 = vpop.f32.mrf.mxu1  ;;  %v2203_v51 = vpop.f32.mrf.mxu0 }
 0x22d   : > { %v1451_v57 = vadd.f32 %v1450_v47, %v5645_v26  ;;  %v2302_v59 = vsel %vm2299_vm4, %v2300_v17, %v2301_v45 }
 0x22f   : > { %v1751_v6 = vadd.f32 %v1689_v43, %v1451_v57  ;;  %2925 = vmatmul.bf16.vlgmr.msra.gmra.mxu3 %v6228_v44  ;;  %v2306_v43 = vsel %vm2299_vm4, %v2303_v42, %v2305_v19  ;;  %v3073_v44 = vrot.slane %v5375_v24, 3 }
 0x231   : > { %v1961_v10 = vadd.f32 %v1899_v54, %v1751_v6  ;;  %v1694_v33 = vpop.f32.mrf.mxu2 }
 0x232   : > { %v1902_v35 = vpop.f32.mrf.mxu3 }
 0x233   : > { %v5819_v36 = vadd.f32 %v2203_v51, %v1961_v10  ;;  %v2307_v10 = vrot.slane %v4812_v1, 2 }
 0x234   : > { %v1453_v40 = vpop.f32.mrf.mxu1  ;;  %v2206_v16 = vpop.f32.mrf.mxu0 }
 0x235   : > { %v1454_v26 = vadd.f32 %v1453_v40, %v5515_v61  ;;  %v2308_v12 = vsel %vm2299_vm4, %v2305_v19, %v2307_v10 }
 0x236   : > { %2626 = vmatmul.bf16.gmra.mxu2 %v2306_v43 }
 0x237   : > { %v1752_v41 = vadd.f32 %v1692_v30, %v1454_v26  ;;  %2411 = vmatmul.bf16.vlgmr.msra.gmra.mxu1 %v2302_v59  ;;  %3181 = vmatmul.bf16.vlgmr.msra.gmra.mxu0 %v3072_v5 }
 0x239   : > { %v1962_v14 = vadd.f32 %v1902_v35, %v1752_v41  ;;  %v1697_v54 = vpop.f32.mrf.mxu2 }
 0x23a   : > { %v1904_v47 = vpop.f32.mrf.mxu3 }
 0x23b   : > { %v5827_v51 = vadd.f32 %v2206_v16, %v1962_v14  ;;  %v6229_v16 = vld [vmem:[#allocation26_spill] sm:$0xff]  ;;  %v6230_v14 = vld [vmem:[#allocation27_spill] sm:$0xff] }
 0x23c   : > { %v1455_v23 = vpop.f32.mrf.mxu1  ;;  %v2208_v11 = vpop.f32.mrf.mxu0 }
 0x23d   : > { %v1456_v61 = vadd.f32 %v1455_v23, %v5526_v15  ;;  %v3074_v15 = vsel %vm3069_vm5, %v3071_v31, %v3073_v44 }
 0x23f   : > { %v1753_v57 = vadd.f32 %v1694_v33, %v1456_v61  ;;  %2930 = vmatmul.bf16.gmra.mxu3 %v5455_v53 }
 0x241   : > { %v1963_v42 = vadd.f32 %v1904_v47, %v1753_v57  ;;  %v1699_v45 = vpop.f32.mrf.mxu2  ;;  %v6232_v57 = vld [vmem:[#allocation3_spill] sm:$0xff] }
 0x242   : > { %v1907_v6 = vpop.f32.mrf.mxu3 }
 0x243   : > { %v5832_v30 = vadd.f32 %v2208_v11, %v1963_v42  ;;  %v6231_v11 = vld [vmem:[#allocation20_spill] sm:$0xff]  ;;  %v2309_v42 = vrot.slane %v6232_v57, 2 }
 0x244   : > { %v1458_v35 = vpop.f32.mrf.mxu1  ;;  %v2211_v40 = vpop.f32.mrf.mxu0 }
 0x245   : > { %v1459_v17 = vadd.f32 %v1458_v35, %v6229_v16  ;;  %v3075_v35 = vrot.slane %v4812_v1, 3 }
 0x246   : > { %2631 = vmatmul.bf16.gmra.mxu2 %v2308_v12 }
 0x247   : > { %v1754_v33 = vadd.f32 %v1697_v54, %v1459_v17  ;;  %2416 = vmatmul.bf16.gmra.mxu1 %v2304_v48  ;;  %3186 = vmatmul.bf16.gmra.mxu0 %v3074_v15  ;;  %v2310_v17 = vsel %vm2299_vm4, %v2307_v10, %v2309_v42 }
 0x249   : > { %v1964_v53 = vadd.f32 %v1907_v6, %v1754_v33  ;;  %v1702_v26 = vpop.f32.mrf.mxu2 }
 0x24a   : > { %v1909_v59 = vpop.f32.mrf.mxu3 }
 0x24b   : > { %v5838_v24 = vadd.f32 %v2211_v40, %v1964_v53  ;;  %v6233_v40 = vld [vmem:[#allocation28_spill] sm:$0xff] }
 0x24c   : > { %v1460_v5 = vpop.f32.mrf.mxu1  ;;  %v2213_v41 = vpop.f32.mrf.mxu0 }
 0x24d   : > { %v1461_v47 = vadd.f32 %v1460_v5, %v6230_v14 }
 0x24f   : > { %v1755_v23 = vadd.f32 %v1699_v45, %v1461_v47  ;;  %2935 = vmatmul.bf16.gmra.mxu3 %v6231_v11  ;;  %v3076_v45 = vsel %vm3069_vm5, %v3073_v44, %v3075_v35  ;;  %v6235_v47 = vld [vmem:[#allocation30_spill] sm:$0xff]  ;;  %v6236_v11 = vld [vmem:[#allocation15_spill] sm:$0xff] }
 0x251   : > { %v1965_v61 = vadd.f32 %v1909_v59, %v1755_v23  ;;  %v1704_v19 = vpop.f32.mrf.mxu2 }
 0x252   : > { %v1912_v31 = vpop.f32.mrf.mxu3 }
 0x253   : > { %v5843_v54 = vadd.f32 %v2213_v41, %v1965_v61 }
 0x254   : > { %v1463_v48 = vpop.f32.mrf.mxu1  ;;  %v2216_v6 = vpop.f32.mrf.mxu0 }
 0x255   : > { %v1464_v16 = vadd.f32 %v1463_v48, %v6233_v40  ;;  %v6237_v48 = vld [vmem:[#allocation7_spill] sm:$0xff] }
 0x256   : > { %2636 = vmatmul.bf16.gmra.mxu2 %v2310_v17  ;;  %v2311_v40 = vrot.slane %v6237_v48, 2 }
 0x257   : > { %v1756_v15 = vadd.f32 %v1702_v26, %v1464_v16  ;;  %2421 = vmatmul.bf16.gmra.mxu1 %v2306_v43  ;;  %3191 = vmatmul.bf16.gmra.mxu0 %v3076_v45  ;;  %v3077_v43 = vrot.slane %v6232_v57, 3 }
 0x259   : > { %v1966_v33 = vadd.f32 %v1912_v31, %v1756_v15  ;;  %v1707_v53 = vpop.f32.mrf.mxu2  ;;  %v2312_v15 = vsel %vm2299_vm4, %v2309_v42, %v2311_v40 }
 0x25a   : > { %v1914_v59 = vpop.f32.mrf.mxu3 }
 0x25b   : > { %v5849_v5 = vadd.f32 %v2216_v6, %v1966_v33  ;;  %v6239_v6 = vld [vmem:[#allocation31_spill] sm:$0xff] }
 0x25c   : > { %v1465_v41 = vpop.f32.mrf.mxu1  ;;  %v2218_v14 = vpop.f32.mrf.mxu0 }
 0x25d   : > { %6234 = vst [vmem:[#allocation19_spill] sm:$0xff] %v5849_v5  ;;  %v1466_v23 = vadd.f32 %v1465_v41, %v6235_v47 }
 0x25f   : > { %v1757_v1 = vadd.f32 %v1704_v19, %v1466_v23  ;;  %2940 = vmatmul.bf16.gmra.mxu3 %v6236_v11  ;;  %v3078_v19 = vsel %vm3069_vm5, %v3075_v35, %v3077_v43 }
 0x261   : > { %v1967_v61 = vadd.f32 %v1914_v59, %v1757_v1  ;;  %v1709_v10 = vpop.f32.mrf.mxu2  ;;  %v6240_v1 = vld [vmem:[#allocation33_spill] sm:$0xff] }
 0x262   : > { %v1917_v44 = vpop.f32.mrf.mxu3 }
 0x263   : > { %v5855_v26 = vadd.f32 %v2218_v14, %v1967_v61 }
 0x264   : > { %v1468_v31 = vpop.f32.mrf.mxu1  ;;  %v2221_v16 = vpop.f32.mrf.mxu0 }
 0x265   : > { %6238 = vst [vmem:[#allocation17_spill] sm:$0xff] %v5855_v26  ;;  %v1469_v45 = vadd.f32 %v1468_v31, %v6239_v6  ;;  %v6241_v26 = vld [vmem:[#allocation18_spill] sm:$0xff] }
 0x266   : > { %2641 = vmatmul.bf16.gmra.mxu2 %v2312_v15  ;;  %v6242_v6 = vld [vmem:[#allocation14_spill] sm:$0xff] }
 0x267   : > { %v1758_v33 = vadd.f32 %v1707_v53, %v1469_v45  ;;  %2426 = vmatmul.bf16.gmra.mxu1 %v2308_v12  ;;  %3196 = vmatmul.bf16.gmra.mxu0 %v3078_v19  ;;  %v2313_v5 = vrot.slane %v6242_v6, 2  ;;  %v3079_v12 = vrot.slane %v6237_v48, 3 }
 0x269   : > { %v1968_v59 = vadd.f32 %v1917_v44, %v1758_v33  ;;  %v1712_v41 = vpop.f32.mrf.mxu2  ;;  %v2314_v33 = vsel %vm2299_vm4, %v2311_v40, %v2313_v5 }
 0x26a   : > { %v1919_v47 = vpop.f32.mrf.mxu3 }
 0x26b   : > { %v5860_v23 = vadd.f32 %v2221_v16, %v1968_v59  ;;  %v6244_v16 = vld [vmem:[#allocation35_spill] sm:$0xff] }
 0x26c   : > { %v1470_v57 = vpop.f32.mrf.mxu1  ;;  %v2223_v14 = vpop.f32.mrf.mxu0 }
 0x26d   : > { %v1471_v11 = vadd.f32 %v1470_v57, %v6240_v1 }
 0x26f   : > { %v1759_v61 = vadd.f32 %v1709_v10, %v1471_v11  ;;  %2945 = vmatmul.bf16.gmra.mxu3 %v6241_v26  ;;  %v3080_v10 = vsel %vm3069_vm5, %v3077_v43, %v3079_v12  ;;  %v6245_v11 = vld [vmem:[#allocation37_spill] sm:$0xff] }
 0x271   : > { %v1969_v31 = vadd.f32 %v1919_v47, %v1759_v61  ;;  %v1714_v42 = vpop.f32.mrf.mxu2 }
 0x272   : > { %v1922_v35 = vpop.f32.mrf.mxu3 }
 0x273   : > { %v5866_v53 = vadd.f32 %v2223_v14, %v1969_v31 }
 0x274   : > { %v1473_v44 = vpop.f32.mrf.mxu1  ;;  %v2226_v45 = vpop.f32.mrf.mxu0 }
 0x275   : > { %6243 = vst [vmem:[#allocation26_spill] sm:$0xff] %v5866_v53  ;;  %v1474_v19 = vadd.f32 %v1473_v44, %v6244_v16  ;;  %v6246_v53 = vld [vmem:[#allocation22_spill] sm:$0xff]  ;;  %v2315_v16 = vrot.slane %v5386_v3, 2 }
 0x276   : > { %2646 = vmatmul.bf16.gmra.mxu2 %v2314_v33 }
 0x277   : > { %v1760_v59 = vadd.f32 %v1712_v41, %v1474_v19  ;;  %2431 = vmatmul.bf16.gmra.mxu1 %v2310_v17  ;;  %3201 = vmatmul.bf16.gmra.mxu0 %v3080_v10  ;;  %v3081_v17 = vrot.slane %v6242_v6, 3 }
 0x279   : > { %v1970_v26 = vadd.f32 %v1922_v35, %v1760_v59  ;;  %v1717_v47 = vpop.f32.mrf.mxu2  ;;  %v2316_v59 = vsel %vm2299_vm4, %v2313_v5, %v2315_v16 }
 0x27a   : > { %v1924_v57 = vpop.f32.mrf.mxu3 }
 0x27b   : > { %v5871_v1 = vadd.f32 %v2226_v45, %v1970_v26  ;;  %v6248_v45 = vld [vmem:[#allocation29_spill] sm:$0xff] }
 0x27c   : > { %v1475_v48 = vpop.f32.mrf.mxu1  ;;  %v2228_v14 = vpop.f32.mrf.mxu0 }
 0x27d   : > { %v1476_v61 = vadd.f32 %v1475_v48, %v6245_v11 }
 0x27f   : > { %v1761_v31 = vadd.f32 %v1714_v42, %v1476_v61  ;;  %2950 = vmatmul.bf16.gmra.mxu3 %v6246_v53  ;;  %v3082_v42 = vsel %vm3069_vm5, %v3079_v12, %v3081_v17  ;;  %v6250_v61 = vld [vmem:[#allocation32_spill] sm:$0xff]  ;;  %v3083_v12 = vrot.slane %v5386_v3, 3 }
 0x281   : > { %v1971_v44 = vadd.f32 %v1924_v57, %v1761_v31  ;;  %v1719_v40 = vpop.f32.mrf.mxu2 }
 0x282   : > { %v1927_v43 = vpop.f32.mrf.mxu3 }
 0x283   : > { %v5877_v41 = vadd.f32 %v2228_v14, %v1971_v44 }
 0x284   : > { %v1478_v35 = vpop.f32.mrf.mxu1  ;;  %v2231_v19 = vpop.f32.mrf.mxu0 }
 0x285   : > { %6247 = vst [vmem:[#allocation27_spill] sm:$0xff] %v5877_v41  ;;  %v1479_v10 = vadd.f32 %v1478_v35, %v6248_v45  ;;  %v6251_v41 = vld [vmem:[#allocation24_spill] sm:$0xff] }
 0x286   : > { %2651 = vmatmul.bf16.gmra.mxu2 %v2316_v59 }
 0x287   : > { %v1762_v26 = vadd.f32 %v1717_v47, %v1479_v10  ;;  %2436 = vmatmul.bf16.gmra.mxu1 %v2312_v15  ;;  %3206 = vmatmul.bf16.gmra.mxu0 %v3082_v42  ;;  %v2317_v15 = vrot.slane %v4862_v2, 2 }
 0x289   : > { %v1972_v53 = vadd.f32 %v1927_v43, %v1762_v26  ;;  %v1722_v57 = vpop.f32.mrf.mxu2  ;;  %v2318_v26 = vsel %vm2299_vm4, %v2315_v16, %v2317_v15 }
 0x28a   : > { %v1929_v48 = vpop.f32.mrf.mxu3 }
 0x28b   : > { %v5882_v11 = vadd.f32 %v2231_v19, %v1972_v53  ;;  %v6253_v19 = vld [vmem:[#allocation34_spill] sm:$0xff] }
 0x28c   : > { %v1480_v6 = vpop.f32.mrf.mxu1  ;;  %v2233_v14 = vpop.f32.mrf.mxu0 }
 0x28d   : > { %6249 = vst [vmem:[#allocation20_spill] sm:$0xff] %v5882_v11  ;;  %v1481_v31 = vadd.f32 %v1480_v6, %v6250_v61 }
 0x28f   : > { %v1763_v44 = vadd.f32 %v1719_v40, %v1481_v31  ;;  %2955 = vmatmul.bf16.gmra.mxu3 %v6251_v41  ;;  %v3084_v40 = vsel %vm3069_vm5, %v3081_v17, %v3083_v12  ;;  %v6255_v31 = vld [vmem:[#allocation36_spill] sm:$0xff] }
 0x291   : > { %v1973_v35 = vadd.f32 %v1929_v48, %v1763_v44  ;;  %v1724_v5 = vpop.f32.mrf.mxu2 }
 0x292   : > { %v1932_v45 = vpop.f32.mrf.mxu3 }
 0x293   : > { %v5887_v47 = vadd.f32 %v2233_v14, %v1973_v35 }
 0x294   : > { %v1483_v43 = vpop.f32.mrf.mxu1  ;;  %v2236_v10 = vpop.f32.mrf.mxu0 }
 0x295   : > { %6252 = vst [vmem:[#allocation3_spill] sm:$0xff] %v5887_v47  ;;  %v1484_v42 = vadd.f32 %v1483_v43, %v6253_v19  ;;  %v6256_v47 = vld [vmem:[#allocation25_spill] sm:$0xff]  ;;  %v2319_v19 = vrot.slane %v4859_v63, 2 }
 0x296   : > { %2656 = vmatmul.bf16.gmra.mxu2 %v2318_v26 }
 0x297   : > { %v1764_v53 = vadd.f32 %v1722_v57, %v1484_v42  ;;  %2441 = vmatmul.bf16.gmra.mxu1 %v2314_v33  ;;  %3211 = vmatmul.bf16.gmra.mxu0 %v3084_v40  ;;  %v3085_v42 = vrot.slane %v4862_v2, 3 }
 0x299   : > { %v1974_v41 = vadd.f32 %v1932_v45, %v1764_v53  ;;  %v1727_v48 = vpop.f32.mrf.mxu2  ;;  %v5903_v53 = vsel %vm2299_vm4, %v2317_v15, %v2319_v19 }
 0x29a   : > { %v1934_v6 = vpop.f32.mrf.mxu3 }
 0x29b   : > { %v5893_v3 = vadd.f32 %v2236_v10, %v1974_v41  ;;  %v6258_v10 = vld [vmem:[#allocation38_spill] sm:$0xff] }
 0x29c   : > { %v1485_v14 = vpop.f32.mrf.mxu1  ;;  %v2238_v61 = vpop.f32.mrf.mxu0  ;;  %v6259_v41 = vld [vmem:[#allocation2_spill] sm:$0xff] }
 0x29d   : > { %6254 = vst [vmem:[#allocation28_spill] sm:$0xff] %v5893_v3  ;;  %v1486_v44 = vadd.f32 %v1485_v14, %v6255_v31 }
 0x29f   : > { %v1765_v35 = vadd.f32 %v1724_v5, %v1486_v44  ;;  %2960 = vmatmul.bf16.gmra.mxu3 %v6256_v47  ;;  %v3086_v5 = vsel %vm3069_vm5, %v3083_v12, %v3085_v42  ;;  %v2801_v47 = vrot.slane %v6205_v4, 2 }
 0x2a1   : > { %v1975_v43 = vadd.f32 %v1934_v6, %v1765_v35  ;;  %v1729_v16 = vpop.f32.mrf.mxu2  ;;  %v2802_v6 = vrot.slane %v6259_v41, 3 }
 0x2a2   : > { %v1937_v17 = vpop.f32.mrf.mxu3 }
 0x2a3   : > { %v5898_v57 = vadd.f32 %v2238_v61, %v1975_v43  ;;  %v2803_v2 = vor.u32 %v2802_v6, %v2801_v47  ;;  %v6264_v47 = vld [vmem:[#allocation40_spill] sm:$0xff] }
 0x2a4   : > { %v1488_v33 = vpop.f32.mrf.mxu1  ;;  %v2241_v45 = vpop.f32.mrf.mxu0 }
 0x2a5   : > { %6257 = vst [vmem:[#allocation30_spill] sm:$0xff] %v5898_v57  ;;  %v1489_v40 = vadd.f32 %v1488_v33, %v6258_v10  ;;  %v6261_v33 = vld [vmem:[#allocation39_spill] sm:$0xff] }
 0x2a6   : > { %2661 = vmatmul.bf16.gmra.mxu2 %v5903_v53  ;;  %v6262_v57 = vld [vmem:[#allocation23_spill] sm:$0xff] }
 0x2a7   : > { %v1766_v14 = vadd.f32 %v1727_v48, %v1489_v40  ;;  %2446 = vmatmul.bf16.gmra.mxu1 %v2316_v59  ;;  %3216 = vmatmul.bf16.gmra.mxu0 %v3086_v5  ;;  %v2804_v12 = vsel %vm2765_vm2, %v6262_v57, %v2803_v2  ;;  %v2321_v59 = vrot.slane %v6208_v34, 2  ;;  %v2806_v57 = vrot.slane %v6211_v28, 3 }
 0x2a9   : > { %v1976_v61 = vadd.f32 %v1937_v17, %v1766_v14  ;;  %v2622_v31 = vpop.f32.mrf.mxu2  ;;  %v3087_v17 = vrot.slane %v4859_v63, 3  ;;  %v5920_v14 = vsel %vm2299_vm4, %v2319_v19, %v2321_v59 }
 0x2aa   : > { %v1939_v44 = vpop.f32.mrf.mxu3 }
 0x2ab   : > { %v5909_v35 = vadd.f32 %v2241_v45, %v1976_v61 }
 0x2ac   : > { %v1490_v43 = vpop.f32.mrf.mxu1  ;;  %v2243_v15 = vpop.f32.mrf.mxu0 }
 0x2ad   : > { %6260 = vst [vmem:[#allocation15_spill] sm:$0xff] %v5909_v35  ;;  %v1491_v10 = vadd.f32 %v1490_v43, %v6261_v33 }
 0x2af   : > { %v1767_v3 = vadd.f32 %v1729_v16, %v1491_v10  ;;  %2965 = vmatmul.bf16.gmra.mxu3 %v2804_v12  ;;  %v3088_v16 = vsel %vm3069_vm5, %v3085_v42, %v3087_v17  ;;  %v6265_v12 = vld [vmem:[#allocation5_spill] sm:$0xff]  ;;  %v3419_v42 = vpop.permute.xlu2 %3418 }
 0x2b1   : > { %v1977_v4 = vadd.f32 %v1939_v44, %v1767_v3  ;;  %v2624_v41 = vpop.f32.mrf.mxu2  ;;  %v2805_v3 = vrot.slane %v6210_v21, 2  ;;  %v5928_v21 = vpop.permute.xlu1 %972 }
 0x2b2   : > { %v2926_v48 = vpop.f32.mrf.mxu3 }
 0x2b3   : > { %v5916_v40 = vadd.f32 %v2243_v15, %v1977_v4  ;;  %v2807_v15 = vor.u32 %v2806_v57, %v2805_v3  ;;  %v3424_v3 = vpop.permute.xlu0 %3423 }
 0x2b4   : > { %v2412_v45 = vpop.f32.mrf.mxu1  ;;  %v3182_v5 = vpop.f32.mrf.mxu0 }
 0x2b5   : > { %6263 = vst [vmem:[#allocation7_spill] sm:$0xff] %v5916_v40  ;;  %v2502_v6 = vadd.f32 %v2412_v45, %v6264_v47  ;;  %v2808_v45 = vsel %vm2765_vm2, %v2803_v2, %v2807_v15 }
 0x2b6   : > { %2666 = vmatmul.bf16.gmra.mxu2 %v5920_v14 }
 0x2b7   : > { %v2712_v61 = vadd.f32 %v2622_v31, %v2502_v6  ;;  %2451 = vmatmul.bf16.gmra.mxu1 %v2318_v26  ;;  %3221 = vmatmul.bf16.gmra.mxu0 %v3088_v16  ;;  %v2323_v26 = vrot.slane %v5102_v58, 2  ;;  %v3089_v16 = vrot.slane %v6208_v34, 3  ;;  %v2810_v34 = vrot.slane %v6213_v52, 3 }
 0x2b9   : > { %v2627_v63 = vpop.f32.mrf.mxu2  ;;  %v3016_v44 = vadd.f32 %v2926_v48, %v2712_v61 }
 0x2ba   : > { %v2928_v43 = vpop.f32.mrf.mxu3 }
 0x2bb   : > { %v3272_v4 = vadd.f32 %v3182_v5, %v3016_v44 }
 0x2bc   : > { %v2414_v33 = vpop.f32.mrf.mxu1  ;;  %v3184_v10 = vpop.f32.mrf.mxu0 }
 0x2bd   : > { %v2503_v19 = vadd.f32 %v2414_v33, %v6265_v12  ;;  %v3596_v6 = vmul.f32 %v3419_v42, %v3272_v4  ;;  %v5934_v12 = vsel %vm2299_vm4, %v2321_v59, %v2323_v26 }
 0x2bf   : > { %v2713_v47 = vadd.f32 %v2624_v41, %v2503_v19  ;;  %2970 = vmatmul.bf16.gmra.mxu3 %v2808_v45  ;;  %v6266_v41 = vld [vmem:[#allocation4_spill] sm:$0xff]  ;;  %v3090_v19 = vsel %vm3069_vm5, %v3087_v17, %v3089_v16  ;;  %v2809_v45 = vrot.slane %v5281_v20, 2 }
 0x2c1   : > { %v3017_v28 = vadd.f32 %v2928_v43, %v2713_v47  ;;  %v2629_v31 = vpop.f32.mrf.mxu2  ;;  %v3677_v43 = vmul.f32 %v3596_v6, %v3272_v4 }
 0x2c2   : > { %v2931_v48 = vpop.f32.mrf.mxu3 }
 0x2c3   : > { %v3273_v57 = vadd.f32 %v3184_v10, %v3017_v28 }
 0x2c4   : > { %v2417_v61 = vpop.f32.mrf.mxu1  ;;  %v3187_v5 = vpop.f32.mrf.mxu0 }
 0x2c5   : > { %v4459_v44 = vpack.c.bf16 %v3273_v57, %v3272_v4  ;;  %v3597_v2 = vmul.f32 %v3424_v3, %v3273_v57  ;;  %v2504_v33 = vadd.f32 %v2417_v61, %v6266_v41  ;;  %v2811_v4 = vor.u32 %v2810_v34, %v2809_v45  ;;  %v3429_v41 = vpop.permute.xlu1 %3428 }
 0x2c6   : > { %2671 = vmatmul.bf16.gmra.mxu2 %v5934_v12 }
 0x2c7   : > { %4460 = vst [vmem:[%s4725_s28] sm:$0xff] %v4459_v44   ;;  %v3633_v10 = vadd.f32 %v3597_v2, %v3596_v6  ;;  %v3678_v47 = vmul.f32 %v3597_v2, %v3273_v57  ;;  %v2714_v42 = vadd.f32 %v2627_v63, %v2504_v33  ;;  %2456 = vmatmul.bf16.gmra.mxu1 %v5903_v53 }
 0x2c8   : > { %3226 = vmatmul.bf16.gmra.mxu0 %v3090_v19  ;;  %v2812_v52 = vsel %vm2765_vm2, %v2807_v15, %v2811_v4  ;;  %v6267_v15 = vld [vmem:[#allocation8_spill] sm:$0xff] }
 0x2c9   : > { %v3713_v28 = vadd.f32 %v3678_v47, %v3677_v43  ;;  %v3018_v3 = vadd.f32 %v2931_v48, %v2714_v42  ;;  %v2632_v59 = vpop.f32.mrf.mxu2  ;;  %v2325_v48 = vrot.slane %v5257_v22, 2  ;;  %v3434_v43 = vpop.permute.xlu2 %3433  ;;  %v2813_v47 = vrot.slane %v5378_v8, 2 }
 0x2ca   : > { %v2933_v61 = vpop.f32.mrf.mxu3  ;;  %v2814_v42 = vrot.slane %v5284_v38, 3 }
 0x2cb   : > { %v3274_v40 = vadd.f32 %v3187_v5, %v3018_v3  ;;  %v3091_v5 = vrot.slane %v5102_v58, 3 }
 0x2cc   : > { %v2419_v35 = vpop.f32.mrf.mxu1  ;;  %v3189_v17 = vpop.f32.mrf.mxu0 }
 0x2cd   : > { %v3598_v11 = vmul.f32 %v3429_v41, %v3274_v40  ;;  %v2505_v20 = vadd.f32 %v2419_v35, %v5684_v60 }
 0x2cf   : > { %v3634_v6 = vadd.f32 %v3633_v10, %v3598_v11  ;;  %v3679_v57 = vmul.f32 %v3598_v11, %v3274_v40  ;;  %v2715_v63 = vadd.f32 %v2629_v31, %v2505_v20  ;;  %2975 = vmatmul.bf16.gmra.mxu3 %v2812_v52  ;;  %v5948_v11 = vsel %vm2299_vm4, %v2323_v26, %v2325_v48  ;;  %v3439_v20 = vpop.permute.xlu0 %3438 }
 0x2d0   : > { %v3092_v31 = vsel %vm3069_vm5, %v3089_v16, %v3091_v5 }
 0x2d1   : > { %v3714_v53 = vadd.f32 %v3713_v28, %v3679_v57  ;;  %v3019_v44 = vadd.f32 %v2933_v61, %v2715_v63  ;;  %v2634_v2 = vpop.f32.mrf.mxu2 }
 0x2d2   : > { %v2936_v33 = vpop.f32.mrf.mxu3 }
 0x2d3   : > { %v3275_v19 = vadd.f32 %v3189_v17, %v3019_v44  ;;  %v2815_v17 = vor.u32 %v2814_v42, %v2813_v47 }
 0x2d4   : > { %v2422_v45 = vpop.f32.mrf.mxu1  ;;  %v3192_v34 = vpop.f32.mrf.mxu0 }
 0x2d5   : > { %v4464_v60 = vpack.c.bf16 %v3275_v19, %v3274_v40  ;;  %v3599_v35 = vmul.f32 %v3434_v43, %v3275_v19  ;;  %v2506_v10 = vadd.f32 %v2422_v45, %v6267_v15  ;;  %v2816_v38 = vsel %vm2765_vm2, %v2811_v4, %v2815_v17  ;;  %v3444_v45 = vpop.permute.xlu1 %3443  ;;  %v6268_v4 = vld [vmem:[#allocation6_spill] sm:$0xff] }
 0x2d6   : > { %2676 = vmatmul.bf16.gmra.mxu2 %v5948_v11 }
 0x2d7   : > { %4564 = vst [vmem:[%s4725_s28 + $0x8] sm:$0xff] %v4464_v60   ;;  %v3635_v58 = vadd.f32 %v3634_v6, %v3599_v35  ;;  %v3680_v28 = vmul.f32 %v3599_v35, %v3275_v19  ;;  %v2716_v3 = vadd.f32 %v2632_v59, %v2506_v10  ;;  %2461 = vmatmul.bf16.gmra.mxu1 %v5920_v14  ;;  %v3093_v19 = vrot.slane %v5257_v22, 3 }
 0x2d8   : > { %3231 = vmatmul.bf16.gmra.mxu0 %v3092_v31  ;;  %v2327_v60 = vrot.slane %v6217_v7, 2 }
 0x2d9   : > { %v3715_v40 = vadd.f32 %v3714_v53, %v3680_v28  ;;  %v3020_v61 = vadd.f32 %v2936_v33, %v2716_v3  ;;  %v2637_v41 = vpop.f32.mrf.mxu2  ;;  %v3094_v47 = vsel %vm3069_vm5, %v3091_v5, %v3093_v19  ;;  %v2817_v28 = vrot.slane %v6218_v49, 2 }
 0x2da   : > { %v2938_v26 = vpop.f32.mrf.mxu3  ;;  %v2818_v3 = vrot.slane %v5186_v46, 3 }
 0x2db   : > { %v3276_v52 = vadd.f32 %v3192_v34, %v3020_v61 }
 0x2dc   : > { %v2424_v57 = vpop.f32.mrf.mxu1  ;;  %v3194_v16 = vpop.f32.mrf.mxu0  ;;  %v2819_v5 = vor.u32 %v2818_v3, %v2817_v28 }
 0x2dd   : > { %v3600_v63 = vmul.f32 %v3439_v20, %v3276_v52  ;;  %v2507_v8 = vadd.f32 %v2424_v57, %v5699_v9  ;;  %v3449_v20 = vpop.permute.xlu2 %3448 }
 0x2df   : > { %v3636_v6 = vadd.f32 %v3635_v58, %v3600_v63  ;;  %v3681_v44 = vmul.f32 %v3600_v63, %v3276_v52  ;;  %v2717_v59 = vadd.f32 %v2634_v2, %v2507_v8  ;;  %2980 = vmatmul.bf16.gmra.mxu3 %v2816_v38  ;;  %v5962_v2 = vsel %vm2299_vm4, %v2325_v48, %v2327_v60  ;;  %v6269_v8 = vld [vmem:[#allocation9_spill] sm:$0xff] }
 0x2e1   : > { %v3716_v14 = vadd.f32 %v3715_v40, %v3681_v44  ;;  %v3021_v53 = vadd.f32 %v2938_v26, %v2717_v59  ;;  %v2639_v33 = vpop.f32.mrf.mxu2 }
 0x2e2   : > { %v2941_v43 = vpop.f32.mrf.mxu3 }
 0x2e3   : > { %v3277_v34 = vadd.f32 %v3194_v16, %v3021_v53 }
 0x2e4   : > { %v2427_v35 = vpop.f32.mrf.mxu1  ;;  %v3197_v15 = vpop.f32.mrf.mxu0 }
 0x2e5   : > { %v4469_v9 = vpack.c.bf16 %v3277_v34, %v3276_v52  ;;  %v3601_v10 = vmul.f32 %v3444_v45, %v3277_v34  ;;  %v2508_v31 = vadd.f32 %v2427_v35, %v6268_v4 }
 0x2e6   : > { %2681 = vmatmul.bf16.gmra.mxu2 %v5962_v2 }
 0x2e7   : > { %4565 = vst [vmem:[%s4725_s28 + $0x10] sm:$0xff] %v4469_v9   ;;  %v3637_v42 = vadd.f32 %v3636_v6, %v3601_v10  ;;  %v3682_v22 = vmul.f32 %v3601_v10, %v3277_v34  ;;  %v2718_v58 = vadd.f32 %v2637_v41, %v2508_v31  ;;  %2466 = vmatmul.bf16.gmra.mxu1 %v5934_v12 }
 0x2e8   : > { %3236 = vmatmul.bf16.gmra.mxu0 %v3094_v47  ;;  %v2820_v41 = vsel %vm2765_vm2, %v2815_v17, %v2819_v5  ;;  %v6270_v17 = vld [vmem:[#allocation41_spill] sm:$0xff]  ;;  %v2821_v47 = vrot.slane %v6221_v39, 2  ;;  %v6271_v39 = vld [vmem:[#allocation11_spill] sm:$0xff] }
 0x2e9   : > { %v3717_v40 = vadd.f32 %v3716_v14, %v3682_v22  ;;  %v3022_v61 = vadd.f32 %v2941_v43, %v2718_v58  ;;  %v2642_v26 = vpop.f32.mrf.mxu2  ;;  %v2329_v14 = vrot.slane %v6220_v0, 2  ;;  %v3454_v43 = vpop.permute.xlu0 %3453 }
 0x2ea   : > { %v2943_v48 = vpop.f32.mrf.mxu3 }
 0x2eb   : > { %v3278_v52 = vadd.f32 %v3197_v15, %v3022_v61  ;;  %v3095_v15 = vrot.slane %v6217_v7, 3 }
 0x2ec   : > { %v2429_v57 = vpop.f32.mrf.mxu1  ;;  %v3199_v16 = vpop.f32.mrf.mxu0 }
 0x2ed   : > { %v3602_v63 = vmul.f32 %v3449_v20, %v3278_v52  ;;  %v2509_v38 = vadd.f32 %v2429_v57, %v6269_v8  ;;  %v3096_v31 = vsel %vm3069_vm5, %v3093_v19, %v3095_v15 }
 0x2ef   : > { %v3638_v12 = vadd.f32 %v3637_v42, %v3602_v63  ;;  %v3683_v6 = vmul.f32 %v3602_v63, %v3278_v52  ;;  %v2719_v44 = vadd.f32 %v2639_v33, %v2509_v38  ;;  %2985 = vmatmul.bf16.gmra.mxu3 %v2820_v41  ;;  %v5976_v33 = vsel %vm2299_vm4, %v2327_v60, %v2329_v14 }
 0x2f0   : > { %v2822_v42 = vrot.slane %v6222_v18, 3 }
 0x2f1   : > { %v3718_v49 = vadd.f32 %v3717_v40, %v3683_v6  ;;  %v3023_v46 = vadd.f32 %v2943_v48, %v2719_v44  ;;  %v2644_v59 = vpop.f32.mrf.mxu2  ;;  %v3459_v48 = vpop.permute.xlu1 %3458  ;;  %v3097_v44 = vrot.slane %v6220_v0, 3 }
 0x2f2   : > { %v2946_v53 = vpop.f32.mrf.mxu3  ;;  %v2823_v61 = vor.u32 %v2822_v42, %v2821_v47 }
 0x2f3   : > { %v3279_v45 = vadd.f32 %v3199_v16, %v3023_v46 }
 0x2f4   : > { %v2432_v34 = vpop.f32.mrf.mxu1  ;;  %v3202_v35 = vpop.f32.mrf.mxu0  ;;  %v2824_v18 = vsel %vm2765_vm2, %v2819_v5, %v2823_v61 }
 0x2f5   : > { %v4474_v9 = vpack.c.bf16 %v3279_v45, %v3278_v52  ;;  %v3603_v10 = vmul.f32 %v3454_v43, %v3279_v45  ;;  %v2510_v4 = vadd.f32 %v2432_v34, %v6270_v17 }
 0x2f6   : > { %2686 = vmatmul.bf16.gmra.mxu2 %v5976_v33 }
 0x2f7   : > { %4566 = vst [vmem:[%s4725_s28 + $0x18] sm:$0xff] %v4474_v9   ;;  %v3639_v22 = vadd.f32 %v3638_v12, %v3603_v10  ;;  %v3684_v58 = vmul.f32 %v3603_v10, %v3279_v45  ;;  %v2720_v28 = vadd.f32 %v2642_v26, %v2510_v4  ;;  %2471 = vmatmul.bf16.gmra.mxu1 %v5948_v11  ;;  %v2331_v12 = vrot.slane %v5331_v55, 2 }
 0x2f8   : > { %3241 = vmatmul.bf16.gmra.mxu0 %v3096_v31  ;;  %v2825_v9 = vrot.slane %v5432_v37, 2  ;;  %v2826_v10 = vrot.slane %v5350_v56, 3  ;;  %v6272_v37 = vld [vmem:[#allocation13_spill] sm:$0xff] }
 0x2f9   : > { %v3719_v7 = vadd.f32 %v3718_v49, %v3684_v58  ;;  %v3024_v3 = vadd.f32 %v2946_v53, %v2720_v28  ;;  %v2647_v40 = vpop.f32.mrf.mxu2  ;;  %v3464_v49 = vpop.permute.xlu2 %3463 }
 0x2fa   : > { %v2948_v60 = vpop.f32.mrf.mxu3  ;;  %v2827_v42 = vor.u32 %v2826_v10, %v2825_v9 }
 0x2fb   : > { %v3280_v20 = vadd.f32 %v3202_v35, %v3024_v3  ;;  %v3098_v35 = vsel %vm3069_vm5, %v3095_v15, %v3097_v44 }
 0x2fc   : > { %v2434_v52 = vpop.f32.mrf.mxu1  ;;  %v3204_v19 = vpop.f32.mrf.mxu0  ;;  %v2828_v56 = vsel %vm2765_vm2, %v2823_v61, %v2827_v42 }
 0x2fd   : > { %v3604_v57 = vmul.f32 %v3459_v48, %v3280_v20  ;;  %v2511_v16 = vadd.f32 %v2434_v52, %v6271_v39  ;;  %v3099_v39 = vrot.slane %v5331_v55, 3 }
 0x2ff   : > { %v3640_v63 = vadd.f32 %v3639_v22, %v3604_v57  ;;  %v3685_v8 = vmul.f32 %v3604_v57, %v3280_v20  ;;  %v2721_v26 = vadd.f32 %v2644_v59, %v2511_v16  ;;  %2990 = vmatmul.bf16.gmra.mxu3 %v2824_v18  ;;  %v5990_v59 = vsel %vm2299_vm4, %v2329_v14, %v2331_v12  ;;  %v3469_v22 = vpop.permute.xlu0 %3468  ;;  %v3474_v16 = vpop.permute.xlu1 %3473 }
 0x301   : > { %v3720_v11 = vadd.f32 %v3719_v7, %v3685_v8  ;;  %v3025_v38 = vadd.f32 %v2948_v60, %v2721_v26  ;;  %v2649_v41 = vpop.f32.mrf.mxu2  ;;  %v924_v26 = vld [vmem:[%s4705_s27 + $0x10] sm:$0xf] }
 0x302   : > { %v2951_v6 = vpop.f32.mrf.mxu3 }
 0x303   : > { %v3281_v46 = vadd.f32 %v3204_v19, %v3025_v38  ;;  %v6001_v19 = vrot.slane %v5427_v25, 2  ;;  %v6273_v38 = vld [vmem:[#allocation10_spill] sm:$0xff] }
 0x304   : > { %v2437_v53 = vpop.f32.mrf.mxu1  ;;  %v3207_v43 = vpop.f32.mrf.mxu0 }
 0x305   : > { %v4479_v45 = vpack.c.bf16 %v3281_v46, %v3280_v20  ;;  %v3605_v34 = vmul.f32 %v3464_v49, %v3281_v46  ;;  %v2512_v5 = vadd.f32 %v2437_v53, %v5741_v32  ;;  %v3100_v49 = vsel %vm3069_vm5, %v3097_v44, %v3099_v39  ;;  %v3479_v44 = vpop.permute.xlu2 %3478 }
 0x306   : > { %2691 = vmatmul.bf16.gmra.mxu2 %v5990_v59  ;;  %v6275_v53 = vshll.u32 %v5427_v25, 16 }
 0x307   : > { %4567 = vst [vmem:[%s4725_s28 + $0x20] sm:$0xff] %v4479_v45   ;;  %v3641_v0 = vadd.f32 %v3640_v63, %v3605_v34  ;;  %v3686_v17 = vmul.f32 %v3605_v34, %v3281_v46  ;;  %v2722_v4 = vadd.f32 %v2647_v40, %v2512_v5  ;;  %2476 = vmatmul.bf16.gmra.mxu1 %v5962_v2  ;;  %v6274_v46 = vshrl.u32 %v5427_v25, 16 }
 0x308   : > { %3246 = vmatmul.bf16.gmra.mxu0 %v3098_v35  ;;  %v929_v35 = vunpack.c.l.bf16 %v924_v26 }
 0x309   : > { %v3721_v31 = vadd.f32 %v3720_v11, %v3686_v17  ;;  %v3026_v32 = vadd.f32 %v2951_v6, %v2722_v4  ;;  %v2652_v47 = vpop.f32.mrf.mxu2  ;;  %v6008_v6 = vsel %vm2299_vm4, %v2331_v12, %v6001_v19  ;;  %v2829_v55 = vrot.slane %v6274_v46, 2 }
 0x30a   : > { %v2953_v14 = vpop.f32.mrf.mxu3 }
 0x30b   : > { %v3282_v58 = vadd.f32 %v3207_v43, %v3026_v32  ;;  %v2830_v43 = vrot.slane %v6275_v53, 3 }
 0x30c   : > { %v2439_v28 = vpop.f32.mrf.mxu1  ;;  %v3209_v15 = vpop.f32.mrf.mxu0 }
 0x30d   : > { %v3606_v7 = vmul.f32 %v3469_v22, %v3282_v58  ;;  %v2513_v3 = vadd.f32 %v2439_v28, %v6272_v37  ;;  %v2831_v17 = vor.u32 %v2830_v43, %v2829_v55 }
 0x30f   : > { %v3642_v60 = vadd.f32 %v3641_v0, %v3606_v7  ;;  %v3687_v40 = vmul.f32 %v3606_v7, %v3282_v58  ;;  %v2723_v48 = vadd.f32 %v2649_v41, %v2513_v3  ;;  %2995 = vmatmul.bf16.gmra.mxu3 %v2828_v56  ;;  %v4623_v3 = vld [vmem:[%s6105_s5] ss:$0 sm:$0xff] }
 0x311   : > { %v3722_v2 = vadd.f32 %v3721_v31, %v3687_v40  ;;  %v3027_v20 = vadd.f32 %v2953_v14, %v2723_v48  ;;  %v2654_v52 = vpop.f32.mrf.mxu2  ;;  %v4622_v31 = vld [vmem:[%s6104_s4] ss:$0 sm:$0xff] }
 0x312   : > { %v2956_v57 = vpop.f32.mrf.mxu3  ;;  %v934_v32 = vmul.f32 %v4622_v31, %v929_v35 }
 0x313   : > { %v3283_v18 = vadd.f32 %v3209_v15, %v3027_v20 }
 0x314   : > { %v2442_v63 = vpop.f32.mrf.mxu1  ;;  %v3212_v8 = vpop.f32.mrf.mxu0  ;;  %v939_v56 = vadd.f32 %v4623_v3, %v934_v32 }
 0x315   : > { %v4484_v61 = vpack.c.bf16 %v3283_v18, %v3282_v58  ;;  %v3607_v11 = vmul.f32 %v3474_v16, %v3283_v18  ;;  %v2514_v41 = vadd.f32 %v2442_v63, %v6273_v38  ;;  %v3101_v16 = vrot.slane %v5427_v25, 3 }
 0x316   : > { %2696 = vmatmul.bf16.gmra.mxu2 %v6008_v6 }
 0x317   : > { %4568 = vst [vmem:[%s4725_s28 + $0x28] sm:$0xff] %v4484_v61   ;;  %v3643_v45 = vadd.f32 %v3642_v60, %v3607_v11  ;;  %v3688_v34 = vmul.f32 %v3607_v11, %v3283_v18  ;;  %v2724_v5 = vadd.f32 %v2652_v47, %v2514_v41  ;;  %2481 = vmatmul.bf16.gmra.mxu1 %v5976_v33  ;;  %v6276_v47 = vld [vmem:[#allocation16_spill] sm:$0xff] }
 0x318   : > { %3251 = vmatmul.bf16.gmra.mxu0 %v3100_v49  ;;  %v2832_v33 = vsel %vm2765_vm2, %v2827_v42, %v2831_v17  ;;  %v6278_v41 = vld [vmem:[#allocation12_spill] sm:$0xff]  ;;  %v3102_v25 = vsel %vm3069_vm5, %v3099_v39, %v3101_v16 }
 0x319   : > { %v3723_v12 = vadd.f32 %v3722_v2, %v3688_v34  ;;  %v3028_v9 = vadd.f32 %v2956_v57, %v2724_v5  ;;  %v2657_v10 = vpop.f32.mrf.mxu2  ;;  %v6277_v2 = vld [vmem:[#allocation21_spill] sm:$0xff] }
 0x31a   : > { %v2958_v0 = vpop.f32.mrf.mxu3  ;;  %v2559_v20 = vrot.slane %v6277_v2, 2  ;;  %v2834_v42 = vshrl.u32 %v6277_v2, 16  ;;  %v2837_v18 = vshll.u32 %v6277_v2, 16  ;;  %v3103_v3 = vrot.slane %v6277_v2, 3 }
 0x31b   : > { %v3284_v4 = vadd.f32 %v3212_v8, %v3028_v9  ;;  %v944_v8 = vmax.f32 %v939_v56, 0.0 }
 0x31c   : > { %v2444_v14 = vpop.f32.mrf.mxu1  ;;  %v3214_v22 = vpop.f32.mrf.mxu0  ;;  %v2560_v46 = vsel %vm2299_vm4, %v6001_v19, %v2559_v20  ;;  %v2836_v55 = vrot.slane %v2834_v42, 2  ;;  %v2839_v53 = vrot.slane %v2837_v18, 3 }
 0x31d   : > { %v3608_v58 = vmul.f32 %v3479_v44, %v3284_v4  ;;  %v2515_v28 = vadd.f32 %v2444_v14, %v6276_v47  ;;  %v979_v5 = vmul.f32 %v5928_v21, %v944_v8 }
 0x31e   : > { %v2840_v44 = vor.u32 %v2839_v53, %v2836_v55 }
 0x31f   : > { %v3644_v15 = vadd.f32 %v3643_v45, %v3608_v58  ;;  %v3689_v7 = vmul.f32 %v3608_v58, %v3284_v4  ;;  %v2725_v37 = vadd.f32 %v2654_v52, %v2515_v28  ;;  %3000 = vmatmul.bf16.gmra.mxu3 %v2832_v33  ;;  %v3484_v52 = vpop.permute.xlu0 %3483  ;;  %v6037_v14 = vpack.c.bf16 %v979_v5, %v979_v5 }
 0x321   : > { %v3724_v60 = vadd.f32 %v3723_v12, %v3689_v7  ;;  %v3029_v40 = vadd.f32 %v2958_v0, %v2725_v37  ;;  %v2659_v48 = vpop.f32.mrf.mxu2  ;;  %v2561_v7 = vrot.slane %v6037_v14, 2  ;;  %v2843_v56 = vshrl.u32 %v6037_v14, 16 }
 0x322   : > { %v2961_v57 = vpop.f32.mrf.mxu3 }
 0x323   : > { %v3285_v63 = vadd.f32 %v3214_v22, %v3029_v40  ;;  %v2845_v8 = vrot.slane %v2843_v56, 2 }
 0x324   : > { %v2447_v26 = vpop.f32.mrf.mxu1  ;;  %v3217_v61 = vpop.f32.mrf.mxu0 }
 0x325   : > { %v4489_v11 = vpack.c.bf16 %v3285_v63, %v3284_v4  ;;  %v3609_v38 = vmul.f32 %v3484_v52, %v3285_v63  ;;  %v2516_v49 = vadd.f32 %v2447_v26, %v6278_v41  ;;  %v3489_v4 = vpop.permute.xlu1 %3488  ;;  %v2562_v52 = vsel %vm2299_vm4, %v2559_v20, %v2561_v7 }
 0x326   : > { %2701 = vmatmul.bf16.gmra.mxu2 %v2560_v46 }
 0x327   : > { %4569 = vst [vmem:[%s4725_s28 + $0x30] sm:$0xff] %v4489_v11   ;;  %v3645_v43 = vadd.f32 %v3644_v15, %v3609_v38  ;;  %v3690_v45 = vmul.f32 %v3609_v38, %v3285_v63  ;;  %v2726_v34 = vadd.f32 %v2657_v10, %v2516_v49  ;;  %2486 = vmatmul.bf16.gmra.mxu1 %v5990_v59 }
 0x328   : > { %3256 = vmatmul.bf16.gmra.mxu0 %v3102_v25  ;;  %v2841_v10 = vsel %vm2765_vm2, %v2831_v17, %v2840_v44  ;;  %v3104_v63 = vsel %vm3069_vm5, %v3101_v16, %v3103_v3 }
 0x329   : > { %v3725_v35 = vadd.f32 %v3724_v60, %v3690_v45  ;;  %v3030_v12 = vadd.f32 %v2961_v57, %v2726_v34  ;;  %v2662_v9 = vpop.f32.mrf.mxu2  ;;  %v2846_v60 = vshll.u32 %v6037_v14, 16 }
 0x32a   : > { %v2963_v0 = vpop.f32.mrf.mxu3 }
 0x32b   : > { %v3286_v31 = vadd.f32 %v3217_v61, %v3030_v12  ;;  %v2848_v26 = vrot.slane %v2846_v60, 3 }
 0x32c   : > { %v2449_v32 = vpop.f32.mrf.mxu1  ;;  %v3219_v39 = vpop.f32.mrf.mxu0 }
 0x32d   : > { %v3610_v22 = vmul.f32 %v3489_v4, %v3286_v31  ;;  %v2517_v58 = vadd.f32 %v2449_v32, %v5788_v62  ;;  %v3494_v62 = vpop.permute.xlu2 %3493  ;;  %v2849_v25 = vor.u32 %v2848_v26, %v2845_v8  ;;  %v3105_v4 = vrot.slane %v6037_v14, 3 }
 0x32f   : > { %v3646_v59 = vadd.f32 %v3645_v43, %v3610_v22  ;;  %v3691_v47 = vmul.f32 %v3610_v22, %v3286_v31  ;;  %v2727_v28 = vadd.f32 %v2659_v48, %v2517_v58  ;;  %3005 = vmatmul.bf16.gmra.mxu3 %v2841_v10  ;;  %v2850_v45 = vsel %vm2765_vm2, %v2840_v44, %v2849_v25 }
 0x330   : > { %v2335_v58 = vrot.slane %v5796_v27, 2 }
 0x331   : > { %v3726_v21 = vadd.f32 %v3725_v35, %v3691_v47  ;;  %v3031_v33 = vadd.f32 %v2963_v0, %v2727_v28  ;;  %v2664_v15 = vpop.f32.mrf.mxu2  ;;  %v3106_v47 = vsel %vm3069_vm5, %v3103_v3, %v3105_v4 }
 0x332   : > { %v2966_v37 = vpop.f32.mrf.mxu3 }
 0x333   : > { %v3287_v40 = vadd.f32 %v3219_v39, %v3031_v33 }
 0x334   : > { %v2452_v17 = vpop.f32.mrf.mxu1  ;;  %v3222_v57 = vpop.f32.mrf.mxu0 }
 0x335   : > { %v4494_v42 = vpack.c.bf16 %v3287_v40, %v3286_v31  ;;  %v3611_v48 = vmul.f32 %v3494_v62, %v3287_v40  ;;  %v2518_v18 = vadd.f32 %v2452_v17, %v5798_v13  ;;  %v3499_v13 = vpop.permute.xlu0 %3498  ;;  %v3504_v31 = vpop.permute.xlu1 %3503 }
 0x336   : > { %2706 = vmatmul.bf16.gmra.mxu2 %v2562_v52  ;;  %v3509_v27 = vpop.permute.xlu2 %3508 }
 0x337   : > { %4570 = vst [vmem:[%s4725_s28 + $0x38] sm:$0xff] %v4494_v42   ;;  %v3647_v2 = vadd.f32 %v3646_v59, %v3611_v48  ;;  %v3692_v61 = vmul.f32 %v3611_v48, %v3287_v40  ;;  %v2728_v11 = vadd.f32 %v2662_v9, %v2518_v18  ;;  %2491 = vmatmul.bf16.gmra.mxu1 %v6008_v6 }
 0x338   : > { %3261 = vmatmul.bf16.gmra.mxu0 %v3104_v63  ;;  %v2336_v59 = vsel %vm2299_vm4, %v6001_v19, %v2335_v58 }
 0x339   : > { %v3727_v38 = vadd.f32 %v3726_v21, %v3692_v61  ;;  %v3032_v41 = vadd.f32 %v2966_v37, %v2728_v11  ;;  %v2667_v49 = vpop.f32.mrf.mxu2 }
 0x33a   : > { %v2968_v46 = vpop.f32.mrf.mxu3 }
 0x33b   : > { %v3288_v55 = vadd.f32 %v3222_v57, %v3032_v41 }
 0x33c   : > { %v2454_v20 = vpop.f32.mrf.mxu1  ;;  %v3224_v53 = vpop.f32.mrf.mxu0 }
 0x33d   : > { %v3612_v43 = vmul.f32 %v3499_v13, %v3288_v55  ;;  %v2519_v16 = vadd.f32 %v2454_v20, %v5806_v50  ;;  %v3514_v52 = vpop.permute.xlu0 %3513 }
 0x33f   : > { %v3648_v34 = vadd.f32 %v3647_v2, %v3612_v43  ;;  %v3693_v5 = vmul.f32 %v3612_v43, %v3288_v55  ;;  %v2729_v35 = vadd.f32 %v2664_v15, %v2519_v16  ;;  %3010 = vmatmul.bf16.gmra.mxu3 %v2850_v45 }
 0x341   : > { %v3728_v6 = vadd.f32 %v3727_v38, %v3693_v5  ;;  %v3033_v12 = vadd.f32 %v2968_v46, %v2729_v35  ;;  %v2669_v9 = vpop.f32.mrf.mxu2 }
 0x342   : > { %v2971_v0 = vpop.f32.mrf.mxu3 }
 0x343   : > { %v3289_v32 = vadd.f32 %v3224_v53, %v3033_v12 }
 0x344   : > { %v2457_v39 = vpop.f32.mrf.mxu1 }
 0x345   : > { %v3227_v22 = vpop.f32.mrf.mxu0  ;;  %v4499_v50 = vpack.c.bf16 %v3289_v32, %v3288_v55  ;;  %v3613_v10 = vmul.f32 %v3504_v31, %v3289_v32  ;;  %v2520_v44 = vadd.f32 %v2457_v39, %v5813_v29  ;;  %v3519_v55 = vpop.permute.xlu1 %3518 }
 0x347   : > { %4571 = vst [vmem:[%s4725_s28 + $0x40] sm:$0xff] %v4499_v50   ;;  %v3649_v28 = vadd.f32 %v3648_v34, %v3613_v10  ;;  %v3694_v21 = vmul.f32 %v3613_v10, %v3289_v32  ;;  %v2730_v33 = vadd.f32 %v2667_v49, %v2520_v44  ;;  %2496 = vmatmul.bf16.gmra.mxu1 %v2336_v59 }
 0x348   : > { %3266 = vmatmul.bf16.gmra.mxu0 %v3106_v47 }
 0x349   : > { %v3729_v14 = vadd.f32 %v3728_v6, %v3694_v21  ;;  %v3034_v15 = vadd.f32 %v2971_v0, %v2730_v33  ;;  %v2672_v7 = vpop.f32.mrf.mxu2  ;;  %v3524_v0 = vpop.permute.xlu2 %3523 }
 0x34a   : > { %v2973_v37 = vpop.f32.mrf.mxu3  ;;  %v3529_v21 = vpop.permute.xlu0 %3528 }
 0x34b   : > { %v3290_v56 = vadd.f32 %v3227_v22, %v3034_v15 }
 0x34c   : > { %v2459_v60 = vpop.f32.mrf.mxu1 }
 0x34d   : > { %v3229_v62 = vpop.f32.mrf.mxu0  ;;  %v3614_v29 = vmul.f32 %v3509_v27, %v3290_v56  ;;  %v2521_v19 = vadd.f32 %v2459_v60, %v5819_v36 }
 0x34f   : > { %v3650_v40 = vadd.f32 %v3649_v28, %v3614_v29  ;;  %v3695_v3 = vmul.f32 %v3614_v29, %v3290_v56  ;;  %v2731_v17 = vadd.f32 %v2669_v9, %v2521_v19 }
 0x351   : > { %v3730_v57 = vadd.f32 %v3729_v14, %v3695_v3  ;;  %v3035_v42 = vadd.f32 %v2973_v37, %v2731_v17  ;;  %v2674_v48 = vpop.f32.mrf.mxu2 }
 0x352   : > { %v2976_v18 = vpop.f32.mrf.mxu3 }
 0x353   : > { %v3291_v63 = vadd.f32 %v3229_v62, %v3035_v42 }
 0x354   : > { %v2462_v8 = vpop.f32.mrf.mxu1 }
 0x355   : > { %v3232_v26 = vpop.f32.mrf.mxu0  ;;  %v4504_v2 = vpack.c.bf16 %v3291_v63, %v3290_v56  ;;  %v3615_v61 = vmul.f32 %v3514_v52, %v3291_v63  ;;  %v2522_v11 = vadd.f32 %v2462_v8, %v5827_v51 }
 0x357   : > { %4572 = vst [vmem:[%s4725_s28 + $0x48] sm:$0xff] %v4504_v2   ;;  %v3651_v38 = vadd.f32 %v3650_v40, %v3615_v61  ;;  %v3696_v41 = vmul.f32 %v3615_v61, %v3291_v63  ;;  %v2732_v49 = vadd.f32 %v2672_v7, %v2522_v11  ;;  %v3534_v40 = vpop.permute.xlu1 %3533 }
 0x359   : > { %v3731_v36 = vadd.f32 %v3730_v57, %v3696_v41  ;;  %v3036_v46 = vadd.f32 %v2976_v18, %v2732_v49  ;;  %v2677_v25 = vpop.f32.mrf.mxu2  ;;  %v6279_v18 = vld [vmem:[#allocation19_spill] sm:$0xff] }
 0x35a   : > { %v2978_v13 = vpop.f32.mrf.mxu3 }
 0x35b   : > { %v3292_v20 = vadd.f32 %v3232_v26, %v3036_v46 }
 0x35c   : > { %v2464_v53 = vpop.f32.mrf.mxu1 }
 0x35d   : > { %v3234_v43 = vpop.f32.mrf.mxu0  ;;  %v3616_v16 = vmul.f32 %v3519_v55, %v3292_v20  ;;  %v2523_v45 = vadd.f32 %v2464_v53, %v5832_v30 }
 0x35f   : > { %v3652_v34 = vadd.f32 %v3651_v38, %v3616_v16  ;;  %v3697_v5 = vmul.f32 %v3616_v16, %v3292_v20  ;;  %v2733_v35 = vadd.f32 %v2674_v48, %v2523_v45  ;;  %v3539_v38 = vpop.permute.xlu2 %3538 }
 0x361   : > { %v3732_v51 = vadd.f32 %v3731_v36, %v3697_v5  ;;  %v3037_v6 = vadd.f32 %v2978_v13, %v2733_v35  ;;  %v2679_v12 = vpop.f32.mrf.mxu2  ;;  %v3544_v5 = vpop.permute.xlu0 %3543 }
 0x362   : > { %v2981_v9 = vpop.f32.mrf.mxu3 }
 0x363   : > { %v3293_v4 = vadd.f32 %v3234_v43, %v3037_v6 }
 0x364   : > { %v2467_v31 = vpop.f32.mrf.mxu1 }
 0x365   : > { %v3237_v32 = vpop.f32.mrf.mxu0  ;;  %v4509_v39 = vpack.c.bf16 %v3293_v4, %v3292_v20  ;;  %v3617_v22 = vmul.f32 %v3524_v0, %v3293_v4  ;;  %v2524_v58 = vadd.f32 %v2467_v31, %v5838_v24 }
 0x367   : > { %4573 = vst [vmem:[%s4725_s28 + $0x50] sm:$0xff] %v4509_v39   ;;  %v3653_v50 = vadd.f32 %v3652_v34, %v3617_v22  ;;  %v3698_v10 = vmul.f32 %v3617_v22, %v3293_v4  ;;  %v2734_v44 = vadd.f32 %v2677_v25, %v2524_v58  ;;  %v6280_v25 = vld [vmem:[#allocation17_spill] sm:$0xff] }
 0x369   : > { %v3733_v30 = vadd.f32 %v3732_v51, %v3698_v10  ;;  %v3038_v59 = vadd.f32 %v2981_v9, %v2734_v44  ;;  %v2682_v47 = vpop.f32.mrf.mxu2  ;;  %v3549_v10 = vpop.permute.xlu1 %3548 }
 0x36a   : > { %v2983_v28 = vpop.f32.mrf.mxu3 }
 0x36b   : > { %v3294_v33 = vadd.f32 %v3237_v32, %v3038_v59 }
 0x36c   : > { %v2469_v14 = vpop.f32.mrf.mxu1 }
 0x36d   : > { %v3239_v15 = vpop.f32.mrf.mxu0  ;;  %v3618_v7 = vmul.f32 %v3529_v21, %v3294_v33  ;;  %v2525_v37 = vadd.f32 %v2469_v14, %v5843_v54 }
 0x36f   : > { %v3654_v27 = vadd.f32 %v3653_v50, %v3618_v7  ;;  %v3699_v56 = vmul.f32 %v3618_v7, %v3294_v33  ;;  %v2735_v60 = vadd.f32 %v2679_v12, %v2525_v37 }
 0x371   : > { %v3734_v24 = vadd.f32 %v3733_v30, %v3699_v56  ;;  %v3039_v62 = vadd.f32 %v2983_v28, %v2735_v60  ;;  %v2684_v29 = vpop.f32.mrf.mxu2  ;;  %v6281_v28 = vld [vmem:[#allocation26_spill] sm:$0xff]  ;;  %v3554_v56 = vpop.permute.xlu2 %3553 }
 0x372   : > { %v2986_v19 = vpop.f32.mrf.mxu3 }
 0x373   : > { %v3295_v3 = vadd.f32 %v3239_v15, %v3039_v62 }
 0x374   : > { %v2472_v17 = vpop.f32.mrf.mxu1 }
 0x375   : > { %v3242_v57 = vpop.f32.mrf.mxu0  ;;  %v4514_v42 = vpack.c.bf16 %v3295_v3, %v3294_v33  ;;  %v3619_v48 = vmul.f32 %v3534_v40, %v3295_v3  ;;  %v2526_v52 = vadd.f32 %v2472_v17, %v6279_v18 }
 0x377   : > { %4574 = vst [vmem:[%s4725_s28 + $0x58] sm:$0xff] %v4514_v42   ;;  %v3655_v63 = vadd.f32 %v3654_v27, %v3619_v48  ;;  %v3700_v8 = vmul.f32 %v3619_v48, %v3295_v3  ;;  %v2736_v26 = vadd.f32 %v2682_v47, %v2526_v52  ;;  %v3559_v52 = vpop.permute.xlu0 %3558 }
 0x379   : > { %v3735_v54 = vadd.f32 %v3734_v24, %v3700_v8  ;;  %v3040_v2 = vadd.f32 %v2986_v19, %v2736_v26  ;;  %v2687_v61 = vpop.f32.mrf.mxu2 }
 0x37a   : > { %v2988_v11 = vpop.f32.mrf.mxu3 }
 0x37b   : > { %v3296_v41 = vadd.f32 %v3242_v57, %v3040_v2 }
 0x37c   : > { %v2474_v49 = vpop.f32.mrf.mxu1 }
 0x37d   : > { %v3244_v36 = vpop.f32.mrf.mxu0  ;;  %v3620_v46 = vmul.f32 %v3539_v38, %v3296_v41  ;;  %v2527_v13 = vadd.f32 %v2474_v49, %v6280_v25  ;;  %v3564_v25 = vpop.permute.xlu1 %3563 }
 0x37f   : > { %v3656_v55 = vadd.f32 %v3655_v63, %v3620_v46  ;;  %v3701_v20 = vmul.f32 %v3620_v46, %v3296_v41  ;;  %v2737_v53 = vadd.f32 %v2684_v29, %v2527_v13 }
 0x381   : > { %v3736_v43 = vadd.f32 %v3735_v54, %v3701_v20  ;;  %v3041_v16 = vadd.f32 %v2988_v11, %v2737_v53  ;;  %v2689_v45 = vpop.f32.mrf.mxu2 }
 0x382   : > { %v2991_v34 = vpop.f32.mrf.mxu3 }
 0x383   : > { %v3297_v35 = vadd.f32 %v3244_v36, %v3041_v16  ;;  %v6283_v16 = vld [vmem:[#allocation20_spill] sm:$0xff] }
 0x384   : > { %v2477_v51 = vpop.f32.mrf.mxu1 }
 0x385   : > { %v3247_v6 = vpop.f32.mrf.mxu0  ;;  %v4519_v12 = vpack.c.bf16 %v3297_v35, %v3296_v41  ;;  %v3621_v9 = vmul.f32 %v3544_v5, %v3297_v35  ;;  %v2528_v0 = vadd.f32 %v2477_v51, %v5860_v23 }
 0x387   : > { %4575 = vst [vmem:[%s4725_s28 + $0x60] sm:$0xff] %v4519_v12   ;;  %v3657_v4 = vadd.f32 %v3656_v55, %v3621_v9  ;;  %v3702_v31 = vmul.f32 %v3621_v9, %v3297_v35  ;;  %v2738_v32 = vadd.f32 %v2687_v61, %v2528_v0  ;;  %v6282_v61 = vld [vmem:[#allocation27_spill] sm:$0xff]  ;;  %v3569_v0 = vpop.permute.xlu2 %3568 }
 0x389   : > { %v3737_v39 = vadd.f32 %v3736_v43, %v3702_v31  ;;  %v3042_v22 = vadd.f32 %v2991_v34, %v2738_v32  ;;  %v2692_v58 = vpop.f32.mrf.mxu2 }
 0x38a   : > { %v2993_v50 = vpop.f32.mrf.mxu3 }
 0x38b   : > { %v3298_v44 = vadd.f32 %v3247_v6, %v3042_v22  ;;  %v6284_v22 = vld [vmem:[#allocation3_spill] sm:$0xff] }
 0x38c   : > { %v2479_v30 = vpop.f32.mrf.mxu1 }
 0x38d   : > { %v3249_v59 = vpop.f32.mrf.mxu0  ;;  %v3622_v47 = vmul.f32 %v3549_v10, %v3298_v44  ;;  %v2529_v21 = vadd.f32 %v2479_v30, %v6281_v28 }
 0x38f   : > { %v3658_v33 = vadd.f32 %v3657_v4, %v3622_v47  ;;  %v3703_v14 = vmul.f32 %v3622_v47, %v3298_v44  ;;  %v2739_v15 = vadd.f32 %v2689_v45, %v2529_v21  ;;  %v3574_v21 = vpop.permute.xlu0 %3573 }
 0x391   : > { %v3738_v23 = vadd.f32 %v3737_v39, %v3703_v14  ;;  %v3043_v7 = vadd.f32 %v2993_v50, %v2739_v15  ;;  %v2694_v37 = vpop.f32.mrf.mxu2 }
 0x392   : > { %v2996_v27 = vpop.f32.mrf.mxu3 }
 0x393   : > { %v3299_v60 = vadd.f32 %v3249_v59, %v3043_v7 }
 0x394   : > { %v2482_v24 = vpop.f32.mrf.mxu1 }
 0x395   : > { %v3252_v62 = vpop.f32.mrf.mxu0  ;;  %v4524_v29 = vpack.c.bf16 %v3299_v60, %v3298_v44  ;;  %v3623_v19 = vmul.f32 %v3554_v56, %v3299_v60  ;;  %v2530_v40 = vadd.f32 %v2482_v24, %v5871_v1 }
 0x397   : > { %4576 = vst [vmem:[%s4725_s28 + $0x68] sm:$0xff] %v4524_v29   ;;  %v3659_v3 = vadd.f32 %v3658_v33, %v3623_v19  ;;  %v3704_v17 = vmul.f32 %v3623_v19, %v3299_v60  ;;  %v2740_v57 = vadd.f32 %v2692_v58, %v2530_v40  ;;  %v3579_v40 = vpop.permute.xlu1 %3578 }
 0x399   : > { %v3739_v42 = vadd.f32 %v3738_v23, %v3704_v17  ;;  %v3044_v48 = vadd.f32 %v2996_v27, %v2740_v57  ;;  %v2697_v8 = vpop.f32.mrf.mxu2 }
 0x39a   : > { %v2998_v18 = vpop.f32.mrf.mxu3 }
 0x39b   : > { %v3300_v63 = vadd.f32 %v3252_v62, %v3044_v48  ;;  %v6286_v48 = vld [vmem:[#allocation30_spill] sm:$0xff] }
 0x39c   : > { %v2484_v26 = vpop.f32.mrf.mxu1 }
 0x39d   : > { %v3254_v54 = vpop.f32.mrf.mxu0  ;;  %v3624_v2 = vmul.f32 %v3559_v52, %v3300_v63  ;;  %v2531_v11 = vadd.f32 %v2484_v26, %v6282_v61  ;;  %v3584_v61 = vpop.permute.xlu2 %3583 }
 0x39f   : > { %v3660_v38 = vadd.f32 %v3659_v3, %v3624_v2  ;;  %v3705_v41 = vmul.f32 %v3624_v2, %v3300_v63  ;;  %v2741_v49 = vadd.f32 %v2694_v37, %v2531_v11  ;;  %v6285_v37 = vld [vmem:[#allocation28_spill] sm:$0xff] }
 0x3a1   : > { %v3740_v1 = vadd.f32 %v3739_v42, %v3705_v41  ;;  %v3045_v36 = vadd.f32 %v2998_v18, %v2741_v49  ;;  %v2699_v34 = vpop.f32.mrf.mxu2 }
 0x3a2   : > { %v3001_v46 = vpop.f32.mrf.mxu3 }
 0x3a3   : > { %v3301_v13 = vadd.f32 %v3254_v54, %v3045_v36  ;;  %v6287_v36 = vld [vmem:[#allocation15_spill] sm:$0xff] }
 0x3a4   : > { %v2487_v55 = vpop.f32.mrf.mxu1 }
 0x3a5   : > { %v3257_v20 = vpop.f32.mrf.mxu0  ;;  %v4529_v53 = vpack.c.bf16 %v3301_v13, %v3300_v63  ;;  %v3625_v43 = vmul.f32 %v3564_v25, %v3301_v13  ;;  %v2532_v45 = vadd.f32 %v2487_v55, %v6283_v16 }
 0x3a7   : > { %4577 = vst [vmem:[%s4725_s28 + $0x70] sm:$0xff] %v4529_v53   ;;  %v3661_v5 = vadd.f32 %v3660_v38, %v3625_v43  ;;  %v3706_v35 = vmul.f32 %v3625_v43, %v3301_v13  ;;  %v2742_v51 = vadd.f32 %v2697_v8, %v2532_v45 }
 0x3a9   : > { %v3741_v6 = vadd.f32 %v3740_v1, %v3706_v35  ;;  %v3046_v12 = vadd.f32 %v3001_v46, %v2742_v51  ;;  %v2702_v30 = vpop.f32.mrf.mxu2  ;;  %v6288_v51 = vld [vmem:[#allocation7_spill] sm:$0xff] }
 0x3aa   : > { %v3003_v9 = vpop.f32.mrf.mxu3 }
 0x3ab   : > { %v3302_v4 = vadd.f32 %v3257_v20, %v3046_v12 }
 0x3ac   : > { %v2489_v31 = vpop.f32.mrf.mxu1 }
 0x3ad   : > { %v3259_v32 = vpop.f32.mrf.mxu0  ;;  %v3626_v39 = vmul.f32 %v3569_v0, %v3302_v4  ;;  %v2533_v58 = vadd.f32 %v2489_v31, %v6284_v22 }
 0x3af   : > { %v3662_v50 = vadd.f32 %v3661_v5, %v3626_v39  ;;  %v3707_v10 = vmul.f32 %v3626_v39, %v3302_v4  ;;  %v2743_v44 = vadd.f32 %v2699_v34, %v2533_v58  ;;  %v3589_v34 = vpop.permute.xlu0 %3588 }
 0x3b1   : > { %v3742_v59 = vadd.f32 %v3741_v6, %v3707_v10  ;;  %v3047_v47 = vadd.f32 %v3003_v9, %v2743_v44  ;;  %v2704_v19 = vpop.f32.mrf.mxu2 }
 0x3b2   : > { %v3006_v28 = vpop.f32.mrf.mxu3 }
 0x3b3   : > { %v3303_v33 = vadd.f32 %v3259_v32, %v3047_v47 }
 0x3b4   : > { %v2492_v14 = vpop.f32.mrf.mxu1 }
 0x3b5   : > { %v3262_v15 = vpop.f32.mrf.mxu0  ;;  %v4534_v23 = vpack.c.bf16 %v3303_v33, %v3302_v4  ;;  %v3627_v7 = vmul.f32 %v3574_v21, %v3303_v33  ;;  %v2534_v27 = vadd.f32 %v2492_v14, %v6285_v37 }
 0x3b7   : > { %4578 = vst [vmem:[%s4725_s28 + $0x78] sm:$0xff] %v4534_v23   ;;  %v3663_v56 = vadd.f32 %v3662_v50, %v3627_v7  ;;  %v3708_v60 = vmul.f32 %v3627_v7, %v3303_v33  ;;  %v2744_v24 = vadd.f32 %v2702_v30, %v2534_v27  ;;  %v3594_v50 = vpop.permute.xlu1 %3593 }
 0x3b9   : > { %v3743_v62 = vadd.f32 %v3742_v59, %v3708_v60  ;;  %v3048_v29 = vadd.f32 %v3006_v28, %v2744_v24  ;;  %v2707_v38 = vpop.f32.mrf.mxu2 }
 0x3ba   : > { %v3008_v17 = vpop.f32.mrf.mxu3 }
 0x3bb   : > { %v3304_v3 = vadd.f32 %v3262_v15, %v3048_v29 }
 0x3bc   : > { %v2494_v57 = vpop.f32.mrf.mxu1 }
 0x3bd   : > { %v3628_v42 = vmul.f32 %v3579_v40, %v3304_v3  ;;  %v2535_v18 = vadd.f32 %v2494_v57, %v6286_v48  ;;  %v3264_v52 = vpop.f32.mrf.mxu0 }
 0x3bf   : > { %v3664_v63 = vadd.f32 %v3663_v56, %v3628_v42  ;;  %v3709_v8 = vmul.f32 %v3628_v42, %v3304_v3  ;;  %v2745_v26 = vadd.f32 %v2704_v19, %v2535_v18  ;;  %v3632_v56 = vld [vmem:[%s6109_s9] sm:$0x1] }
 0x3c1   : > { %v3744_v54 = vadd.f32 %v3743_v62, %v3709_v8  ;;  %v3049_v2 = vadd.f32 %v3008_v17, %v2745_v26  ;;  %v2709_v12 = vpop.f32.mrf.mxu2  ;;  %v3676_v62 = vld [vmem:[%s6110_s10] sm:$0x1] }
 0x3c2   : > { %v3011_v25 = vpop.f32.mrf.mxu3 }
 0x3c3   : > { %v3305_v11 = vadd.f32 %v3264_v52, %v3049_v2 }
 0x3c4   : > { %v2497_v41 = vpop.f32.mrf.mxu1 }
 0x3c5   : > { %v4539_v49 = vpack.c.bf16 %v3305_v11, %v3304_v3  ;;  %v3629_v1 = vmul.f32 %v3584_v61, %v3305_v11  ;;  %v2536_v46 = vadd.f32 %v2497_v41, %v6287_v36  ;;  %v3267_v53 = vpop.f32.mrf.mxu0 }
 0x3c7   : > { %4579 = vst [vmem:[%s4725_s28 + $0x80] sm:$0xff] %v4539_v49   ;;  %v3665_v13 = vadd.f32 %v3664_v63, %v3629_v1  ;;  %v3710_v55 = vmul.f32 %v3629_v1, %v3305_v11  ;;  %v2746_v20 = vadd.f32 %v2707_v38, %v2536_v46 }
 0x3c9   : > { %v3745_v43 = vadd.f32 %v3744_v54, %v3710_v55  ;;  %v3050_v16 = vadd.f32 %v3011_v25, %v2746_v20 }
 0x3ca   : > { %v3013_v31 = vpop.f32.mrf.mxu3 }
 0x3cb   : > { %v3306_v45 = vadd.f32 %v3267_v53, %v3050_v16 }
 0x3cc   : > { %v2499_v5 = vpop.f32.mrf.mxu1 }
 0x3cd   : > { %v3630_v35 = vmul.f32 %v3589_v34, %v3306_v45  ;;  %v2537_v6 = vadd.f32 %v2499_v5, %v6288_v51  ;;  %v3269_v22 = vpop.f32.mrf.mxu0 }
 0x3cf   : > { %v3666_v9 = vadd.f32 %v3665_v13, %v3630_v35  ;;  %v3711_v0 = vmul.f32 %v3630_v35, %v3306_v45  ;;  %v2747_v4 = vadd.f32 %v2709_v12, %v2537_v6 }
 0x3d1   : > { %v3746_v32 = vadd.f32 %v3745_v43, %v3711_v0  ;;  %v3051_v39 = vadd.f32 %v3013_v31, %v2747_v4 }
 0x3d3   : > { %v3307_v58 = vadd.f32 %v3269_v22, %v3051_v39 }
 0x3d5   : > { %v4544_v10 = vpack.c.bf16 %v3307_v58, %v3306_v45  ;;  %v3631_v44 = vmul.f32 %v3594_v50, %v3307_v58 }
 0x3d7   : > { %4580 = vst [vmem:[%s4725_s28 + $0x88] sm:$0xff] %v4544_v10   ;;  %v3667_v30 = vadd.f32 %v3666_v9, %v3631_v44  ;;  %v3712_v59 = vmul.f32 %v3631_v44, %v3307_v58 }
 0x3d9   : > { %v3668_v47 = vrot.slane %v3667_v30, 4  ;;  %v3747_v28 = vadd.f32 %v3746_v32, %v3712_v59 }
 0x3db   : > { %v3669_v21 = vadd.f32 %v3668_v47, %v3667_v30  ;;  %v3748_v33 = vrot.slane %v3747_v28, 4 }
 0x3dd   : > { %v3670_v14 = vrot.slane %v3669_v21, 2  ;;  %v3749_v15 = vadd.f32 %v3748_v33, %v3747_v28 }
 0x3df   : > { %v3671_v23 = vadd.f32 %v3670_v14, %v3669_v21  ;;  %v3750_v7 = vrot.slane %v3749_v15, 2 }
 0x3e1   : > { %v3672_v37 = vrot.slane %v3671_v23, 1  ;;  %v3751_v27 = vadd.f32 %v3750_v7, %v3749_v15 }
 0x3e3   : > { %v3673_v60 = vadd.f32 %v3672_v37, %v3671_v23  ;;  %v3752_v24 = vrot.slane %v3751_v27, 1 }
 0x3e5   : > { %v3674_v29 = vadd.f32 %v3673_v60, %v3632_v56  ;;  %v3753_v19 = vadd.f32 %v3752_v24, %v3751_v27 }
 0x3e7   : > { %3675 = vst [vmem:[%s6109_s9] sm:$0x1] %v3674_v29  ;;  %v3754_v40 = vadd.f32 %v3753_v19, %v3676_v62 }
 0x3e9   : > { %3755 = vst [vmem:[%s6110_s10] sm:$0x1] %v3754_v40 }
 0x3ea PF: > { %s21_s13 = sadd.s32 1, %s4630_s13  }
 0x3eb   : > { %p18_p7 = scmp.ge.s32.totalorder %s21_s13, 5  }
 0x3ed   :  { %20 = sbr.rel (!%p18_p7) target bundleno = 2 (0x2), region = 122 }

// kernel: standard_block_forward.5
= control target key start
LH: loop header
LB: loop body
LE: loop exit
PB: predicated region body
PF: predicated region fallthrough
CT: control target
= control target key end

     0   :  { %s590_s12 = smov 0   ;;  %s751_s0 = inlined_call_operand.vmem [shape: bf16[864,128], index: 0, kind: input, shape index: {}]   ;;  %s752_s1 = inlined_call_operand.vmem [shape: f32[1,128], index: 1, kind: input, shape index: {}]   ;;  %s753_s2 = inlined_call_operand.vmem [shape: f32[1,128], index: 2, kind: input, shape index: {}]   ;;  %s754_s3 = inlined_call_operand.vmem [shape: f32[864,128], index: 3, kind: output, shape index: {}]  }
   0x1 LB: > { %s454_s13 = sadd.s32 4294967295, %s568_s12   ;;  %p458_p0 = scmp.ge.s32.totalorder %s568_s12, 1  ;;  %s568_s12 = sphi %s590_s12, %s13_s12  }
   0x2   : > { %p138_p1 = scmp.lt.s32.totalorder %s568_s12, 4 }
   0x4   : > { %p139_p2 = pnand %p458_p0, %p138_p1 }
   0x5   : > { %s162_s14 = smul.u32 (!%p139_p2), 36, %s454_s13 }
   0x6   : > { %142 = sbr.rel (%p139_p2) target bundleno = 59 (0x3b), region = 32 }
   0x7   : > { %p163_p3 = scmp.lt.s32.totalorder (!%p139_p2), %s162_s14, 107 }
   0xb   : > { %s756_s14 = smov (!%p163_p3, %s162_s14), 107  ;;  %v609_v0 = vld [vmem:[%s752_s1] ss:$0 sm:$0xff] }
   0xc   : > { %s459_s15 = sshll.u32 %s756_s14, 2  ;;  %v617_v5 = vld [vmem:[%s753_s2] ss:$0 sm:$0xff]  ;;  %s460_s23 = sshll.u32 %s756_s14, 3 }
   0xd   : > { %s604_s18 = scalar_lea.vmem %s751_s0, %s459_s15  ;;  %s636_s26 = scalar_lea.vmem %s754_s3, %s460_s23 }
   0xe   : > { %v464_v1 = vld [vmem:[%s604_s18] sm:$0xff]   ;;  %v535_v2 = vld [vmem:[%s604_s18 + $0x8] sm:$0xff]   ;;  %v536_v3 = vld [vmem:[%s604_s18 + $0x10] sm:$0xff]  }
   0xf   : > { %v465_v4 = vunpack.c.l.bf16 %v464_v1  ;;  %v466_v6 = vunpack.c.h.bf16 %v464_v1  ;;  %v469_v7 = vunpack.c.l.bf16 %v535_v2  ;;  %v470_v8 = vunpack.c.h.bf16 %v535_v2  ;;  %v537_v9 = vld [vmem:[%s604_s18 + $0x18] sm:$0xff]   ;;  %v538_v30 = vld [vmem:[%s604_s18 + $0x20] sm:$0xff]   ;;  %v539_v31 = vld [vmem:[%s604_s18 + $0x28] sm:$0xff]  }
  0x10   : > { %v473_v10 = vunpack.c.l.bf16 %v536_v3  ;;  %v474_v11 = vunpack.c.h.bf16 %v536_v3  ;;  %v477_v12 = vunpack.c.l.bf16 %v537_v9  ;;  %v478_v13 = vunpack.c.h.bf16 %v537_v9  ;;  %v540_v36 = vld [vmem:[%s604_s18 + $0x30] sm:$0xff]   ;;  %v541_v37 = vld [vmem:[%s604_s18 + $0x38] sm:$0xff]   ;;  %v542_v3 = vld [vmem:[%s604_s18 + $0x40] sm:$0xff]  }
  0x11   : > { %v250_v14 = vmul.f32 %v609_v0, %v465_v4  ;;  %v251_v15 = vmul.f32 %v609_v0, %v466_v6  ;;  %v252_v16 = vmul.f32 %v609_v0, %v469_v7  ;;  %v253_v17 = vmul.f32 %v609_v0, %v470_v8  ;;  %v543_v4 = vld [vmem:[%s604_s18 + $0x48] sm:$0xff]   ;;  %v544_v6 = vld [vmem:[%s604_s18 + $0x50] sm:$0xff]  }
  0x12   : > { %v254_v18 = vmul.f32 %v609_v0, %v473_v10  ;;  %v255_v19 = vmul.f32 %v609_v0, %v474_v11  ;;  %v256_v20 = vmul.f32 %v609_v0, %v477_v12  ;;  %v257_v21 = vmul.f32 %v609_v0, %v478_v13  ;;  %v545_v11 = vld [vmem:[%s604_s18 + $0x58] sm:$0xff]  }
  0x13   : > { %v290_v22 = vadd.f32 %v617_v5, %v250_v14  ;;  %v291_v23 = vadd.f32 %v617_v5, %v251_v15  ;;  %v292_v24 = vadd.f32 %v617_v5, %v252_v16  ;;  %v293_v25 = vadd.f32 %v617_v5, %v253_v17 }
  0x14   : > { %v294_v26 = vadd.f32 %v617_v5, %v254_v18  ;;  %v295_v27 = vadd.f32 %v617_v5, %v255_v19  ;;  %v296_v28 = vadd.f32 %v617_v5, %v256_v20  ;;  %v297_v29 = vadd.f32 %v617_v5, %v257_v21 }
  0x15   : > { %v326_v32 = vmax.f32 %v290_v22, 0.0  ;;  %v327_v33 = vmax.f32 %v291_v23, 0.0  ;;  %v328_v34 = vmax.f32 %v292_v24, 0.0  ;;  %v329_v35 = vmax.f32 %v293_v25, 0.0 }
  0x16   : > { %v330_v38 = vmax.f32 %v294_v26, 0.0  ;;  %v331_v39 = vmax.f32 %v295_v27, 0.0  ;;  %v332_v40 = vmax.f32 %v296_v28, 0.0  ;;  %v333_v41 = vmax.f32 %v297_v29, 0.0 }
  0x17   : > { %362 = vst [vmem:[%s636_s26] sm:$0xff] %v326_v32  ;;  %v481_v42 = vunpack.c.l.bf16 %v538_v30  ;;  %v482_v43 = vunpack.c.h.bf16 %v538_v30  ;;  %v485_v44 = vunpack.c.l.bf16 %v539_v31  ;;  %v486_v45 = vunpack.c.h.bf16 %v539_v31 }
  0x18   : > { %363 = vst [vmem:[%s636_s26 + $0x8] sm:$0xff] %v327_v33  ;;  %v489_v46 = vunpack.c.l.bf16 %v540_v36  ;;  %v490_v47 = vunpack.c.h.bf16 %v540_v36  ;;  %v493_v48 = vunpack.c.l.bf16 %v541_v37  ;;  %v494_v49 = vunpack.c.h.bf16 %v541_v37 }
  0x19   : > { %364 = vst [vmem:[%s636_s26 + $0x10] sm:$0xff] %v328_v34  ;;  %v258_v50 = vmul.f32 %v609_v0, %v481_v42  ;;  %v259_v51 = vmul.f32 %v609_v0, %v482_v43  ;;  %v260_v52 = vmul.f32 %v609_v0, %v485_v44  ;;  %v261_v53 = vmul.f32 %v609_v0, %v486_v45  ;;  %v548_v42 = vld [vmem:[%s604_s18 + $0x70] sm:$0xff]  }
  0x1a   : > { %365 = vst [vmem:[%s636_s26 + $0x18] sm:$0xff] %v329_v35  ;;  %v262_v54 = vmul.f32 %v609_v0, %v489_v46  ;;  %v263_v55 = vmul.f32 %v609_v0, %v490_v47  ;;  %v264_v56 = vmul.f32 %v609_v0, %v493_v48  ;;  %v265_v57 = vmul.f32 %v609_v0, %v494_v49  ;;  %v549_v47 = vld [vmem:[%s604_s18 + $0x78] sm:$0xff]  }
  0x1b   : > { %366 = vst [vmem:[%s636_s26 + $0x20] sm:$0xff] %v330_v38  ;;  %v298_v58 = vadd.f32 %v617_v5, %v258_v50  ;;  %v299_v59 = vadd.f32 %v617_v5, %v259_v51  ;;  %v300_v60 = vadd.f32 %v617_v5, %v260_v52  ;;  %v301_v61 = vadd.f32 %v617_v5, %v261_v53 }
  0x1c   : > { %367 = vst [vmem:[%s636_s26 + $0x28] sm:$0xff] %v331_v39  ;;  %v302_v62 = vadd.f32 %v617_v5, %v262_v54  ;;  %v303_v63 = vadd.f32 %v617_v5, %v263_v55  ;;  %v304_v1 = vadd.f32 %v617_v5, %v264_v56  ;;  %v305_v2 = vadd.f32 %v617_v5, %v265_v57 }
  0x1d   : > { %368 = vst [vmem:[%s636_s26 + $0x30] sm:$0xff] %v332_v40  ;;  %v334_v7 = vmax.f32 %v298_v58, 0.0  ;;  %v335_v8 = vmax.f32 %v299_v59, 0.0  ;;  %v336_v9 = vmax.f32 %v300_v60, 0.0  ;;  %v337_v10 = vmax.f32 %v301_v61, 0.0  ;;  %v546_v40 = vld [vmem:[%s604_s18 + $0x60] sm:$0xff]  }
  0x1e   : > { %369 = vst [vmem:[%s636_s26 + $0x38] sm:$0xff] %v333_v41  ;;  %v338_v12 = vmax.f32 %v302_v62, 0.0  ;;  %v339_v13 = vmax.f32 %v303_v63, 0.0  ;;  %v340_v14 = vmax.f32 %v304_v1, 0.0  ;;  %v341_v15 = vmax.f32 %v305_v2, 0.0  ;;  %v547_v41 = vld [vmem:[%s604_s18 + $0x68] sm:$0xff]  }
  0x1f   : > { %370 = vst [vmem:[%s636_s26 + $0x40] sm:$0xff] %v334_v7  ;;  %v497_v16 = vunpack.c.l.bf16 %v542_v3  ;;  %v498_v17 = vunpack.c.h.bf16 %v542_v3  ;;  %v501_v18 = vunpack.c.l.bf16 %v543_v4  ;;  %v502_v19 = vunpack.c.h.bf16 %v543_v4 }
  0x20   : > { %371 = vst [vmem:[%s636_s26 + $0x48] sm:$0xff] %v335_v8  ;;  %v505_v20 = vunpack.c.l.bf16 %v544_v6  ;;  %v506_v21 = vunpack.c.h.bf16 %v544_v6  ;;  %v509_v22 = vunpack.c.l.bf16 %v545_v11  ;;  %v510_v23 = vunpack.c.h.bf16 %v545_v11 }
  0x21   : > { %372 = vst [vmem:[%s636_s26 + $0x50] sm:$0xff] %v336_v9  ;;  %v266_v24 = vmul.f32 %v609_v0, %v497_v16  ;;  %v267_v25 = vmul.f32 %v609_v0, %v498_v17  ;;  %v268_v26 = vmul.f32 %v609_v0, %v501_v18  ;;  %v269_v27 = vmul.f32 %v609_v0, %v502_v19 }
  0x22   : > { %373 = vst [vmem:[%s636_s26 + $0x58] sm:$0xff] %v337_v10  ;;  %v270_v28 = vmul.f32 %v609_v0, %v505_v20  ;;  %v271_v29 = vmul.f32 %v609_v0, %v506_v21  ;;  %v272_v30 = vmul.f32 %v609_v0, %v509_v22  ;;  %v273_v31 = vmul.f32 %v609_v0, %v510_v23 }
  0x23   : > { %374 = vst [vmem:[%s636_s26 + $0x60] sm:$0xff] %v338_v12  ;;  %v306_v32 = vadd.f32 %v617_v5, %v266_v24  ;;  %v307_v33 = vadd.f32 %v617_v5, %v267_v25  ;;  %v308_v34 = vadd.f32 %v617_v5, %v268_v26  ;;  %v309_v35 = vadd.f32 %v617_v5, %v269_v27 }
  0x24   : > { %375 = vst [vmem:[%s636_s26 + $0x68] sm:$0xff] %v339_v13  ;;  %v310_v36 = vadd.f32 %v617_v5, %v270_v28  ;;  %v311_v37 = vadd.f32 %v617_v5, %v271_v29  ;;  %v312_v38 = vadd.f32 %v617_v5, %v272_v30  ;;  %v313_v39 = vadd.f32 %v617_v5, %v273_v31  ;;  %v550_v13 = vld [vmem:[%s604_s18 + $0x80] sm:$0xff]  }
  0x25   : > { %376 = vst [vmem:[%s636_s26 + $0x70] sm:$0xff] %v340_v14  ;;  %v342_v43 = vmax.f32 %v306_v32, 0.0  ;;  %v343_v44 = vmax.f32 %v307_v33, 0.0  ;;  %v344_v45 = vmax.f32 %v308_v34, 0.0  ;;  %v345_v46 = vmax.f32 %v309_v35, 0.0  ;;  %v551_v14 = vld [vmem:[%s604_s18 + $0x88] sm:$0xff]  }
  0x26   : > { %377 = vst [vmem:[%s636_s26 + $0x78] sm:$0xff] %v341_v15  ;;  %v346_v48 = vmax.f32 %v310_v36, 0.0  ;;  %v347_v49 = vmax.f32 %v311_v37, 0.0  ;;  %v348_v50 = vmax.f32 %v312_v38, 0.0  ;;  %v349_v51 = vmax.f32 %v313_v39, 0.0 }
  0x27   : > { %378 = vst [vmem:[%s636_s26 + $0x80] sm:$0xff] %v342_v43  ;;  %v513_v52 = vunpack.c.l.bf16 %v546_v40  ;;  %v514_v53 = vunpack.c.h.bf16 %v546_v40  ;;  %v517_v54 = vunpack.c.l.bf16 %v547_v41  ;;  %v518_v55 = vunpack.c.h.bf16 %v547_v41 }
  0x28   : > { %379 = vst [vmem:[%s636_s26 + $0x88] sm:$0xff] %v343_v44  ;;  %v521_v56 = vunpack.c.l.bf16 %v548_v42  ;;  %v522_v57 = vunpack.c.h.bf16 %v548_v42  ;;  %v525_v58 = vunpack.c.l.bf16 %v549_v47  ;;  %v526_v59 = vunpack.c.h.bf16 %v549_v47 }
  0x29   : > { %380 = vst [vmem:[%s636_s26 + $0x90] sm:$0xff] %v344_v45  ;;  %v274_v60 = vmul.f32 %v609_v0, %v513_v52  ;;  %v275_v61 = vmul.f32 %v609_v0, %v514_v53  ;;  %v276_v62 = vmul.f32 %v609_v0, %v517_v54  ;;  %v277_v63 = vmul.f32 %v609_v0, %v518_v55 }
  0x2a   : > { %381 = vst [vmem:[%s636_s26 + $0x98] sm:$0xff] %v345_v46  ;;  %v278_v1 = vmul.f32 %v609_v0, %v521_v56  ;;  %v279_v2 = vmul.f32 %v609_v0, %v522_v57  ;;  %v280_v3 = vmul.f32 %v609_v0, %v525_v58  ;;  %v281_v4 = vmul.f32 %v609_v0, %v526_v59 }
  0x2b   : > { %382 = vst [vmem:[%s636_s26 + $0xa0] sm:$0xff] %v346_v48  ;;  %v314_v6 = vadd.f32 %v617_v5, %v274_v60  ;;  %v315_v7 = vadd.f32 %v617_v5, %v275_v61  ;;  %v316_v8 = vadd.f32 %v617_v5, %v276_v62  ;;  %v317_v9 = vadd.f32 %v617_v5, %v277_v63 }
  0x2c   : > { %383 = vst [vmem:[%s636_s26 + $0xa8] sm:$0xff] %v347_v49  ;;  %v318_v10 = vadd.f32 %v617_v5, %v278_v1  ;;  %v319_v11 = vadd.f32 %v617_v5, %v279_v2  ;;  %v320_v12 = vadd.f32 %v617_v5, %v280_v3  ;;  %v321_v20 = vadd.f32 %v617_v5, %v281_v4 }
  0x2d   : > { %384 = vst [vmem:[%s636_s26 + $0xb0] sm:$0xff] %v348_v50  ;;  %v350_v15 = vmax.f32 %v314_v6, 0.0  ;;  %v351_v16 = vmax.f32 %v315_v7, 0.0  ;;  %v352_v17 = vmax.f32 %v316_v8, 0.0  ;;  %v353_v18 = vmax.f32 %v317_v9, 0.0 }
  0x2e   : > { %385 = vst [vmem:[%s636_s26 + $0xb8] sm:$0xff] %v349_v51  ;;  %v354_v19 = vmax.f32 %v318_v10, 0.0  ;;  %v529_v21 = vunpack.c.l.bf16 %v550_v13  ;;  %v530_v22 = vunpack.c.h.bf16 %v550_v13  ;;  %v533_v23 = vunpack.c.l.bf16 %v551_v14 }
  0x2f   : > { %386 = vst [vmem:[%s636_s26 + $0xc0] sm:$0xff] %v350_v15  ;;  %v534_v24 = vunpack.c.h.bf16 %v551_v14  ;;  %v355_v25 = vmax.f32 %v319_v11, 0.0  ;;  %v356_v26 = vmax.f32 %v320_v12, 0.0  ;;  %v357_v31 = vmax.f32 %v321_v20, 0.0 }
  0x30   : > { %387 = vst [vmem:[%s636_s26 + $0xc8] sm:$0xff] %v351_v16  ;;  %v282_v27 = vmul.f32 %v609_v0, %v529_v21  ;;  %v283_v28 = vmul.f32 %v609_v0, %v530_v22  ;;  %v284_v29 = vmul.f32 %v609_v0, %v533_v23 }
  0x31   : > { %388 = vst [vmem:[%s636_s26 + $0xd0] sm:$0xff] %v352_v17  ;;  %v285_v30 = vmul.f32 %v609_v0, %v534_v24 }
  0x32   : > { %389 = vst [vmem:[%s636_s26 + $0xd8] sm:$0xff] %v353_v18  ;;  %v322_v32 = vadd.f32 %v617_v5, %v282_v27  ;;  %v323_v33 = vadd.f32 %v617_v5, %v283_v28  ;;  %v324_v34 = vadd.f32 %v617_v5, %v284_v29 }
  0x33   : > { %390 = vst [vmem:[%s636_s26 + $0xe0] sm:$0xff] %v354_v19  ;;  %v325_v35 = vadd.f32 %v617_v5, %v285_v30 }
  0x34   : > { %391 = vst [vmem:[%s636_s26 + $0xe8] sm:$0xff] %v355_v25  ;;  %v358_v36 = vmax.f32 %v322_v32, 0.0  ;;  %v359_v37 = vmax.f32 %v323_v33, 0.0  ;;  %v360_v38 = vmax.f32 %v324_v34, 0.0 }
  0x35   : > { %392 = vst [vmem:[%s636_s26 + $0xf0] sm:$0xff] %v356_v26  ;;  %v361_v0 = vmax.f32 %v325_v35, 0.0 }
  0x36   : > { %393 = vst [vmem:[%s636_s26 + $0xf8] sm:$0xff] %v357_v31 }
  0x37   : > { %394 = vst [vmem:[%s636_s26 + $0x100] sm:$0xff] %v358_v36 }
  0x38   : > { %395 = vst [vmem:[%s636_s26 + $0x108] sm:$0xff] %v359_v37 }
  0x39   : > { %396 = vst [vmem:[%s636_s26 + $0x110] sm:$0xff] %v360_v38 }
  0x3a   : > { %397 = vst [vmem:[%s636_s26 + $0x118] sm:$0xff] %v361_v0 }
  0x3b PF: > { %s13_s12 = sadd.s32 1, %s568_s12  }
  0x3c   : > { %p10_p4 = scmp.ge.s32.totalorder %s13_s12, 5  }
  0x3e   :  { %12 = sbr.rel (!%p10_p4) target bundleno = 1 (0x1), region = 62 }

</bundles_post_ra>
